<compile_context>
chip_gen: v7x
topology: tpu7x:2x2x1
jax: 0.10.0
libtpu: 0.0.40
codegen_flags: <defaults>
</compile_context>

<pallas_src>
import jax
import jax.numpy as jnp
from jax import lax
from jax.experimental import pallas as pl
from jax.experimental.pallas import tpu as pltpu

K = 3  # 3x3x3 conv


# ---------------------------------------------------------------------------
# Fused Pallas kernel: one (sample n, output depth d) grid step.
# ---------------------------------------------------------------------------
def _make_fused_block_kernel(D, H, W, Cin, Cout):

    def conv_plane(load_plane, w_ref, cin):
        # One output depth-plane of a 3x3x3 conv as 27 shifted tap GEMMs,
        # accumulated in f32 ((H*W, cin) @ (cin, Cout) per tap).
        acc = jnp.zeros((H * W, Cout), jnp.float32)
        for kd in range(K):
            plane = load_plane(kd)                          # (H+2, W+2, cin) bf16
            for kh in range(K):
                for kw in range(K):
                    a = plane[kh:kh + H, kw:kw + W, :].reshape(H * W, cin)
                    acc = acc + jnp.dot(a, w_ref[kd, kh, kw],
                                        preferred_element_type=jnp.float32)
        return acc

    def kernel(x_ref, w1_ref, b1_ref, w2_ref, b2_ref, o_ref, s1_ref):
        # x_ref : (D+2, H+2, W+2, Cin)   bf16  zero-padded input volume of sample n
        # w1_ref: (3, 3, 3, Cin,  Cout)  bf16  conv1 weight, BN1 scale folded in
        # b1_ref: (1, Cout)              f32   BN1 folded bias
        # w2_ref: (3, 3, 3, Cout, Cout)  bf16  conv2 weight, BN2 scale folded in
        # b2_ref: (1, Cout)              f32   BN2 folded bias
        # o_ref : (H, W, Cout)           f32   output plane at depth d
        # s1_ref: (D+2, H+2, W+2, Cout)  bf16  stage-1 activation (zero halo), scratch
        d = pl.program_id(1)

        # ---- stage 1: computed once per sample (at its first depth step) into the
        #      VMEM scratch volume; the zero halo doubles as conv2's zero padding. ----
        @pl.when(d == 0)
        def _():
            s1_ref[...] = jnp.zeros_like(s1_ref)
            for dd in range(D):
                acc1 = conv_plane(lambda kd, dd=dd: x_ref[dd + kd], w1_ref, Cin)
                y1 = jnp.maximum(acc1 + b1_ref[...], 0.0)
                s1_ref[dd + 1, 1:H + 1, 1:W + 1, :] = (
                    y1.reshape(H, W, Cout).astype(s1_ref.dtype))

        # ---- stage 2 for output depth d: conv over the resident stage-1 volume,
        #      + bias + identity residual (from the resident input tile), ReLU. ----
        acc2 = conv_plane(lambda kd: s1_ref[d + kd], w2_ref, Cout)
        res = x_ref[d + 1][1:H + 1, 1:W + 1, :].reshape(H * W, Cin)
        y = jnp.maximum(acc2 + b2_ref[...] + res.astype(jnp.float32), 0.0)
        o_ref[...] = y.reshape(H, W, Cout).astype(o_ref.dtype)

    return kernel


# ---------------------------------------------------------------------------
# BasicBlock_3d forward.
# ---------------------------------------------------------------------------
def basic_block_3d_forward(x_ncdhw, params):
    """Forward of BasicBlock_3d; x is NCDHW (PyTorch convention).

    The single NCDHW<->NDHWC transpose pair at the block boundary exists only to match
    the PyTorch interface; a full network would stay NDHWC end-to-end.
    """
    x = jnp.transpose(x_ncdhw, (0, 2, 3, 4, 1)).astype(jnp.float32)   # NDHWC
    N, D, H, W, Cin = x.shape
    Cout = params["w1"].shape[-1]
    assert Cin == Cout, "stride=1 / downsample=None requires inplanes == planes"

    # Fold BN scales into the conv weights in f32, then cast the MXU feeds to bf16.
    w1 = (params["w1"] * params["s1"]).astype(jnp.bfloat16)
    w2 = (params["w2"] * params["s2"]).astype(jnp.bfloat16)
    b1 = params["b1"].reshape(1, Cout).astype(jnp.float32)
    b2 = params["b2"].reshape(1, Cout).astype(jnp.float32)

    # Zero-pad the conv halo once and cast to bf16.  This is the only activation
    # stream the kernel reads (~1.07x activation bytes vs ~27x for an HBM im2col slab).
    xpad = jnp.pad(x, ((0, 0), (1, 1), (1, 1), (1, 1), (0, 0))).astype(jnp.bfloat16)

    kernel = _make_fused_block_kernel(D, H, W, Cin, Cout)

    out = pl.pallas_call(
        kernel,
        out_shape=jax.ShapeDtypeStruct((N, D, H, W, Cout), jnp.float32),
        grid_spec=pltpu.PrefetchScalarGridSpec(
            num_scalar_prefetch=0,
            grid=(N, D),
            in_specs=[
                # Per-sample padded input volume; constant across d => fetched once per
                # sample and kept VMEM-resident for the whole depth sweep.
                pl.BlockSpec((None, D + 2, H + 2, W + 2, Cin),
                             lambda n, d: (n, 0, 0, 0, 0)),
                # Weights / biases: constant index maps, VMEM-resident (tiny next to
                # the activation volume, so the default double buffer is fine).
                pl.BlockSpec((K, K, K, Cin, Cout), lambda n, d: (0, 0, 0, 0, 0)),
                pl.BlockSpec((1, Cout), lambda n, d: (0, 0)),
                pl.BlockSpec((K, K, K, Cout, Cout), lambda n, d: (0, 0, 0, 0, 0)),
                pl.BlockSpec((1, Cout), lambda n, d: (0, 0)),
            ],
            out_specs=pl.BlockSpec((None, None, H, W, Cout),
                                   lambda n, d: (n, d, 0, 0, 0)),
            scratch_shapes=[
                # Stage-1 activation volume (bf16, zero halo) — never leaves VMEM.
                pltpu.VMEM((D + 2, H + 2, W + 2, Cout), jnp.bfloat16),
            ],
        ),
        compiler_params=pltpu.CompilerParams(
            # Samples split across v7x's two TensorCores; depth is the sequential
            # carry axis for the stage-1 scratch volume.
            dimension_semantics=("parallel", "arbitrary"),
            vmem_limit_bytes=32 * 1024 * 1024,   # safe on v5e / v6e / v7x
        ),
    )(xpad, w1, b1, w2, b2)

    return jnp.transpose(out, (0, 4, 1, 2, 3))   # back to NCDHW


# ---------------------------------------------------------------------------
# Parameter construction / reference.
# ---------------------------------------------------------------------------
def fold_bn(gamma, beta, mean, var, eps=1e-5):
    scale = gamma / jnp.sqrt(var + eps)
    bias = beta - mean * scale
    return scale, bias


def init_params(key, inplanes, planes):
    ks = jax.random.split(key, 10)
    w1 = 0.1 * jax.random.normal(ks[0], (K, K, K, inplanes, planes), jnp.float32)
    w2 = 0.1 * jax.random.normal(ks[1], (K, K, K, planes, planes), jnp.float32)
    g1 = 0.5 + jax.random.uniform(ks[2], (planes,), jnp.float32)
    b1 = 0.1 * jax.random.normal(ks[3], (planes,), jnp.float32)
    m1 = 0.1 * jax.random.normal(ks[4], (planes,), jnp.float32)
    v1 = 0.5 + jax.random.uniform(ks[5], (planes,), jnp.float32)
    g2 = 0.5 + jax.random.uniform(ks[6], (planes,), jnp.float32)
    b2 = 0.1 * jax.random.normal(ks[7], (planes,), jnp.float32)
    m2 = 0.1 * jax.random.normal(ks[8], (planes,), jnp.float32)
    v2 = 0.5 + jax.random.uniform(ks[9], (planes,), jnp.float32)
    s1, bb1 = fold_bn(g1, b1, m1, v1)
    s2, bb2 = fold_bn(g2, b2, m2, v2)
    return dict(w1=w1, s1=s1, b1=bb1, w2=w2, s2=s2, b2=bb2)


def reference_forward(x_ncdhw, params):
    """Plain-JAX f32 reference (original module semantics), for validation."""
    x = jnp.transpose(x_ncdhw, (0, 2, 3, 4, 1))
    dn = lax.conv_dimension_numbers(x.shape, params["w1"].shape,
                                    ("NDHWC", "DHWIO", "NDHWC"))
    c1 = lax.conv_general_dilated(x, params["w1"], (1, 1, 1),
                                  [(1, 1)] * 3, dimension_numbers=dn)
    y = jnp.maximum(c1 * params["s1"] + params["b1"], 0.0)
    c2 = lax.conv_general_dilated(y, params["w2"], (1, 1, 1),
                                  [(1, 1)] * 3, dimension_numbers=dn)
    out = jnp.maximum(c2 * params["s2"] + params["b2"] + x, 0.0)
    return jnp.transpose(out, (0, 4, 1, 2, 3))


if __name__ == "__main__":
    key = jax.random.PRNGKey(0)
    kx, kp = jax.random.split(key)

    N, C, D, H, W = 2, 4, 4, 8, 8             # small NCDHW input
    inplanes = planes = C                      # stride=1, downsample=None
    x = jax.random.normal(kx, (N, C, D, H, W), jnp.float32)
    params = init_params(kp, inplanes, planes)

    out = jax.block_until_ready(basic_block_3d_forward(x, params))
    ref = jax.block_until_ready(reference_forward(x, params))

    assert out.shape == (N, planes, D, H, W)
    err = float(jnp.max(jnp.abs(out - ref)))
    # bf16 MXU feeds / bf16 skip-path rounding, with f32 accumulation everywhere.
    assert jnp.allclose(out, ref, rtol=5e-2, atol=5e-2), f"max err {err}"
    print("KERNEL_OK")
</pallas_src>

<mosaic_0001>
module attributes {stable_mosaic.version = 11 : i64} {
  func.func @kernel(%arg0: i32, %arg1: i32, %arg2: memref<1x6x10x10x4xbf16, #tpu.memory_space<vmem>>, %arg3: memref<3x3x3x4x4xbf16, #tpu.memory_space<vmem>>, %arg4: memref<1x4xf32, #tpu.memory_space<vmem>>, %arg5: memref<3x3x3x4x4xbf16, #tpu.memory_space<vmem>>, %arg6: memref<1x4xf32, #tpu.memory_space<vmem>>, %arg7: memref<1x1x8x8x4xf32, #tpu.memory_space<vmem>>, %arg8: memref<6x10x10x4xbf16, #tpu.memory_space<vmem>>) attributes {dimension_semantics = [#tpu.dimension_semantics<parallel>, #tpu.dimension_semantics<arbitrary>], iteration_bounds = array<i64: 2, 4>, scalar_prefetch = 0 : i64, scratch_operands = 1 : i64, tpu.core_type = #tpu.core_type<tc>, window_params = [{transform_indices = @transform_0, window_bounds = array<i64: 1, 6, 10, 10, 4>}, {pipeline_mode = #tpu.pipeline_mode<synchronous>, transform_indices = @transform_1, window_bounds = array<i64: 3, 3, 3, 4, 4>}, {pipeline_mode = #tpu.pipeline_mode<synchronous>, transform_indices = @transform_2, window_bounds = array<i64: 1, 4>}, {pipeline_mode = #tpu.pipeline_mode<synchronous>, transform_indices = @transform_3, window_bounds = array<i64: 3, 3, 3, 4, 4>}, {pipeline_mode = #tpu.pipeline_mode<synchronous>, transform_indices = @transform_4, window_bounds = array<i64: 1, 4>}, {transform_indices = @transform_5, window_bounds = array<i64: 1, 1, 8, 8, 4>}]} {
    %c0_i32 = arith.constant 0 : i32
    %0 = arith.cmpi eq, %arg1, %c0_i32 : i32
    %1 = arith.extui %0 : i1 to i32
    %c0_i32_0 = arith.constant 0 : i32
    %2 = arith.cmpi ne, %1, %c0_i32_0 : i32
    scf.if %2 {
      %cst_183 = arith.constant 0.000000e+00 : bf16
      %195 = vector.broadcast %cst_183 : bf16 to vector<6x10x10x4xbf16>
      %c0_184 = arith.constant 0 : index
      %c0_185 = arith.constant 0 : index
      %c0_186 = arith.constant 0 : index
      %c0_187 = arith.constant 0 : index
      %196 = vector.load %arg8[%c0_184, %c0_185, %c0_186, %c0_187] : memref<6x10x10x4xbf16, #tpu.memory_space<vmem>>, vector<6x10x10x4xbf16>
      tpu.vector_store %arg8[%c0_184, %c0_185, %c0_186, %c0_187], %195 {strides = array<i32>} : memref<6x10x10x4xbf16, #tpu.memory_space<vmem>>, vector<6x10x10x4xbf16>,
      %cst_188 = arith.constant 0.000000e+00 : f32
      %197 = vector.broadcast %cst_188 : f32 to vector<64x4xf32>
      %c0_189 = arith.constant 0 : index
      %c0_190 = arith.constant 0 : index
      %c0_191 = arith.constant 0 : index
      %c0_192 = arith.constant 0 : index
      %c0_193 = arith.constant 0 : index
      %198 = vector.load %arg2[%c0_189, %c0_190, %c0_191, %c0_192, %c0_193] : memref<1x6x10x10x4xbf16, #tpu.memory_space<vmem>>, vector<1x1x10x10x4xbf16>
      %199 = vector.shape_cast %198 : vector<1x1x10x10x4xbf16> to vector<10x10x4xbf16>
      %200 = vector.extract_strided_slice %199 {offsets = [0, 0, 0], sizes = [8, 8, 4], strides = [1, 1, 1]} : vector<10x10x4xbf16> to vector<8x8x4xbf16>
      %201 = vector.shape_cast %200 : vector<8x8x4xbf16> to vector<64x4xbf16>
      %c0_194 = arith.constant 0 : index
      %c0_195 = arith.constant 0 : index
      %c0_196 = arith.constant 0 : index
      %c0_197 = arith.constant 0 : index
      %c0_198 = arith.constant 0 : index
      %202 = vector.load %arg3[%c0_194, %c0_195, %c0_196, %c0_197, %c0_198] : memref<3x3x3x4x4xbf16, #tpu.memory_space<vmem>>, vector<1x1x1x4x4xbf16>
      %203 = vector.shape_cast %202 : vector<1x1x1x4x4xbf16> to vector<4x4xbf16>
      %cst_199 = arith.constant dense<0.000000e+00> : vector<64x4xf32>
      %204 = tpu.matmul %201, %203, %cst_199 {dimension_numbers = #tpu.dot_dimension_numbers<[1], [0], [0], [1], [0, 0, 1, 1], [], []>} : vector<64x4xbf16>, vector<4x4xbf16>, vector<64x4xf32> -> vector<64x4xf32>
      %205 = arith.addf %197, %204 : vector<64x4xf32>
      %206 = vector.extract_strided_slice %199 {offsets = [0, 1, 0], sizes = [8, 8, 4], strides = [1, 1, 1]} : vector<10x10x4xbf16> to vector<8x8x4xbf16>
      %207 = vector.shape_cast %206 : vector<8x8x4xbf16> to vector<64x4xbf16>
      %c0_200 = arith.constant 0 : index
      %c0_201 = arith.constant 0 : index
      %c1_202 = arith.constant 1 : index
      %c0_203 = arith.constant 0 : index
      %c0_204 = arith.constant 0 : index
      %208 = vector.load %arg3[%c0_200, %c0_201, %c1_202, %c0_203, %c0_204] : memref<3x3x3x4x4xbf16, #tpu.memory_space<vmem>>, vector<1x1x1x4x4xbf16>
      %209 = vector.shape_cast %208 : vector<1x1x1x4x4xbf16> to vector<4x4xbf16>
      %cst_205 = arith.constant dense<0.000000e+00> : vector<64x4xf32>
      %210 = tpu.matmul %207, %209, %cst_205 {dimension_numbers = #tpu.dot_dimension_numbers<[1], [0], [0], [1], [0, 0, 1, 1], [], []>} : vector<64x4xbf16>, vector<4x4xbf16>, vector<64x4xf32> -> vector<64x4xf32>
      %211 = arith.addf %205, %210 : vector<64x4xf32>
      %212 = vector.extract_strided_slice %199 {offsets = [0, 2, 0], sizes = [8, 8, 4], strides = [1, 1, 1]} : vector<10x10x4xbf16> to vector<8x8x4xbf16>
      %213 = vector.shape_cast %212 : vector<8x8x4xbf16> to vector<64x4xbf16>
      %c0_206 = arith.constant 0 : index
      %c0_207 = arith.constant 0 : index
      %c2_208 = arith.constant 2 : index
      %c0_209 = arith.constant 0 : index
      %c0_210 = arith.constant 0 : index
      %214 = vector.load %arg3[%c0_206, %c0_207, %c2_208, %c0_209, %c0_210] : memref<3x3x3x4x4xbf16, #tpu.memory_space<vmem>>, vector<1x1x1x4x4xbf16>
      %215 = vector.shape_cast %214 : vector<1x1x1x4x4xbf16> to vector<4x4xbf16>
      %cst_211 = arith.constant dense<0.000000e+00> : vector<64x4xf32>
      %216 = tpu.matmul %213, %215, %cst_211 {dimension_numbers = #tpu.dot_dimension_numbers<[1], [0], [0], [1], [0, 0, 1, 1], [], []>} : vector<64x4xbf16>, vector<4x4xbf16>, vector<64x4xf32> -> vector<64x4xf32>
      %217 = arith.addf %211, %216 : vector<64x4xf32>
      %218 = vector.extract_strided_slice %199 {offsets = [1, 0, 0], sizes = [8, 8, 4], strides = [1, 1, 1]} : vector<10x10x4xbf16> to vector<8x8x4xbf16>
      %219 = vector.shape_cast %218 : vector<8x8x4xbf16> to vector<64x4xbf16>
      %c0_212 = arith.constant 0 : index
      %c1_213 = arith.constant 1 : index
      %c0_214 = arith.constant 0 : index
      %c0_215 = arith.constant 0 : index
      %c0_216 = arith.constant 0 : index
      %220 = vector.load %arg3[%c0_212, %c1_213, %c0_214, %c0_215, %c0_216] : memref<3x3x3x4x4xbf16, #tpu.memory_space<vmem>>, vector<1x1x1x4x4xbf16>
      %221 = vector.shape_cast %220 : vector<1x1x1x4x4xbf16> to vector<4x4xbf16>
      %cst_217 = arith.constant dense<0.000000e+00> : vector<64x4xf32>
      %222 = tpu.matmul %219, %221, %cst_217 {dimension_numbers = #tpu.dot_dimension_numbers<[1], [0], [0], [1], [0, 0, 1, 1], [], []>} : vector<64x4xbf16>, vector<4x4xbf16>, vector<64x4xf32> -> vector<64x4xf32>
      %223 = arith.addf %217, %222 : vector<64x4xf32>
      %224 = vector.extract_strided_slice %199 {offsets = [1, 1, 0], sizes = [8, 8, 4], strides = [1, 1, 1]} : vector<10x10x4xbf16> to vector<8x8x4xbf16>
      %225 = vector.shape_cast %224 : vector<8x8x4xbf16> to vector<64x4xbf16>
      %c0_218 = arith.constant 0 : index
      %c1_219 = arith.constant 1 : index
      %c1_220 = arith.constant 1 : index
      %c0_221 = arith.constant 0 : index
      %c0_222 = arith.constant 0 : index
      %226 = vector.load %arg3[%c0_218, %c1_219, %c1_220, %c0_221, %c0_222] : memref<3x3x3x4x4xbf16, #tpu.memory_space<vmem>>, vector<1x1x1x4x4xbf16>
      %227 = vector.shape_cast %226 : vector<1x1x1x4x4xbf16> to vector<4x4xbf16>
      %cst_223 = arith.constant dense<0.000000e+00> : vector<64x4xf32>
      %228 = tpu.matmul %225, %227, %cst_223 {dimension_numbers = #tpu.dot_dimension_numbers<[1], [0], [0], [1], [0, 0, 1, 1], [], []>} : vector<64x4xbf16>, vector<4x4xbf16>, vector<64x4xf32> -> vector<64x4xf32>
      %229 = arith.addf %223, %228 : vector<64x4xf32>
      %230 = vector.extract_strided_slice %199 {offsets = [1, 2, 0], sizes = [8, 8, 4], strides = [1, 1, 1]} : vector<10x10x4xbf16> to vector<8x8x4xbf16>
      %231 = vector.shape_cast %230 : vector<8x8x4xbf16> to vector<64x4xbf16>
      %c0_224 = arith.constant 0 : index
      %c1_225 = arith.constant 1 : index
      %c2_226 = arith.constant 2 : index
      %c0_227 = arith.constant 0 : index
      %c0_228 = arith.constant 0 : index
      %232 = vector.load %arg3[%c0_224, %c1_225, %c2_226, %c0_227, %c0_228] : memref<3x3x3x4x4xbf16, #tpu.memory_space<vmem>>, vector<1x1x1x4x4xbf16>
      %233 = vector.shape_cast %232 : vector<1x1x1x4x4xbf16> to vector<4x4xbf16>
      %cst_229 = arith.constant dense<0.000000e+00> : vector<64x4xf32>
      %234 = tpu.matmul %231, %233, %cst_229 {dimension_numbers = #tpu.dot_dimension_numbers<[1], [0], [0], [1], [0, 0, 1, 1], [], []>} : vector<64x4xbf16>, vector<4x4xbf16>, vector<64x4xf32> -> vector<64x4xf32>
      %235 = arith.addf %229, %234 : vector<64x4xf32>
      %236 = vector.extract_strided_slice %199 {offsets = [2, 0, 0], sizes = [8, 8, 4], strides = [1, 1, 1]} : vector<10x10x4xbf16> to vector<8x8x4xbf16>
      %237 = vector.shape_cast %236 : vector<8x8x4xbf16> to vector<64x4xbf16>
      %c0_230 = arith.constant 0 : index
      %c2_231 = arith.constant 2 : index
      %c0_232 = arith.constant 0 : index
      %c0_233 = arith.constant 0 : index
      %c0_234 = arith.constant 0 : index
      %238 = vector.load %arg3[%c0_230, %c2_231, %c0_232, %c0_233, %c0_234] : memref<3x3x3x4x4xbf16, #tpu.memory_space<vmem>>, vector<1x1x1x4x4xbf16>
      %239 = vector.shape_cast %238 : vector<1x1x1x4x4xbf16> to vector<4x4xbf16>
      %cst_235 = arith.constant dense<0.000000e+00> : vector<64x4xf32>
      %240 = tpu.matmul %237, %239, %cst_235 {dimension_numbers = #tpu.dot_dimension_numbers<[1], [0], [0], [1], [0, 0, 1, 1], [], []>} : vector<64x4xbf16>, vector<4x4xbf16>, vector<64x4xf32> -> vector<64x4xf32>
      %241 = arith.addf %235, %240 : vector<64x4xf32>
      %242 = vector.extract_strided_slice %199 {offsets = [2, 1, 0], sizes = [8, 8, 4], strides = [1, 1, 1]} : vector<10x10x4xbf16> to vector<8x8x4xbf16>
      %243 = vector.shape_cast %242 : vector<8x8x4xbf16> to vector<64x4xbf16>
      %c0_236 = arith.constant 0 : index
      %c2_237 = arith.constant 2 : index
      %c1_238 = arith.constant 1 : index
      %c0_239 = arith.constant 0 : index
      %c0_240 = arith.constant 0 : index
      %244 = vector.load %arg3[%c0_236, %c2_237, %c1_238, %c0_239, %c0_240] : memref<3x3x3x4x4xbf16, #tpu.memory_space<vmem>>, vector<1x1x1x4x4xbf16>
      %245 = vector.shape_cast %244 : vector<1x1x1x4x4xbf16> to vector<4x4xbf16>
      %cst_241 = arith.constant dense<0.000000e+00> : vector<64x4xf32>
      %246 = tpu.matmul %243, %245, %cst_241 {dimension_numbers = #tpu.dot_dimension_numbers<[1], [0], [0], [1], [0, 0, 1, 1], [], []>} : vector<64x4xbf16>, vector<4x4xbf16>, vector<64x4xf32> -> vector<64x4xf32>
      %247 = arith.addf %241, %246 : vector<64x4xf32>
      %248 = vector.extract_strided_slice %199 {offsets = [2, 2, 0], sizes = [8, 8, 4], strides = [1, 1, 1]} : vector<10x10x4xbf16> to vector<8x8x4xbf16>
      %249 = vector.shape_cast %248 : vector<8x8x4xbf16> to vector<64x4xbf16>
      %c0_242 = arith.constant 0 : index
      %c2_243 = arith.constant 2 : index
      %c2_244 = arith.constant 2 : index
      %c0_245 = arith.constant 0 : index
      %c0_246 = arith.constant 0 : index
      %250 = vector.load %arg3[%c0_242, %c2_243, %c2_244, %c0_245, %c0_246] : memref<3x3x3x4x4xbf16, #tpu.memory_space<vmem>>, vector<1x1x1x4x4xbf16>
      %251 = vector.shape_cast %250 : vector<1x1x1x4x4xbf16> to vector<4x4xbf16>
      %cst_247 = arith.constant dense<0.000000e+00> : vector<64x4xf32>
      %252 = tpu.matmul %249, %251, %cst_247 {dimension_numbers = #tpu.dot_dimension_numbers<[1], [0], [0], [1], [0, 0, 1, 1], [], []>} : vector<64x4xbf16>, vector<4x4xbf16>, vector<64x4xf32> -> vector<64x4xf32>
      %253 = arith.addf %247, %252 : vector<64x4xf32>
      %c0_248 = arith.constant 0 : index
      %c1_249 = arith.constant 1 : index
      %c0_250 = arith.constant 0 : index
      %c0_251 = arith.constant 0 : index
      %c0_252 = arith.constant 0 : index
      %254 = vector.load %arg2[%c0_248, %c1_249, %c0_250, %c0_251, %c0_252] : memref<1x6x10x10x4xbf16, #tpu.memory_space<vmem>>, vector<1x1x10x10x4xbf16>
      %255 = vector.shape_cast %254 : vector<1x1x10x10x4xbf16> to vector<10x10x4xbf16>
      %256 = vector.extract_strided_slice %255 {offsets = [0, 0, 0], sizes = [8, 8, 4], strides = [1, 1, 1]} : vector<10x10x4xbf16> to vector<8x8x4xbf16>
      %257 = vector.shape_cast %256 : vector<8x8x4xbf16> to vector<64x4xbf16>
      %c1_253 = arith.constant 1 : index
      %c0_254 = arith.constant 0 : index
      %c0_255 = arith.constant 0 : index
      %c0_256 = arith.constant 0 : index
      %c0_257 = arith.constant 0 : index
      %258 = vector.load %arg3[%c1_253, %c0_254, %c0_255, %c0_256, %c0_257] : memref<3x3x3x4x4xbf16, #tpu.memory_space<vmem>>, vector<1x1x1x4x4xbf16>
      %259 = vector.shape_cast %258 : vector<1x1x1x4x4xbf16> to vector<4x4xbf16>
      %cst_258 = arith.constant dense<0.000000e+00> : vector<64x4xf32>
      %260 = tpu.matmul %257, %259, %cst_258 {dimension_numbers = #tpu.dot_dimension_numbers<[1], [0], [0], [1], [0, 0, 1, 1], [], []>} : vector<64x4xbf16>, vector<4x4xbf16>, vector<64x4xf32> -> vector<64x4xf32>
      %261 = arith.addf %253, %260 : vector<64x4xf32>
      %262 = vector.extract_strided_slice %255 {offsets = [0, 1, 0], sizes = [8, 8, 4], strides = [1, 1, 1]} : vector<10x10x4xbf16> to vector<8x8x4xbf16>
      %263 = vector.shape_cast %262 : vector<8x8x4xbf16> to vector<64x4xbf16>
      %c1_259 = arith.constant 1 : index
      %c0_260 = arith.constant 0 : index
      %c1_261 = arith.constant 1 : index
      %c0_262 = arith.constant 0 : index
      %c0_263 = arith.constant 0 : index
      %264 = vector.load %arg3[%c1_259, %c0_260, %c1_261, %c0_262, %c0_263] : memref<3x3x3x4x4xbf16, #tpu.memory_space<vmem>>, vector<1x1x1x4x4xbf16>
      %265 = vector.shape_cast %264 : vector<1x1x1x4x4xbf16> to vector<4x4xbf16>
      %cst_264 = arith.constant dense<0.000000e+00> : vector<64x4xf32>
      %266 = tpu.matmul %263, %265, %cst_264 {dimension_numbers = #tpu.dot_dimension_numbers<[1], [0], [0], [1], [0, 0, 1, 1], [], []>} : vector<64x4xbf16>, vector<4x4xbf16>, vector<64x4xf32> -> vector<64x4xf32>
      %267 = arith.addf %261, %266 : vector<64x4xf32>
      %268 = vector.extract_strided_slice %255 {offsets = [0, 2, 0], sizes = [8, 8, 4], strides = [1, 1, 1]} : vector<10x10x4xbf16> to vector<8x8x4xbf16>
      %269 = vector.shape_cast %268 : vector<8x8x4xbf16> to vector<64x4xbf16>
      %c1_265 = arith.constant 1 : index
      %c0_266 = arith.constant 0 : index
      %c2_267 = arith.constant 2 : index
      %c0_268 = arith.constant 0 : index
      %c0_269 = arith.constant 0 : index
      %270 = vector.load %arg3[%c1_265, %c0_266, %c2_267, %c0_268, %c0_269] : memref<3x3x3x4x4xbf16, #tpu.memory_space<vmem>>, vector<1x1x1x4x4xbf16>
      %271 = vector.shape_cast %270 : vector<1x1x1x4x4xbf16> to vector<4x4xbf16>
      %cst_270 = arith.constant dense<0.000000e+00> : vector<64x4xf32>
      %272 = tpu.matmul %269, %271, %cst_270 {dimension_numbers = #tpu.dot_dimension_numbers<[1], [0], [0], [1], [0, 0, 1, 1], [], []>} : vector<64x4xbf16>, vector<4x4xbf16>, vector<64x4xf32> -> vector<64x4xf32>
      %273 = arith.addf %267, %272 : vector<64x4xf32>
      %274 = vector.extract_strided_slice %255 {offsets = [1, 0, 0], sizes = [8, 8, 4], strides = [1, 1, 1]} : vector<10x10x4xbf16> to vector<8x8x4xbf16>
      %275 = vector.shape_cast %274 : vector<8x8x4xbf16> to vector<64x4xbf16>
      %c1_271 = arith.constant 1 : index
      %c1_272 = arith.constant 1 : index
      %c0_273 = arith.constant 0 : index
      %c0_274 = arith.constant 0 : index
      %c0_275 = arith.constant 0 : index
      %276 = vector.load %arg3[%c1_271, %c1_272, %c0_273, %c0_274, %c0_275] : memref<3x3x3x4x4xbf16, #tpu.memory_space<vmem>>, vector<1x1x1x4x4xbf16>
      %277 = vector.shape_cast %276 : vector<1x1x1x4x4xbf16> to vector<4x4xbf16>
      %cst_276 = arith.constant dense<0.000000e+00> : vector<64x4xf32>
      %278 = tpu.matmul %275, %277, %cst_276 {dimension_numbers = #tpu.dot_dimension_numbers<[1], [0], [0], [1], [0, 0, 1, 1], [], []>} : vector<64x4xbf16>, vector<4x4xbf16>, vector<64x4xf32> -> vector<64x4xf32>
      %279 = arith.addf %273, %278 : vector<64x4xf32>
      %280 = vector.extract_strided_slice %255 {offsets = [1, 1, 0], sizes = [8, 8, 4], strides = [1, 1, 1]} : vector<10x10x4xbf16> to vector<8x8x4xbf16>
      %281 = vector.shape_cast %280 : vector<8x8x4xbf16> to vector<64x4xbf16>
      %c1_277 = arith.constant 1 : index
      %c1_278 = arith.constant 1 : index
      %c1_279 = arith.constant 1 : index
      %c0_280 = arith.constant 0 : index
      %c0_281 = arith.constant 0 : index
      %282 = vector.load %arg3[%c1_277, %c1_278, %c1_279, %c0_280, %c0_281] : memref<3x3x3x4x4xbf16, #tpu.memory_space<vmem>>, vector<1x1x1x4x4xbf16>
      %283 = vector.shape_cast %282 : vector<1x1x1x4x4xbf16> to vector<4x4xbf16>
      %cst_282 = arith.constant dense<0.000000e+00> : vector<64x4xf32>
      %284 = tpu.matmul %281, %283, %cst_282 {dimension_numbers = #tpu.dot_dimension_numbers<[1], [0], [0], [1], [0, 0, 1, 1], [], []>} : vector<64x4xbf16>, vector<4x4xbf16>, vector<64x4xf32> -> vector<64x4xf32>
      %285 = arith.addf %279, %284 : vector<64x4xf32>
      %286 = vector.extract_strided_slice %255 {offsets = [1, 2, 0], sizes = [8, 8, 4], strides = [1, 1, 1]} : vector<10x10x4xbf16> to vector<8x8x4xbf16>
      %287 = vector.shape_cast %286 : vector<8x8x4xbf16> to vector<64x4xbf16>
      %c1_283 = arith.constant 1 : index
      %c1_284 = arith.constant 1 : index
      %c2_285 = arith.constant 2 : index
      %c0_286 = arith.constant 0 : index
      %c0_287 = arith.constant 0 : index
      %288 = vector.load %arg3[%c1_283, %c1_284, %c2_285, %c0_286, %c0_287] : memref<3x3x3x4x4xbf16, #tpu.memory_space<vmem>>, vector<1x1x1x4x4xbf16>
      %289 = vector.shape_cast %288 : vector<1x1x1x4x4xbf16> to vector<4x4xbf16>
      %cst_288 = arith.constant dense<0.000000e+00> : vector<64x4xf32>
      %290 = tpu.matmul %287, %289, %cst_288 {dimension_numbers = #tpu.dot_dimension_numbers<[1], [0], [0], [1], [0, 0, 1, 1], [], []>} : vector<64x4xbf16>, vector<4x4xbf16>, vector<64x4xf32> -> vector<64x4xf32>
      %291 = arith.addf %285, %290 : vector<64x4xf32>
      %292 = vector.extract_strided_slice %255 {offsets = [2, 0, 0], sizes = [8, 8, 4], strides = [1, 1, 1]} : vector<10x10x4xbf16> to vector<8x8x4xbf16>
      %293 = vector.shape_cast %292 : vector<8x8x4xbf16> to vector<64x4xbf16>
      %c1_289 = arith.constant 1 : index
      %c2_290 = arith.constant 2 : index
      %c0_291 = arith.constant 0 : index
      %c0_292 = arith.constant 0 : index
      %c0_293 = arith.constant 0 : index
      %294 = vector.load %arg3[%c1_289, %c2_290, %c0_291, %c0_292, %c0_293] : memref<3x3x3x4x4xbf16, #tpu.memory_space<vmem>>, vector<1x1x1x4x4xbf16>
      %295 = vector.shape_cast %294 : vector<1x1x1x4x4xbf16> to vector<4x4xbf16>
      %cst_294 = arith.constant dense<0.000000e+00> : vector<64x4xf32>
      %296 = tpu.matmul %293, %295, %cst_294 {dimension_numbers = #tpu.dot_dimension_numbers<[1], [0], [0], [1], [0, 0, 1, 1], [], []>} : vector<64x4xbf16>, vector<4x4xbf16>, vector<64x4xf32> -> vector<64x4xf32>
      %297 = arith.addf %291, %296 : vector<64x4xf32>
      %298 = vector.extract_strided_slice %255 {offsets = [2, 1, 0], sizes = [8, 8, 4], strides = [1, 1, 1]} : vector<10x10x4xbf16> to vector<8x8x4xbf16>
      %299 = vector.shape_cast %298 : vector<8x8x4xbf16> to vector<64x4xbf16>
      %c1_295 = arith.constant 1 : index
      %c2_296 = arith.constant 2 : index
      %c1_297 = arith.constant 1 : index
      %c0_298 = arith.constant 0 : index
      %c0_299 = arith.constant 0 : index
      %300 = vector.load %arg3[%c1_295, %c2_296, %c1_297, %c0_298, %c0_299] : memref<3x3x3x4x4xbf16, #tpu.memory_space<vmem>>, vector<1x1x1x4x4xbf16>
      %301 = vector.shape_cast %300 : vector<1x1x1x4x4xbf16> to vector<4x4xbf16>
      %cst_300 = arith.constant dense<0.000000e+00> : vector<64x4xf32>
      %302 = tpu.matmul %299, %301, %cst_300 {dimension_numbers = #tpu.dot_dimension_numbers<[1], [0], [0], [1], [0, 0, 1, 1], [], []>} : vector<64x4xbf16>, vector<4x4xbf16>, vector<64x4xf32> -> vector<64x4xf32>
      %303 = arith.addf %297, %302 : vector<64x4xf32>
      %304 = vector.extract_strided_slice %255 {offsets = [2, 2, 0], sizes = [8, 8, 4], strides = [1, 1, 1]} : vector<10x10x4xbf16> to vector<8x8x4xbf16>
      %305 = vector.shape_cast %304 : vector<8x8x4xbf16> to vector<64x4xbf16>
      %c1_301 = arith.constant 1 : index
      %c2_302 = arith.constant 2 : index
      %c2_303 = arith.constant 2 : index
      %c0_304 = arith.constant 0 : index
      %c0_305 = arith.constant 0 : index
      %306 = vector.load %arg3[%c1_301, %c2_302, %c2_303, %c0_304, %c0_305] : memref<3x3x3x4x4xbf16, #tpu.memory_space<vmem>>, vector<1x1x1x4x4xbf16>
      %307 = vector.shape_cast %306 : vector<1x1x1x4x4xbf16> to vector<4x4xbf16>
      %cst_306 = arith.constant dense<0.000000e+00> : vector<64x4xf32>
      %308 = tpu.matmul %305, %307, %cst_306 {dimension_numbers = #tpu.dot_dimension_numbers<[1], [0], [0], [1], [0, 0, 1, 1], [], []>} : vector<64x4xbf16>, vector<4x4xbf16>, vector<64x4xf32> -> vector<64x4xf32>
      %309 = arith.addf %303, %308 : vector<64x4xf32>
      %c0_307 = arith.constant 0 : index
      %c2_308 = arith.constant 2 : index
      %c0_309 = arith.constant 0 : index
      %c0_310 = arith.constant 0 : index
      %c0_311 = arith.constant 0 : index
      %310 = vector.load %arg2[%c0_307, %c2_308, %c0_309, %c0_310, %c0_311] : memref<1x6x10x10x4xbf16, #tpu.memory_space<vmem>>, vector<1x1x10x10x4xbf16>
      %311 = vector.shape_cast %310 : vector<1x1x10x10x4xbf16> to vector<10x10x4xbf16>
      %312 = vector.extract_strided_slice %311 {offsets = [0, 0, 0], sizes = [8, 8, 4], strides = [1, 1, 1]} : vector<10x10x4xbf16> to vector<8x8x4xbf16>
      %313 = vector.shape_cast %312 : vector<8x8x4xbf16> to vector<64x4xbf16>
      %c2_312 = arith.constant 2 : index
      %c0_313 = arith.constant 0 : index
      %c0_314 = arith.constant 0 : index
      %c0_315 = arith.constant 0 : index
      %c0_316 = arith.constant 0 : index
      %314 = vector.load %arg3[%c2_312, %c0_313, %c0_314, %c0_315, %c0_316] : memref<3x3x3x4x4xbf16, #tpu.memory_space<vmem>>, vector<1x1x1x4x4xbf16>
      %315 = vector.shape_cast %314 : vector<1x1x1x4x4xbf16> to vector<4x4xbf16>
      %cst_317 = arith.constant dense<0.000000e+00> : vector<64x4xf32>
      %316 = tpu.matmul %313, %315, %cst_317 {dimension_numbers = #tpu.dot_dimension_numbers<[1], [0], [0], [1], [0, 0, 1, 1], [], []>} : vector<64x4xbf16>, vector<4x4xbf16>, vector<64x4xf32> -> vector<64x4xf32>
      %317 = arith.addf %309, %316 : vector<64x4xf32>
      %318 = vector.extract_strided_slice %311 {offsets = [0, 1, 0], sizes = [8, 8, 4], strides = [1, 1, 1]} : vector<10x10x4xbf16> to vector<8x8x4xbf16>
      %319 = vector.shape_cast %318 : vector<8x8x4xbf16> to vector<64x4xbf16>
      %c2_318 = arith.constant 2 : index
      %c0_319 = arith.constant 0 : index
      %c1_320 = arith.constant 1 : index
      %c0_321 = arith.constant 0 : index
      %c0_322 = arith.constant 0 : index
      %320 = vector.load %arg3[%c2_318, %c0_319, %c1_320, %c0_321, %c0_322] : memref<3x3x3x4x4xbf16, #tpu.memory_space<vmem>>, vector<1x1x1x4x4xbf16>
      %321 = vector.shape_cast %320 : vector<1x1x1x4x4xbf16> to vector<4x4xbf16>
      %cst_323 = arith.constant dense<0.000000e+00> : vector<64x4xf32>
      %322 = tpu.matmul %319, %321, %cst_323 {dimension_numbers = #tpu.dot_dimension_numbers<[1], [0], [0], [1], [0, 0, 1, 1], [], []>} : vector<64x4xbf16>, vector<4x4xbf16>, vector<64x4xf32> -> vector<64x4xf32>
      %323 = arith.addf %317, %322 : vector<64x4xf32>
      %324 = vector.extract_strided_slice %311 {offsets = [0, 2, 0], sizes = [8, 8, 4], strides = [1, 1, 1]} : vector<10x10x4xbf16> to vector<8x8x4xbf16>
      %325 = vector.shape_cast %324 : vector<8x8x4xbf16> to vector<64x4xbf16>
      %c2_324 = arith.constant 2 : index
      %c0_325 = arith.constant 0 : index
      %c2_326 = arith.constant 2 : index
      %c0_327 = arith.constant 0 : index
      %c0_328 = arith.constant 0 : index
      %326 = vector.load %arg3[%c2_324, %c0_325, %c2_326, %c0_327, %c0_328] : memref<3x3x3x4x4xbf16, #tpu.memory_space<vmem>>, vector<1x1x1x4x4xbf16>
      %327 = vector.shape_cast %326 : vector<1x1x1x4x4xbf16> to vector<4x4xbf16>
      %cst_329 = arith.constant dense<0.000000e+00> : vector<64x4xf32>
      %328 = tpu.matmul %325, %327, %cst_329 {dimension_numbers = #tpu.dot_dimension_numbers<[1], [0], [0], [1], [0, 0, 1, 1], [], []>} : vector<64x4xbf16>, vector<4x4xbf16>, vector<64x4xf32> -> vector<64x4xf32>
      %329 = arith.addf %323, %328 : vector<64x4xf32>
      %330 = vector.extract_strided_slice %311 {offsets = [1, 0, 0], sizes = [8, 8, 4], strides = [1, 1, 1]} : vector<10x10x4xbf16> to vector<8x8x4xbf16>
      %331 = vector.shape_cast %330 : vector<8x8x4xbf16> to vector<64x4xbf16>
      %c2_330 = arith.constant 2 : index
      %c1_331 = arith.constant 1 : index
      %c0_332 = arith.constant 0 : index
      %c0_333 = arith.constant 0 : index
      %c0_334 = arith.constant 0 : index
      %332 = vector.load %arg3[%c2_330, %c1_331, %c0_332, %c0_333, %c0_334] : memref<3x3x3x4x4xbf16, #tpu.memory_space<vmem>>, vector<1x1x1x4x4xbf16>
      %333 = vector.shape_cast %332 : vector<1x1x1x4x4xbf16> to vector<4x4xbf16>
      %cst_335 = arith.constant dense<0.000000e+00> : vector<64x4xf32>
      %334 = tpu.matmul %331, %333, %cst_335 {dimension_numbers = #tpu.dot_dimension_numbers<[1], [0], [0], [1], [0, 0, 1, 1], [], []>} : vector<64x4xbf16>, vector<4x4xbf16>, vector<64x4xf32> -> vector<64x4xf32>
      %335 = arith.addf %329, %334 : vector<64x4xf32>
      %336 = vector.extract_strided_slice %311 {offsets = [1, 1, 0], sizes = [8, 8, 4], strides = [1, 1, 1]} : vector<10x10x4xbf16> to vector<8x8x4xbf16>
      %337 = vector.shape_cast %336 : vector<8x8x4xbf16> to vector<64x4xbf16>
      %c2_336 = arith.constant 2 : index
      %c1_337 = arith.constant 1 : index
      %c1_338 = arith.constant 1 : index
      %c0_339 = arith.constant 0 : index
      %c0_340 = arith.constant 0 : index
      %338 = vector.load %arg3[%c2_336, %c1_337, %c1_338, %c0_339, %c0_340] : memref<3x3x3x4x4xbf16, #tpu.memory_space<vmem>>, vector<1x1x1x4x4xbf16>
      %339 = vector.shape_cast %338 : vector<1x1x1x4x4xbf16> to vector<4x4xbf16>
      %cst_341 = arith.constant dense<0.000000e+00> : vector<64x4xf32>
      %340 = tpu.matmul %337, %339, %cst_341 {dimension_numbers = #tpu.dot_dimension_numbers<[1], [0], [0], [1], [0, 0, 1, 1], [], []>} : vector<64x4xbf16>, vector<4x4xbf16>, vector<64x4xf32> -> vector<64x4xf32>
      %341 = arith.addf %335, %340 : vector<64x4xf32>
      %342 = vector.extract_strided_slice %311 {offsets = [1, 2, 0], sizes = [8, 8, 4], strides = [1, 1, 1]} : vector<10x10x4xbf16> to vector<8x8x4xbf16>
      %343 = vector.shape_cast %342 : vector<8x8x4xbf16> to vector<64x4xbf16>
      %c2_342 = arith.constant 2 : index
      %c1_343 = arith.constant 1 : index
      %c2_344 = arith.constant 2 : index
      %c0_345 = arith.constant 0 : index
      %c0_346 = arith.constant 0 : index
      %344 = vector.load %arg3[%c2_342, %c1_343, %c2_344, %c0_345, %c0_346] : memref<3x3x3x4x4xbf16, #tpu.memory_space<vmem>>, vector<1x1x1x4x4xbf16>
      %345 = vector.shape_cast %344 : vector<1x1x1x4x4xbf16> to vector<4x4xbf16>
      %cst_347 = arith.constant dense<0.000000e+00> : vector<64x4xf32>
      %346 = tpu.matmul %343, %345, %cst_347 {dimension_numbers = #tpu.dot_dimension_numbers<[1], [0], [0], [1], [0, 0, 1, 1], [], []>} : vector<64x4xbf16>, vector<4x4xbf16>, vector<64x4xf32> -> vector<64x4xf32>
      %347 = arith.addf %341, %346 : vector<64x4xf32>
      %348 = vector.extract_strided_slice %311 {offsets = [2, 0, 0], sizes = [8, 8, 4], strides = [1, 1, 1]} : vector<10x10x4xbf16> to vector<8x8x4xbf16>
      %349 = vector.shape_cast %348 : vector<8x8x4xbf16> to vector<64x4xbf16>
      %c2_348 = arith.constant 2 : index
      %c2_349 = arith.constant 2 : index
      %c0_350 = arith.constant 0 : index
      %c0_351 = arith.constant 0 : index
      %c0_352 = arith.constant 0 : index
      %350 = vector.load %arg3[%c2_348, %c2_349, %c0_350, %c0_351, %c0_352] : memref<3x3x3x4x4xbf16, #tpu.memory_space<vmem>>, vector<1x1x1x4x4xbf16>
      %351 = vector.shape_cast %350 : vector<1x1x1x4x4xbf16> to vector<4x4xbf16>
      %cst_353 = arith.constant dense<0.000000e+00> : vector<64x4xf32>
      %352 = tpu.matmul %349, %351, %cst_353 {dimension_numbers = #tpu.dot_dimension_numbers<[1], [0], [0], [1], [0, 0, 1, 1], [], []>} : vector<64x4xbf16>, vector<4x4xbf16>, vector<64x4xf32> -> vector<64x4xf32>
      %353 = arith.addf %347, %352 : vector<64x4xf32>
      %354 = vector.extract_strided_slice %311 {offsets = [2, 1, 0], sizes = [8, 8, 4], strides = [1, 1, 1]} : vector<10x10x4xbf16> to vector<8x8x4xbf16>
      %355 = vector.shape_cast %354 : vector<8x8x4xbf16> to vector<64x4xbf16>
      %c2_354 = arith.constant 2 : index
      %c2_355 = arith.constant 2 : index
      %c1_356 = arith.constant 1 : index
      %c0_357 = arith.constant 0 : index
      %c0_358 = arith.constant 0 : index
      %356 = vector.load %arg3[%c2_354, %c2_355, %c1_356, %c0_357, %c0_358] : memref<3x3x3x4x4xbf16, #tpu.memory_space<vmem>>, vector<1x1x1x4x4xbf16>
      %357 = vector.shape_cast %356 : vector<1x1x1x4x4xbf16> to vector<4x4xbf16>
      %cst_359 = arith.constant dense<0.000000e+00> : vector<64x4xf32>
      %358 = tpu.matmul %355, %357, %cst_359 {dimension_numbers = #tpu.dot_dimension_numbers<[1], [0], [0], [1], [0, 0, 1, 1], [], []>} : vector<64x4xbf16>, vector<4x4xbf16>, vector<64x4xf32> -> vector<64x4xf32>
      %359 = arith.addf %353, %358 : vector<64x4xf32>
      %360 = vector.extract_strided_slice %311 {offsets = [2, 2, 0], sizes = [8, 8, 4], strides = [1, 1, 1]} : vector<10x10x4xbf16> to vector<8x8x4xbf16>
      %361 = vector.shape_cast %360 : vector<8x8x4xbf16> to vector<64x4xbf16>
      %c2_360 = arith.constant 2 : index
      %c2_361 = arith.constant 2 : index
      %c2_362 = arith.constant 2 : index
      %c0_363 = arith.constant 0 : index
      %c0_364 = arith.constant 0 : index
      %362 = vector.load %arg3[%c2_360, %c2_361, %c2_362, %c0_363, %c0_364] : memref<3x3x3x4x4xbf16, #tpu.memory_space<vmem>>, vector<1x1x1x4x4xbf16>
      %363 = vector.shape_cast %362 : vector<1x1x1x4x4xbf16> to vector<4x4xbf16>
      %cst_365 = arith.constant dense<0.000000e+00> : vector<64x4xf32>
      %364 = tpu.matmul %361, %363, %cst_365 {dimension_numbers = #tpu.dot_dimension_numbers<[1], [0], [0], [1], [0, 0, 1, 1], [], []>} : vector<64x4xbf16>, vector<4x4xbf16>, vector<64x4xf32> -> vector<64x4xf32>
      %365 = arith.addf %359, %364 : vector<64x4xf32>
      %c0_366 = arith.constant 0 : index
      %c0_367 = arith.constant 0 : index
      %366 = vector.load %arg4[%c0_366, %c0_367] : memref<1x4xf32, #tpu.memory_space<vmem>>, vector<1x4xf32>
      %367 = vector.broadcast %366 : vector<1x4xf32> to vector<64x4xf32>
      %368 = arith.addf %365, %367 : vector<64x4xf32>
      %cst_368 = arith.constant 0.000000e+00 : f32
      %369 = vector.broadcast %cst_368 : f32 to vector<64x4xf32>
      %370 = arith.maximumf %368, %369 : vector<64x4xf32>
      %371 = vector.shape_cast %370 : vector<64x4xf32> to vector<8x8x4xf32>
      %372 = arith.truncf %371 : vector<8x8x4xf32> to vector<8x8x4xbf16>
      %c1_369 = arith.constant 1 : index
      %c1_370 = arith.constant 1 : index
      %c1_371 = arith.constant 1 : index
      %c0_372 = arith.constant 0 : index
      %373 = vector.load %arg8[%c1_369, %c1_370, %c1_371, %c0_372] : memref<6x10x10x4xbf16, #tpu.memory_space<vmem>>, vector<1x8x8x4xbf16>
      %374 = vector.shape_cast %373 : vector<1x8x8x4xbf16> to vector<8x8x4xbf16>
      %375 = vector.shape_cast %372 : vector<8x8x4xbf16> to vector<1x8x8x4xbf16>
      tpu.vector_store %arg8[%c1_369, %c1_370, %c1_371, %c0_372], %375 {strides = array<i32>} : memref<6x10x10x4xbf16, #tpu.memory_space<vmem>>, vector<1x8x8x4xbf16>,
      %cst_373 = arith.constant 0.000000e+00 : f32
      %376 = vector.broadcast %cst_373 : f32 to vector<64x4xf32>
      %c0_374 = arith.constant 0 : index
      %c1_375 = arith.constant 1 : index
      %c0_376 = arith.constant 0 : index
      %c0_377 = arith.constant 0 : index
      %c0_378 = arith.constant 0 : index
      %377 = vector.load %arg2[%c0_374, %c1_375, %c0_376, %c0_377, %c0_378] : memref<1x6x10x10x4xbf16, #tpu.memory_space<vmem>>, vector<1x1x10x10x4xbf16>
      %378 = vector.shape_cast %377 : vector<1x1x10x10x4xbf16> to vector<10x10x4xbf16>
      %379 = vector.extract_strided_slice %378 {offsets = [0, 0, 0], sizes = [8, 8, 4], strides = [1, 1, 1]} : vector<10x10x4xbf16> to vector<8x8x4xbf16>
      %380 = vector.shape_cast %379 : vector<8x8x4xbf16> to vector<64x4xbf16>
      %c0_379 = arith.constant 0 : index
      %c0_380 = arith.constant 0 : index
      %c0_381 = arith.constant 0 : index
      %c0_382 = arith.constant 0 : index
      %c0_383 = arith.constant 0 : index
      %381 = vector.load %arg3[%c0_379, %c0_380, %c0_381, %c0_382, %c0_383] : memref<3x3x3x4x4xbf16, #tpu.memory_space<vmem>>, vector<1x1x1x4x4xbf16>
      %382 = vector.shape_cast %381 : vector<1x1x1x4x4xbf16> to vector<4x4xbf16>
      %cst_384 = arith.constant dense<0.000000e+00> : vector<64x4xf32>
      %383 = tpu.matmul %380, %382, %cst_384 {dimension_numbers = #tpu.dot_dimension_numbers<[1], [0], [0], [1], [0, 0, 1, 1], [], []>} : vector<64x4xbf16>, vector<4x4xbf16>, vector<64x4xf32> -> vector<64x4xf32>
      %384 = arith.addf %376, %383 : vector<64x4xf32>
      %385 = vector.extract_strided_slice %378 {offsets = [0, 1, 0], sizes = [8, 8, 4], strides = [1, 1, 1]} : vector<10x10x4xbf16> to vector<8x8x4xbf16>
      %386 = vector.shape_cast %385 : vector<8x8x4xbf16> to vector<64x4xbf16>
      %c0_385 = arith.constant 0 : index
      %c0_386 = arith.constant 0 : index
      %c1_387 = arith.constant 1 : index
      %c0_388 = arith.constant 0 : index
      %c0_389 = arith.constant 0 : index
      %387 = vector.load %arg3[%c0_385, %c0_386, %c1_387, %c0_388, %c0_389] : memref<3x3x3x4x4xbf16, #tpu.memory_space<vmem>>, vector<1x1x1x4x4xbf16>
      %388 = vector.shape_cast %387 : vector<1x1x1x4x4xbf16> to vector<4x4xbf16>
      %cst_390 = arith.constant dense<0.000000e+00> : vector<64x4xf32>
      %389 = tpu.matmul %386, %388, %cst_390 {dimension_numbers = #tpu.dot_dimension_numbers<[1], [0], [0], [1], [0, 0, 1, 1], [], []>} : vector<64x4xbf16>, vector<4x4xbf16>, vector<64x4xf32> -> vector<64x4xf32>
      %390 = arith.addf %384, %389 : vector<64x4xf32>
      %391 = vector.extract_strided_slice %378 {offsets = [0, 2, 0], sizes = [8, 8, 4], strides = [1, 1, 1]} : vector<10x10x4xbf16> to vector<8x8x4xbf16>
      %392 = vector.shape_cast %391 : vector<8x8x4xbf16> to vector<64x4xbf16>
      %c0_391 = arith.constant 0 : index
      %c0_392 = arith.constant 0 : index
      %c2_393 = arith.constant 2 : index
      %c0_394 = arith.constant 0 : index
      %c0_395 = arith.constant 0 : index
      %393 = vector.load %arg3[%c0_391, %c0_392, %c2_393, %c0_394, %c0_395] : memref<3x3x3x4x4xbf16, #tpu.memory_space<vmem>>, vector<1x1x1x4x4xbf16>
      %394 = vector.shape_cast %393 : vector<1x1x1x4x4xbf16> to vector<4x4xbf16>
      %cst_396 = arith.constant dense<0.000000e+00> : vector<64x4xf32>
      %395 = tpu.matmul %392, %394, %cst_396 {dimension_numbers = #tpu.dot_dimension_numbers<[1], [0], [0], [1], [0, 0, 1, 1], [], []>} : vector<64x4xbf16>, vector<4x4xbf16>, vector<64x4xf32> -> vector<64x4xf32>
      %396 = arith.addf %390, %395 : vector<64x4xf32>
      %397 = vector.extract_strided_slice %378 {offsets = [1, 0, 0], sizes = [8, 8, 4], strides = [1, 1, 1]} : vector<10x10x4xbf16> to vector<8x8x4xbf16>
      %398 = vector.shape_cast %397 : vector<8x8x4xbf16> to vector<64x4xbf16>
      %c0_397 = arith.constant 0 : index
      %c1_398 = arith.constant 1 : index
      %c0_399 = arith.constant 0 : index
      %c0_400 = arith.constant 0 : index
      %c0_401 = arith.constant 0 : index
      %399 = vector.load %arg3[%c0_397, %c1_398, %c0_399, %c0_400, %c0_401] : memref<3x3x3x4x4xbf16, #tpu.memory_space<vmem>>, vector<1x1x1x4x4xbf16>
      %400 = vector.shape_cast %399 : vector<1x1x1x4x4xbf16> to vector<4x4xbf16>
      %cst_402 = arith.constant dense<0.000000e+00> : vector<64x4xf32>
      %401 = tpu.matmul %398, %400, %cst_402 {dimension_numbers = #tpu.dot_dimension_numbers<[1], [0], [0], [1], [0, 0, 1, 1], [], []>} : vector<64x4xbf16>, vector<4x4xbf16>, vector<64x4xf32> -> vector<64x4xf32>
      %402 = arith.addf %396, %401 : vector<64x4xf32>
      %403 = vector.extract_strided_slice %378 {offsets = [1, 1, 0], sizes = [8, 8, 4], strides = [1, 1, 1]} : vector<10x10x4xbf16> to vector<8x8x4xbf16>
      %404 = vector.shape_cast %403 : vector<8x8x4xbf16> to vector<64x4xbf16>
      %c0_403 = arith.constant 0 : index
      %c1_404 = arith.constant 1 : index
      %c1_405 = arith.constant 1 : index
      %c0_406 = arith.constant 0 : index
      %c0_407 = arith.constant 0 : index
      %405 = vector.load %arg3[%c0_403, %c1_404, %c1_405, %c0_406, %c0_407] : memref<3x3x3x4x4xbf16, #tpu.memory_space<vmem>>, vector<1x1x1x4x4xbf16>
      %406 = vector.shape_cast %405 : vector<1x1x1x4x4xbf16> to vector<4x4xbf16>
      %cst_408 = arith.constant dense<0.000000e+00> : vector<64x4xf32>
      %407 = tpu.matmul %404, %406, %cst_408 {dimension_numbers = #tpu.dot_dimension_numbers<[1], [0], [0], [1], [0, 0, 1, 1], [], []>} : vector<64x4xbf16>, vector<4x4xbf16>, vector<64x4xf32> -> vector<64x4xf32>
      %408 = arith.addf %402, %407 : vector<64x4xf32>
      %409 = vector.extract_strided_slice %378 {offsets = [1, 2, 0], sizes = [8, 8, 4], strides = [1, 1, 1]} : vector<10x10x4xbf16> to vector<8x8x4xbf16>
      %410 = vector.shape_cast %409 : vector<8x8x4xbf16> to vector<64x4xbf16>
      %c0_409 = arith.constant 0 : index
      %c1_410 = arith.constant 1 : index
      %c2_411 = arith.constant 2 : index
      %c0_412 = arith.constant 0 : index
      %c0_413 = arith.constant 0 : index
      %411 = vector.load %arg3[%c0_409, %c1_410, %c2_411, %c0_412, %c0_413] : memref<3x3x3x4x4xbf16, #tpu.memory_space<vmem>>, vector<1x1x1x4x4xbf16>
      %412 = vector.shape_cast %411 : vector<1x1x1x4x4xbf16> to vector<4x4xbf16>
      %cst_414 = arith.constant dense<0.000000e+00> : vector<64x4xf32>
      %413 = tpu.matmul %410, %412, %cst_414 {dimension_numbers = #tpu.dot_dimension_numbers<[1], [0], [0], [1], [0, 0, 1, 1], [], []>} : vector<64x4xbf16>, vector<4x4xbf16>, vector<64x4xf32> -> vector<64x4xf32>
      %414 = arith.addf %408, %413 : vector<64x4xf32>
      %415 = vector.extract_strided_slice %378 {offsets = [2, 0, 0], sizes = [8, 8, 4], strides = [1, 1, 1]} : vector<10x10x4xbf16> to vector<8x8x4xbf16>
      %416 = vector.shape_cast %415 : vector<8x8x4xbf16> to vector<64x4xbf16>
      %c0_415 = arith.constant 0 : index
      %c2_416 = arith.constant 2 : index
      %c0_417 = arith.constant 0 : index
      %c0_418 = arith.constant 0 : index
      %c0_419 = arith.constant 0 : index
      %417 = vector.load %arg3[%c0_415, %c2_416, %c0_417, %c0_418, %c0_419] : memref<3x3x3x4x4xbf16, #tpu.memory_space<vmem>>, vector<1x1x1x4x4xbf16>
      %418 = vector.shape_cast %417 : vector<1x1x1x4x4xbf16> to vector<4x4xbf16>
      %cst_420 = arith.constant dense<0.000000e+00> : vector<64x4xf32>
      %419 = tpu.matmul %416, %418, %cst_420 {dimension_numbers = #tpu.dot_dimension_numbers<[1], [0], [0], [1], [0, 0, 1, 1], [], []>} : vector<64x4xbf16>, vector<4x4xbf16>, vector<64x4xf32> -> vector<64x4xf32>
      %420 = arith.addf %414, %419 : vector<64x4xf32>
      %421 = vector.extract_strided_slice %378 {offsets = [2, 1, 0], sizes = [8, 8, 4], strides = [1, 1, 1]} : vector<10x10x4xbf16> to vector<8x8x4xbf16>
      %422 = vector.shape_cast %421 : vector<8x8x4xbf16> to vector<64x4xbf16>
      %c0_421 = arith.constant 0 : index
      %c2_422 = arith.constant 2 : index
      %c1_423 = arith.constant 1 : index
      %c0_424 = arith.constant 0 : index
      %c0_425 = arith.constant 0 : index
      %423 = vector.load %arg3[%c0_421, %c2_422, %c1_423, %c0_424, %c0_425] : memref<3x3x3x4x4xbf16, #tpu.memory_space<vmem>>, vector<1x1x1x4x4xbf16>
      %424 = vector.shape_cast %423 : vector<1x1x1x4x4xbf16> to vector<4x4xbf16>
      %cst_426 = arith.constant dense<0.000000e+00> : vector<64x4xf32>
      %425 = tpu.matmul %422, %424, %cst_426 {dimension_numbers = #tpu.dot_dimension_numbers<[1], [0], [0], [1], [0, 0, 1, 1], [], []>} : vector<64x4xbf16>, vector<4x4xbf16>, vector<64x4xf32> -> vector<64x4xf32>
      %426 = arith.addf %420, %425 : vector<64x4xf32>
      %427 = vector.extract_strided_slice %378 {offsets = [2, 2, 0], sizes = [8, 8, 4], strides = [1, 1, 1]} : vector<10x10x4xbf16> to vector<8x8x4xbf16>
      %428 = vector.shape_cast %427 : vector<8x8x4xbf16> to vector<64x4xbf16>
      %c0_427 = arith.constant 0 : index
      %c2_428 = arith.constant 2 : index
      %c2_429 = arith.constant 2 : index
      %c0_430 = arith.constant 0 : index
      %c0_431 = arith.constant 0 : index
      %429 = vector.load %arg3[%c0_427, %c2_428, %c2_429, %c0_430, %c0_431] : memref<3x3x3x4x4xbf16, #tpu.memory_space<vmem>>, vector<1x1x1x4x4xbf16>
      %430 = vector.shape_cast %429 : vector<1x1x1x4x4xbf16> to vector<4x4xbf16>
      %cst_432 = arith.constant dense<0.000000e+00> : vector<64x4xf32>
      %431 = tpu.matmul %428, %430, %cst_432 {dimension_numbers = #tpu.dot_dimension_numbers<[1], [0], [0], [1], [0, 0, 1, 1], [], []>} : vector<64x4xbf16>, vector<4x4xbf16>, vector<64x4xf32> -> vector<64x4xf32>
      %432 = arith.addf %426, %431 : vector<64x4xf32>
      %c0_433 = arith.constant 0 : index
      %c2_434 = arith.constant 2 : index
      %c0_435 = arith.constant 0 : index
      %c0_436 = arith.constant 0 : index
      %c0_437 = arith.constant 0 : index
      %433 = vector.load %arg2[%c0_433, %c2_434, %c0_435, %c0_436, %c0_437] : memref<1x6x10x10x4xbf16, #tpu.memory_space<vmem>>, vector<1x1x10x10x4xbf16>
      %434 = vector.shape_cast %433 : vector<1x1x10x10x4xbf16> to vector<10x10x4xbf16>
      %435 = vector.extract_strided_slice %434 {offsets = [0, 0, 0], sizes = [8, 8, 4], strides = [1, 1, 1]} : vector<10x10x4xbf16> to vector<8x8x4xbf16>
      %436 = vector.shape_cast %435 : vector<8x8x4xbf16> to vector<64x4xbf16>
      %c1_438 = arith.constant 1 : index
      %c0_439 = arith.constant 0 : index
      %c0_440 = arith.constant 0 : index
      %c0_441 = arith.constant 0 : index
      %c0_442 = arith.constant 0 : index
      %437 = vector.load %arg3[%c1_438, %c0_439, %c0_440, %c0_441, %c0_442] : memref<3x3x3x4x4xbf16, #tpu.memory_space<vmem>>, vector<1x1x1x4x4xbf16>
      %438 = vector.shape_cast %437 : vector<1x1x1x4x4xbf16> to vector<4x4xbf16>
      %cst_443 = arith.constant dense<0.000000e+00> : vector<64x4xf32>
      %439 = tpu.matmul %436, %438, %cst_443 {dimension_numbers = #tpu.dot_dimension_numbers<[1], [0], [0], [1], [0, 0, 1, 1], [], []>} : vector<64x4xbf16>, vector<4x4xbf16>, vector<64x4xf32> -> vector<64x4xf32>
      %440 = arith.addf %432, %439 : vector<64x4xf32>
      %441 = vector.extract_strided_slice %434 {offsets = [0, 1, 0], sizes = [8, 8, 4], strides = [1, 1, 1]} : vector<10x10x4xbf16> to vector<8x8x4xbf16>
      %442 = vector.shape_cast %441 : vector<8x8x4xbf16> to vector<64x4xbf16>
      %c1_444 = arith.constant 1 : index
      %c0_445 = arith.constant 0 : index
      %c1_446 = arith.constant 1 : index
      %c0_447 = arith.constant 0 : index
      %c0_448 = arith.constant 0 : index
      %443 = vector.load %arg3[%c1_444, %c0_445, %c1_446, %c0_447, %c0_448] : memref<3x3x3x4x4xbf16, #tpu.memory_space<vmem>>, vector<1x1x1x4x4xbf16>
      %444 = vector.shape_cast %443 : vector<1x1x1x4x4xbf16> to vector<4x4xbf16>
      %cst_449 = arith.constant dense<0.000000e+00> : vector<64x4xf32>
      %445 = tpu.matmul %442, %444, %cst_449 {dimension_numbers = #tpu.dot_dimension_numbers<[1], [0], [0], [1], [0, 0, 1, 1], [], []>} : vector<64x4xbf16>, vector<4x4xbf16>, vector<64x4xf32> -> vector<64x4xf32>
      %446 = arith.addf %440, %445 : vector<64x4xf32>
      %447 = vector.extract_strided_slice %434 {offsets = [0, 2, 0], sizes = [8, 8, 4], strides = [1, 1, 1]} : vector<10x10x4xbf16> to vector<8x8x4xbf16>
      %448 = vector.shape_cast %447 : vector<8x8x4xbf16> to vector<64x4xbf16>
      %c1_450 = arith.constant 1 : index
      %c0_451 = arith.constant 0 : index
      %c2_452 = arith.constant 2 : index
      %c0_453 = arith.constant 0 : index
      %c0_454 = arith.constant 0 : index
      %449 = vector.load %arg3[%c1_450, %c0_451, %c2_452, %c0_453, %c0_454] : memref<3x3x3x4x4xbf16, #tpu.memory_space<vmem>>, vector<1x1x1x4x4xbf16>
      %450 = vector.shape_cast %449 : vector<1x1x1x4x4xbf16> to vector<4x4xbf16>
      %cst_455 = arith.constant dense<0.000000e+00> : vector<64x4xf32>
      %451 = tpu.matmul %448, %450, %cst_455 {dimension_numbers = #tpu.dot_dimension_numbers<[1], [0], [0], [1], [0, 0, 1, 1], [], []>} : vector<64x4xbf16>, vector<4x4xbf16>, vector<64x4xf32> -> vector<64x4xf32>
      %452 = arith.addf %446, %451 : vector<64x4xf32>
      %453 = vector.extract_strided_slice %434 {offsets = [1, 0, 0], sizes = [8, 8, 4], strides = [1, 1, 1]} : vector<10x10x4xbf16> to vector<8x8x4xbf16>
      %454 = vector.shape_cast %453 : vector<8x8x4xbf16> to vector<64x4xbf16>
      %c1_456 = arith.constant 1 : index
      %c1_457 = arith.constant 1 : index
      %c0_458 = arith.constant 0 : index
      %c0_459 = arith.constant 0 : index
      %c0_460 = arith.constant 0 : index
      %455 = vector.load %arg3[%c1_456, %c1_457, %c0_458, %c0_459, %c0_460] : memref<3x3x3x4x4xbf16, #tpu.memory_space<vmem>>, vector<1x1x1x4x4xbf16>
      %456 = vector.shape_cast %455 : vector<1x1x1x4x4xbf16> to vector<4x4xbf16>
      %cst_461 = arith.constant dense<0.000000e+00> : vector<64x4xf32>
      %457 = tpu.matmul %454, %456, %cst_461 {dimension_numbers = #tpu.dot_dimension_numbers<[1], [0], [0], [1], [0, 0, 1, 1], [], []>} : vector<64x4xbf16>, vector<4x4xbf16>, vector<64x4xf32> -> vector<64x4xf32>
      %458 = arith.addf %452, %457 : vector<64x4xf32>
      %459 = vector.extract_strided_slice %434 {offsets = [1, 1, 0], sizes = [8, 8, 4], strides = [1, 1, 1]} : vector<10x10x4xbf16> to vector<8x8x4xbf16>
      %460 = vector.shape_cast %459 : vector<8x8x4xbf16> to vector<64x4xbf16>
      %c1_462 = arith.constant 1 : index
      %c1_463 = arith.constant 1 : index
      %c1_464 = arith.constant 1 : index
      %c0_465 = arith.constant 0 : index
      %c0_466 = arith.constant 0 : index
      %461 = vector.load %arg3[%c1_462, %c1_463, %c1_464, %c0_465, %c0_466] : memref<3x3x3x4x4xbf16, #tpu.memory_space<vmem>>, vector<1x1x1x4x4xbf16>
      %462 = vector.shape_cast %461 : vector<1x1x1x4x4xbf16> to vector<4x4xbf16>
      %cst_467 = arith.constant dense<0.000000e+00> : vector<64x4xf32>
      %463 = tpu.matmul %460, %462, %cst_467 {dimension_numbers = #tpu.dot_dimension_numbers<[1], [0], [0], [1], [0, 0, 1, 1], [], []>} : vector<64x4xbf16>, vector<4x4xbf16>, vector<64x4xf32> -> vector<64x4xf32>
      %464 = arith.addf %458, %463 : vector<64x4xf32>
      %465 = vector.extract_strided_slice %434 {offsets = [1, 2, 0], sizes = [8, 8, 4], strides = [1, 1, 1]} : vector<10x10x4xbf16> to vector<8x8x4xbf16>
      %466 = vector.shape_cast %465 : vector<8x8x4xbf16> to vector<64x4xbf16>
      %c1_468 = arith.constant 1 : index
      %c1_469 = arith.constant 1 : index
      %c2_470 = arith.constant 2 : index
      %c0_471 = arith.constant 0 : index
      %c0_472 = arith.constant 0 : index
      %467 = vector.load %arg3[%c1_468, %c1_469, %c2_470, %c0_471, %c0_472] : memref<3x3x3x4x4xbf16, #tpu.memory_space<vmem>>, vector<1x1x1x4x4xbf16>
      %468 = vector.shape_cast %467 : vector<1x1x1x4x4xbf16> to vector<4x4xbf16>
      %cst_473 = arith.constant dense<0.000000e+00> : vector<64x4xf32>
      %469 = tpu.matmul %466, %468, %cst_473 {dimension_numbers = #tpu.dot_dimension_numbers<[1], [0], [0], [1], [0, 0, 1, 1], [], []>} : vector<64x4xbf16>, vector<4x4xbf16>, vector<64x4xf32> -> vector<64x4xf32>
      %470 = arith.addf %464, %469 : vector<64x4xf32>
      %471 = vector.extract_strided_slice %434 {offsets = [2, 0, 0], sizes = [8, 8, 4], strides = [1, 1, 1]} : vector<10x10x4xbf16> to vector<8x8x4xbf16>
      %472 = vector.shape_cast %471 : vector<8x8x4xbf16> to vector<64x4xbf16>
      %c1_474 = arith.constant 1 : index
      %c2_475 = arith.constant 2 : index
      %c0_476 = arith.constant 0 : index
      %c0_477 = arith.constant 0 : index
      %c0_478 = arith.constant 0 : index
      %473 = vector.load %arg3[%c1_474, %c2_475, %c0_476, %c0_477, %c0_478] : memref<3x3x3x4x4xbf16, #tpu.memory_space<vmem>>, vector<1x1x1x4x4xbf16>
      %474 = vector.shape_cast %473 : vector<1x1x1x4x4xbf16> to vector<4x4xbf16>
      %cst_479 = arith.constant dense<0.000000e+00> : vector<64x4xf32>
      %475 = tpu.matmul %472, %474, %cst_479 {dimension_numbers = #tpu.dot_dimension_numbers<[1], [0], [0], [1], [0, 0, 1, 1], [], []>} : vector<64x4xbf16>, vector<4x4xbf16>, vector<64x4xf32> -> vector<64x4xf32>
      %476 = arith.addf %470, %475 : vector<64x4xf32>
      %477 = vector.extract_strided_slice %434 {offsets = [2, 1, 0], sizes = [8, 8, 4], strides = [1, 1, 1]} : vector<10x10x4xbf16> to vector<8x8x4xbf16>
      %478 = vector.shape_cast %477 : vector<8x8x4xbf16> to vector<64x4xbf16>
      %c1_480 = arith.constant 1 : index
      %c2_481 = arith.constant 2 : index
      %c1_482 = arith.constant 1 : index
      %c0_483 = arith.constant 0 : index
      %c0_484 = arith.constant 0 : index
      %479 = vector.load %arg3[%c1_480, %c2_481, %c1_482, %c0_483, %c0_484] : memref<3x3x3x4x4xbf16, #tpu.memory_space<vmem>>, vector<1x1x1x4x4xbf16>
      %480 = vector.shape_cast %479 : vector<1x1x1x4x4xbf16> to vector<4x4xbf16>
      %cst_485 = arith.constant dense<0.000000e+00> : vector<64x4xf32>
      %481 = tpu.matmul %478, %480, %cst_485 {dimension_numbers = #tpu.dot_dimension_numbers<[1], [0], [0], [1], [0, 0, 1, 1], [], []>} : vector<64x4xbf16>, vector<4x4xbf16>, vector<64x4xf32> -> vector<64x4xf32>
      %482 = arith.addf %476, %481 : vector<64x4xf32>
      %483 = vector.extract_strided_slice %434 {offsets = [2, 2, 0], sizes = [8, 8, 4], strides = [1, 1, 1]} : vector<10x10x4xbf16> to vector<8x8x4xbf16>
      %484 = vector.shape_cast %483 : vector<8x8x4xbf16> to vector<64x4xbf16>
      %c1_486 = arith.constant 1 : index
      %c2_487 = arith.constant 2 : index
      %c2_488 = arith.constant 2 : index
      %c0_489 = arith.constant 0 : index
      %c0_490 = arith.constant 0 : index
      %485 = vector.load %arg3[%c1_486, %c2_487, %c2_488, %c0_489, %c0_490] : memref<3x3x3x4x4xbf16, #tpu.memory_space<vmem>>, vector<1x1x1x4x4xbf16>
      %486 = vector.shape_cast %485 : vector<1x1x1x4x4xbf16> to vector<4x4xbf16>
      %cst_491 = arith.constant dense<0.000000e+00> : vector<64x4xf32>
      %487 = tpu.matmul %484, %486, %cst_491 {dimension_numbers = #tpu.dot_dimension_numbers<[1], [0], [0], [1], [0, 0, 1, 1], [], []>} : vector<64x4xbf16>, vector<4x4xbf16>, vector<64x4xf32> -> vector<64x4xf32>
      %488 = arith.addf %482, %487 : vector<64x4xf32>
      %c0_492 = arith.constant 0 : index
      %c3 = arith.constant 3 : index
      %c0_493 = arith.constant 0 : index
      %c0_494 = arith.constant 0 : index
      %c0_495 = arith.constant 0 : index
      %489 = vector.load %arg2[%c0_492, %c3, %c0_493, %c0_494, %c0_495] : memref<1x6x10x10x4xbf16, #tpu.memory_space<vmem>>, vector<1x1x10x10x4xbf16>
      %490 = vector.shape_cast %489 : vector<1x1x10x10x4xbf16> to vector<10x10x4xbf16>
      %491 = vector.extract_strided_slice %490 {offsets = [0, 0, 0], sizes = [8, 8, 4], strides = [1, 1, 1]} : vector<10x10x4xbf16> to vector<8x8x4xbf16>
      %492 = vector.shape_cast %491 : vector<8x8x4xbf16> to vector<64x4xbf16>
      %c2_496 = arith.constant 2 : index
      %c0_497 = arith.constant 0 : index
      %c0_498 = arith.constant 0 : index
      %c0_499 = arith.constant 0 : index
      %c0_500 = arith.constant 0 : index
      %493 = vector.load %arg3[%c2_496, %c0_497, %c0_498, %c0_499, %c0_500] : memref<3x3x3x4x4xbf16, #tpu.memory_space<vmem>>, vector<1x1x1x4x4xbf16>
      %494 = vector.shape_cast %493 : vector<1x1x1x4x4xbf16> to vector<4x4xbf16>
      %cst_501 = arith.constant dense<0.000000e+00> : vector<64x4xf32>
      %495 = tpu.matmul %492, %494, %cst_501 {dimension_numbers = #tpu.dot_dimension_numbers<[1], [0], [0], [1], [0, 0, 1, 1], [], []>} : vector<64x4xbf16>, vector<4x4xbf16>, vector<64x4xf32> -> vector<64x4xf32>
      %496 = arith.addf %488, %495 : vector<64x4xf32>
      %497 = vector.extract_strided_slice %490 {offsets = [0, 1, 0], sizes = [8, 8, 4], strides = [1, 1, 1]} : vector<10x10x4xbf16> to vector<8x8x4xbf16>
      %498 = vector.shape_cast %497 : vector<8x8x4xbf16> to vector<64x4xbf16>
      %c2_502 = arith.constant 2 : index
      %c0_503 = arith.constant 0 : index
      %c1_504 = arith.constant 1 : index
      %c0_505 = arith.constant 0 : index
      %c0_506 = arith.constant 0 : index
      %499 = vector.load %arg3[%c2_502, %c0_503, %c1_504, %c0_505, %c0_506] : memref<3x3x3x4x4xbf16, #tpu.memory_space<vmem>>, vector<1x1x1x4x4xbf16>
      %500 = vector.shape_cast %499 : vector<1x1x1x4x4xbf16> to vector<4x4xbf16>
      %cst_507 = arith.constant dense<0.000000e+00> : vector<64x4xf32>
      %501 = tpu.matmul %498, %500, %cst_507 {dimension_numbers = #tpu.dot_dimension_numbers<[1], [0], [0], [1], [0, 0, 1, 1], [], []>} : vector<64x4xbf16>, vector<4x4xbf16>, vector<64x4xf32> -> vector<64x4xf32>
      %502 = arith.addf %496, %501 : vector<64x4xf32>
      %503 = vector.extract_strided_slice %490 {offsets = [0, 2, 0], sizes = [8, 8, 4], strides = [1, 1, 1]} : vector<10x10x4xbf16> to vector<8x8x4xbf16>
      %504 = vector.shape_cast %503 : vector<8x8x4xbf16> to vector<64x4xbf16>
      %c2_508 = arith.constant 2 : index
      %c0_509 = arith.constant 0 : index
      %c2_510 = arith.constant 2 : index
      %c0_511 = arith.constant 0 : index
      %c0_512 = arith.constant 0 : index
      %505 = vector.load %arg3[%c2_508, %c0_509, %c2_510, %c0_511, %c0_512] : memref<3x3x3x4x4xbf16, #tpu.memory_space<vmem>>, vector<1x1x1x4x4xbf16>
      %506 = vector.shape_cast %505 : vector<1x1x1x4x4xbf16> to vector<4x4xbf16>
      %cst_513 = arith.constant dense<0.000000e+00> : vector<64x4xf32>
      %507 = tpu.matmul %504, %506, %cst_513 {dimension_numbers = #tpu.dot_dimension_numbers<[1], [0], [0], [1], [0, 0, 1, 1], [], []>} : vector<64x4xbf16>, vector<4x4xbf16>, vector<64x4xf32> -> vector<64x4xf32>
      %508 = arith.addf %502, %507 : vector<64x4xf32>
      %509 = vector.extract_strided_slice %490 {offsets = [1, 0, 0], sizes = [8, 8, 4], strides = [1, 1, 1]} : vector<10x10x4xbf16> to vector<8x8x4xbf16>
      %510 = vector.shape_cast %509 : vector<8x8x4xbf16> to vector<64x4xbf16>
      %c2_514 = arith.constant 2 : index
      %c1_515 = arith.constant 1 : index
      %c0_516 = arith.constant 0 : index
      %c0_517 = arith.constant 0 : index
      %c0_518 = arith.constant 0 : index
      %511 = vector.load %arg3[%c2_514, %c1_515, %c0_516, %c0_517, %c0_518] : memref<3x3x3x4x4xbf16, #tpu.memory_space<vmem>>, vector<1x1x1x4x4xbf16>
      %512 = vector.shape_cast %511 : vector<1x1x1x4x4xbf16> to vector<4x4xbf16>
      %cst_519 = arith.constant dense<0.000000e+00> : vector<64x4xf32>
      %513 = tpu.matmul %510, %512, %cst_519 {dimension_numbers = #tpu.dot_dimension_numbers<[1], [0], [0], [1], [0, 0, 1, 1], [], []>} : vector<64x4xbf16>, vector<4x4xbf16>, vector<64x4xf32> -> vector<64x4xf32>
      %514 = arith.addf %508, %513 : vector<64x4xf32>
      %515 = vector.extract_strided_slice %490 {offsets = [1, 1, 0], sizes = [8, 8, 4], strides = [1, 1, 1]} : vector<10x10x4xbf16> to vector<8x8x4xbf16>
      %516 = vector.shape_cast %515 : vector<8x8x4xbf16> to vector<64x4xbf16>
      %c2_520 = arith.constant 2 : index
      %c1_521 = arith.constant 1 : index
      %c1_522 = arith.constant 1 : index
      %c0_523 = arith.constant 0 : index
      %c0_524 = arith.constant 0 : index
      %517 = vector.load %arg3[%c2_520, %c1_521, %c1_522, %c0_523, %c0_524] : memref<3x3x3x4x4xbf16, #tpu.memory_space<vmem>>, vector<1x1x1x4x4xbf16>
      %518 = vector.shape_cast %517 : vector<1x1x1x4x4xbf16> to vector<4x4xbf16>
      %cst_525 = arith.constant dense<0.000000e+00> : vector<64x4xf32>
      %519 = tpu.matmul %516, %518, %cst_525 {dimension_numbers = #tpu.dot_dimension_numbers<[1], [0], [0], [1], [0, 0, 1, 1], [], []>} : vector<64x4xbf16>, vector<4x4xbf16>, vector<64x4xf32> -> vector<64x4xf32>
      %520 = arith.addf %514, %519 : vector<64x4xf32>
      %521 = vector.extract_strided_slice %490 {offsets = [1, 2, 0], sizes = [8, 8, 4], strides = [1, 1, 1]} : vector<10x10x4xbf16> to vector<8x8x4xbf16>
      %522 = vector.shape_cast %521 : vector<8x8x4xbf16> to vector<64x4xbf16>
      %c2_526 = arith.constant 2 : index
      %c1_527 = arith.constant 1 : index
      %c2_528 = arith.constant 2 : index
      %c0_529 = arith.constant 0 : index
      %c0_530 = arith.constant 0 : index
      %523 = vector.load %arg3[%c2_526, %c1_527, %c2_528, %c0_529, %c0_530] : memref<3x3x3x4x4xbf16, #tpu.memory_space<vmem>>, vector<1x1x1x4x4xbf16>
      %524 = vector.shape_cast %523 : vector<1x1x1x4x4xbf16> to vector<4x4xbf16>
      %cst_531 = arith.constant dense<0.000000e+00> : vector<64x4xf32>
      %525 = tpu.matmul %522, %524, %cst_531 {dimension_numbers = #tpu.dot_dimension_numbers<[1], [0], [0], [1], [0, 0, 1, 1], [], []>} : vector<64x4xbf16>, vector<4x4xbf16>, vector<64x4xf32> -> vector<64x4xf32>
      %526 = arith.addf %520, %525 : vector<64x4xf32>
      %527 = vector.extract_strided_slice %490 {offsets = [2, 0, 0], sizes = [8, 8, 4], strides = [1, 1, 1]} : vector<10x10x4xbf16> to vector<8x8x4xbf16>
      %528 = vector.shape_cast %527 : vector<8x8x4xbf16> to vector<64x4xbf16>
      %c2_532 = arith.constant 2 : index
      %c2_533 = arith.constant 2 : index
      %c0_534 = arith.constant 0 : index
      %c0_535 = arith.constant 0 : index
      %c0_536 = arith.constant 0 : index
      %529 = vector.load %arg3[%c2_532, %c2_533, %c0_534, %c0_535, %c0_536] : memref<3x3x3x4x4xbf16, #tpu.memory_space<vmem>>, vector<1x1x1x4x4xbf16>
      %530 = vector.shape_cast %529 : vector<1x1x1x4x4xbf16> to vector<4x4xbf16>
      %cst_537 = arith.constant dense<0.000000e+00> : vector<64x4xf32>
      %531 = tpu.matmul %528, %530, %cst_537 {dimension_numbers = #tpu.dot_dimension_numbers<[1], [0], [0], [1], [0, 0, 1, 1], [], []>} : vector<64x4xbf16>, vector<4x4xbf16>, vector<64x4xf32> -> vector<64x4xf32>
      %532 = arith.addf %526, %531 : vector<64x4xf32>
      %533 = vector.extract_strided_slice %490 {offsets = [2, 1, 0], sizes = [8, 8, 4], strides = [1, 1, 1]} : vector<10x10x4xbf16> to vector<8x8x4xbf16>
      %534 = vector.shape_cast %533 : vector<8x8x4xbf16> to vector<64x4xbf16>
      %c2_538 = arith.constant 2 : index
      %c2_539 = arith.constant 2 : index
      %c1_540 = arith.constant 1 : index
      %c0_541 = arith.constant 0 : index
      %c0_542 = arith.constant 0 : index
      %535 = vector.load %arg3[%c2_538, %c2_539, %c1_540, %c0_541, %c0_542] : memref<3x3x3x4x4xbf16, #tpu.memory_space<vmem>>, vector<1x1x1x4x4xbf16>
      %536 = vector.shape_cast %535 : vector<1x1x1x4x4xbf16> to vector<4x4xbf16>
      %cst_543 = arith.constant dense<0.000000e+00> : vector<64x4xf32>
      %537 = tpu.matmul %534, %536, %cst_543 {dimension_numbers = #tpu.dot_dimension_numbers<[1], [0], [0], [1], [0, 0, 1, 1], [], []>} : vector<64x4xbf16>, vector<4x4xbf16>, vector<64x4xf32> -> vector<64x4xf32>
      %538 = arith.addf %532, %537 : vector<64x4xf32>
      %539 = vector.extract_strided_slice %490 {offsets = [2, 2, 0], sizes = [8, 8, 4], strides = [1, 1, 1]} : vector<10x10x4xbf16> to vector<8x8x4xbf16>
      %540 = vector.shape_cast %539 : vector<8x8x4xbf16> to vector<64x4xbf16>
      %c2_544 = arith.constant 2 : index
      %c2_545 = arith.constant 2 : index
      %c2_546 = arith.constant 2 : index
      %c0_547 = arith.constant 0 : index
      %c0_548 = arith.constant 0 : index
      %541 = vector.load %arg3[%c2_544, %c2_545, %c2_546, %c0_547, %c0_548] : memref<3x3x3x4x4xbf16, #tpu.memory_space<vmem>>, vector<1x1x1x4x4xbf16>
      %542 = vector.shape_cast %541 : vector<1x1x1x4x4xbf16> to vector<4x4xbf16>
      %cst_549 = arith.constant dense<0.000000e+00> : vector<64x4xf32>
      %543 = tpu.matmul %540, %542, %cst_549 {dimension_numbers = #tpu.dot_dimension_numbers<[1], [0], [0], [1], [0, 0, 1, 1], [], []>} : vector<64x4xbf16>, vector<4x4xbf16>, vector<64x4xf32> -> vector<64x4xf32>
      %544 = arith.addf %538, %543 : vector<64x4xf32>
      %c0_550 = arith.constant 0 : index
      %c0_551 = arith.constant 0 : index
      %545 = vector.load %arg4[%c0_550, %c0_551] : memref<1x4xf32, #tpu.memory_space<vmem>>, vector<1x4xf32>
      %546 = vector.broadcast %545 : vector<1x4xf32> to vector<64x4xf32>
      %547 = arith.addf %544, %546 : vector<64x4xf32>
      %cst_552 = arith.constant 0.000000e+00 : f32
      %548 = vector.broadcast %cst_552 : f32 to vector<64x4xf32>
      %549 = arith.maximumf %547, %548 : vector<64x4xf32>
      %550 = vector.shape_cast %549 : vector<64x4xf32> to vector<8x8x4xf32>
      %551 = arith.truncf %550 : vector<8x8x4xf32> to vector<8x8x4xbf16>
      %c2_553 = arith.constant 2 : index
      %c1_554 = arith.constant 1 : index
      %c1_555 = arith.constant 1 : index
      %c0_556 = arith.constant 0 : index
      %552 = vector.load %arg8[%c2_553, %c1_554, %c1_555, %c0_556] : memref<6x10x10x4xbf16, #tpu.memory_space<vmem>>, vector<1x8x8x4xbf16>
      %553 = vector.shape_cast %552 : vector<1x8x8x4xbf16> to vector<8x8x4xbf16>
      %554 = vector.shape_cast %551 : vector<8x8x4xbf16> to vector<1x8x8x4xbf16>
      tpu.vector_store %arg8[%c2_553, %c1_554, %c1_555, %c0_556], %554 {strides = array<i32>} : memref<6x10x10x4xbf16, #tpu.memory_space<vmem>>, vector<1x8x8x4xbf16>,
      %cst_557 = arith.constant 0.000000e+00 : f32
      %555 = vector.broadcast %cst_557 : f32 to vector<64x4xf32>
      %c0_558 = arith.constant 0 : index
      %c2_559 = arith.constant 2 : index
      %c0_560 = arith.constant 0 : index
      %c0_561 = arith.constant 0 : index
      %c0_562 = arith.constant 0 : index
      %556 = vector.load %arg2[%c0_558, %c2_559, %c0_560, %c0_561, %c0_562] : memref<1x6x10x10x4xbf16, #tpu.memory_space<vmem>>, vector<1x1x10x10x4xbf16>
      %557 = vector.shape_cast %556 : vector<1x1x10x10x4xbf16> to vector<10x10x4xbf16>
      %558 = vector.extract_strided_slice %557 {offsets = [0, 0, 0], sizes = [8, 8, 4], strides = [1, 1, 1]} : vector<10x10x4xbf16> to vector<8x8x4xbf16>
      %559 = vector.shape_cast %558 : vector<8x8x4xbf16> to vector<64x4xbf16>
      %c0_563 = arith.constant 0 : index
      %c0_564 = arith.constant 0 : index
      %c0_565 = arith.constant 0 : index
      %c0_566 = arith.constant 0 : index
      %c0_567 = arith.constant 0 : index
      %560 = vector.load %arg3[%c0_563, %c0_564, %c0_565, %c0_566, %c0_567] : memref<3x3x3x4x4xbf16, #tpu.memory_space<vmem>>, vector<1x1x1x4x4xbf16>
      %561 = vector.shape_cast %560 : vector<1x1x1x4x4xbf16> to vector<4x4xbf16>
      %cst_568 = arith.constant dense<0.000000e+00> : vector<64x4xf32>
      %562 = tpu.matmul %559, %561, %cst_568 {dimension_numbers = #tpu.dot_dimension_numbers<[1], [0], [0], [1], [0, 0, 1, 1], [], []>} : vector<64x4xbf16>, vector<4x4xbf16>, vector<64x4xf32> -> vector<64x4xf32>
      %563 = arith.addf %555, %562 : vector<64x4xf32>
      %564 = vector.extract_strided_slice %557 {offsets = [0, 1, 0], sizes = [8, 8, 4], strides = [1, 1, 1]} : vector<10x10x4xbf16> to vector<8x8x4xbf16>
      %565 = vector.shape_cast %564 : vector<8x8x4xbf16> to vector<64x4xbf16>
      %c0_569 = arith.constant 0 : index
      %c0_570 = arith.constant 0 : index
      %c1_571 = arith.constant 1 : index
      %c0_572 = arith.constant 0 : index
      %c0_573 = arith.constant 0 : index
      %566 = vector.load %arg3[%c0_569, %c0_570, %c1_571, %c0_572, %c0_573] : memref<3x3x3x4x4xbf16, #tpu.memory_space<vmem>>, vector<1x1x1x4x4xbf16>
      %567 = vector.shape_cast %566 : vector<1x1x1x4x4xbf16> to vector<4x4xbf16>
      %cst_574 = arith.constant dense<0.000000e+00> : vector<64x4xf32>
      %568 = tpu.matmul %565, %567, %cst_574 {dimension_numbers = #tpu.dot_dimension_numbers<[1], [0], [0], [1], [0, 0, 1, 1], [], []>} : vector<64x4xbf16>, vector<4x4xbf16>, vector<64x4xf32> -> vector<64x4xf32>
      %569 = arith.addf %563, %568 : vector<64x4xf32>
      %570 = vector.extract_strided_slice %557 {offsets = [0, 2, 0], sizes = [8, 8, 4], strides = [1, 1, 1]} : vector<10x10x4xbf16> to vector<8x8x4xbf16>
      %571 = vector.shape_cast %570 : vector<8x8x4xbf16> to vector<64x4xbf16>
      %c0_575 = arith.constant 0 : index
      %c0_576 = arith.constant 0 : index
      %c2_577 = arith.constant 2 : index
      %c0_578 = arith.constant 0 : index
      %c0_579 = arith.constant 0 : index
      %572 = vector.load %arg3[%c0_575, %c0_576, %c2_577, %c0_578, %c0_579] : memref<3x3x3x4x4xbf16, #tpu.memory_space<vmem>>, vector<1x1x1x4x4xbf16>
      %573 = vector.shape_cast %572 : vector<1x1x1x4x4xbf16> to vector<4x4xbf16>
      %cst_580 = arith.constant dense<0.000000e+00> : vector<64x4xf32>
      %574 = tpu.matmul %571, %573, %cst_580 {dimension_numbers = #tpu.dot_dimension_numbers<[1], [0], [0], [1], [0, 0, 1, 1], [], []>} : vector<64x4xbf16>, vector<4x4xbf16>, vector<64x4xf32> -> vector<64x4xf32>
      %575 = arith.addf %569, %574 : vector<64x4xf32>
      %576 = vector.extract_strided_slice %557 {offsets = [1, 0, 0], sizes = [8, 8, 4], strides = [1, 1, 1]} : vector<10x10x4xbf16> to vector<8x8x4xbf16>
      %577 = vector.shape_cast %576 : vector<8x8x4xbf16> to vector<64x4xbf16>
      %c0_581 = arith.constant 0 : index
      %c1_582 = arith.constant 1 : index
      %c0_583 = arith.constant 0 : index
      %c0_584 = arith.constant 0 : index
      %c0_585 = arith.constant 0 : index
      %578 = vector.load %arg3[%c0_581, %c1_582, %c0_583, %c0_584, %c0_585] : memref<3x3x3x4x4xbf16, #tpu.memory_space<vmem>>, vector<1x1x1x4x4xbf16>
      %579 = vector.shape_cast %578 : vector<1x1x1x4x4xbf16> to vector<4x4xbf16>
      %cst_586 = arith.constant dense<0.000000e+00> : vector<64x4xf32>
      %580 = tpu.matmul %577, %579, %cst_586 {dimension_numbers = #tpu.dot_dimension_numbers<[1], [0], [0], [1], [0, 0, 1, 1], [], []>} : vector<64x4xbf16>, vector<4x4xbf16>, vector<64x4xf32> -> vector<64x4xf32>
      %581 = arith.addf %575, %580 : vector<64x4xf32>
      %582 = vector.extract_strided_slice %557 {offsets = [1, 1, 0], sizes = [8, 8, 4], strides = [1, 1, 1]} : vector<10x10x4xbf16> to vector<8x8x4xbf16>
      %583 = vector.shape_cast %582 : vector<8x8x4xbf16> to vector<64x4xbf16>
      %c0_587 = arith.constant 0 : index
      %c1_588 = arith.constant 1 : index
      %c1_589 = arith.constant 1 : index
      %c0_590 = arith.constant 0 : index
      %c0_591 = arith.constant 0 : index
      %584 = vector.load %arg3[%c0_587, %c1_588, %c1_589, %c0_590, %c0_591] : memref<3x3x3x4x4xbf16, #tpu.memory_space<vmem>>, vector<1x1x1x4x4xbf16>
      %585 = vector.shape_cast %584 : vector<1x1x1x4x4xbf16> to vector<4x4xbf16>
      %cst_592 = arith.constant dense<0.000000e+00> : vector<64x4xf32>
      %586 = tpu.matmul %583, %585, %cst_592 {dimension_numbers = #tpu.dot_dimension_numbers<[1], [0], [0], [1], [0, 0, 1, 1], [], []>} : vector<64x4xbf16>, vector<4x4xbf16>, vector<64x4xf32> -> vector<64x4xf32>
      %587 = arith.addf %581, %586 : vector<64x4xf32>
      %588 = vector.extract_strided_slice %557 {offsets = [1, 2, 0], sizes = [8, 8, 4], strides = [1, 1, 1]} : vector<10x10x4xbf16> to vector<8x8x4xbf16>
      %589 = vector.shape_cast %588 : vector<8x8x4xbf16> to vector<64x4xbf16>
      %c0_593 = arith.constant 0 : index
      %c1_594 = arith.constant 1 : index
      %c2_595 = arith.constant 2 : index
      %c0_596 = arith.constant 0 : index
      %c0_597 = arith.constant 0 : index
      %590 = vector.load %arg3[%c0_593, %c1_594, %c2_595, %c0_596, %c0_597] : memref<3x3x3x4x4xbf16, #tpu.memory_space<vmem>>, vector<1x1x1x4x4xbf16>
      %591 = vector.shape_cast %590 : vector<1x1x1x4x4xbf16> to vector<4x4xbf16>
      %cst_598 = arith.constant dense<0.000000e+00> : vector<64x4xf32>
      %592 = tpu.matmul %589, %591, %cst_598 {dimension_numbers = #tpu.dot_dimension_numbers<[1], [0], [0], [1], [0, 0, 1, 1], [], []>} : vector<64x4xbf16>, vector<4x4xbf16>, vector<64x4xf32> -> vector<64x4xf32>
      %593 = arith.addf %587, %592 : vector<64x4xf32>
      %594 = vector.extract_strided_slice %557 {offsets = [2, 0, 0], sizes = [8, 8, 4], strides = [1, 1, 1]} : vector<10x10x4xbf16> to vector<8x8x4xbf16>
      %595 = vector.shape_cast %594 : vector<8x8x4xbf16> to vector<64x4xbf16>
      %c0_599 = arith.constant 0 : index
      %c2_600 = arith.constant 2 : index
      %c0_601 = arith.constant 0 : index
      %c0_602 = arith.constant 0 : index
      %c0_603 = arith.constant 0 : index
      %596 = vector.load %arg3[%c0_599, %c2_600, %c0_601, %c0_602, %c0_603] : memref<3x3x3x4x4xbf16, #tpu.memory_space<vmem>>, vector<1x1x1x4x4xbf16>
      %597 = vector.shape_cast %596 : vector<1x1x1x4x4xbf16> to vector<4x4xbf16>
      %cst_604 = arith.constant dense<0.000000e+00> : vector<64x4xf32>
      %598 = tpu.matmul %595, %597, %cst_604 {dimension_numbers = #tpu.dot_dimension_numbers<[1], [0], [0], [1], [0, 0, 1, 1], [], []>} : vector<64x4xbf16>, vector<4x4xbf16>, vector<64x4xf32> -> vector<64x4xf32>
      %599 = arith.addf %593, %598 : vector<64x4xf32>
      %600 = vector.extract_strided_slice %557 {offsets = [2, 1, 0], sizes = [8, 8, 4], strides = [1, 1, 1]} : vector<10x10x4xbf16> to vector<8x8x4xbf16>
      %601 = vector.shape_cast %600 : vector<8x8x4xbf16> to vector<64x4xbf16>
      %c0_605 = arith.constant 0 : index
      %c2_606 = arith.constant 2 : index
      %c1_607 = arith.constant 1 : index
      %c0_608 = arith.constant 0 : index
      %c0_609 = arith.constant 0 : index
      %602 = vector.load %arg3[%c0_605, %c2_606, %c1_607, %c0_608, %c0_609] : memref<3x3x3x4x4xbf16, #tpu.memory_space<vmem>>, vector<1x1x1x4x4xbf16>
      %603 = vector.shape_cast %602 : vector<1x1x1x4x4xbf16> to vector<4x4xbf16>
      %cst_610 = arith.constant dense<0.000000e+00> : vector<64x4xf32>
      %604 = tpu.matmul %601, %603, %cst_610 {dimension_numbers = #tpu.dot_dimension_numbers<[1], [0], [0], [1], [0, 0, 1, 1], [], []>} : vector<64x4xbf16>, vector<4x4xbf16>, vector<64x4xf32> -> vector<64x4xf32>
      %605 = arith.addf %599, %604 : vector<64x4xf32>
      %606 = vector.extract_strided_slice %557 {offsets = [2, 2, 0], sizes = [8, 8, 4], strides = [1, 1, 1]} : vector<10x10x4xbf16> to vector<8x8x4xbf16>
      %607 = vector.shape_cast %606 : vector<8x8x4xbf16> to vector<64x4xbf16>
      %c0_611 = arith.constant 0 : index
      %c2_612 = arith.constant 2 : index
      %c2_613 = arith.constant 2 : index
      %c0_614 = arith.constant 0 : index
      %c0_615 = arith.constant 0 : index
      %608 = vector.load %arg3[%c0_611, %c2_612, %c2_613, %c0_614, %c0_615] : memref<3x3x3x4x4xbf16, #tpu.memory_space<vmem>>, vector<1x1x1x4x4xbf16>
      %609 = vector.shape_cast %608 : vector<1x1x1x4x4xbf16> to vector<4x4xbf16>
      %cst_616 = arith.constant dense<0.000000e+00> : vector<64x4xf32>
      %610 = tpu.matmul %607, %609, %cst_616 {dimension_numbers = #tpu.dot_dimension_numbers<[1], [0], [0], [1], [0, 0, 1, 1], [], []>} : vector<64x4xbf16>, vector<4x4xbf16>, vector<64x4xf32> -> vector<64x4xf32>
      %611 = arith.addf %605, %610 : vector<64x4xf32>
      %c0_617 = arith.constant 0 : index
      %c3_618 = arith.constant 3 : index
      %c0_619 = arith.constant 0 : index
      %c0_620 = arith.constant 0 : index
      %c0_621 = arith.constant 0 : index
      %612 = vector.load %arg2[%c0_617, %c3_618, %c0_619, %c0_620, %c0_621] : memref<1x6x10x10x4xbf16, #tpu.memory_space<vmem>>, vector<1x1x10x10x4xbf16>
      %613 = vector.shape_cast %612 : vector<1x1x10x10x4xbf16> to vector<10x10x4xbf16>
      %614 = vector.extract_strided_slice %613 {offsets = [0, 0, 0], sizes = [8, 8, 4], strides = [1, 1, 1]} : vector<10x10x4xbf16> to vector<8x8x4xbf16>
      %615 = vector.shape_cast %614 : vector<8x8x4xbf16> to vector<64x4xbf16>
      %c1_622 = arith.constant 1 : index
      %c0_623 = arith.constant 0 : index
      %c0_624 = arith.constant 0 : index
      %c0_625 = arith.constant 0 : index
      %c0_626 = arith.constant 0 : index
      %616 = vector.load %arg3[%c1_622, %c0_623, %c0_624, %c0_625, %c0_626] : memref<3x3x3x4x4xbf16, #tpu.memory_space<vmem>>, vector<1x1x1x4x4xbf16>
      %617 = vector.shape_cast %616 : vector<1x1x1x4x4xbf16> to vector<4x4xbf16>
      %cst_627 = arith.constant dense<0.000000e+00> : vector<64x4xf32>
      %618 = tpu.matmul %615, %617, %cst_627 {dimension_numbers = #tpu.dot_dimension_numbers<[1], [0], [0], [1], [0, 0, 1, 1], [], []>} : vector<64x4xbf16>, vector<4x4xbf16>, vector<64x4xf32> -> vector<64x4xf32>
      %619 = arith.addf %611, %618 : vector<64x4xf32>
      %620 = vector.extract_strided_slice %613 {offsets = [0, 1, 0], sizes = [8, 8, 4], strides = [1, 1, 1]} : vector<10x10x4xbf16> to vector<8x8x4xbf16>
      %621 = vector.shape_cast %620 : vector<8x8x4xbf16> to vector<64x4xbf16>
      %c1_628 = arith.constant 1 : index
      %c0_629 = arith.constant 0 : index
      %c1_630 = arith.constant 1 : index
      %c0_631 = arith.constant 0 : index
      %c0_632 = arith.constant 0 : index
      %622 = vector.load %arg3[%c1_628, %c0_629, %c1_630, %c0_631, %c0_632] : memref<3x3x3x4x4xbf16, #tpu.memory_space<vmem>>, vector<1x1x1x4x4xbf16>
      %623 = vector.shape_cast %622 : vector<1x1x1x4x4xbf16> to vector<4x4xbf16>
      %cst_633 = arith.constant dense<0.000000e+00> : vector<64x4xf32>
      %624 = tpu.matmul %621, %623, %cst_633 {dimension_numbers = #tpu.dot_dimension_numbers<[1], [0], [0], [1], [0, 0, 1, 1], [], []>} : vector<64x4xbf16>, vector<4x4xbf16>, vector<64x4xf32> -> vector<64x4xf32>
      %625 = arith.addf %619, %624 : vector<64x4xf32>
      %626 = vector.extract_strided_slice %613 {offsets = [0, 2, 0], sizes = [8, 8, 4], strides = [1, 1, 1]} : vector<10x10x4xbf16> to vector<8x8x4xbf16>
      %627 = vector.shape_cast %626 : vector<8x8x4xbf16> to vector<64x4xbf16>
      %c1_634 = arith.constant 1 : index
      %c0_635 = arith.constant 0 : index
      %c2_636 = arith.constant 2 : index
      %c0_637 = arith.constant 0 : index
      %c0_638 = arith.constant 0 : index
      %628 = vector.load %arg3[%c1_634, %c0_635, %c2_636, %c0_637, %c0_638] : memref<3x3x3x4x4xbf16, #tpu.memory_space<vmem>>, vector<1x1x1x4x4xbf16>
      %629 = vector.shape_cast %628 : vector<1x1x1x4x4xbf16> to vector<4x4xbf16>
      %cst_639 = arith.constant dense<0.000000e+00> : vector<64x4xf32>
      %630 = tpu.matmul %627, %629, %cst_639 {dimension_numbers = #tpu.dot_dimension_numbers<[1], [0], [0], [1], [0, 0, 1, 1], [], []>} : vector<64x4xbf16>, vector<4x4xbf16>, vector<64x4xf32> -> vector<64x4xf32>
      %631 = arith.addf %625, %630 : vector<64x4xf32>
      %632 = vector.extract_strided_slice %613 {offsets = [1, 0, 0], sizes = [8, 8, 4], strides = [1, 1, 1]} : vector<10x10x4xbf16> to vector<8x8x4xbf16>
      %633 = vector.shape_cast %632 : vector<8x8x4xbf16> to vector<64x4xbf16>
      %c1_640 = arith.constant 1 : index
      %c1_641 = arith.constant 1 : index
      %c0_642 = arith.constant 0 : index
      %c0_643 = arith.constant 0 : index
      %c0_644 = arith.constant 0 : index
      %634 = vector.load %arg3[%c1_640, %c1_641, %c0_642, %c0_643, %c0_644] : memref<3x3x3x4x4xbf16, #tpu.memory_space<vmem>>, vector<1x1x1x4x4xbf16>
      %635 = vector.shape_cast %634 : vector<1x1x1x4x4xbf16> to vector<4x4xbf16>
      %cst_645 = arith.constant dense<0.000000e+00> : vector<64x4xf32>
      %636 = tpu.matmul %633, %635, %cst_645 {dimension_numbers = #tpu.dot_dimension_numbers<[1], [0], [0], [1], [0, 0, 1, 1], [], []>} : vector<64x4xbf16>, vector<4x4xbf16>, vector<64x4xf32> -> vector<64x4xf32>
      %637 = arith.addf %631, %636 : vector<64x4xf32>
      %638 = vector.extract_strided_slice %613 {offsets = [1, 1, 0], sizes = [8, 8, 4], strides = [1, 1, 1]} : vector<10x10x4xbf16> to vector<8x8x4xbf16>
      %639 = vector.shape_cast %638 : vector<8x8x4xbf16> to vector<64x4xbf16>
      %c1_646 = arith.constant 1 : index
      %c1_647 = arith.constant 1 : index
      %c1_648 = arith.constant 1 : index
      %c0_649 = arith.constant 0 : index
      %c0_650 = arith.constant 0 : index
      %640 = vector.load %arg3[%c1_646, %c1_647, %c1_648, %c0_649, %c0_650] : memref<3x3x3x4x4xbf16, #tpu.memory_space<vmem>>, vector<1x1x1x4x4xbf16>
      %641 = vector.shape_cast %640 : vector<1x1x1x4x4xbf16> to vector<4x4xbf16>
      %cst_651 = arith.constant dense<0.000000e+00> : vector<64x4xf32>
      %642 = tpu.matmul %639, %641, %cst_651 {dimension_numbers = #tpu.dot_dimension_numbers<[1], [0], [0], [1], [0, 0, 1, 1], [], []>} : vector<64x4xbf16>, vector<4x4xbf16>, vector<64x4xf32> -> vector<64x4xf32>
      %643 = arith.addf %637, %642 : vector<64x4xf32>
      %644 = vector.extract_strided_slice %613 {offsets = [1, 2, 0], sizes = [8, 8, 4], strides = [1, 1, 1]} : vector<10x10x4xbf16> to vector<8x8x4xbf16>
      %645 = vector.shape_cast %644 : vector<8x8x4xbf16> to vector<64x4xbf16>
      %c1_652 = arith.constant 1 : index
      %c1_653 = arith.constant 1 : index
      %c2_654 = arith.constant 2 : index
      %c0_655 = arith.constant 0 : index
      %c0_656 = arith.constant 0 : index
      %646 = vector.load %arg3[%c1_652, %c1_653, %c2_654, %c0_655, %c0_656] : memref<3x3x3x4x4xbf16, #tpu.memory_space<vmem>>, vector<1x1x1x4x4xbf16>
      %647 = vector.shape_cast %646 : vector<1x1x1x4x4xbf16> to vector<4x4xbf16>
      %cst_657 = arith.constant dense<0.000000e+00> : vector<64x4xf32>
      %648 = tpu.matmul %645, %647, %cst_657 {dimension_numbers = #tpu.dot_dimension_numbers<[1], [0], [0], [1], [0, 0, 1, 1], [], []>} : vector<64x4xbf16>, vector<4x4xbf16>, vector<64x4xf32> -> vector<64x4xf32>
      %649 = arith.addf %643, %648 : vector<64x4xf32>
      %650 = vector.extract_strided_slice %613 {offsets = [2, 0, 0], sizes = [8, 8, 4], strides = [1, 1, 1]} : vector<10x10x4xbf16> to vector<8x8x4xbf16>
      %651 = vector.shape_cast %650 : vector<8x8x4xbf16> to vector<64x4xbf16>
      %c1_658 = arith.constant 1 : index
      %c2_659 = arith.constant 2 : index
      %c0_660 = arith.constant 0 : index
      %c0_661 = arith.constant 0 : index
      %c0_662 = arith.constant 0 : index
      %652 = vector.load %arg3[%c1_658, %c2_659, %c0_660, %c0_661, %c0_662] : memref<3x3x3x4x4xbf16, #tpu.memory_space<vmem>>, vector<1x1x1x4x4xbf16>
      %653 = vector.shape_cast %652 : vector<1x1x1x4x4xbf16> to vector<4x4xbf16>
      %cst_663 = arith.constant dense<0.000000e+00> : vector<64x4xf32>
      %654 = tpu.matmul %651, %653, %cst_663 {dimension_numbers = #tpu.dot_dimension_numbers<[1], [0], [0], [1], [0, 0, 1, 1], [], []>} : vector<64x4xbf16>, vector<4x4xbf16>, vector<64x4xf32> -> vector<64x4xf32>
      %655 = arith.addf %649, %654 : vector<64x4xf32>
      %656 = vector.extract_strided_slice %613 {offsets = [2, 1, 0], sizes = [8, 8, 4], strides = [1, 1, 1]} : vector<10x10x4xbf16> to vector<8x8x4xbf16>
      %657 = vector.shape_cast %656 : vector<8x8x4xbf16> to vector<64x4xbf16>
      %c1_664 = arith.constant 1 : index
      %c2_665 = arith.constant 2 : index
      %c1_666 = arith.constant 1 : index
      %c0_667 = arith.constant 0 : index
      %c0_668 = arith.constant 0 : index
      %658 = vector.load %arg3[%c1_664, %c2_665, %c1_666, %c0_667, %c0_668] : memref<3x3x3x4x4xbf16, #tpu.memory_space<vmem>>, vector<1x1x1x4x4xbf16>
      %659 = vector.shape_cast %658 : vector<1x1x1x4x4xbf16> to vector<4x4xbf16>
      %cst_669 = arith.constant dense<0.000000e+00> : vector<64x4xf32>
      %660 = tpu.matmul %657, %659, %cst_669 {dimension_numbers = #tpu.dot_dimension_numbers<[1], [0], [0], [1], [0, 0, 1, 1], [], []>} : vector<64x4xbf16>, vector<4x4xbf16>, vector<64x4xf32> -> vector<64x4xf32>
      %661 = arith.addf %655, %660 : vector<64x4xf32>
      %662 = vector.extract_strided_slice %613 {offsets = [2, 2, 0], sizes = [8, 8, 4], strides = [1, 1, 1]} : vector<10x10x4xbf16> to vector<8x8x4xbf16>
      %663 = vector.shape_cast %662 : vector<8x8x4xbf16> to vector<64x4xbf16>
      %c1_670 = arith.constant 1 : index
      %c2_671 = arith.constant 2 : index
      %c2_672 = arith.constant 2 : index
      %c0_673 = arith.constant 0 : index
      %c0_674 = arith.constant 0 : index
      %664 = vector.load %arg3[%c1_670, %c2_671, %c2_672, %c0_673, %c0_674] : memref<3x3x3x4x4xbf16, #tpu.memory_space<vmem>>, vector<1x1x1x4x4xbf16>
      %665 = vector.shape_cast %664 : vector<1x1x1x4x4xbf16> to vector<4x4xbf16>
      %cst_675 = arith.constant dense<0.000000e+00> : vector<64x4xf32>
      %666 = tpu.matmul %663, %665, %cst_675 {dimension_numbers = #tpu.dot_dimension_numbers<[1], [0], [0], [1], [0, 0, 1, 1], [], []>} : vector<64x4xbf16>, vector<4x4xbf16>, vector<64x4xf32> -> vector<64x4xf32>
      %667 = arith.addf %661, %666 : vector<64x4xf32>
      %c0_676 = arith.constant 0 : index
      %c4 = arith.constant 4 : index
      %c0_677 = arith.constant 0 : index
      %c0_678 = arith.constant 0 : index
      %c0_679 = arith.constant 0 : index
      %668 = vector.load %arg2[%c0_676, %c4, %c0_677, %c0_678, %c0_679] : memref<1x6x10x10x4xbf16, #tpu.memory_space<vmem>>, vector<1x1x10x10x4xbf16>
      %669 = vector.shape_cast %668 : vector<1x1x10x10x4xbf16> to vector<10x10x4xbf16>
      %670 = vector.extract_strided_slice %669 {offsets = [0, 0, 0], sizes = [8, 8, 4], strides = [1, 1, 1]} : vector<10x10x4xbf16> to vector<8x8x4xbf16>
      %671 = vector.shape_cast %670 : vector<8x8x4xbf16> to vector<64x4xbf16>
      %c2_680 = arith.constant 2 : index
      %c0_681 = arith.constant 0 : index
      %c0_682 = arith.constant 0 : index
      %c0_683 = arith.constant 0 : index
      %c0_684 = arith.constant 0 : index
      %672 = vector.load %arg3[%c2_680, %c0_681, %c0_682, %c0_683, %c0_684] : memref<3x3x3x4x4xbf16, #tpu.memory_space<vmem>>, vector<1x1x1x4x4xbf16>
      %673 = vector.shape_cast %672 : vector<1x1x1x4x4xbf16> to vector<4x4xbf16>
      %cst_685 = arith.constant dense<0.000000e+00> : vector<64x4xf32>
      %674 = tpu.matmul %671, %673, %cst_685 {dimension_numbers = #tpu.dot_dimension_numbers<[1], [0], [0], [1], [0, 0, 1, 1], [], []>} : vector<64x4xbf16>, vector<4x4xbf16>, vector<64x4xf32> -> vector<64x4xf32>
      %675 = arith.addf %667, %674 : vector<64x4xf32>
      %676 = vector.extract_strided_slice %669 {offsets = [0, 1, 0], sizes = [8, 8, 4], strides = [1, 1, 1]} : vector<10x10x4xbf16> to vector<8x8x4xbf16>
      %677 = vector.shape_cast %676 : vector<8x8x4xbf16> to vector<64x4xbf16>
      %c2_686 = arith.constant 2 : index
      %c0_687 = arith.constant 0 : index
      %c1_688 = arith.constant 1 : index
      %c0_689 = arith.constant 0 : index
      %c0_690 = arith.constant 0 : index
      %678 = vector.load %arg3[%c2_686, %c0_687, %c1_688, %c0_689, %c0_690] : memref<3x3x3x4x4xbf16, #tpu.memory_space<vmem>>, vector<1x1x1x4x4xbf16>
      %679 = vector.shape_cast %678 : vector<1x1x1x4x4xbf16> to vector<4x4xbf16>
      %cst_691 = arith.constant dense<0.000000e+00> : vector<64x4xf32>
      %680 = tpu.matmul %677, %679, %cst_691 {dimension_numbers = #tpu.dot_dimension_numbers<[1], [0], [0], [1], [0, 0, 1, 1], [], []>} : vector<64x4xbf16>, vector<4x4xbf16>, vector<64x4xf32> -> vector<64x4xf32>
      %681 = arith.addf %675, %680 : vector<64x4xf32>
      %682 = vector.extract_strided_slice %669 {offsets = [0, 2, 0], sizes = [8, 8, 4], strides = [1, 1, 1]} : vector<10x10x4xbf16> to vector<8x8x4xbf16>
      %683 = vector.shape_cast %682 : vector<8x8x4xbf16> to vector<64x4xbf16>
      %c2_692 = arith.constant 2 : index
      %c0_693 = arith.constant 0 : index
      %c2_694 = arith.constant 2 : index
      %c0_695 = arith.constant 0 : index
      %c0_696 = arith.constant 0 : index
      %684 = vector.load %arg3[%c2_692, %c0_693, %c2_694, %c0_695, %c0_696] : memref<3x3x3x4x4xbf16, #tpu.memory_space<vmem>>, vector<1x1x1x4x4xbf16>
      %685 = vector.shape_cast %684 : vector<1x1x1x4x4xbf16> to vector<4x4xbf16>
      %cst_697 = arith.constant dense<0.000000e+00> : vector<64x4xf32>
      %686 = tpu.matmul %683, %685, %cst_697 {dimension_numbers = #tpu.dot_dimension_numbers<[1], [0], [0], [1], [0, 0, 1, 1], [], []>} : vector<64x4xbf16>, vector<4x4xbf16>, vector<64x4xf32> -> vector<64x4xf32>
      %687 = arith.addf %681, %686 : vector<64x4xf32>
      %688 = vector.extract_strided_slice %669 {offsets = [1, 0, 0], sizes = [8, 8, 4], strides = [1, 1, 1]} : vector<10x10x4xbf16> to vector<8x8x4xbf16>
      %689 = vector.shape_cast %688 : vector<8x8x4xbf16> to vector<64x4xbf16>
      %c2_698 = arith.constant 2 : index
      %c1_699 = arith.constant 1 : index
      %c0_700 = arith.constant 0 : index
      %c0_701 = arith.constant 0 : index
      %c0_702 = arith.constant 0 : index
      %690 = vector.load %arg3[%c2_698, %c1_699, %c0_700, %c0_701, %c0_702] : memref<3x3x3x4x4xbf16, #tpu.memory_space<vmem>>, vector<1x1x1x4x4xbf16>
      %691 = vector.shape_cast %690 : vector<1x1x1x4x4xbf16> to vector<4x4xbf16>
      %cst_703 = arith.constant dense<0.000000e+00> : vector<64x4xf32>
      %692 = tpu.matmul %689, %691, %cst_703 {dimension_numbers = #tpu.dot_dimension_numbers<[1], [0], [0], [1], [0, 0, 1, 1], [], []>} : vector<64x4xbf16>, vector<4x4xbf16>, vector<64x4xf32> -> vector<64x4xf32>
      %693 = arith.addf %687, %692 : vector<64x4xf32>
      %694 = vector.extract_strided_slice %669 {offsets = [1, 1, 0], sizes = [8, 8, 4], strides = [1, 1, 1]} : vector<10x10x4xbf16> to vector<8x8x4xbf16>
      %695 = vector.shape_cast %694 : vector<8x8x4xbf16> to vector<64x4xbf16>
      %c2_704 = arith.constant 2 : index
      %c1_705 = arith.constant 1 : index
      %c1_706 = arith.constant 1 : index
      %c0_707 = arith.constant 0 : index
      %c0_708 = arith.constant 0 : index
      %696 = vector.load %arg3[%c2_704, %c1_705, %c1_706, %c0_707, %c0_708] : memref<3x3x3x4x4xbf16, #tpu.memory_space<vmem>>, vector<1x1x1x4x4xbf16>
      %697 = vector.shape_cast %696 : vector<1x1x1x4x4xbf16> to vector<4x4xbf16>
      %cst_709 = arith.constant dense<0.000000e+00> : vector<64x4xf32>
      %698 = tpu.matmul %695, %697, %cst_709 {dimension_numbers = #tpu.dot_dimension_numbers<[1], [0], [0], [1], [0, 0, 1, 1], [], []>} : vector<64x4xbf16>, vector<4x4xbf16>, vector<64x4xf32> -> vector<64x4xf32>
      %699 = arith.addf %693, %698 : vector<64x4xf32>
      %700 = vector.extract_strided_slice %669 {offsets = [1, 2, 0], sizes = [8, 8, 4], strides = [1, 1, 1]} : vector<10x10x4xbf16> to vector<8x8x4xbf16>
      %701 = vector.shape_cast %700 : vector<8x8x4xbf16> to vector<64x4xbf16>
      %c2_710 = arith.constant 2 : index
      %c1_711 = arith.constant 1 : index
      %c2_712 = arith.constant 2 : index
      %c0_713 = arith.constant 0 : index
      %c0_714 = arith.constant 0 : index
      %702 = vector.load %arg3[%c2_710, %c1_711, %c2_712, %c0_713, %c0_714] : memref<3x3x3x4x4xbf16, #tpu.memory_space<vmem>>, vector<1x1x1x4x4xbf16>
      %703 = vector.shape_cast %702 : vector<1x1x1x4x4xbf16> to vector<4x4xbf16>
      %cst_715 = arith.constant dense<0.000000e+00> : vector<64x4xf32>
      %704 = tpu.matmul %701, %703, %cst_715 {dimension_numbers = #tpu.dot_dimension_numbers<[1], [0], [0], [1], [0, 0, 1, 1], [], []>} : vector<64x4xbf16>, vector<4x4xbf16>, vector<64x4xf32> -> vector<64x4xf32>
      %705 = arith.addf %699, %704 : vector<64x4xf32>
      %706 = vector.extract_strided_slice %669 {offsets = [2, 0, 0], sizes = [8, 8, 4], strides = [1, 1, 1]} : vector<10x10x4xbf16> to vector<8x8x4xbf16>
      %707 = vector.shape_cast %706 : vector<8x8x4xbf16> to vector<64x4xbf16>
      %c2_716 = arith.constant 2 : index
      %c2_717 = arith.constant 2 : index
      %c0_718 = arith.constant 0 : index
      %c0_719 = arith.constant 0 : index
      %c0_720 = arith.constant 0 : index
      %708 = vector.load %arg3[%c2_716, %c2_717, %c0_718, %c0_719, %c0_720] : memref<3x3x3x4x4xbf16, #tpu.memory_space<vmem>>, vector<1x1x1x4x4xbf16>
      %709 = vector.shape_cast %708 : vector<1x1x1x4x4xbf16> to vector<4x4xbf16>
      %cst_721 = arith.constant dense<0.000000e+00> : vector<64x4xf32>
      %710 = tpu.matmul %707, %709, %cst_721 {dimension_numbers = #tpu.dot_dimension_numbers<[1], [0], [0], [1], [0, 0, 1, 1], [], []>} : vector<64x4xbf16>, vector<4x4xbf16>, vector<64x4xf32> -> vector<64x4xf32>
      %711 = arith.addf %705, %710 : vector<64x4xf32>
      %712 = vector.extract_strided_slice %669 {offsets = [2, 1, 0], sizes = [8, 8, 4], strides = [1, 1, 1]} : vector<10x10x4xbf16> to vector<8x8x4xbf16>
      %713 = vector.shape_cast %712 : vector<8x8x4xbf16> to vector<64x4xbf16>
      %c2_722 = arith.constant 2 : index
      %c2_723 = arith.constant 2 : index
      %c1_724 = arith.constant 1 : index
      %c0_725 = arith.constant 0 : index
      %c0_726 = arith.constant 0 : index
      %714 = vector.load %arg3[%c2_722, %c2_723, %c1_724, %c0_725, %c0_726] : memref<3x3x3x4x4xbf16, #tpu.memory_space<vmem>>, vector<1x1x1x4x4xbf16>
      %715 = vector.shape_cast %714 : vector<1x1x1x4x4xbf16> to vector<4x4xbf16>
      %cst_727 = arith.constant dense<0.000000e+00> : vector<64x4xf32>
      %716 = tpu.matmul %713, %715, %cst_727 {dimension_numbers = #tpu.dot_dimension_numbers<[1], [0], [0], [1], [0, 0, 1, 1], [], []>} : vector<64x4xbf16>, vector<4x4xbf16>, vector<64x4xf32> -> vector<64x4xf32>
      %717 = arith.addf %711, %716 : vector<64x4xf32>
      %718 = vector.extract_strided_slice %669 {offsets = [2, 2, 0], sizes = [8, 8, 4], strides = [1, 1, 1]} : vector<10x10x4xbf16> to vector<8x8x4xbf16>
      %719 = vector.shape_cast %718 : vector<8x8x4xbf16> to vector<64x4xbf16>
      %c2_728 = arith.constant 2 : index
      %c2_729 = arith.constant 2 : index
      %c2_730 = arith.constant 2 : index
      %c0_731 = arith.constant 0 : index
      %c0_732 = arith.constant 0 : index
      %720 = vector.load %arg3[%c2_728, %c2_729, %c2_730, %c0_731, %c0_732] : memref<3x3x3x4x4xbf16, #tpu.memory_space<vmem>>, vector<1x1x1x4x4xbf16>
      %721 = vector.shape_cast %720 : vector<1x1x1x4x4xbf16> to vector<4x4xbf16>
      %cst_733 = arith.constant dense<0.000000e+00> : vector<64x4xf32>
      %722 = tpu.matmul %719, %721, %cst_733 {dimension_numbers = #tpu.dot_dimension_numbers<[1], [0], [0], [1], [0, 0, 1, 1], [], []>} : vector<64x4xbf16>, vector<4x4xbf16>, vector<64x4xf32> -> vector<64x4xf32>
      %723 = arith.addf %717, %722 : vector<64x4xf32>
      %c0_734 = arith.constant 0 : index
      %c0_735 = arith.constant 0 : index
      %724 = vector.load %arg4[%c0_734, %c0_735] : memref<1x4xf32, #tpu.memory_space<vmem>>, vector<1x4xf32>
      %725 = vector.broadcast %724 : vector<1x4xf32> to vector<64x4xf32>
      %726 = arith.addf %723, %725 : vector<64x4xf32>
      %cst_736 = arith.constant 0.000000e+00 : f32
      %727 = vector.broadcast %cst_736 : f32 to vector<64x4xf32>
      %728 = arith.maximumf %726, %727 : vector<64x4xf32>
      %729 = vector.shape_cast %728 : vector<64x4xf32> to vector<8x8x4xf32>
      %730 = arith.truncf %729 : vector<8x8x4xf32> to vector<8x8x4xbf16>
      %c3_737 = arith.constant 3 : index
      %c1_738 = arith.constant 1 : index
      %c1_739 = arith.constant 1 : index
      %c0_740 = arith.constant 0 : index
      %731 = vector.load %arg8[%c3_737, %c1_738, %c1_739, %c0_740] : memref<6x10x10x4xbf16, #tpu.memory_space<vmem>>, vector<1x8x8x4xbf16>
      %732 = vector.shape_cast %731 : vector<1x8x8x4xbf16> to vector<8x8x4xbf16>
      %733 = vector.shape_cast %730 : vector<8x8x4xbf16> to vector<1x8x8x4xbf16>
      tpu.vector_store %arg8[%c3_737, %c1_738, %c1_739, %c0_740], %733 {strides = array<i32>} : memref<6x10x10x4xbf16, #tpu.memory_space<vmem>>, vector<1x8x8x4xbf16>,
      %cst_741 = arith.constant 0.000000e+00 : f32
      %734 = vector.broadcast %cst_741 : f32 to vector<64x4xf32>
      %c0_742 = arith.constant 0 : index
      %c3_743 = arith.constant 3 : index
      %c0_744 = arith.constant 0 : index
      %c0_745 = arith.constant 0 : index
      %c0_746 = arith.constant 0 : index
      %735 = vector.load %arg2[%c0_742, %c3_743, %c0_744, %c0_745, %c0_746] : memref<1x6x10x10x4xbf16, #tpu.memory_space<vmem>>, vector<1x1x10x10x4xbf16>
      %736 = vector.shape_cast %735 : vector<1x1x10x10x4xbf16> to vector<10x10x4xbf16>
      %737 = vector.extract_strided_slice %736 {offsets = [0, 0, 0], sizes = [8, 8, 4], strides = [1, 1, 1]} : vector<10x10x4xbf16> to vector<8x8x4xbf16>
      %738 = vector.shape_cast %737 : vector<8x8x4xbf16> to vector<64x4xbf16>
      %c0_747 = arith.constant 0 : index
      %c0_748 = arith.constant 0 : index
      %c0_749 = arith.constant 0 : index
      %c0_750 = arith.constant 0 : index
      %c0_751 = arith.constant 0 : index
      %739 = vector.load %arg3[%c0_747, %c0_748, %c0_749, %c0_750, %c0_751] : memref<3x3x3x4x4xbf16, #tpu.memory_space<vmem>>, vector<1x1x1x4x4xbf16>
      %740 = vector.shape_cast %739 : vector<1x1x1x4x4xbf16> to vector<4x4xbf16>
      %cst_752 = arith.constant dense<0.000000e+00> : vector<64x4xf32>
      %741 = tpu.matmul %738, %740, %cst_752 {dimension_numbers = #tpu.dot_dimension_numbers<[1], [0], [0], [1], [0, 0, 1, 1], [], []>} : vector<64x4xbf16>, vector<4x4xbf16>, vector<64x4xf32> -> vector<64x4xf32>
      %742 = arith.addf %734, %741 : vector<64x4xf32>
      %743 = vector.extract_strided_slice %736 {offsets = [0, 1, 0], sizes = [8, 8, 4], strides = [1, 1, 1]} : vector<10x10x4xbf16> to vector<8x8x4xbf16>
      %744 = vector.shape_cast %743 : vector<8x8x4xbf16> to vector<64x4xbf16>
      %c0_753 = arith.constant 0 : index
      %c0_754 = arith.constant 0 : index
      %c1_755 = arith.constant 1 : index
      %c0_756 = arith.constant 0 : index
      %c0_757 = arith.constant 0 : index
      %745 = vector.load %arg3[%c0_753, %c0_754, %c1_755, %c0_756, %c0_757] : memref<3x3x3x4x4xbf16, #tpu.memory_space<vmem>>, vector<1x1x1x4x4xbf16>
      %746 = vector.shape_cast %745 : vector<1x1x1x4x4xbf16> to vector<4x4xbf16>
      %cst_758 = arith.constant dense<0.000000e+00> : vector<64x4xf32>
      %747 = tpu.matmul %744, %746, %cst_758 {dimension_numbers = #tpu.dot_dimension_numbers<[1], [0], [0], [1], [0, 0, 1, 1], [], []>} : vector<64x4xbf16>, vector<4x4xbf16>, vector<64x4xf32> -> vector<64x4xf32>
      %748 = arith.addf %742, %747 : vector<64x4xf32>
      %749 = vector.extract_strided_slice %736 {offsets = [0, 2, 0], sizes = [8, 8, 4], strides = [1, 1, 1]} : vector<10x10x4xbf16> to vector<8x8x4xbf16>
      %750 = vector.shape_cast %749 : vector<8x8x4xbf16> to vector<64x4xbf16>
      %c0_759 = arith.constant 0 : index
      %c0_760 = arith.constant 0 : index
      %c2_761 = arith.constant 2 : index
      %c0_762 = arith.constant 0 : index
      %c0_763 = arith.constant 0 : index
      %751 = vector.load %arg3[%c0_759, %c0_760, %c2_761, %c0_762, %c0_763] : memref<3x3x3x4x4xbf16, #tpu.memory_space<vmem>>, vector<1x1x1x4x4xbf16>
      %752 = vector.shape_cast %751 : vector<1x1x1x4x4xbf16> to vector<4x4xbf16>
      %cst_764 = arith.constant dense<0.000000e+00> : vector<64x4xf32>
      %753 = tpu.matmul %750, %752, %cst_764 {dimension_numbers = #tpu.dot_dimension_numbers<[1], [0], [0], [1], [0, 0, 1, 1], [], []>} : vector<64x4xbf16>, vector<4x4xbf16>, vector<64x4xf32> -> vector<64x4xf32>
      %754 = arith.addf %748, %753 : vector<64x4xf32>
      %755 = vector.extract_strided_slice %736 {offsets = [1, 0, 0], sizes = [8, 8, 4], strides = [1, 1, 1]} : vector<10x10x4xbf16> to vector<8x8x4xbf16>
      %756 = vector.shape_cast %755 : vector<8x8x4xbf16> to vector<64x4xbf16>
      %c0_765 = arith.constant 0 : index
      %c1_766 = arith.constant 1 : index
      %c0_767 = arith.constant 0 : index
      %c0_768 = arith.constant 0 : index
      %c0_769 = arith.constant 0 : index
      %757 = vector.load %arg3[%c0_765, %c1_766, %c0_767, %c0_768, %c0_769] : memref<3x3x3x4x4xbf16, #tpu.memory_space<vmem>>, vector<1x1x1x4x4xbf16>
      %758 = vector.shape_cast %757 : vector<1x1x1x4x4xbf16> to vector<4x4xbf16>
      %cst_770 = arith.constant dense<0.000000e+00> : vector<64x4xf32>
      %759 = tpu.matmul %756, %758, %cst_770 {dimension_numbers = #tpu.dot_dimension_numbers<[1], [0], [0], [1], [0, 0, 1, 1], [], []>} : vector<64x4xbf16>, vector<4x4xbf16>, vector<64x4xf32> -> vector<64x4xf32>
      %760 = arith.addf %754, %759 : vector<64x4xf32>
      %761 = vector.extract_strided_slice %736 {offsets = [1, 1, 0], sizes = [8, 8, 4], strides = [1, 1, 1]} : vector<10x10x4xbf16> to vector<8x8x4xbf16>
      %762 = vector.shape_cast %761 : vector<8x8x4xbf16> to vector<64x4xbf16>
      %c0_771 = arith.constant 0 : index
      %c1_772 = arith.constant 1 : index
      %c1_773 = arith.constant 1 : index
      %c0_774 = arith.constant 0 : index
      %c0_775 = arith.constant 0 : index
      %763 = vector.load %arg3[%c0_771, %c1_772, %c1_773, %c0_774, %c0_775] : memref<3x3x3x4x4xbf16, #tpu.memory_space<vmem>>, vector<1x1x1x4x4xbf16>
      %764 = vector.shape_cast %763 : vector<1x1x1x4x4xbf16> to vector<4x4xbf16>
      %cst_776 = arith.constant dense<0.000000e+00> : vector<64x4xf32>
      %765 = tpu.matmul %762, %764, %cst_776 {dimension_numbers = #tpu.dot_dimension_numbers<[1], [0], [0], [1], [0, 0, 1, 1], [], []>} : vector<64x4xbf16>, vector<4x4xbf16>, vector<64x4xf32> -> vector<64x4xf32>
      %766 = arith.addf %760, %765 : vector<64x4xf32>
      %767 = vector.extract_strided_slice %736 {offsets = [1, 2, 0], sizes = [8, 8, 4], strides = [1, 1, 1]} : vector<10x10x4xbf16> to vector<8x8x4xbf16>
      %768 = vector.shape_cast %767 : vector<8x8x4xbf16> to vector<64x4xbf16>
      %c0_777 = arith.constant 0 : index
      %c1_778 = arith.constant 1 : index
      %c2_779 = arith.constant 2 : index
      %c0_780 = arith.constant 0 : index
      %c0_781 = arith.constant 0 : index
      %769 = vector.load %arg3[%c0_777, %c1_778, %c2_779, %c0_780, %c0_781] : memref<3x3x3x4x4xbf16, #tpu.memory_space<vmem>>, vector<1x1x1x4x4xbf16>
      %770 = vector.shape_cast %769 : vector<1x1x1x4x4xbf16> to vector<4x4xbf16>
      %cst_782 = arith.constant dense<0.000000e+00> : vector<64x4xf32>
      %771 = tpu.matmul %768, %770, %cst_782 {dimension_numbers = #tpu.dot_dimension_numbers<[1], [0], [0], [1], [0, 0, 1, 1], [], []>} : vector<64x4xbf16>, vector<4x4xbf16>, vector<64x4xf32> -> vector<64x4xf32>
      %772 = arith.addf %766, %771 : vector<64x4xf32>
      %773 = vector.extract_strided_slice %736 {offsets = [2, 0, 0], sizes = [8, 8, 4], strides = [1, 1, 1]} : vector<10x10x4xbf16> to vector<8x8x4xbf16>
      %774 = vector.shape_cast %773 : vector<8x8x4xbf16> to vector<64x4xbf16>
      %c0_783 = arith.constant 0 : index
      %c2_784 = arith.constant 2 : index
      %c0_785 = arith.constant 0 : index
      %c0_786 = arith.constant 0 : index
      %c0_787 = arith.constant 0 : index
      %775 = vector.load %arg3[%c0_783, %c2_784, %c0_785, %c0_786, %c0_787] : memref<3x3x3x4x4xbf16, #tpu.memory_space<vmem>>, vector<1x1x1x4x4xbf16>
      %776 = vector.shape_cast %775 : vector<1x1x1x4x4xbf16> to vector<4x4xbf16>
      %cst_788 = arith.constant dense<0.000000e+00> : vector<64x4xf32>
      %777 = tpu.matmul %774, %776, %cst_788 {dimension_numbers = #tpu.dot_dimension_numbers<[1], [0], [0], [1], [0, 0, 1, 1], [], []>} : vector<64x4xbf16>, vector<4x4xbf16>, vector<64x4xf32> -> vector<64x4xf32>
      %778 = arith.addf %772, %777 : vector<64x4xf32>
      %779 = vector.extract_strided_slice %736 {offsets = [2, 1, 0], sizes = [8, 8, 4], strides = [1, 1, 1]} : vector<10x10x4xbf16> to vector<8x8x4xbf16>
      %780 = vector.shape_cast %779 : vector<8x8x4xbf16> to vector<64x4xbf16>
      %c0_789 = arith.constant 0 : index
      %c2_790 = arith.constant 2 : index
      %c1_791 = arith.constant 1 : index
      %c0_792 = arith.constant 0 : index
      %c0_793 = arith.constant 0 : index
      %781 = vector.load %arg3[%c0_789, %c2_790, %c1_791, %c0_792, %c0_793] : memref<3x3x3x4x4xbf16, #tpu.memory_space<vmem>>, vector<1x1x1x4x4xbf16>
      %782 = vector.shape_cast %781 : vector<1x1x1x4x4xbf16> to vector<4x4xbf16>
      %cst_794 = arith.constant dense<0.000000e+00> : vector<64x4xf32>
      %783 = tpu.matmul %780, %782, %cst_794 {dimension_numbers = #tpu.dot_dimension_numbers<[1], [0], [0], [1], [0, 0, 1, 1], [], []>} : vector<64x4xbf16>, vector<4x4xbf16>, vector<64x4xf32> -> vector<64x4xf32>
      %784 = arith.addf %778, %783 : vector<64x4xf32>
      %785 = vector.extract_strided_slice %736 {offsets = [2, 2, 0], sizes = [8, 8, 4], strides = [1, 1, 1]} : vector<10x10x4xbf16> to vector<8x8x4xbf16>
      %786 = vector.shape_cast %785 : vector<8x8x4xbf16> to vector<64x4xbf16>
      %c0_795 = arith.constant 0 : index
      %c2_796 = arith.constant 2 : index
      %c2_797 = arith.constant 2 : index
      %c0_798 = arith.constant 0 : index
      %c0_799 = arith.constant 0 : index
      %787 = vector.load %arg3[%c0_795, %c2_796, %c2_797, %c0_798, %c0_799] : memref<3x3x3x4x4xbf16, #tpu.memory_space<vmem>>, vector<1x1x1x4x4xbf16>
      %788 = vector.shape_cast %787 : vector<1x1x1x4x4xbf16> to vector<4x4xbf16>
      %cst_800 = arith.constant dense<0.000000e+00> : vector<64x4xf32>
      %789 = tpu.matmul %786, %788, %cst_800 {dimension_numbers = #tpu.dot_dimension_numbers<[1], [0], [0], [1], [0, 0, 1, 1], [], []>} : vector<64x4xbf16>, vector<4x4xbf16>, vector<64x4xf32> -> vector<64x4xf32>
      %790 = arith.addf %784, %789 : vector<64x4xf32>
      %c0_801 = arith.constant 0 : index
      %c4_802 = arith.constant 4 : index
      %c0_803 = arith.constant 0 : index
      %c0_804 = arith.constant 0 : index
      %c0_805 = arith.constant 0 : index
      %791 = vector.load %arg2[%c0_801, %c4_802, %c0_803, %c0_804, %c0_805] : memref<1x6x10x10x4xbf16, #tpu.memory_space<vmem>>, vector<1x1x10x10x4xbf16>
      %792 = vector.shape_cast %791 : vector<1x1x10x10x4xbf16> to vector<10x10x4xbf16>
      %793 = vector.extract_strided_slice %792 {offsets = [0, 0, 0], sizes = [8, 8, 4], strides = [1, 1, 1]} : vector<10x10x4xbf16> to vector<8x8x4xbf16>
      %794 = vector.shape_cast %793 : vector<8x8x4xbf16> to vector<64x4xbf16>
      %c1_806 = arith.constant 1 : index
      %c0_807 = arith.constant 0 : index
      %c0_808 = arith.constant 0 : index
      %c0_809 = arith.constant 0 : index
      %c0_810 = arith.constant 0 : index
      %795 = vector.load %arg3[%c1_806, %c0_807, %c0_808, %c0_809, %c0_810] : memref<3x3x3x4x4xbf16, #tpu.memory_space<vmem>>, vector<1x1x1x4x4xbf16>
      %796 = vector.shape_cast %795 : vector<1x1x1x4x4xbf16> to vector<4x4xbf16>
      %cst_811 = arith.constant dense<0.000000e+00> : vector<64x4xf32>
      %797 = tpu.matmul %794, %796, %cst_811 {dimension_numbers = #tpu.dot_dimension_numbers<[1], [0], [0], [1], [0, 0, 1, 1], [], []>} : vector<64x4xbf16>, vector<4x4xbf16>, vector<64x4xf32> -> vector<64x4xf32>
      %798 = arith.addf %790, %797 : vector<64x4xf32>
      %799 = vector.extract_strided_slice %792 {offsets = [0, 1, 0], sizes = [8, 8, 4], strides = [1, 1, 1]} : vector<10x10x4xbf16> to vector<8x8x4xbf16>
      %800 = vector.shape_cast %799 : vector<8x8x4xbf16> to vector<64x4xbf16>
      %c1_812 = arith.constant 1 : index
      %c0_813 = arith.constant 0 : index
      %c1_814 = arith.constant 1 : index
      %c0_815 = arith.constant 0 : index
      %c0_816 = arith.constant 0 : index
      %801 = vector.load %arg3[%c1_812, %c0_813, %c1_814, %c0_815, %c0_816] : memref<3x3x3x4x4xbf16, #tpu.memory_space<vmem>>, vector<1x1x1x4x4xbf16>
      %802 = vector.shape_cast %801 : vector<1x1x1x4x4xbf16> to vector<4x4xbf16>
      %cst_817 = arith.constant dense<0.000000e+00> : vector<64x4xf32>
      %803 = tpu.matmul %800, %802, %cst_817 {dimension_numbers = #tpu.dot_dimension_numbers<[1], [0], [0], [1], [0, 0, 1, 1], [], []>} : vector<64x4xbf16>, vector<4x4xbf16>, vector<64x4xf32> -> vector<64x4xf32>
      %804 = arith.addf %798, %803 : vector<64x4xf32>
      %805 = vector.extract_strided_slice %792 {offsets = [0, 2, 0], sizes = [8, 8, 4], strides = [1, 1, 1]} : vector<10x10x4xbf16> to vector<8x8x4xbf16>
      %806 = vector.shape_cast %805 : vector<8x8x4xbf16> to vector<64x4xbf16>
      %c1_818 = arith.constant 1 : index
      %c0_819 = arith.constant 0 : index
      %c2_820 = arith.constant 2 : index
      %c0_821 = arith.constant 0 : index
      %c0_822 = arith.constant 0 : index
      %807 = vector.load %arg3[%c1_818, %c0_819, %c2_820, %c0_821, %c0_822] : memref<3x3x3x4x4xbf16, #tpu.memory_space<vmem>>, vector<1x1x1x4x4xbf16>
      %808 = vector.shape_cast %807 : vector<1x1x1x4x4xbf16> to vector<4x4xbf16>
      %cst_823 = arith.constant dense<0.000000e+00> : vector<64x4xf32>
      %809 = tpu.matmul %806, %808, %cst_823 {dimension_numbers = #tpu.dot_dimension_numbers<[1], [0], [0], [1], [0, 0, 1, 1], [], []>} : vector<64x4xbf16>, vector<4x4xbf16>, vector<64x4xf32> -> vector<64x4xf32>
      %810 = arith.addf %804, %809 : vector<64x4xf32>
      %811 = vector.extract_strided_slice %792 {offsets = [1, 0, 0], sizes = [8, 8, 4], strides = [1, 1, 1]} : vector<10x10x4xbf16> to vector<8x8x4xbf16>
      %812 = vector.shape_cast %811 : vector<8x8x4xbf16> to vector<64x4xbf16>
      %c1_824 = arith.constant 1 : index
      %c1_825 = arith.constant 1 : index
      %c0_826 = arith.constant 0 : index
      %c0_827 = arith.constant 0 : index
      %c0_828 = arith.constant 0 : index
      %813 = vector.load %arg3[%c1_824, %c1_825, %c0_826, %c0_827, %c0_828] : memref<3x3x3x4x4xbf16, #tpu.memory_space<vmem>>, vector<1x1x1x4x4xbf16>
      %814 = vector.shape_cast %813 : vector<1x1x1x4x4xbf16> to vector<4x4xbf16>
      %cst_829 = arith.constant dense<0.000000e+00> : vector<64x4xf32>
      %815 = tpu.matmul %812, %814, %cst_829 {dimension_numbers = #tpu.dot_dimension_numbers<[1], [0], [0], [1], [0, 0, 1, 1], [], []>} : vector<64x4xbf16>, vector<4x4xbf16>, vector<64x4xf32> -> vector<64x4xf32>
      %816 = arith.addf %810, %815 : vector<64x4xf32>
      %817 = vector.extract_strided_slice %792 {offsets = [1, 1, 0], sizes = [8, 8, 4], strides = [1, 1, 1]} : vector<10x10x4xbf16> to vector<8x8x4xbf16>
      %818 = vector.shape_cast %817 : vector<8x8x4xbf16> to vector<64x4xbf16>
      %c1_830 = arith.constant 1 : index
      %c1_831 = arith.constant 1 : index
      %c1_832 = arith.constant 1 : index
      %c0_833 = arith.constant 0 : index
      %c0_834 = arith.constant 0 : index
      %819 = vector.load %arg3[%c1_830, %c1_831, %c1_832, %c0_833, %c0_834] : memref<3x3x3x4x4xbf16, #tpu.memory_space<vmem>>, vector<1x1x1x4x4xbf16>
      %820 = vector.shape_cast %819 : vector<1x1x1x4x4xbf16> to vector<4x4xbf16>
      %cst_835 = arith.constant dense<0.000000e+00> : vector<64x4xf32>
      %821 = tpu.matmul %818, %820, %cst_835 {dimension_numbers = #tpu.dot_dimension_numbers<[1], [0], [0], [1], [0, 0, 1, 1], [], []>} : vector<64x4xbf16>, vector<4x4xbf16>, vector<64x4xf32> -> vector<64x4xf32>
      %822 = arith.addf %816, %821 : vector<64x4xf32>
      %823 = vector.extract_strided_slice %792 {offsets = [1, 2, 0], sizes = [8, 8, 4], strides = [1, 1, 1]} : vector<10x10x4xbf16> to vector<8x8x4xbf16>
      %824 = vector.shape_cast %823 : vector<8x8x4xbf16> to vector<64x4xbf16>
      %c1_836 = arith.constant 1 : index
      %c1_837 = arith.constant 1 : index
      %c2_838 = arith.constant 2 : index
      %c0_839 = arith.constant 0 : index
      %c0_840 = arith.constant 0 : index
      %825 = vector.load %arg3[%c1_836, %c1_837, %c2_838, %c0_839, %c0_840] : memref<3x3x3x4x4xbf16, #tpu.memory_space<vmem>>, vector<1x1x1x4x4xbf16>
      %826 = vector.shape_cast %825 : vector<1x1x1x4x4xbf16> to vector<4x4xbf16>
      %cst_841 = arith.constant dense<0.000000e+00> : vector<64x4xf32>
      %827 = tpu.matmul %824, %826, %cst_841 {dimension_numbers = #tpu.dot_dimension_numbers<[1], [0], [0], [1], [0, 0, 1, 1], [], []>} : vector<64x4xbf16>, vector<4x4xbf16>, vector<64x4xf32> -> vector<64x4xf32>
      %828 = arith.addf %822, %827 : vector<64x4xf32>
      %829 = vector.extract_strided_slice %792 {offsets = [2, 0, 0], sizes = [8, 8, 4], strides = [1, 1, 1]} : vector<10x10x4xbf16> to vector<8x8x4xbf16>
      %830 = vector.shape_cast %829 : vector<8x8x4xbf16> to vector<64x4xbf16>
      %c1_842 = arith.constant 1 : index
      %c2_843 = arith.constant 2 : index
      %c0_844 = arith.constant 0 : index
      %c0_845 = arith.constant 0 : index
      %c0_846 = arith.constant 0 : index
      %831 = vector.load %arg3[%c1_842, %c2_843, %c0_844, %c0_845, %c0_846] : memref<3x3x3x4x4xbf16, #tpu.memory_space<vmem>>, vector<1x1x1x4x4xbf16>
      %832 = vector.shape_cast %831 : vector<1x1x1x4x4xbf16> to vector<4x4xbf16>
      %cst_847 = arith.constant dense<0.000000e+00> : vector<64x4xf32>
      %833 = tpu.matmul %830, %832, %cst_847 {dimension_numbers = #tpu.dot_dimension_numbers<[1], [0], [0], [1], [0, 0, 1, 1], [], []>} : vector<64x4xbf16>, vector<4x4xbf16>, vector<64x4xf32> -> vector<64x4xf32>
      %834 = arith.addf %828, %833 : vector<64x4xf32>
      %835 = vector.extract_strided_slice %792 {offsets = [2, 1, 0], sizes = [8, 8, 4], strides = [1, 1, 1]} : vector<10x10x4xbf16> to vector<8x8x4xbf16>
      %836 = vector.shape_cast %835 : vector<8x8x4xbf16> to vector<64x4xbf16>
      %c1_848 = arith.constant 1 : index
      %c2_849 = arith.constant 2 : index
      %c1_850 = arith.constant 1 : index
      %c0_851 = arith.constant 0 : index
      %c0_852 = arith.constant 0 : index
      %837 = vector.load %arg3[%c1_848, %c2_849, %c1_850, %c0_851, %c0_852] : memref<3x3x3x4x4xbf16, #tpu.memory_space<vmem>>, vector<1x1x1x4x4xbf16>
      %838 = vector.shape_cast %837 : vector<1x1x1x4x4xbf16> to vector<4x4xbf16>
      %cst_853 = arith.constant dense<0.000000e+00> : vector<64x4xf32>
      %839 = tpu.matmul %836, %838, %cst_853 {dimension_numbers = #tpu.dot_dimension_numbers<[1], [0], [0], [1], [0, 0, 1, 1], [], []>} : vector<64x4xbf16>, vector<4x4xbf16>, vector<64x4xf32> -> vector<64x4xf32>
      %840 = arith.addf %834, %839 : vector<64x4xf32>
      %841 = vector.extract_strided_slice %792 {offsets = [2, 2, 0], sizes = [8, 8, 4], strides = [1, 1, 1]} : vector<10x10x4xbf16> to vector<8x8x4xbf16>
      %842 = vector.shape_cast %841 : vector<8x8x4xbf16> to vector<64x4xbf16>
      %c1_854 = arith.constant 1 : index
      %c2_855 = arith.constant 2 : index
      %c2_856 = arith.constant 2 : index
      %c0_857 = arith.constant 0 : index
      %c0_858 = arith.constant 0 : index
      %843 = vector.load %arg3[%c1_854, %c2_855, %c2_856, %c0_857, %c0_858] : memref<3x3x3x4x4xbf16, #tpu.memory_space<vmem>>, vector<1x1x1x4x4xbf16>
      %844 = vector.shape_cast %843 : vector<1x1x1x4x4xbf16> to vector<4x4xbf16>
      %cst_859 = arith.constant dense<0.000000e+00> : vector<64x4xf32>
      %845 = tpu.matmul %842, %844, %cst_859 {dimension_numbers = #tpu.dot_dimension_numbers<[1], [0], [0], [1], [0, 0, 1, 1], [], []>} : vector<64x4xbf16>, vector<4x4xbf16>, vector<64x4xf32> -> vector<64x4xf32>
      %846 = arith.addf %840, %845 : vector<64x4xf32>
      %c0_860 = arith.constant 0 : index
      %c5 = arith.constant 5 : index
      %c0_861 = arith.constant 0 : index
      %c0_862 = arith.constant 0 : index
      %c0_863 = arith.constant 0 : index
      %847 = vector.load %arg2[%c0_860, %c5, %c0_861, %c0_862, %c0_863] : memref<1x6x10x10x4xbf16, #tpu.memory_space<vmem>>, vector<1x1x10x10x4xbf16>
      %848 = vector.shape_cast %847 : vector<1x1x10x10x4xbf16> to vector<10x10x4xbf16>
      %849 = vector.extract_strided_slice %848 {offsets = [0, 0, 0], sizes = [8, 8, 4], strides = [1, 1, 1]} : vector<10x10x4xbf16> to vector<8x8x4xbf16>
      %850 = vector.shape_cast %849 : vector<8x8x4xbf16> to vector<64x4xbf16>
      %c2_864 = arith.constant 2 : index
      %c0_865 = arith.constant 0 : index
      %c0_866 = arith.constant 0 : index
      %c0_867 = arith.constant 0 : index
      %c0_868 = arith.constant 0 : index
      %851 = vector.load %arg3[%c2_864, %c0_865, %c0_866, %c0_867, %c0_868] : memref<3x3x3x4x4xbf16, #tpu.memory_space<vmem>>, vector<1x1x1x4x4xbf16>
      %852 = vector.shape_cast %851 : vector<1x1x1x4x4xbf16> to vector<4x4xbf16>
      %cst_869 = arith.constant dense<0.000000e+00> : vector<64x4xf32>
      %853 = tpu.matmul %850, %852, %cst_869 {dimension_numbers = #tpu.dot_dimension_numbers<[1], [0], [0], [1], [0, 0, 1, 1], [], []>} : vector<64x4xbf16>, vector<4x4xbf16>, vector<64x4xf32> -> vector<64x4xf32>
      %854 = arith.addf %846, %853 : vector<64x4xf32>
      %855 = vector.extract_strided_slice %848 {offsets = [0, 1, 0], sizes = [8, 8, 4], strides = [1, 1, 1]} : vector<10x10x4xbf16> to vector<8x8x4xbf16>
      %856 = vector.shape_cast %855 : vector<8x8x4xbf16> to vector<64x4xbf16>
      %c2_870 = arith.constant 2 : index
      %c0_871 = arith.constant 0 : index
      %c1_872 = arith.constant 1 : index
      %c0_873 = arith.constant 0 : index
      %c0_874 = arith.constant 0 : index
      %857 = vector.load %arg3[%c2_870, %c0_871, %c1_872, %c0_873, %c0_874] : memref<3x3x3x4x4xbf16, #tpu.memory_space<vmem>>, vector<1x1x1x4x4xbf16>
      %858 = vector.shape_cast %857 : vector<1x1x1x4x4xbf16> to vector<4x4xbf16>
      %cst_875 = arith.constant dense<0.000000e+00> : vector<64x4xf32>
      %859 = tpu.matmul %856, %858, %cst_875 {dimension_numbers = #tpu.dot_dimension_numbers<[1], [0], [0], [1], [0, 0, 1, 1], [], []>} : vector<64x4xbf16>, vector<4x4xbf16>, vector<64x4xf32> -> vector<64x4xf32>
      %860 = arith.addf %854, %859 : vector<64x4xf32>
      %861 = vector.extract_strided_slice %848 {offsets = [0, 2, 0], sizes = [8, 8, 4], strides = [1, 1, 1]} : vector<10x10x4xbf16> to vector<8x8x4xbf16>
      %862 = vector.shape_cast %861 : vector<8x8x4xbf16> to vector<64x4xbf16>
      %c2_876 = arith.constant 2 : index
      %c0_877 = arith.constant 0 : index
      %c2_878 = arith.constant 2 : index
      %c0_879 = arith.constant 0 : index
      %c0_880 = arith.constant 0 : index
      %863 = vector.load %arg3[%c2_876, %c0_877, %c2_878, %c0_879, %c0_880] : memref<3x3x3x4x4xbf16, #tpu.memory_space<vmem>>, vector<1x1x1x4x4xbf16>
      %864 = vector.shape_cast %863 : vector<1x1x1x4x4xbf16> to vector<4x4xbf16>
      %cst_881 = arith.constant dense<0.000000e+00> : vector<64x4xf32>
      %865 = tpu.matmul %862, %864, %cst_881 {dimension_numbers = #tpu.dot_dimension_numbers<[1], [0], [0], [1], [0, 0, 1, 1], [], []>} : vector<64x4xbf16>, vector<4x4xbf16>, vector<64x4xf32> -> vector<64x4xf32>
      %866 = arith.addf %860, %865 : vector<64x4xf32>
      %867 = vector.extract_strided_slice %848 {offsets = [1, 0, 0], sizes = [8, 8, 4], strides = [1, 1, 1]} : vector<10x10x4xbf16> to vector<8x8x4xbf16>
      %868 = vector.shape_cast %867 : vector<8x8x4xbf16> to vector<64x4xbf16>
      %c2_882 = arith.constant 2 : index
      %c1_883 = arith.constant 1 : index
      %c0_884 = arith.constant 0 : index
      %c0_885 = arith.constant 0 : index
      %c0_886 = arith.constant 0 : index
      %869 = vector.load %arg3[%c2_882, %c1_883, %c0_884, %c0_885, %c0_886] : memref<3x3x3x4x4xbf16, #tpu.memory_space<vmem>>, vector<1x1x1x4x4xbf16>
      %870 = vector.shape_cast %869 : vector<1x1x1x4x4xbf16> to vector<4x4xbf16>
      %cst_887 = arith.constant dense<0.000000e+00> : vector<64x4xf32>
      %871 = tpu.matmul %868, %870, %cst_887 {dimension_numbers = #tpu.dot_dimension_numbers<[1], [0], [0], [1], [0, 0, 1, 1], [], []>} : vector<64x4xbf16>, vector<4x4xbf16>, vector<64x4xf32> -> vector<64x4xf32>
      %872 = arith.addf %866, %871 : vector<64x4xf32>
      %873 = vector.extract_strided_slice %848 {offsets = [1, 1, 0], sizes = [8, 8, 4], strides = [1, 1, 1]} : vector<10x10x4xbf16> to vector<8x8x4xbf16>
      %874 = vector.shape_cast %873 : vector<8x8x4xbf16> to vector<64x4xbf16>
      %c2_888 = arith.constant 2 : index
      %c1_889 = arith.constant 1 : index
      %c1_890 = arith.constant 1 : index
      %c0_891 = arith.constant 0 : index
      %c0_892 = arith.constant 0 : index
      %875 = vector.load %arg3[%c2_888, %c1_889, %c1_890, %c0_891, %c0_892] : memref<3x3x3x4x4xbf16, #tpu.memory_space<vmem>>, vector<1x1x1x4x4xbf16>
      %876 = vector.shape_cast %875 : vector<1x1x1x4x4xbf16> to vector<4x4xbf16>
      %cst_893 = arith.constant dense<0.000000e+00> : vector<64x4xf32>
      %877 = tpu.matmul %874, %876, %cst_893 {dimension_numbers = #tpu.dot_dimension_numbers<[1], [0], [0], [1], [0, 0, 1, 1], [], []>} : vector<64x4xbf16>, vector<4x4xbf16>, vector<64x4xf32> -> vector<64x4xf32>
      %878 = arith.addf %872, %877 : vector<64x4xf32>
      %879 = vector.extract_strided_slice %848 {offsets = [1, 2, 0], sizes = [8, 8, 4], strides = [1, 1, 1]} : vector<10x10x4xbf16> to vector<8x8x4xbf16>
      %880 = vector.shape_cast %879 : vector<8x8x4xbf16> to vector<64x4xbf16>
      %c2_894 = arith.constant 2 : index
      %c1_895 = arith.constant 1 : index
      %c2_896 = arith.constant 2 : index
      %c0_897 = arith.constant 0 : index
      %c0_898 = arith.constant 0 : index
      %881 = vector.load %arg3[%c2_894, %c1_895, %c2_896, %c0_897, %c0_898] : memref<3x3x3x4x4xbf16, #tpu.memory_space<vmem>>, vector<1x1x1x4x4xbf16>
      %882 = vector.shape_cast %881 : vector<1x1x1x4x4xbf16> to vector<4x4xbf16>
      %cst_899 = arith.constant dense<0.000000e+00> : vector<64x4xf32>
      %883 = tpu.matmul %880, %882, %cst_899 {dimension_numbers = #tpu.dot_dimension_numbers<[1], [0], [0], [1], [0, 0, 1, 1], [], []>} : vector<64x4xbf16>, vector<4x4xbf16>, vector<64x4xf32> -> vector<64x4xf32>
      %884 = arith.addf %878, %883 : vector<64x4xf32>
      %885 = vector.extract_strided_slice %848 {offsets = [2, 0, 0], sizes = [8, 8, 4], strides = [1, 1, 1]} : vector<10x10x4xbf16> to vector<8x8x4xbf16>
      %886 = vector.shape_cast %885 : vector<8x8x4xbf16> to vector<64x4xbf16>
      %c2_900 = arith.constant 2 : index
      %c2_901 = arith.constant 2 : index
      %c0_902 = arith.constant 0 : index
      %c0_903 = arith.constant 0 : index
      %c0_904 = arith.constant 0 : index
      %887 = vector.load %arg3[%c2_900, %c2_901, %c0_902, %c0_903, %c0_904] : memref<3x3x3x4x4xbf16, #tpu.memory_space<vmem>>, vector<1x1x1x4x4xbf16>
      %888 = vector.shape_cast %887 : vector<1x1x1x4x4xbf16> to vector<4x4xbf16>
      %cst_905 = arith.constant dense<0.000000e+00> : vector<64x4xf32>
      %889 = tpu.matmul %886, %888, %cst_905 {dimension_numbers = #tpu.dot_dimension_numbers<[1], [0], [0], [1], [0, 0, 1, 1], [], []>} : vector<64x4xbf16>, vector<4x4xbf16>, vector<64x4xf32> -> vector<64x4xf32>
      %890 = arith.addf %884, %889 : vector<64x4xf32>
      %891 = vector.extract_strided_slice %848 {offsets = [2, 1, 0], sizes = [8, 8, 4], strides = [1, 1, 1]} : vector<10x10x4xbf16> to vector<8x8x4xbf16>
      %892 = vector.shape_cast %891 : vector<8x8x4xbf16> to vector<64x4xbf16>
      %c2_906 = arith.constant 2 : index
      %c2_907 = arith.constant 2 : index
      %c1_908 = arith.constant 1 : index
      %c0_909 = arith.constant 0 : index
      %c0_910 = arith.constant 0 : index
      %893 = vector.load %arg3[%c2_906, %c2_907, %c1_908, %c0_909, %c0_910] : memref<3x3x3x4x4xbf16, #tpu.memory_space<vmem>>, vector<1x1x1x4x4xbf16>
      %894 = vector.shape_cast %893 : vector<1x1x1x4x4xbf16> to vector<4x4xbf16>
      %cst_911 = arith.constant dense<0.000000e+00> : vector<64x4xf32>
      %895 = tpu.matmul %892, %894, %cst_911 {dimension_numbers = #tpu.dot_dimension_numbers<[1], [0], [0], [1], [0, 0, 1, 1], [], []>} : vector<64x4xbf16>, vector<4x4xbf16>, vector<64x4xf32> -> vector<64x4xf32>
      %896 = arith.addf %890, %895 : vector<64x4xf32>
      %897 = vector.extract_strided_slice %848 {offsets = [2, 2, 0], sizes = [8, 8, 4], strides = [1, 1, 1]} : vector<10x10x4xbf16> to vector<8x8x4xbf16>
      %898 = vector.shape_cast %897 : vector<8x8x4xbf16> to vector<64x4xbf16>
      %c2_912 = arith.constant 2 : index
      %c2_913 = arith.constant 2 : index
      %c2_914 = arith.constant 2 : index
      %c0_915 = arith.constant 0 : index
      %c0_916 = arith.constant 0 : index
      %899 = vector.load %arg3[%c2_912, %c2_913, %c2_914, %c0_915, %c0_916] : memref<3x3x3x4x4xbf16, #tpu.memory_space<vmem>>, vector<1x1x1x4x4xbf16>
      %900 = vector.shape_cast %899 : vector<1x1x1x4x4xbf16> to vector<4x4xbf16>
      %cst_917 = arith.constant dense<0.000000e+00> : vector<64x4xf32>
      %901 = tpu.matmul %898, %900, %cst_917 {dimension_numbers = #tpu.dot_dimension_numbers<[1], [0], [0], [1], [0, 0, 1, 1], [], []>} : vector<64x4xbf16>, vector<4x4xbf16>, vector<64x4xf32> -> vector<64x4xf32>
      %902 = arith.addf %896, %901 : vector<64x4xf32>
      %c0_918 = arith.constant 0 : index
      %c0_919 = arith.constant 0 : index
      %903 = vector.load %arg4[%c0_918, %c0_919] : memref<1x4xf32, #tpu.memory_space<vmem>>, vector<1x4xf32>
      %904 = vector.broadcast %903 : vector<1x4xf32> to vector<64x4xf32>
      %905 = arith.addf %902, %904 : vector<64x4xf32>
      %cst_920 = arith.constant 0.000000e+00 : f32
      %906 = vector.broadcast %cst_920 : f32 to vector<64x4xf32>
      %907 = arith.maximumf %905, %906 : vector<64x4xf32>
      %908 = vector.shape_cast %907 : vector<64x4xf32> to vector<8x8x4xf32>
      %909 = arith.truncf %908 : vector<8x8x4xf32> to vector<8x8x4xbf16>
      %c4_921 = arith.constant 4 : index
      %c1_922 = arith.constant 1 : index
      %c1_923 = arith.constant 1 : index
      %c0_924 = arith.constant 0 : index
      %910 = vector.load %arg8[%c4_921, %c1_922, %c1_923, %c0_924] : memref<6x10x10x4xbf16, #tpu.memory_space<vmem>>, vector<1x8x8x4xbf16>
      %911 = vector.shape_cast %910 : vector<1x8x8x4xbf16> to vector<8x8x4xbf16>
      %912 = vector.shape_cast %909 : vector<8x8x4xbf16> to vector<1x8x8x4xbf16>
      tpu.vector_store %arg8[%c4_921, %c1_922, %c1_923, %c0_924], %912 {strides = array<i32>} : memref<6x10x10x4xbf16, #tpu.memory_space<vmem>>, vector<1x8x8x4xbf16>,
    } else {
    }
    %cst = arith.constant 0.000000e+00 : f32
    %3 = vector.broadcast %cst : f32 to vector<64x4xf32>
    %c0_i32_1 = arith.constant 0 : i32
    %4 = arith.addi %arg1, %c0_i32_1 : i32
    %5 = arith.index_cast %4 : i32 to index
    %c0 = arith.constant 0 : index
    %c0_2 = arith.constant 0 : index
    %c0_3 = arith.constant 0 : index
    %6 = vector.load %arg8[%5, %c0, %c0_2, %c0_3] : memref<6x10x10x4xbf16, #tpu.memory_space<vmem>>, vector<1x10x10x4xbf16>
    %7 = vector.shape_cast %6 : vector<1x10x10x4xbf16> to vector<10x10x4xbf16>
    %8 = vector.extract_strided_slice %7 {offsets = [0, 0, 0], sizes = [8, 8, 4], strides = [1, 1, 1]} : vector<10x10x4xbf16> to vector<8x8x4xbf16>
    %9 = vector.shape_cast %8 : vector<8x8x4xbf16> to vector<64x4xbf16>
    %c0_4 = arith.constant 0 : index
    %c0_5 = arith.constant 0 : index
    %c0_6 = arith.constant 0 : index
    %c0_7 = arith.constant 0 : index
    %c0_8 = arith.constant 0 : index
    %10 = vector.load %arg5[%c0_4, %c0_5, %c0_6, %c0_7, %c0_8] : memref<3x3x3x4x4xbf16, #tpu.memory_space<vmem>>, vector<1x1x1x4x4xbf16>
    %11 = vector.shape_cast %10 : vector<1x1x1x4x4xbf16> to vector<4x4xbf16>
    %cst_9 = arith.constant dense<0.000000e+00> : vector<64x4xf32>
    %12 = tpu.matmul %9, %11, %cst_9 {dimension_numbers = #tpu.dot_dimension_numbers<[1], [0], [0], [1], [0, 0, 1, 1], [], []>} : vector<64x4xbf16>, vector<4x4xbf16>, vector<64x4xf32> -> vector<64x4xf32>
    %13 = arith.addf %3, %12 : vector<64x4xf32>
    %14 = vector.extract_strided_slice %7 {offsets = [0, 1, 0], sizes = [8, 8, 4], strides = [1, 1, 1]} : vector<10x10x4xbf16> to vector<8x8x4xbf16>
    %15 = vector.shape_cast %14 : vector<8x8x4xbf16> to vector<64x4xbf16>
    %c0_10 = arith.constant 0 : index
    %c0_11 = arith.constant 0 : index
    %c1 = arith.constant 1 : index
    %c0_12 = arith.constant 0 : index
    %c0_13 = arith.constant 0 : index
    %16 = vector.load %arg5[%c0_10, %c0_11, %c1, %c0_12, %c0_13] : memref<3x3x3x4x4xbf16, #tpu.memory_space<vmem>>, vector<1x1x1x4x4xbf16>
    %17 = vector.shape_cast %16 : vector<1x1x1x4x4xbf16> to vector<4x4xbf16>
    %cst_14 = arith.constant dense<0.000000e+00> : vector<64x4xf32>
    %18 = tpu.matmul %15, %17, %cst_14 {dimension_numbers = #tpu.dot_dimension_numbers<[1], [0], [0], [1], [0, 0, 1, 1], [], []>} : vector<64x4xbf16>, vector<4x4xbf16>, vector<64x4xf32> -> vector<64x4xf32>
    %19 = arith.addf %13, %18 : vector<64x4xf32>
    %20 = vector.extract_strided_slice %7 {offsets = [0, 2, 0], sizes = [8, 8, 4], strides = [1, 1, 1]} : vector<10x10x4xbf16> to vector<8x8x4xbf16>
    %21 = vector.shape_cast %20 : vector<8x8x4xbf16> to vector<64x4xbf16>
    %c0_15 = arith.constant 0 : index
    %c0_16 = arith.constant 0 : index
    %c2 = arith.constant 2 : index
    %c0_17 = arith.constant 0 : index
    %c0_18 = arith.constant 0 : index
    %22 = vector.load %arg5[%c0_15, %c0_16, %c2, %c0_17, %c0_18] : memref<3x3x3x4x4xbf16, #tpu.memory_space<vmem>>, vector<1x1x1x4x4xbf16>
    %23 = vector.shape_cast %22 : vector<1x1x1x4x4xbf16> to vector<4x4xbf16>
    %cst_19 = arith.constant dense<0.000000e+00> : vector<64x4xf32>
    %24 = tpu.matmul %21, %23, %cst_19 {dimension_numbers = #tpu.dot_dimension_numbers<[1], [0], [0], [1], [0, 0, 1, 1], [], []>} : vector<64x4xbf16>, vector<4x4xbf16>, vector<64x4xf32> -> vector<64x4xf32>
    %25 = arith.addf %19, %24 : vector<64x4xf32>
    %26 = vector.extract_strided_slice %7 {offsets = [1, 0, 0], sizes = [8, 8, 4], strides = [1, 1, 1]} : vector<10x10x4xbf16> to vector<8x8x4xbf16>
    %27 = vector.shape_cast %26 : vector<8x8x4xbf16> to vector<64x4xbf16>
    %c0_20 = arith.constant 0 : index
    %c1_21 = arith.constant 1 : index
    %c0_22 = arith.constant 0 : index
    %c0_23 = arith.constant 0 : index
    %c0_24 = arith.constant 0 : index
    %28 = vector.load %arg5[%c0_20, %c1_21, %c0_22, %c0_23, %c0_24] : memref<3x3x3x4x4xbf16, #tpu.memory_space<vmem>>, vector<1x1x1x4x4xbf16>
    %29 = vector.shape_cast %28 : vector<1x1x1x4x4xbf16> to vector<4x4xbf16>
    %cst_25 = arith.constant dense<0.000000e+00> : vector<64x4xf32>
    %30 = tpu.matmul %27, %29, %cst_25 {dimension_numbers = #tpu.dot_dimension_numbers<[1], [0], [0], [1], [0, 0, 1, 1], [], []>} : vector<64x4xbf16>, vector<4x4xbf16>, vector<64x4xf32> -> vector<64x4xf32>
    %31 = arith.addf %25, %30 : vector<64x4xf32>
    %32 = vector.extract_strided_slice %7 {offsets = [1, 1, 0], sizes = [8, 8, 4], strides = [1, 1, 1]} : vector<10x10x4xbf16> to vector<8x8x4xbf16>
    %33 = vector.shape_cast %32 : vector<8x8x4xbf16> to vector<64x4xbf16>
    %c0_26 = arith.constant 0 : index
    %c1_27 = arith.constant 1 : index
    %c1_28 = arith.constant 1 : index
    %c0_29 = arith.constant 0 : index
    %c0_30 = arith.constant 0 : index
    %34 = vector.load %arg5[%c0_26, %c1_27, %c1_28, %c0_29, %c0_30] : memref<3x3x3x4x4xbf16, #tpu.memory_space<vmem>>, vector<1x1x1x4x4xbf16>
    %35 = vector.shape_cast %34 : vector<1x1x1x4x4xbf16> to vector<4x4xbf16>
    %cst_31 = arith.constant dense<0.000000e+00> : vector<64x4xf32>
    %36 = tpu.matmul %33, %35, %cst_31 {dimension_numbers = #tpu.dot_dimension_numbers<[1], [0], [0], [1], [0, 0, 1, 1], [], []>} : vector<64x4xbf16>, vector<4x4xbf16>, vector<64x4xf32> -> vector<64x4xf32>
    %37 = arith.addf %31, %36 : vector<64x4xf32>
    %38 = vector.extract_strided_slice %7 {offsets = [1, 2, 0], sizes = [8, 8, 4], strides = [1, 1, 1]} : vector<10x10x4xbf16> to vector<8x8x4xbf16>
    %39 = vector.shape_cast %38 : vector<8x8x4xbf16> to vector<64x4xbf16>
    %c0_32 = arith.constant 0 : index
    %c1_33 = arith.constant 1 : index
    %c2_34 = arith.constant 2 : index
    %c0_35 = arith.constant 0 : index
    %c0_36 = arith.constant 0 : index
    %40 = vector.load %arg5[%c0_32, %c1_33, %c2_34, %c0_35, %c0_36] : memref<3x3x3x4x4xbf16, #tpu.memory_space<vmem>>, vector<1x1x1x4x4xbf16>
    %41 = vector.shape_cast %40 : vector<1x1x1x4x4xbf16> to vector<4x4xbf16>
    %cst_37 = arith.constant dense<0.000000e+00> : vector<64x4xf32>
    %42 = tpu.matmul %39, %41, %cst_37 {dimension_numbers = #tpu.dot_dimension_numbers<[1], [0], [0], [1], [0, 0, 1, 1], [], []>} : vector<64x4xbf16>, vector<4x4xbf16>, vector<64x4xf32> -> vector<64x4xf32>
    %43 = arith.addf %37, %42 : vector<64x4xf32>
    %44 = vector.extract_strided_slice %7 {offsets = [2, 0, 0], sizes = [8, 8, 4], strides = [1, 1, 1]} : vector<10x10x4xbf16> to vector<8x8x4xbf16>
    %45 = vector.shape_cast %44 : vector<8x8x4xbf16> to vector<64x4xbf16>
    %c0_38 = arith.constant 0 : index
    %c2_39 = arith.constant 2 : index
    %c0_40 = arith.constant 0 : index
    %c0_41 = arith.constant 0 : index
    %c0_42 = arith.constant 0 : index
    %46 = vector.load %arg5[%c0_38, %c2_39, %c0_40, %c0_41, %c0_42] : memref<3x3x3x4x4xbf16, #tpu.memory_space<vmem>>, vector<1x1x1x4x4xbf16>
    %47 = vector.shape_cast %46 : vector<1x1x1x4x4xbf16> to vector<4x4xbf16>
    %cst_43 = arith.constant dense<0.000000e+00> : vector<64x4xf32>
    %48 = tpu.matmul %45, %47, %cst_43 {dimension_numbers = #tpu.dot_dimension_numbers<[1], [0], [0], [1], [0, 0, 1, 1], [], []>} : vector<64x4xbf16>, vector<4x4xbf16>, vector<64x4xf32> -> vector<64x4xf32>
    %49 = arith.addf %43, %48 : vector<64x4xf32>
    %50 = vector.extract_strided_slice %7 {offsets = [2, 1, 0], sizes = [8, 8, 4], strides = [1, 1, 1]} : vector<10x10x4xbf16> to vector<8x8x4xbf16>
    %51 = vector.shape_cast %50 : vector<8x8x4xbf16> to vector<64x4xbf16>
    %c0_44 = arith.constant 0 : index
    %c2_45 = arith.constant 2 : index
    %c1_46 = arith.constant 1 : index
    %c0_47 = arith.constant 0 : index
    %c0_48 = arith.constant 0 : index
    %52 = vector.load %arg5[%c0_44, %c2_45, %c1_46, %c0_47, %c0_48] : memref<3x3x3x4x4xbf16, #tpu.memory_space<vmem>>, vector<1x1x1x4x4xbf16>
    %53 = vector.shape_cast %52 : vector<1x1x1x4x4xbf16> to vector<4x4xbf16>
    %cst_49 = arith.constant dense<0.000000e+00> : vector<64x4xf32>
    %54 = tpu.matmul %51, %53, %cst_49 {dimension_numbers = #tpu.dot_dimension_numbers<[1], [0], [0], [1], [0, 0, 1, 1], [], []>} : vector<64x4xbf16>, vector<4x4xbf16>, vector<64x4xf32> -> vector<64x4xf32>
    %55 = arith.addf %49, %54 : vector<64x4xf32>
    %56 = vector.extract_strided_slice %7 {offsets = [2, 2, 0], sizes = [8, 8, 4], strides = [1, 1, 1]} : vector<10x10x4xbf16> to vector<8x8x4xbf16>
    %57 = vector.shape_cast %56 : vector<8x8x4xbf16> to vector<64x4xbf16>
    %c0_50 = arith.constant 0 : index
    %c2_51 = arith.constant 2 : index
    %c2_52 = arith.constant 2 : index
    %c0_53 = arith.constant 0 : index
    %c0_54 = arith.constant 0 : index
    %58 = vector.load %arg5[%c0_50, %c2_51, %c2_52, %c0_53, %c0_54] : memref<3x3x3x4x4xbf16, #tpu.memory_space<vmem>>, vector<1x1x1x4x4xbf16>
    %59 = vector.shape_cast %58 : vector<1x1x1x4x4xbf16> to vector<4x4xbf16>
    %cst_55 = arith.constant dense<0.000000e+00> : vector<64x4xf32>
    %60 = tpu.matmul %57, %59, %cst_55 {dimension_numbers = #tpu.dot_dimension_numbers<[1], [0], [0], [1], [0, 0, 1, 1], [], []>} : vector<64x4xbf16>, vector<4x4xbf16>, vector<64x4xf32> -> vector<64x4xf32>
    %61 = arith.addf %55, %60 : vector<64x4xf32>
    %c1_i32 = arith.constant 1 : i32
    %62 = arith.addi %arg1, %c1_i32 : i32
    %63 = arith.index_cast %62 : i32 to index
    %c0_56 = arith.constant 0 : index
    %c0_57 = arith.constant 0 : index
    %c0_58 = arith.constant 0 : index
    %64 = vector.load %arg8[%63, %c0_56, %c0_57, %c0_58] : memref<6x10x10x4xbf16, #tpu.memory_space<vmem>>, vector<1x10x10x4xbf16>
    %65 = vector.shape_cast %64 : vector<1x10x10x4xbf16> to vector<10x10x4xbf16>
    %66 = vector.extract_strided_slice %65 {offsets = [0, 0, 0], sizes = [8, 8, 4], strides = [1, 1, 1]} : vector<10x10x4xbf16> to vector<8x8x4xbf16>
    %67 = vector.shape_cast %66 : vector<8x8x4xbf16> to vector<64x4xbf16>
    %c1_59 = arith.constant 1 : index
    %c0_60 = arith.constant 0 : index
    %c0_61 = arith.constant 0 : index
    %c0_62 = arith.constant 0 : index
    %c0_63 = arith.constant 0 : index
    %68 = vector.load %arg5[%c1_59, %c0_60, %c0_61, %c0_62, %c0_63] : memref<3x3x3x4x4xbf16, #tpu.memory_space<vmem>>, vector<1x1x1x4x4xbf16>
    %69 = vector.shape_cast %68 : vector<1x1x1x4x4xbf16> to vector<4x4xbf16>
    %cst_64 = arith.constant dense<0.000000e+00> : vector<64x4xf32>
    %70 = tpu.matmul %67, %69, %cst_64 {dimension_numbers = #tpu.dot_dimension_numbers<[1], [0], [0], [1], [0, 0, 1, 1], [], []>} : vector<64x4xbf16>, vector<4x4xbf16>, vector<64x4xf32> -> vector<64x4xf32>
    %71 = arith.addf %61, %70 : vector<64x4xf32>
    %72 = vector.extract_strided_slice %65 {offsets = [0, 1, 0], sizes = [8, 8, 4], strides = [1, 1, 1]} : vector<10x10x4xbf16> to vector<8x8x4xbf16>
    %73 = vector.shape_cast %72 : vector<8x8x4xbf16> to vector<64x4xbf16>
    %c1_65 = arith.constant 1 : index
    %c0_66 = arith.constant 0 : index
    %c1_67 = arith.constant 1 : index
    %c0_68 = arith.constant 0 : index
    %c0_69 = arith.constant 0 : index
    %74 = vector.load %arg5[%c1_65, %c0_66, %c1_67, %c0_68, %c0_69] : memref<3x3x3x4x4xbf16, #tpu.memory_space<vmem>>, vector<1x1x1x4x4xbf16>
    %75 = vector.shape_cast %74 : vector<1x1x1x4x4xbf16> to vector<4x4xbf16>
    %cst_70 = arith.constant dense<0.000000e+00> : vector<64x4xf32>
    %76 = tpu.matmul %73, %75, %cst_70 {dimension_numbers = #tpu.dot_dimension_numbers<[1], [0], [0], [1], [0, 0, 1, 1], [], []>} : vector<64x4xbf16>, vector<4x4xbf16>, vector<64x4xf32> -> vector<64x4xf32>
    %77 = arith.addf %71, %76 : vector<64x4xf32>
    %78 = vector.extract_strided_slice %65 {offsets = [0, 2, 0], sizes = [8, 8, 4], strides = [1, 1, 1]} : vector<10x10x4xbf16> to vector<8x8x4xbf16>
    %79 = vector.shape_cast %78 : vector<8x8x4xbf16> to vector<64x4xbf16>
    %c1_71 = arith.constant 1 : index
    %c0_72 = arith.constant 0 : index
    %c2_73 = arith.constant 2 : index
    %c0_74 = arith.constant 0 : index
    %c0_75 = arith.constant 0 : index
    %80 = vector.load %arg5[%c1_71, %c0_72, %c2_73, %c0_74, %c0_75] : memref<3x3x3x4x4xbf16, #tpu.memory_space<vmem>>, vector<1x1x1x4x4xbf16>
    %81 = vector.shape_cast %80 : vector<1x1x1x4x4xbf16> to vector<4x4xbf16>
    %cst_76 = arith.constant dense<0.000000e+00> : vector<64x4xf32>
    %82 = tpu.matmul %79, %81, %cst_76 {dimension_numbers = #tpu.dot_dimension_numbers<[1], [0], [0], [1], [0, 0, 1, 1], [], []>} : vector<64x4xbf16>, vector<4x4xbf16>, vector<64x4xf32> -> vector<64x4xf32>
    %83 = arith.addf %77, %82 : vector<64x4xf32>
    %84 = vector.extract_strided_slice %65 {offsets = [1, 0, 0], sizes = [8, 8, 4], strides = [1, 1, 1]} : vector<10x10x4xbf16> to vector<8x8x4xbf16>
    %85 = vector.shape_cast %84 : vector<8x8x4xbf16> to vector<64x4xbf16>
    %c1_77 = arith.constant 1 : index
    %c1_78 = arith.constant 1 : index
    %c0_79 = arith.constant 0 : index
    %c0_80 = arith.constant 0 : index
    %c0_81 = arith.constant 0 : index
    %86 = vector.load %arg5[%c1_77, %c1_78, %c0_79, %c0_80, %c0_81] : memref<3x3x3x4x4xbf16, #tpu.memory_space<vmem>>, vector<1x1x1x4x4xbf16>
    %87 = vector.shape_cast %86 : vector<1x1x1x4x4xbf16> to vector<4x4xbf16>
    %cst_82 = arith.constant dense<0.000000e+00> : vector<64x4xf32>
    %88 = tpu.matmul %85, %87, %cst_82 {dimension_numbers = #tpu.dot_dimension_numbers<[1], [0], [0], [1], [0, 0, 1, 1], [], []>} : vector<64x4xbf16>, vector<4x4xbf16>, vector<64x4xf32> -> vector<64x4xf32>
    %89 = arith.addf %83, %88 : vector<64x4xf32>
    %90 = vector.extract_strided_slice %65 {offsets = [1, 1, 0], sizes = [8, 8, 4], strides = [1, 1, 1]} : vector<10x10x4xbf16> to vector<8x8x4xbf16>
    %91 = vector.shape_cast %90 : vector<8x8x4xbf16> to vector<64x4xbf16>
    %c1_83 = arith.constant 1 : index
    %c1_84 = arith.constant 1 : index
    %c1_85 = arith.constant 1 : index
    %c0_86 = arith.constant 0 : index
    %c0_87 = arith.constant 0 : index
    %92 = vector.load %arg5[%c1_83, %c1_84, %c1_85, %c0_86, %c0_87] : memref<3x3x3x4x4xbf16, #tpu.memory_space<vmem>>, vector<1x1x1x4x4xbf16>
    %93 = vector.shape_cast %92 : vector<1x1x1x4x4xbf16> to vector<4x4xbf16>
    %cst_88 = arith.constant dense<0.000000e+00> : vector<64x4xf32>
    %94 = tpu.matmul %91, %93, %cst_88 {dimension_numbers = #tpu.dot_dimension_numbers<[1], [0], [0], [1], [0, 0, 1, 1], [], []>} : vector<64x4xbf16>, vector<4x4xbf16>, vector<64x4xf32> -> vector<64x4xf32>
    %95 = arith.addf %89, %94 : vector<64x4xf32>
    %96 = vector.extract_strided_slice %65 {offsets = [1, 2, 0], sizes = [8, 8, 4], strides = [1, 1, 1]} : vector<10x10x4xbf16> to vector<8x8x4xbf16>
    %97 = vector.shape_cast %96 : vector<8x8x4xbf16> to vector<64x4xbf16>
    %c1_89 = arith.constant 1 : index
    %c1_90 = arith.constant 1 : index
    %c2_91 = arith.constant 2 : index
    %c0_92 = arith.constant 0 : index
    %c0_93 = arith.constant 0 : index
    %98 = vector.load %arg5[%c1_89, %c1_90, %c2_91, %c0_92, %c0_93] : memref<3x3x3x4x4xbf16, #tpu.memory_space<vmem>>, vector<1x1x1x4x4xbf16>
    %99 = vector.shape_cast %98 : vector<1x1x1x4x4xbf16> to vector<4x4xbf16>
    %cst_94 = arith.constant dense<0.000000e+00> : vector<64x4xf32>
    %100 = tpu.matmul %97, %99, %cst_94 {dimension_numbers = #tpu.dot_dimension_numbers<[1], [0], [0], [1], [0, 0, 1, 1], [], []>} : vector<64x4xbf16>, vector<4x4xbf16>, vector<64x4xf32> -> vector<64x4xf32>
    %101 = arith.addf %95, %100 : vector<64x4xf32>
    %102 = vector.extract_strided_slice %65 {offsets = [2, 0, 0], sizes = [8, 8, 4], strides = [1, 1, 1]} : vector<10x10x4xbf16> to vector<8x8x4xbf16>
    %103 = vector.shape_cast %102 : vector<8x8x4xbf16> to vector<64x4xbf16>
    %c1_95 = arith.constant 1 : index
    %c2_96 = arith.constant 2 : index
    %c0_97 = arith.constant 0 : index
    %c0_98 = arith.constant 0 : index
    %c0_99 = arith.constant 0 : index
    %104 = vector.load %arg5[%c1_95, %c2_96, %c0_97, %c0_98, %c0_99] : memref<3x3x3x4x4xbf16, #tpu.memory_space<vmem>>, vector<1x1x1x4x4xbf16>
    %105 = vector.shape_cast %104 : vector<1x1x1x4x4xbf16> to vector<4x4xbf16>
    %cst_100 = arith.constant dense<0.000000e+00> : vector<64x4xf32>
    %106 = tpu.matmul %103, %105, %cst_100 {dimension_numbers = #tpu.dot_dimension_numbers<[1], [0], [0], [1], [0, 0, 1, 1], [], []>} : vector<64x4xbf16>, vector<4x4xbf16>, vector<64x4xf32> -> vector<64x4xf32>
    %107 = arith.addf %101, %106 : vector<64x4xf32>
    %108 = vector.extract_strided_slice %65 {offsets = [2, 1, 0], sizes = [8, 8, 4], strides = [1, 1, 1]} : vector<10x10x4xbf16> to vector<8x8x4xbf16>
    %109 = vector.shape_cast %108 : vector<8x8x4xbf16> to vector<64x4xbf16>
    %c1_101 = arith.constant 1 : index
    %c2_102 = arith.constant 2 : index
    %c1_103 = arith.constant 1 : index
    %c0_104 = arith.constant 0 : index
    %c0_105 = arith.constant 0 : index
    %110 = vector.load %arg5[%c1_101, %c2_102, %c1_103, %c0_104, %c0_105] : memref<3x3x3x4x4xbf16, #tpu.memory_space<vmem>>, vector<1x1x1x4x4xbf16>
    %111 = vector.shape_cast %110 : vector<1x1x1x4x4xbf16> to vector<4x4xbf16>
    %cst_106 = arith.constant dense<0.000000e+00> : vector<64x4xf32>
    %112 = tpu.matmul %109, %111, %cst_106 {dimension_numbers = #tpu.dot_dimension_numbers<[1], [0], [0], [1], [0, 0, 1, 1], [], []>} : vector<64x4xbf16>, vector<4x4xbf16>, vector<64x4xf32> -> vector<64x4xf32>
    %113 = arith.addf %107, %112 : vector<64x4xf32>
    %114 = vector.extract_strided_slice %65 {offsets = [2, 2, 0], sizes = [8, 8, 4], strides = [1, 1, 1]} : vector<10x10x4xbf16> to vector<8x8x4xbf16>
    %115 = vector.shape_cast %114 : vector<8x8x4xbf16> to vector<64x4xbf16>
    %c1_107 = arith.constant 1 : index
    %c2_108 = arith.constant 2 : index
    %c2_109 = arith.constant 2 : index
    %c0_110 = arith.constant 0 : index
    %c0_111 = arith.constant 0 : index
    %116 = vector.load %arg5[%c1_107, %c2_108, %c2_109, %c0_110, %c0_111] : memref<3x3x3x4x4xbf16, #tpu.memory_space<vmem>>, vector<1x1x1x4x4xbf16>
    %117 = vector.shape_cast %116 : vector<1x1x1x4x4xbf16> to vector<4x4xbf16>
    %cst_112 = arith.constant dense<0.000000e+00> : vector<64x4xf32>
    %118 = tpu.matmul %115, %117, %cst_112 {dimension_numbers = #tpu.dot_dimension_numbers<[1], [0], [0], [1], [0, 0, 1, 1], [], []>} : vector<64x4xbf16>, vector<4x4xbf16>, vector<64x4xf32> -> vector<64x4xf32>
    %119 = arith.addf %113, %118 : vector<64x4xf32>
    %c2_i32 = arith.constant 2 : i32
    %120 = arith.addi %arg1, %c2_i32 : i32
    %121 = arith.index_cast %120 : i32 to index
    %c0_113 = arith.constant 0 : index
    %c0_114 = arith.constant 0 : index
    %c0_115 = arith.constant 0 : index
    %122 = vector.load %arg8[%121, %c0_113, %c0_114, %c0_115] : memref<6x10x10x4xbf16, #tpu.memory_space<vmem>>, vector<1x10x10x4xbf16>
    %123 = vector.shape_cast %122 : vector<1x10x10x4xbf16> to vector<10x10x4xbf16>
    %124 = vector.extract_strided_slice %123 {offsets = [0, 0, 0], sizes = [8, 8, 4], strides = [1, 1, 1]} : vector<10x10x4xbf16> to vector<8x8x4xbf16>
    %125 = vector.shape_cast %124 : vector<8x8x4xbf16> to vector<64x4xbf16>
    %c2_116 = arith.constant 2 : index
    %c0_117 = arith.constant 0 : index
    %c0_118 = arith.constant 0 : index
    %c0_119 = arith.constant 0 : index
    %c0_120 = arith.constant 0 : index
    %126 = vector.load %arg5[%c2_116, %c0_117, %c0_118, %c0_119, %c0_120] : memref<3x3x3x4x4xbf16, #tpu.memory_space<vmem>>, vector<1x1x1x4x4xbf16>
    %127 = vector.shape_cast %126 : vector<1x1x1x4x4xbf16> to vector<4x4xbf16>
    %cst_121 = arith.constant dense<0.000000e+00> : vector<64x4xf32>
    %128 = tpu.matmul %125, %127, %cst_121 {dimension_numbers = #tpu.dot_dimension_numbers<[1], [0], [0], [1], [0, 0, 1, 1], [], []>} : vector<64x4xbf16>, vector<4x4xbf16>, vector<64x4xf32> -> vector<64x4xf32>
    %129 = arith.addf %119, %128 : vector<64x4xf32>
    %130 = vector.extract_strided_slice %123 {offsets = [0, 1, 0], sizes = [8, 8, 4], strides = [1, 1, 1]} : vector<10x10x4xbf16> to vector<8x8x4xbf16>
    %131 = vector.shape_cast %130 : vector<8x8x4xbf16> to vector<64x4xbf16>
    %c2_122 = arith.constant 2 : index
    %c0_123 = arith.constant 0 : index
    %c1_124 = arith.constant 1 : index
    %c0_125 = arith.constant 0 : index
    %c0_126 = arith.constant 0 : index
    %132 = vector.load %arg5[%c2_122, %c0_123, %c1_124, %c0_125, %c0_126] : memref<3x3x3x4x4xbf16, #tpu.memory_space<vmem>>, vector<1x1x1x4x4xbf16>
    %133 = vector.shape_cast %132 : vector<1x1x1x4x4xbf16> to vector<4x4xbf16>
    %cst_127 = arith.constant dense<0.000000e+00> : vector<64x4xf32>
    %134 = tpu.matmul %131, %133, %cst_127 {dimension_numbers = #tpu.dot_dimension_numbers<[1], [0], [0], [1], [0, 0, 1, 1], [], []>} : vector<64x4xbf16>, vector<4x4xbf16>, vector<64x4xf32> -> vector<64x4xf32>
    %135 = arith.addf %129, %134 : vector<64x4xf32>
    %136 = vector.extract_strided_slice %123 {offsets = [0, 2, 0], sizes = [8, 8, 4], strides = [1, 1, 1]} : vector<10x10x4xbf16> to vector<8x8x4xbf16>
    %137 = vector.shape_cast %136 : vector<8x8x4xbf16> to vector<64x4xbf16>
    %c2_128 = arith.constant 2 : index
    %c0_129 = arith.constant 0 : index
    %c2_130 = arith.constant 2 : index
    %c0_131 = arith.constant 0 : index
    %c0_132 = arith.constant 0 : index
    %138 = vector.load %arg5[%c2_128, %c0_129, %c2_130, %c0_131, %c0_132] : memref<3x3x3x4x4xbf16, #tpu.memory_space<vmem>>, vector<1x1x1x4x4xbf16>
    %139 = vector.shape_cast %138 : vector<1x1x1x4x4xbf16> to vector<4x4xbf16>
    %cst_133 = arith.constant dense<0.000000e+00> : vector<64x4xf32>
    %140 = tpu.matmul %137, %139, %cst_133 {dimension_numbers = #tpu.dot_dimension_numbers<[1], [0], [0], [1], [0, 0, 1, 1], [], []>} : vector<64x4xbf16>, vector<4x4xbf16>, vector<64x4xf32> -> vector<64x4xf32>
    %141 = arith.addf %135, %140 : vector<64x4xf32>
    %142 = vector.extract_strided_slice %123 {offsets = [1, 0, 0], sizes = [8, 8, 4], strides = [1, 1, 1]} : vector<10x10x4xbf16> to vector<8x8x4xbf16>
    %143 = vector.shape_cast %142 : vector<8x8x4xbf16> to vector<64x4xbf16>
    %c2_134 = arith.constant 2 : index
    %c1_135 = arith.constant 1 : index
    %c0_136 = arith.constant 0 : index
    %c0_137 = arith.constant 0 : index
    %c0_138 = arith.constant 0 : index
    %144 = vector.load %arg5[%c2_134, %c1_135, %c0_136, %c0_137, %c0_138] : memref<3x3x3x4x4xbf16, #tpu.memory_space<vmem>>, vector<1x1x1x4x4xbf16>
    %145 = vector.shape_cast %144 : vector<1x1x1x4x4xbf16> to vector<4x4xbf16>
    %cst_139 = arith.constant dense<0.000000e+00> : vector<64x4xf32>
    %146 = tpu.matmul %143, %145, %cst_139 {dimension_numbers = #tpu.dot_dimension_numbers<[1], [0], [0], [1], [0, 0, 1, 1], [], []>} : vector<64x4xbf16>, vector<4x4xbf16>, vector<64x4xf32> -> vector<64x4xf32>
    %147 = arith.addf %141, %146 : vector<64x4xf32>
    %148 = vector.extract_strided_slice %123 {offsets = [1, 1, 0], sizes = [8, 8, 4], strides = [1, 1, 1]} : vector<10x10x4xbf16> to vector<8x8x4xbf16>
    %149 = vector.shape_cast %148 : vector<8x8x4xbf16> to vector<64x4xbf16>
    %c2_140 = arith.constant 2 : index
    %c1_141 = arith.constant 1 : index
    %c1_142 = arith.constant 1 : index
    %c0_143 = arith.constant 0 : index
    %c0_144 = arith.constant 0 : index
    %150 = vector.load %arg5[%c2_140, %c1_141, %c1_142, %c0_143, %c0_144] : memref<3x3x3x4x4xbf16, #tpu.memory_space<vmem>>, vector<1x1x1x4x4xbf16>
    %151 = vector.shape_cast %150 : vector<1x1x1x4x4xbf16> to vector<4x4xbf16>
    %cst_145 = arith.constant dense<0.000000e+00> : vector<64x4xf32>
    %152 = tpu.matmul %149, %151, %cst_145 {dimension_numbers = #tpu.dot_dimension_numbers<[1], [0], [0], [1], [0, 0, 1, 1], [], []>} : vector<64x4xbf16>, vector<4x4xbf16>, vector<64x4xf32> -> vector<64x4xf32>
    %153 = arith.addf %147, %152 : vector<64x4xf32>
    %154 = vector.extract_strided_slice %123 {offsets = [1, 2, 0], sizes = [8, 8, 4], strides = [1, 1, 1]} : vector<10x10x4xbf16> to vector<8x8x4xbf16>
    %155 = vector.shape_cast %154 : vector<8x8x4xbf16> to vector<64x4xbf16>
    %c2_146 = arith.constant 2 : index
    %c1_147 = arith.constant 1 : index
    %c2_148 = arith.constant 2 : index
    %c0_149 = arith.constant 0 : index
    %c0_150 = arith.constant 0 : index
    %156 = vector.load %arg5[%c2_146, %c1_147, %c2_148, %c0_149, %c0_150] : memref<3x3x3x4x4xbf16, #tpu.memory_space<vmem>>, vector<1x1x1x4x4xbf16>
    %157 = vector.shape_cast %156 : vector<1x1x1x4x4xbf16> to vector<4x4xbf16>
    %cst_151 = arith.constant dense<0.000000e+00> : vector<64x4xf32>
    %158 = tpu.matmul %155, %157, %cst_151 {dimension_numbers = #tpu.dot_dimension_numbers<[1], [0], [0], [1], [0, 0, 1, 1], [], []>} : vector<64x4xbf16>, vector<4x4xbf16>, vector<64x4xf32> -> vector<64x4xf32>
    %159 = arith.addf %153, %158 : vector<64x4xf32>
    %160 = vector.extract_strided_slice %123 {offsets = [2, 0, 0], sizes = [8, 8, 4], strides = [1, 1, 1]} : vector<10x10x4xbf16> to vector<8x8x4xbf16>
    %161 = vector.shape_cast %160 : vector<8x8x4xbf16> to vector<64x4xbf16>
    %c2_152 = arith.constant 2 : index
    %c2_153 = arith.constant 2 : index
    %c0_154 = arith.constant 0 : index
    %c0_155 = arith.constant 0 : index
    %c0_156 = arith.constant 0 : index
    %162 = vector.load %arg5[%c2_152, %c2_153, %c0_154, %c0_155, %c0_156] : memref<3x3x3x4x4xbf16, #tpu.memory_space<vmem>>, vector<1x1x1x4x4xbf16>
    %163 = vector.shape_cast %162 : vector<1x1x1x4x4xbf16> to vector<4x4xbf16>
    %cst_157 = arith.constant dense<0.000000e+00> : vector<64x4xf32>
    %164 = tpu.matmul %161, %163, %cst_157 {dimension_numbers = #tpu.dot_dimension_numbers<[1], [0], [0], [1], [0, 0, 1, 1], [], []>} : vector<64x4xbf16>, vector<4x4xbf16>, vector<64x4xf32> -> vector<64x4xf32>
    %165 = arith.addf %159, %164 : vector<64x4xf32>
    %166 = vector.extract_strided_slice %123 {offsets = [2, 1, 0], sizes = [8, 8, 4], strides = [1, 1, 1]} : vector<10x10x4xbf16> to vector<8x8x4xbf16>
    %167 = vector.shape_cast %166 : vector<8x8x4xbf16> to vector<64x4xbf16>
    %c2_158 = arith.constant 2 : index
    %c2_159 = arith.constant 2 : index
    %c1_160 = arith.constant 1 : index
    %c0_161 = arith.constant 0 : index
    %c0_162 = arith.constant 0 : index
    %168 = vector.load %arg5[%c2_158, %c2_159, %c1_160, %c0_161, %c0_162] : memref<3x3x3x4x4xbf16, #tpu.memory_space<vmem>>, vector<1x1x1x4x4xbf16>
    %169 = vector.shape_cast %168 : vector<1x1x1x4x4xbf16> to vector<4x4xbf16>
    %cst_163 = arith.constant dense<0.000000e+00> : vector<64x4xf32>
    %170 = tpu.matmul %167, %169, %cst_163 {dimension_numbers = #tpu.dot_dimension_numbers<[1], [0], [0], [1], [0, 0, 1, 1], [], []>} : vector<64x4xbf16>, vector<4x4xbf16>, vector<64x4xf32> -> vector<64x4xf32>
    %171 = arith.addf %165, %170 : vector<64x4xf32>
    %172 = vector.extract_strided_slice %123 {offsets = [2, 2, 0], sizes = [8, 8, 4], strides = [1, 1, 1]} : vector<10x10x4xbf16> to vector<8x8x4xbf16>
    %173 = vector.shape_cast %172 : vector<8x8x4xbf16> to vector<64x4xbf16>
    %c2_164 = arith.constant 2 : index
    %c2_165 = arith.constant 2 : index
    %c2_166 = arith.constant 2 : index
    %c0_167 = arith.constant 0 : index
    %c0_168 = arith.constant 0 : index
    %174 = vector.load %arg5[%c2_164, %c2_165, %c2_166, %c0_167, %c0_168] : memref<3x3x3x4x4xbf16, #tpu.memory_space<vmem>>, vector<1x1x1x4x4xbf16>
    %175 = vector.shape_cast %174 : vector<1x1x1x4x4xbf16> to vector<4x4xbf16>
    %cst_169 = arith.constant dense<0.000000e+00> : vector<64x4xf32>
    %176 = tpu.matmul %173, %175, %cst_169 {dimension_numbers = #tpu.dot_dimension_numbers<[1], [0], [0], [1], [0, 0, 1, 1], [], []>} : vector<64x4xbf16>, vector<4x4xbf16>, vector<64x4xf32> -> vector<64x4xf32>
    %177 = arith.addf %171, %176 : vector<64x4xf32>
    %c1_i32_170 = arith.constant 1 : i32
    %178 = arith.addi %arg1, %c1_i32_170 : i32
    %c0_171 = arith.constant 0 : index
    %179 = arith.index_cast %178 : i32 to index
    %c0_172 = arith.constant 0 : index
    %c0_173 = arith.constant 0 : index
    %c0_174 = arith.constant 0 : index
    %180 = vector.load %arg2[%c0_171, %179, %c0_172, %c0_173, %c0_174] : memref<1x6x10x10x4xbf16, #tpu.memory_space<vmem>>, vector<1x1x10x10x4xbf16>
    %181 = vector.shape_cast %180 : vector<1x1x10x10x4xbf16> to vector<10x10x4xbf16>
    %182 = vector.extract_strided_slice %181 {offsets = [1, 1, 0], sizes = [8, 8, 4], strides = [1, 1, 1]} : vector<10x10x4xbf16> to vector<8x8x4xbf16>
    %183 = vector.shape_cast %182 : vector<8x8x4xbf16> to vector<64x4xbf16>
    %c0_175 = arith.constant 0 : index
    %c0_176 = arith.constant 0 : index
    %184 = vector.load %arg6[%c0_175, %c0_176] : memref<1x4xf32, #tpu.memory_space<vmem>>, vector<1x4xf32>
    %185 = vector.broadcast %184 : vector<1x4xf32> to vector<64x4xf32>
    %186 = arith.addf %177, %185 : vector<64x4xf32>
    %187 = arith.extf %183 : vector<64x4xbf16> to vector<64x4xf32>
    %188 = arith.addf %186, %187 : vector<64x4xf32>
    %cst_177 = arith.constant 0.000000e+00 : f32
    %189 = vector.broadcast %cst_177 : f32 to vector<64x4xf32>
    %190 = arith.maximumf %188, %189 : vector<64x4xf32>
    %191 = vector.shape_cast %190 : vector<64x4xf32> to vector<8x8x4xf32>
    %c0_178 = arith.constant 0 : index
    %c0_179 = arith.constant 0 : index
    %c0_180 = arith.constant 0 : index
    %c0_181 = arith.constant 0 : index
    %c0_182 = arith.constant 0 : index
    %192 = vector.load %arg7[%c0_178, %c0_179, %c0_180, %c0_181, %c0_182] : memref<1x1x8x8x4xf32, #tpu.memory_space<vmem>>, vector<1x1x8x8x4xf32>
    %193 = vector.shape_cast %192 : vector<1x1x8x8x4xf32> to vector<8x8x4xf32>
    %194 = vector.shape_cast %191 : vector<8x8x4xf32> to vector<1x1x8x8x4xf32>
    tpu.vector_store %arg7[%c0_178, %c0_179, %c0_180, %c0_181, %c0_182], %194 {strides = array<i32>} : memref<1x1x8x8x4xf32, #tpu.memory_space<vmem>>, vector<1x1x8x8x4xf32>,
    return
  }
  func.func @transform_0(%arg0: i32, %arg1: i32) -> (i32, i32, i32, i32, i32) {
    %c0_i32 = arith.constant 0 : i32
    %c0_i32_0 = arith.constant 0 : i32
    %c0_i32_1 = arith.constant 0 : i32
    %c0_i32_2 = arith.constant 0 : i32
    %c0_i32_3 = arith.constant 0 : i32
    return %arg0, %c0_i32, %c0_i32_0, %c0_i32_1, %c0_i32_2 : i32, i32, i32, i32, i32
  }
  func.func @transform_1(%arg0: i32, %arg1: i32) -> (i32, i32, i32, i32, i32) {
    %c0_i32 = arith.constant 0 : i32
    %c0_i32_0 = arith.constant 0 : i32
    %c0_i32_1 = arith.constant 0 : i32
    %c0_i32_2 = arith.constant 0 : i32
    %c0_i32_3 = arith.constant 0 : i32
    %c0_i32_4 = arith.constant 0 : i32
    return %c0_i32, %c0_i32_0, %c0_i32_1, %c0_i32_2, %c0_i32_3 : i32, i32, i32, i32, i32
  }
  func.func @transform_2(%arg0: i32, %arg1: i32) -> (i32, i32) {
    %c0_i32 = arith.constant 0 : i32
    %c0_i32_0 = arith.constant 0 : i32
    %c0_i32_1 = arith.constant 0 : i32
    return %c0_i32, %c0_i32_0 : i32, i32
  }
  func.func @transform_3(%arg0: i32, %arg1: i32) -> (i32, i32, i32, i32, i32) {
    %c0_i32 = arith.constant 0 : i32
    %c0_i32_0 = arith.constant 0 : i32
    %c0_i32_1 = arith.constant 0 : i32
    %c0_i32_2 = arith.constant 0 : i32
    %c0_i32_3 = arith.constant 0 : i32
    %c0_i32_4 = arith.constant 0 : i32
    return %c0_i32, %c0_i32_0, %c0_i32_1, %c0_i32_2, %c0_i32_3 : i32, i32, i32, i32, i32
  }
  func.func @transform_4(%arg0: i32, %arg1: i32) -> (i32, i32) {
    %c0_i32 = arith.constant 0 : i32
    %c0_i32_0 = arith.constant 0 : i32
    %c0_i32_1 = arith.constant 0 : i32
    return %c0_i32, %c0_i32_0 : i32, i32
  }
  func.func @transform_5(%arg0: i32, %arg1: i32) -> (i32, i32, i32, i32, i32) {
    %c0_i32 = arith.constant 0 : i32
    %c0_i32_0 = arith.constant 0 : i32
    %c0_i32_1 = arith.constant 0 : i32
    %c0_i32_2 = arith.constant 0 : i32
    return %arg0, %arg1, %c0_i32, %c0_i32_0, %c0_i32_1 : i32, i32, i32, i32, i32
  }
}

</mosaic_0001>

<bundles_post_ra>
// kernel: tpu_custom_call.1
= control target key start
LH: loop header
LB: loop body
LE: loop exit
PB: predicated region body
PF: predicated region fallthrough
CT: control target
= control target key end

     0   :  { %s22207_s18 = smov 0   ;;  %s22209_s19 = smov 0   ;;  %s28386_s0 = inlined_call_operand.vmem [shape: bf16[2,6,10,10,4], index: 0, kind: input, shape index: {}]   ;;  %s28387_s1 = inlined_call_operand.vmem [shape: bf16[3,3,3,4,4], index: 1, kind: input, shape index: {}]   ;;  %s28388_s2 = inlined_call_operand.vmem [shape: f32[1,4], index: 2, kind: input, shape index: {}]   ;;  %s28389_s3 = inlined_call_operand.vmem [shape: bf16[3,3,3,4,4], index: 3, kind: input, shape index: {}]   ;;  %s28390_s4 = inlined_call_operand.vmem [shape: f32[1,4], index: 4, kind: input, shape index: {}]   ;;  %s28391_s5 = inlined_call_operand.vmem [shape: f32[2,4,8,8,4], index: 5, kind: output, shape index: {}]  }
   0x1   :  { %s22211_s20 = smov 0   ;;  %s22213_s21 = smov 0  }
   0x2   :  { %s22215_s22 = smov 0  }
   0x3 LB: > { %s24_s23 = sadd.s32 1, %s22166_s20  ;;  %s27_s24 = sadd.s32 1, %s22170_s21  ;;  %s22174_s22 = sphi %s22215_s22, %s15_s22   ;;  %s22170_s21 = sphi %s22213_s21, %s28884_s21   ;;  %s22166_s20 = sphi %s22211_s20, %s28883_s20   ;;  %s22162_s19 = sphi %s22209_s19, %s28882_s19   ;;  %s22158_s18 = sphi %s22207_s18, %s28881_s18  }
   0x4   : > { %p25_p0 = scmp.ge.s32.totalorder %s24_s23, 4  ;;  %p17171_p1 = scmp.ge.s32.totalorder %s22174_s22, 1 }
   0x5   : > { %p201_p2 = scmp.lt.s32.totalorder %s22174_s22, 9 }
   0x6   : > { %s28886_s23 = smov (%p25_p0, %s24_s23), 0  ;;  %s28888_s24 = smov (!%p25_p0, %s27_s24), %s22170_s21 }
   0x7   : > { %p202_p3 = pnand %p17171_p1, %p201_p2  ;;  %p29_p4 = scmp.ge.s32.totalorder %s28888_s24, 2 }
   0x9   : > { %s28890_s24 = smov (%p29_p4, %s28888_s24), 0  ;;  %205 = sbr.rel (%p202_p3) target bundleno = 1653 (0x675), region = 40 }
  0x10   : > { %p233_p5 = scmp.lt.s32.totalorder %s22162_s19, 1  ;;  %p240_p6 = scmp.lt.s32.totalorder %s22158_s18, 3 }
  0x11   : > { %p17176_p7 = scmp.ne.s32.totalorder %s22158_s18, 0 }
  0x12   : > { %s28892_s19 = smov (!%p233_p5, %s22162_s19), 1 }
  0x13   : > { %s241_s25 = scalar_select %p240_p6, %s22158_s18, 3 }
  0x14   : > { %s21954_s26 = smul.u32 480, %s28892_s19  ;;  %s17174_s27 = sshll.u32 %s28892_s19, 5 }
  0x15   : > { %s17173_s28 = sshll.u32 %s241_s25, 3  ;;  %251 = sbr.rel (%p17176_p7) target bundleno = 1180 (0x49c), region = 44 }
  0x16   : > { %s22244_s6 = scalar_lea.vmem %s28386_s0, %s21954_s26  ;;  %s244_s7 = sadd.s32 %s17174_s27, %s17173_s28 }
  0x17   : > { %s17175_s8 = sshll.u32 %s244_s7, 3 }
  0x18   : > { %s22249_s11 = scalar_lea.vmem %s28391_s5, %s17175_s8 }
  0x1c   : > { %v17177_v0 = vld [vmem:[%s28387_s1 + $0x2] sm:$0x3]  ;;  %vm537_vm0 = vcmask 1041408   ;;  %v22266_v5 = vld [vmem:[%s22244_s6 + $0x4] sm:$0x1]  ;;  %v28562_v32 = vmov 0 }
  0x1d   : > { %v17491_v1 = vld [vmem:[%s28387_s1 + $0x2] sm:$0x3]  ;;  %21818 = vmatprep.subr.msk.bf16.mxu0 %vm537_vm0, %v17177_v0  ;;  %v539_v2 = vsel %vm537_vm0, %v17177_v0, 0  ;;  %v22269_v6 = vld [vmem:[%s22244_s6 + $0x8] sm:$0xf]  ;;  %v408_v15 = vshll.u32 %v22266_v5, 16 }
  0x1e   : > { %21845 = vmatprep.subr.msk.bf16.mxu1 %vm537_vm0, %v17491_v1  ;;  %v3896_v3 = vsel %vm537_vm0, %v17491_v1, 0  ;;  %v22263_v4 = vld [vmem:[%s22244_s6] sm:$0xf]  ;;  %19427 = vmatpush3.bf16.msra.mxu0 %v539_v2  ;;  %v22272_v7 = vld [vmem:[%s22244_s6 + $0x10] sm:$0xf]  ;;  %v413_v16 = vshrl.u32 %v22269_v6, 16 }
  0x1f   : > { %19697 = vmatpush3.bf16.msra.mxu1 %v3896_v3  ;;  %v22275_v8 = vld [vmem:[%s22244_s6 + $0xc] sm:$0x1]  ;;  %v22280_v10 = vld [vmem:[%s22244_s6 + $0x14] sm:$0x1]  ;;  %v22283_v11 = vld [vmem:[%s22244_s6 + $0x18] sm:$0xf] }
  0x20   : > { %v22286_v12 = vld [vmem:[%s22244_s6 + $0x1c] sm:$0x1]  ;;  %vm395_vm1 = vsmask.f32 3328  ;;  %v399_v13 = vshrl.u32 %v22263_v4, 16  ;;  %v402_v14 = vshll.u32 %v22263_v4, 16 }
  0x21   : > { %v416_v17 = vshll.u32 %v22269_v6, 16  ;;  %v422_v18 = vshll.u32 %v22275_v8, 16  ;;  %v427_v19 = vshrl.u32 %v22272_v7, 16  ;;  %v22298_v20 = vld [vmem:[%s28387_s1] sm:$0x3]  ;;  %v430_v23 = vshll.u32 %v22272_v7, 16 }
  0x22   : > { %vm396_vm2 = vsmask.f32 7440  ;;  %v401_v21 = vrot.slane %v399_v13, 4  ;;  %v404_v22 = vrot.slane %v402_v14, 5  ;;  %21819 = vmatprep.subr.msk.bf16.mxu0 %vm537_vm0, %v22298_v20  ;;  %v410_v24 = vrot.slane %v408_v15, 5 }
  0x23   : > { %v415_v25 = vrot.slane %v413_v16, 4  ;;  %v418_v26 = vrot.slane %v416_v17, 5  ;;  %v429_v27 = vrot.slane %v427_v19, 4  ;;  %v432_v29 = vrot.slane %v430_v23, 5  ;;  %vm22306_vm3 = vmor %vm395_vm1, %vm396_vm2  ;;  %v22313_v43 = vld [vmem:[%s22244_s6 + $0x20] sm:$0xf] }
  0x24   : > { %v405_v28 = vor.u32 %v404_v22, %v401_v21  ;;  %v436_v30 = vshll.u32 %v22280_v10, 16  ;;  %v441_v31 = vshrl.u32 %v22283_v11, 16  ;;  %v28563_v32 = vsel %vm22306_vm3, 4294967295, %v28562_v32  ;;  %v22323_v50 = vld [vmem:[%s22244_s6 + $0x50] sm:$0xf] }
  0x25   : > { %28564 = vst [vmem:[#allocation3_spill] sm:$0xff] %v28563_v32  ;;  %v419_v33 = vor.u32 %v418_v26, %v415_v25  ;;  %v424_v34 = vrot.slane %v422_v18, 5  ;;  %v444_v35 = vshll.u32 %v22283_v11, 16  ;;  %v450_v36 = vshll.u32 %v22286_v12, 16  ;;  %v22328_v51 = vld [vmem:[%s28387_s1] sm:$0x3] }
  0x26   : > { %v406_v37 = vrot.slane %v405_v28, 4  ;;  %v433_v38 = vor.u32 %v432_v29, %v429_v27  ;;  %v443_v39 = vrot.slane %v441_v31, 4  ;;  %v438_v41 = vrot.slane %v436_v30, 5  ;;  %21846 = vmatprep.subr.msk.bf16.mxu1 %vm537_vm0, %v22328_v51  ;;  %v22338_v55 = vld [vmem:[%s22244_s6 + $0x24] sm:$0x1] }
  0x27   : > { %v420_v40 = vrot.slane %v419_v33, 4  ;;  %v446_v42 = vrot.slane %v444_v35, 5  ;;  %v452_v48 = vrot.slane %v450_v36, 5  ;;  %vm524_vm4 = vcmask 31744   ;;  %v22343_v57 = vld [vmem:[%s22244_s6 + $0x54] sm:$0x1] }
  0x28   : > { %v411_v44 = vsel %vm22306_vm3, %v406_v37, %v410_v24  ;;  %v434_v45 = vrot.slane %v433_v38, 4  ;;  %v455_v54 = vshrl.u32 %v22313_v43, 16  ;;  %v458_v56 = vshll.u32 %v22313_v43, 16  ;;  %v22352_v60 = vld [vmem:[%s22244_s6 + $0x58] sm:$0xf] }
  0x29   : > { %v22319_v46 = vsel %vm22306_vm3, %v420_v40, %v424_v34  ;;  %v447_v47 = vor.u32 %v446_v42, %v443_v39  ;;  %v22355_v61 = vld [vmem:[%s22244_s6 + $0x5c] sm:$0x1]  ;;  %v3759_v62 = vshrl.u32 %v22323_v50, 16  ;;  %v3762_v63 = vshll.u32 %v22323_v50, 16  ;;  %v22364_v1 = vld [vmem:[%s22244_s6 + $0x60] sm:$0xf] }
  0x2a   : > { %v17178_v49 = vcombine.low %v411_v44, %v22319_v46  ;;  %v22332_v52 = vsel %vm22306_vm3, %v434_v45, %v438_v41  ;;  %v457_v2 = vrot.slane %v455_v54, 4  ;;  %v22367_v3 = vld [vmem:[%s22244_s6 + $0x64] sm:$0x1]  ;;  %v3768_v15 = vshll.u32 %v22343_v57, 16  ;;  %v22372_v17 = vld [vmem:[%s22244_s6 + $0x68] sm:$0xf] }
  0x2b   : > { %v448_v53 = vrot.slane %v447_v47, 4  ;;  %v3761_v13 = vrot.slane %v3759_v62, 4  ;;  %v3764_v14 = vrot.slane %v3762_v63, 5  ;;  %v464_v16 = vshll.u32 %v22338_v55, 16  ;;  %v22380_v23 = vld [vmem:[%s22244_s6 + $0x6c] sm:$0x1] }
  0x2c   : > { %19428 = vmatprep.mubr.msk.bf16.mxu0 %vm524_vm4, %v17178_v49  ;;  %v3773_v18 = vshrl.u32 %v22352_v60, 16  ;;  %v3776_v19 = vshll.u32 %v22352_v60, 16  ;;  %v3782_v21 = vshll.u32 %v22355_v61, 16  ;;  %v460_v22 = vrot.slane %v458_v56, 5  ;;  %v22384_v27 = vld [vmem:[%s22244_s6 + $0x70] sm:$0xf] }
  0x2d   : > { %v22347_v58 = vsel %vm22306_vm3, %v448_v53, %v452_v48  ;;  %v3765_v24 = vor.u32 %v3764_v14, %v3761_v13  ;;  %v3770_v25 = vrot.slane %v3768_v15, 5  ;;  %v3787_v26 = vshrl.u32 %v22364_v1, 16  ;;  %v22390_v37 = vld [vmem:[%s22244_s6 + $0x74] sm:$0x1] }
  0x2e   : > { %v22361_v0 = vcombine.low %v22332_v52, %v22347_v58  ;;  %v3775_v28 = vrot.slane %v3773_v18, 4  ;;  %v3778_v29 = vrot.slane %v3776_v19, 5  ;;  %v3784_v30 = vrot.slane %v3782_v21, 5  ;;  %v22405_v21 = vld [vmem:[%s22244_s6 + $0x28] sm:$0xf] }
  0x2f   : > { %v3790_v31 = vshll.u32 %v22364_v1, 16  ;;  %v3766_v33 = vrot.slane %v3765_v24, 4  ;;  %v3789_v34 = vrot.slane %v3787_v26, 4  ;;  %v3796_v35 = vshll.u32 %v22367_v3, 16 }
  0x30   : > { %28565 = vst [vmem:[#allocation4_spill] sm:$0xff] %v22361_v0  ;;  %19429 = vmatmul.mubr.msk.bf16.vlgmr.msra.gmra.mrb[0].mxu0 %vm524_vm4, %v22361_v0  ;;  %v3801_v36 = vshrl.u32 %v22372_v17, 16  ;;  %v3779_v38 = vor.u32 %v3778_v29, %v3775_v28  ;;  %v3804_v40 = vshll.u32 %v22372_v17, 16  ;;  %v3810_v41 = vshll.u32 %v22380_v23, 16  ;;  %v22414_v28 = vld [vmem:[%s28387_s1 + $0x4] sm:$0x3] }
  0x31   : > { %v3792_v39 = vrot.slane %v3790_v31, 5  ;;  %v461_v42 = vor.u32 %v460_v22, %v457_v2  ;;  %v3771_v44 = vsel %vm22306_vm3, %v3766_v33, %v3770_v25  ;;  %v3815_v47 = vshrl.u32 %v22384_v27, 16  ;;  %v22422_v33 = vld [vmem:[%s22244_s6 + $0x2c] sm:$0x1]  ;;  %v22492_v31 = vld [vmem:[%s22244_s6 + $0x88] sm:$0xf] }
  0x32   : > { %v3803_v45 = vrot.slane %v3801_v36, 4  ;;  %v3780_v48 = vrot.slane %v3779_v38, 4  ;;  %v3798_v53 = vrot.slane %v3796_v35, 5  ;;  %v3806_v54 = vrot.slane %v3804_v40, 5  ;;  %v22433_v38 = vld [vmem:[%s22244_s6 + $0x7c] sm:$0x1] }
  0x33   : > { %v3793_v49 = vor.u32 %v3792_v39, %v3789_v34  ;;  %v3817_v56 = vrot.slane %v3815_v47, 4  ;;  %v3818_v62 = vshll.u32 %v22384_v27, 16  ;;  %v3824_v63 = vshll.u32 %v22390_v37, 16  ;;  %v22425_v34 = vld [vmem:[%s22244_s6 + $0x78] sm:$0xf] }
  0x34   : > { %v22401_v13 = vsel %vm22306_vm3, %v3780_v48, %v3784_v30  ;;  %v3807_v14 = vor.u32 %v3806_v54, %v3803_v45  ;;  %v3812_v15 = vrot.slane %v3810_v41, 5  ;;  %v462_v22 = vrot.slane %v461_v42, 4  ;;  %v22436_v39 = vld [vmem:[%s22244_s6 + $0x30] sm:$0xf] }
  0x35   : > { %v3794_v2 = vrot.slane %v3793_v49, 4  ;;  %v3820_v18 = vrot.slane %v3818_v62, 5  ;;  %v17492_v19 = vcombine.low %v3771_v44, %v22401_v13  ;;  %v466_v24 = vrot.slane %v464_v16, 5  ;;  %v22446_v44 = vld [vmem:[%s22244_s6 + $0x34] sm:$0x1] }
  0x36   : > { %v3808_v26 = vrot.slane %v3807_v14, 4  ;;  %v3826_v30 = vrot.slane %v3824_v63, 5  ;;  %v639_v16 = vsel %vm537_vm0, %v22298_v20, 0  ;;  %v469_v36 = vshrl.u32 %v22405_v21, 16  ;;  %v22470_v63 = vld [vmem:[%s22244_s6 + $0x38] sm:$0xf] }
  0x37   : > { %v22409_v25 = vsel %vm22306_vm3, %v3794_v2, %v3798_v53  ;;  %v3821_v29 = vor.u32 %v3820_v18, %v3817_v56  ;;  %19698 = vmatprep.mubr.msk.bf16.mxu1 %vm524_vm4, %v17492_v19  ;;  %19437 = vmatpush3.bf16.msra.mxu0 %v639_v16  ;;  %v3996_v41 = vsel %vm537_vm0, %v22328_v51, 0  ;;  %v472_v42 = vshll.u32 %v22405_v21, 16  ;;  %v22459_v51 = vld [vmem:[%s28387_s1 + $0x4] sm:$0x3]  ;;  %v22475_v18 = vld [vmem:[%s22244_s6 + $0x3c] sm:$0x1] }
  0x38   : > { %v22429_v35 = vsel %vm22306_vm3, %v3808_v26, %v3812_v15  ;;  %21820 = vmatprep.subr.msk.bf16.mxu0 %vm537_vm0, %v22414_v28  ;;  %v22452_v45 = vsel %vm22306_vm3, %v462_v22, %v466_v24  ;;  %v471_v47 = vrot.slane %v469_v36, 4  ;;  %v478_v48 = vshll.u32 %v22422_v33, 16 }
  0x39   : > { %v3822_v40 = vrot.slane %v3821_v29, 4  ;;  %v22440_v20 = vcombine.low %v22409_v25, %v22429_v35  ;;  %v3829_v49 = vshrl.u32 %v22425_v34, 16  ;;  %v474_v54 = vrot.slane %v472_v42, 5 }
  0x3a   : > { %v3832_v56 = vshll.u32 %v22425_v34, 16  ;;  %v3838_v62 = vshll.u32 %v22433_v38, 16  ;;  %v480_v14 = vrot.slane %v478_v48, 5  ;;  %v483_v19 = vshrl.u32 %v22436_v39, 16 }
  0x3b   : > { %28566 = vst [vmem:[#allocation5_spill] sm:$0xff] %v22440_v20  ;;  %v22463_v53 = vsel %vm22306_vm3, %v3822_v40, %v3826_v30  ;;  %19699 = vmatmul.mubr.msk.bf16.vlgmr.msra.gmra.mrb[0].mxu1 %vm524_vm4, %v22440_v20  ;;  %v3831_v15 = vrot.slane %v3829_v49, 4  ;;  %v475_v22 = vor.u32 %v474_v54, %v471_v47  ;;  %v486_v29 = vshll.u32 %v22436_v39, 16  ;;  %v22480_v30 = vld [vmem:[%s22244_s6 + $0x80] sm:$0xf] }
  0x3c   : > { %28567 = vst [vmem:[#allocation6_spill] sm:$0xff] %v22463_v53  ;;  %19707 = vmatpush3.bf16.msra.mxu1 %v3996_v41  ;;  %v3834_v24 = vrot.slane %v3832_v56, 5  ;;  %v3840_v26 = vrot.slane %v3838_v62, 5  ;;  %v485_v16 = vrot.slane %v483_v19, 4  ;;  %v492_v36 = vshll.u32 %v22446_v44, 16 }
  0x3d   : > { %21847 = vmatprep.subr.msk.bf16.mxu1 %vm537_vm0, %v22459_v51  ;;  %v497_v40 = vshrl.u32 %v22470_v63, 16  ;;  %v500_v41 = vshll.u32 %v22470_v63, 16  ;;  %v476_v42 = vrot.slane %v475_v22, 4  ;;  %v488_v48 = vrot.slane %v486_v29, 5  ;;  %v22489_v54 = vld [vmem:[%s22244_s6 + $0x84] sm:$0x1] }
  0x3e   : > { %v3835_v47 = vor.u32 %v3834_v24, %v3831_v15  ;;  %v506_v49 = vshll.u32 %v22475_v18, 16  ;;  %v494_v56 = vrot.slane %v492_v36, 5  ;;  %v3843_v19 = vshrl.u32 %v22480_v30, 16  ;;  %v22504_v29 = vld [vmem:[%s22244_s6 + $0x8c] sm:$0x1] }
  0x3f   : > { %v499_v62 = vrot.slane %v497_v40, 4  ;;  %v502_v2 = vrot.slane %v500_v41, 5  ;;  %v22497_v59 = vsel %vm22306_vm3, %v476_v42, %v480_v14  ;;  %v489_v22 = vor.u32 %v488_v48, %v485_v16 }
  0x40   : > { %v3836_v9 = vrot.slane %v3835_v47, 4  ;;  %v508_v20 = vrot.slane %v506_v49, 5  ;;  %v22501_v15 = vcombine.low %v22452_v45, %v22497_v59  ;;  %v3845_v36 = vrot.slane %v3843_v19, 4 }
  0x41   : > { %v503_v24 = vor.u32 %v502_v2, %v499_v62  ;;  %v3846_v40 = vshll.u32 %v22480_v30, 16  ;;  %v490_v0 = vrot.slane %v489_v22, 4  ;;  %v3852_v14 = vshll.u32 %v22489_v54, 16 }
  0x42   : > { %28568 = vst [vmem:[#allocation7_spill] sm:$0xff] %v22501_v15  ;;  %v22509_v41 = vsel %vm22306_vm3, %v3836_v9, %v3840_v26  ;;  %v3857_v16 = vshrl.u32 %v22492_v31, 16  ;;  %19432 = vmatprep.mubr.msk.bf16.mxu0 %vm524_vm4, %v22501_v15  ;;  %v3860_v48 = vshll.u32 %v22492_v31, 16  ;;  %v3866_v49 = vshll.u32 %v22504_v29, 16 }
  0x43   : > { %v22517_v2 = vcombine.low %v22463_v53, %v22509_v41  ;;  %v504_v42 = vrot.slane %v503_v24, 4  ;;  %v3848_v47 = vrot.slane %v3846_v40, 5  ;;  %v22522_v9 = vsel %vm22306_vm3, %v490_v0, %v494_v56 }
  0x44   : > { %v3859_v26 = vrot.slane %v3857_v16, 4  ;;  %v17186_v62 = vcombine.low %v22263_v4, %v22269_v6  ;;  %v3854_v24 = vrot.slane %v3852_v14, 5  ;;  %v3862_v40 = vrot.slane %v3860_v48, 5 }
  0x45   : > { %28569 = vst [vmem:[#allocation8_spill] sm:$0xff] %v22517_v2  ;;  %19702 = vmatprep.mubr.msk.bf16.mxu1 %vm524_vm4, %v22517_v2  ;;  %v22531_v19 = vsel %vm22306_vm3, %v504_v42, %v508_v20  ;;  %v3849_v22 = vor.u32 %v3848_v47, %v3845_v36  ;;  %v3868_v15 = vrot.slane %v3866_v49, 5  ;;  %v17500_v36 = vcombine.low %v22323_v50, %v22352_v60 }
  0x46   : > { %v22535_v0 = vcombine.low %v22522_v9, %v22531_v19  ;;  %v3863_v16 = vor.u32 %v3862_v40, %v3859_v26  ;;  %vm714_vm5 = vcmask 1042432   ;;  %vm715_vm6 = vcmask 1046532  }
  0x47   : > { %v3850_v56 = vrot.slane %v3849_v22, 4  ;;  %v22556_v42 = vcombine.low %v22272_v7, %v22283_v11  ;;  %v719_v47 = vrot.slane %v22266_v5, 5  ;;  %v22561_v48 = vcombine.low %v22313_v43, %v22405_v21  ;;  %vm22570_vm7 = vmor %vm714_vm5, %vm715_vm6  ;;  %v17211_v5 = vld [vmem:[%s28387_s1 + $0x6] sm:$0x3] }
  0x48   : > { %28570 = vst [vmem:[#allocation9_spill] sm:$0xff] %v22535_v0  ;;  %19433 = vmatmul.mubr.msk.bf16.gmra.mrb[4].mxu0 %vm524_vm4, %v22535_v0  ;;  %v3864_v53 = vrot.slane %v3863_v16, 4  ;;  %v17194_v26 = vrot.slane %v22263_v4, 9  ;;  %v17195_v49 = vrot.slane %v22269_v6, 9  ;;  %v4073_v4 = vrot.slane %v22343_v57, 5 }
  0x49   : > { %v22541_v2 = vsel %vm22306_vm3, %v3850_v56, %v3854_v24  ;;  %19438 = vmatprep.mubr.msk.bf16.mxu0 %vm524_vm4, %v17186_v62  ;;  %v28572_v62 = vmov 0  ;;  %v22587_v22 = vcombine.low %v22364_v1, %v22372_v17  ;;  %v22599_v56 = vcombine.low %v22384_v27, %v22425_v34 }
  0x4a   : > { %v22546_v20 = vsel %vm22306_vm3, %v3864_v53, %v3868_v15  ;;  %v723_v53 = vrot.slane %v22275_v8, 5  ;;  %v776_v15 = vsel %vm537_vm0, %v22414_v28, 0  ;;  %v28573_v62 = vsel %vm22570_vm7, 4294967295, %v28572_v62 }
  0x4b   : > { %v22552_v14 = vcombine.low %v22541_v2, %v22546_v20  ;;  %28574 = vst [vmem:[#allocation11_spill] sm:$0xff] %v28573_v62  ;;  %v17196_v8 = vrot.slane %v22272_v7, 9  ;;  %v727_v28 = vrot.slane %v22280_v10, 5  ;;  %v720_v24 = vsel %vm22570_vm7, %v17194_v26, %v719_v47  ;;  %28575 = vst [vmem:[#allocation12_spill] sm:$0xff] %v22599_v56  ;;  %v17525_v26 = vld [vmem:[%s28387_s1 + $0x6] sm:$0x3] }
  0x4c   : > { %v22593_v40 = vsel %vm22570_vm7, %v17195_v49, %v723_v53  ;;  %v4077_v10 = vrot.slane %v22355_v61, 5  ;;  %v17508_v57 = vrot.slane %v22323_v50, 9  ;;  %v17509_v16 = vrot.slane %v22352_v60, 9 }
  0x4d   : > { %28571 = vst [vmem:[#allocation10_spill] sm:$0xff] %v22552_v14  ;;  %19703 = vmatmul.mubr.msk.bf16.gmra.mrb[4].mxu1 %vm524_vm4, %v22552_v14  ;;  %v731_v47 = vrot.slane %v22286_v12, 5  ;;  %v4129_v53 = vsel %vm537_vm0, %v22459_v51, 0  ;;  %v17203_v61 = vcombine.low %v720_v24, %v22593_v40  ;;  %v17198_v50 = vrot.slane %v22313_v43, 9 }
  0x4e   : > { %19708 = vmatprep.mubr.msk.bf16.mxu1 %vm524_vm4, %v17500_v36  ;;  %v17197_v36 = vrot.slane %v22283_v11, 9  ;;  %v735_v12 = vrot.slane %v22338_v55, 5  ;;  %v17199_v49 = vrot.slane %v22405_v21, 9  ;;  %v739_v51 = vrot.slane %v22422_v33, 5 }
  0x4f   : > { %v4074_v24 = vsel %vm22570_vm7, %v17508_v57, %v4073_v4  ;;  %v22627_v14 = vsel %vm22570_vm7, %v17509_v16, %v4077_v10  ;;  %v22631_v0 = vsel %vm22570_vm7, %v17196_v8, %v727_v28  ;;  %v17510_v33 = vrot.slane %v22364_v1, 9 }
  0x50   : > { %19439 = vmatmul.mubr.msk.bf16.vlgmr.msra.gmra.mrb[0].mxu0 %vm524_vm4, %v22556_v42  ;;  %v22635_v55 = vsel %vm22570_vm7, %v17197_v36, %v731_v47  ;;  %v4081_v4 = vrot.slane %v22367_v3, 5  ;;  %v17511_v10 = vrot.slane %v22372_v17, 9  ;;  %v4085_v57 = vrot.slane %v22380_v23, 5 }
  0x51   : > { %19447 = vmatpush3.bf16.msra.mxu0 %v776_v15  ;;  %19442 = vmatprep.mubr.msk.bf16.mxu0 %vm524_vm4, %v22561_v48  ;;  %v22609_v15 = vcombine.low %v22436_v39, %v22470_v63  ;;  %v22647_v8 = vcombine.low %v22480_v30, %v22492_v31  ;;  %v17517_v28 = vcombine.low %v4074_v24, %v22627_v14  ;;  %v17512_v3 = vrot.slane %v22384_v27, 9 }
  0x52   : > { %21821 = vmatprep.subr.msk.bf16.mxu0 %vm537_vm0, %v17211_v5  ;;  %v22652_v16 = vsel %vm22570_vm7, %v17198_v50, %v735_v12  ;;  %v22656_v36 = vsel %vm22570_vm7, %v17199_v49, %v739_v51  ;;  %v4089_v23 = vrot.slane %v22390_v37, 5  ;;  %v17513_v47 = vrot.slane %v22425_v34, 9 }
  0x53   : > { %v17200_v24 = vrot.slane %v22436_v39, 9  ;;  %v22669_v50 = vcombine.low %v22652_v16, %v22656_v36  ;;  %v743_v12 = vrot.slane %v22446_v44, 5  ;;  %v17201_v49 = vrot.slane %v22470_v63, 9 }
  0x54   : > { %v747_v37 = vrot.slane %v22475_v18, 5  ;;  %v22679_v51 = vsel %vm22570_vm7, %v17510_v33, %v4081_v4  ;;  %v22688_v44 = vsel %vm22570_vm7, %v17512_v3, %v4089_v23  ;;  %v4097_v3 = vrot.slane %v22489_v54, 5 }
  0x55   : > { %19709 = vmatmul.mubr.msk.bf16.vlgmr.msra.gmra.mrb[0].mxu1 %vm524_vm4, %v22587_v22  ;;  %v22703_v33 = vsel %vm22570_vm7, %v17200_v24, %v743_v12  ;;  %v17515_v23 = vrot.slane %v22492_v31, 9  ;;  %v17534_v12 = vld [vmem:[%s28387_s1 + $0x8] sm:$0x3]  ;;  %vm252_vm8 = vcmask 27648   ;;  %vm254_vm9 = vcmask 24576  }
  0x56   : > { %19717 = vmatpush3.bf16.msra.mxu1 %v4129_v53  ;;  %19712 = vmatprep.mubr.msk.bf16.mxu1 %vm524_vm4, %v22599_v56  ;;  %v4093_v53 = vrot.slane %v22433_v38, 5  ;;  %v872_v38 = vsel %vm537_vm0, %v17211_v5, 0  ;;  %v22683_v56 = vsel %vm22570_vm7, %v17511_v10, %v4085_v57  ;;  %v17220_v5 = vld [vmem:[%s28387_s1 + $0x8] sm:$0x3]  ;;  %v22707_v4 = vsel %vm22570_vm7, %v17201_v49, %v747_v37 }
  0x57   : > { %21848 = vmatprep.subr.msk.bf16.mxu1 %vm537_vm0, %v17525_v26  ;;  %v22711_v10 = vcombine.low %v22679_v51, %v22683_v56  ;;  %v22725_v24 = vcombine.low %v22703_v33, %v22707_v4  ;;  %v17526_v37 = vcombine.low %v22352_v60, %v22364_v1  ;;  %v22768_v60 = vld [vmem:[%s22244_s6 + $0x40] sm:$0xf]  ;;  %v17527_v1 = vcombine.low %v22372_v17, %v22384_v27  ;;  %v22786_v17 = vld [vmem:[%s22244_s6 + $0x90] sm:$0xf]  ;;  %v391_v27 = vld [vmem:[%s22244_s6 + $0x44] sm:$0x1] }
  0x58   : > { %19443 = vmatmul.mubr.msk.bf16.gmra.mrb[4].mxu0 %vm524_vm4, %v22609_v15  ;;  %v22692_v18 = vsel %vm22570_vm7, %v17513_v47, %v4093_v53  ;;  %v4101_v47 = vrot.slane %v22504_v29, 5  ;;  %v4224_v53 = vsel %vm537_vm0, %v17525_v26, 0  ;;  %v28576_v26 = vcombine.low %v22269_v6, %v22272_v7  ;;  %v17230_v7 = vld [vmem:[%s28387_s1 + $0xa] sm:$0x3] }
  0x59   : > { %19448 = vmatprep.mubr.msk.bf16.mxu0 %vm524_vm4, %v17203_v61  ;;  %v22664_v61 = vcombine.low %v22631_v0, %v22635_v55  ;;  %v22715_v57 = vcombine.low %v22688_v44, %v22692_v18  ;;  %v981_v6 = vsel %vm537_vm0, %v17220_v5, 0  ;;  %vm3684_vm10 = vsmask.f32 7938 }
  0x5a   : > { %v22740_v29 = vsel %vm22570_vm7, %v17515_v23, %v4101_v47  ;;  %vm3690_vm11 = vsmask.f32 256  ;;  %vm26114_vm12 = vmand %vm252_vm8, %vm3684_vm10 }
  0x5b   : > { %vm26122_vm13 = vmand %vm254_vm9, %vm3690_vm11 }
  0x5d   : > { %19713 = vmatmul.mubr.msk.bf16.gmra.mrb[4].mxu1 %vm524_vm4, %v22647_v8 }
  0x5e   : > { %19718 = vmatprep.mubr.msk.bf16.mxu1 %vm524_vm4, %v17517_v28  ;;  %v17514_v28 = vrot.slane %v22480_v30, 9 }
  0x60   : > { %19449 = vmatmul.mubr.msk.bf16.vlgmr.msra.gmra.mrb[0].mxu0 %vm524_vm4, %v22664_v61  ;;  %v22736_v54 = vsel %vm22570_vm7, %v17514_v28, %v4097_v3  ;;  %v17214_v28 = vcombine.low %v22405_v21, %v22436_v39  ;;  %v17528_v21 = vcombine.low %v22425_v34, %v22480_v30  ;;  %v4332_v39 = vsel %vm537_vm0, %v17534_v12, 0  ;;  %v17544_v3 = vld [vmem:[%s28387_s1 + $0xa] sm:$0x3] }
  0x61   : > { %19457 = vmatpush3.bf16.msra.mxu0 %v872_v38  ;;  %19452 = vmatprep.mubr.msk.bf16.mxu0 %vm524_vm4, %v22669_v50  ;;  %v22751_v49 = vcombine.low %v22736_v54, %v22740_v29  ;;  %v17213_v38 = vcombine.low %v22283_v11, %v22313_v43  ;;  %v948_v11 = vshrl.u32 %v22768_v60, 16  ;;  %v951_v43 = vshll.u32 %v22768_v60, 16 }
  0x62   : > { %21822 = vmatprep.subr.msk.bf16.mxu0 %vm537_vm0, %v17220_v5  ;;  %v17215_v5 = vcombine.low %v22470_v63, %v22768_v60  ;;  %v4300_v34 = vshrl.u32 %v22786_v17, 16  ;;  %v4303_v30 = vshll.u32 %v22786_v17, 16  ;;  %v28577_v63 = vcombine.low %v22319_v46, %v22332_v52 }
  0x63   : > { %v950_v23 = vrot.slane %v948_v11, 4  ;;  %v953_v47 = vrot.slane %v951_v43, 5  ;;  %v17223_v11 = vcombine.low %v22497_v59, %v22522_v9  ;;  %v1081_v46 = vsel %vm537_vm0, %v17230_v7, 0 }
  0x64   : > { %v28578_v52 = vcombine.low %v22401_v13, %v22409_v25  ;;  %v17537_v13 = vcombine.low %v22509_v41, %v22541_v2  ;;  %v4431_v9 = vsel %vm537_vm0, %v17544_v3, 0 }
  0x65   : > { %19719 = vmatmul.mubr.msk.bf16.vlgmr.msra.gmra.mrb[0].mxu1 %vm524_vm4, %v22711_v10 }
  0x66   : > { %19727 = vmatpush3.bf16.msra.mxu1 %v4224_v53  ;;  %19722 = vmatprep.mubr.msk.bf16.mxu1 %vm524_vm4, %v22715_v57  ;;  %v954_v53 = vor.u32 %v953_v47, %v950_v23  ;;  %v28579_v23 = vld [vmem:[#allocation6_spill] sm:$0xff] }
  0x67   : > { %21849 = vmatprep.subr.msk.bf16.mxu1 %vm537_vm0, %v17534_v12  ;;  %v957_v12 = vshll.u32 %v391_v27, 16  ;;  %v28580_v47 = vcombine.low %v22429_v35, %v28579_v23  ;;  %v17545_v35 = vcombine.low %v22627_v14, %v22679_v51  ;;  %v17592_v23 = vld [vmem:[%s28387_s1 + $0x12] sm:$0x3] }
  0x68   : > { %19453 = vmatmul.mubr.msk.bf16.gmra.mrb[4].mxu0 %vm524_vm4, %v22725_v24  ;;  %v955_v43 = vrot.slane %v954_v53, 4  ;;  %v17489_v53 = vld [vmem:[%s22244_s6 + $0x98] sm:$0xf] }
  0x69   : > { %19458 = vmatprep.mubr.msk.bf16.mxu0 %vm524_vm4, %v28576_v26  ;;  %v17529_v26 = vcombine.low %v22492_v31, %v22786_v17 }
  0x6d   : > { %19723 = vmatmul.mubr.msk.bf16.gmra.mrb[4].mxu1 %vm524_vm4, %v22751_v49 }
  0x6e   : > { %19728 = vmatprep.mubr.msk.bf16.mxu1 %vm524_vm4, %v17526_v37  ;;  %v4302_v37 = vrot.slane %v4300_v34, 4 }
  0x70   : > { %19459 = vmatmul.mubr.msk.bf16.vlgmr.msra.gmra.mrb[0].mxu0 %vm524_vm4, %v17213_v38  ;;  %v4305_v38 = vrot.slane %v4303_v30, 5  ;;  %v17559_v30 = vld [vmem:[%s28387_s1 + $0xe] sm:$0x3] }
  0x71   : > { %19467 = vmatpush3.bf16.msra.mxu0 %v981_v6  ;;  %19462 = vmatprep.mubr.msk.bf16.mxu0 %vm524_vm4, %v17214_v28  ;;  %v17222_v28 = vcombine.low %v22347_v58, %v22452_v45  ;;  %v17488_v6 = vld [vmem:[%s22244_s6 + $0x94] sm:$0x1]  ;;  %v17239_v58 = vld [vmem:[%s28387_s1 + $0xc] sm:$0x3] }
  0x72   : > { %21823 = vmatprep.subr.msk.bf16.mxu0 %vm537_vm0, %v17230_v7  ;;  %v4306_v31 = vor.u32 %v4305_v38, %v4302_v37  ;;  %v1165_v34 = vsel %vm537_vm0, %v17239_v58, 0  ;;  %v4410_v51 = vrot.slane %v17488_v6, 5  ;;  %v4590_v37 = vshrl.u32 %v17489_v53, 16 }
  0x73   : > { %v4593_v38 = vshll.u32 %v17489_v53, 16 }
  0x74   : > { %v4307_v25 = vrot.slane %v4306_v31, 4 }
  0x75   : > { %19729 = vmatmul.mubr.msk.bf16.vlgmr.msra.gmra.mrb[0].mxu1 %vm524_vm4, %v17527_v1  ;;  %v959_v1 = vrot.slane %v957_v12, 5 }
  0x76   : > { %19737 = vmatpush3.bf16.msra.mxu1 %v4332_v39  ;;  %19732 = vmatprep.mubr.msk.bf16.mxu1 %vm524_vm4, %v17528_v21  ;;  %v4309_v21 = vshll.u32 %v17488_v6, 16  ;;  %v17231_v39 = vcombine.low %v22593_v40, %v22631_v0  ;;  %v17233_v0 = vcombine.low %v22656_v36, %v22703_v33  ;;  %v17229_v40 = vrot.slane %v22768_v60, 9 }
  0x77   : > { %21850 = vmatprep.subr.msk.bf16.mxu1 %vm537_vm0, %v17544_v3  ;;  %v22818_v59 = vsel %vm22306_vm3, %v955_v43, %v959_v1  ;;  %v1059_v3 = vrot.slane %v391_v27, 5  ;;  %v17543_v36 = vrot.slane %v22786_v17, 9  ;;  %v17554_v43 = vcombine.low %v22786_v17, %v17489_v53  ;;  %v28584_v17 = vld [vmem:[#allocation7_spill] sm:$0xff] }
  0x78   : > { %19463 = vmatmul.mubr.msk.bf16.gmra.mrb[4].mxu0 %vm524_vm4, %v17215_v5  ;;  %v4311_v45 = vrot.slane %v4309_v21, 5  ;;  %v17224_v7 = vcombine.low %v22531_v19, %v22818_v59  ;;  %v17553_v5 = vld [vmem:[%s28387_s1 + $0xc] sm:$0x3]  ;;  %v17232_v19 = vcombine.low %v22635_v55, %v22652_v16  ;;  %v17546_v55 = vcombine.low %v22683_v56, %v22688_v44 }
  0x79   : > { %19468 = vmatprep.mubr.msk.bf16.mxu0 %vm524_vm4, %v28577_v63  ;;  %v22862_v14 = vsel %vm22570_vm7, %v17229_v40, %v1059_v3  ;;  %v17547_v16 = vcombine.low %v22692_v18, %v22736_v54  ;;  %v4514_v33 = vsel %vm537_vm0, %v17553_v5, 0  ;;  %v22880_v56 = vsel %vm22570_vm7, %v17543_v36, %v4410_v51  ;;  %v22898_v54 = vld [vmem:[%s22244_s6 + $0x48] sm:$0xf]  ;;  %v22956_v36 = vld [vmem:[%s22244_s6 + $0xa0] sm:$0xf] }
  0x7a   : > { %v22838_v41 = vsel %vm22306_vm3, %v4307_v25, %v4311_v45  ;;  %v17234_v27 = vcombine.low %v22707_v4, %v22862_v14  ;;  %v17548_v44 = vcombine.low %v22740_v29, %v22880_v56  ;;  %v17252_v4 = vld [vmem:[%s28387_s1 + $0x10] sm:$0x3]  ;;  %v1244_v29 = vshll.u32 %v22898_v54, 16  ;;  %v28583_v25 = vld [vmem:[#allocation5_spill] sm:$0xff]  ;;  %v17278_v45 = vld [vmem:[%s28387_s1 + $0x12] sm:$0x3] }
  0x7b   : > { %v17538_v2 = vcombine.low %v22546_v20, %v22838_v41  ;;  %v17245_v20 = vld [vmem:[%s28387_s1 + $0xe] sm:$0x3]  ;;  %v17240_v63 = vcombine.low %v22768_v60, %v22898_v54  ;;  %v28582_v60 = vld [vmem:[#allocation4_spill] sm:$0xff]  ;;  %v4592_v1 = vrot.slane %v4590_v37, 4  ;;  %v17565_v40 = vrot.slane %v17489_v53, 9 }
  0x7c   : > { %v1262_v18 = vsel %vm537_vm0, %v17245_v20, 0  ;;  %v22986_v53 = vld [vmem:[%s22244_s6 + $0x54] sm:$0x1] }
  0x7d   : > { %19733 = vmatmul.mubr.msk.bf16.gmra.mrb[4].mxu1 %vm524_vm4, %v17529_v26  ;;  %v1246_v26 = vrot.slane %v1244_v29, 5  ;;  %v22981_v29 = vld [vmem:[%s22244_s6 + $0x60] sm:$0xf] }
  0x7e   : > { %19738 = vmatprep.mubr.msk.bf16.mxu1 %vm524_vm4, %v28578_v52  ;;  %v17490_v52 = vld [vmem:[%s22244_s6 + $0x9c] sm:$0x1] }
  0x7f   : > { %v4688_v3 = vrot.slane %v17490_v52, 5 }
  0x80   : > { %19469 = vmatmul.mubr.msk.bf16.vlgmr.msra.gmra.mrb[0].mxu0 %vm524_vm4, %v17222_v28  ;;  %v393_v28 = vld [vmem:[%s22244_s6 + $0x4c] sm:$0x1] }
  0x81   : > { %19477 = vmatpush3.bf16.msra.mxu0 %v1081_v46  ;;  %19472 = vmatprep.mubr.msk.bf16.mxu0 %vm524_vm4, %v17223_v11  ;;  %v1250_v11 = vshll.u32 %v393_v28, 16  ;;  %v4595_v46 = vrot.slane %v4593_v38, 5 }
  0x82   : > { %21824 = vmatprep.subr.msk.bf16.mxu0 %vm537_vm0, %v17239_v58 }
  0x83   : > { %v1252_v21 = vrot.slane %v1250_v11, 5  ;;  %v4596_v58 = vor.u32 %v4595_v46, %v4592_v1  ;;  %v23001_v11 = vld [vmem:[%s22244_s6 + $0xa4] sm:$0x1]  ;;  %v1588_v1 = vshll.u32 %v22981_v29, 16 }
  0x85   : > { %19739 = vmatmul.mubr.msk.bf16.vlgmr.msra.gmra.mrb[0].mxu1 %vm524_vm4, %v28580_v47 }
  0x86   : > { %19747 = vmatpush3.bf16.msra.mxu1 %v4431_v9  ;;  %19742 = vmatprep.mubr.msk.bf16.mxu1 %vm524_vm4, %v17537_v13  ;;  %v4599_v13 = vshll.u32 %v17490_v52, 16  ;;  %v28585_v9 = vld [vmem:[#allocation9_spill] sm:$0xff] }
  0x87   : > { %21851 = vmatprep.subr.msk.bf16.mxu1 %vm537_vm0, %v17553_v5 }
  0x88   : > { %19473 = vmatmul.mubr.msk.bf16.gmra.mrb[4].mxu0 %vm524_vm4, %v17224_v7  ;;  %v4601_v5 = vrot.slane %v4599_v13, 5  ;;  %v23017_v13 = vld [vmem:[%s22244_s6 + $0xb8] sm:$0xf] }
  0x89   : > { %19478 = vmatprep.mubr.msk.bf16.mxu0 %vm524_vm4, %v17231_v39  ;;  %v4597_v39 = vrot.slane %v4596_v58, 4 }
  0x8d   : > { %19743 = vmatmul.mubr.msk.bf16.gmra.mrb[4].mxu1 %vm524_vm4, %v17538_v2 }
  0x8e   : > { %19748 = vmatprep.mubr.msk.bf16.mxu1 %vm524_vm4, %v17545_v35  ;;  %v17251_v35 = vrot.slane %v22898_v54, 9 }
  0x90   : > { %19479 = vmatmul.mubr.msk.bf16.vlgmr.msra.gmra.mrb[0].mxu0 %vm524_vm4, %v17232_v19  ;;  %v1340_v19 = vrot.slane %v393_v28, 5  ;;  %v22993_v28 = vsel %vm537_vm0, %v17592_v23, 0 }
  0x91   : > { %19487 = vmatpush3.bf16.msra.mxu0 %v1165_v34  ;;  %19482 = vmatprep.mubr.msk.bf16.mxu0 %vm524_vm4, %v17233_v0  ;;  %v22944_v0 = vld [vmem:[%s22244_s6 + $0x50] sm:$0xf]  ;;  %v22947_v34 = vld [vmem:[%s22244_s6 + $0x58] sm:$0xf] }
  0x92   : > { %21825 = vmatprep.subr.msk.bf16.mxu0 %vm537_vm0, %v17245_v20  ;;  %v1557_v20 = vshrl.u32 %v22944_v0, 16  ;;  %v1571_v51 = vshrl.u32 %v22947_v34, 16 }
  0x95   : > { %19749 = vmatmul.mubr.msk.bf16.vlgmr.msra.gmra.mrb[0].mxu1 %vm524_vm4, %v17546_v55  ;;  %v28586_v55 = vld [vmem:[#allocation8_spill] sm:$0xff] }
  0x96   : > { %19757 = vmatpush3.bf16.msra.mxu1 %v4514_v33  ;;  %19752 = vmatprep.mubr.msk.bf16.mxu1 %vm524_vm4, %v17547_v16  ;;  %v4602_v16 = vsel %vm22306_vm3, %v4597_v39, %v4601_v5  ;;  %v1574_v33 = vshll.u32 %v22947_v34, 16  ;;  %v17601_v39 = vld [vmem:[%s28387_s1 + $0x14] sm:$0x3]  ;;  %v23030_v5 = vld [vmem:[%s22244_s6 + $0x70] sm:$0xf] }
  0x97   : > { %21852 = vmatprep.subr.msk.bf16.mxu1 %vm537_vm0, %v17559_v30 }
  0x98   : > { %19483 = vmatmul.mubr.msk.bf16.gmra.mrb[4].mxu0 %vm524_vm4, %v17234_v27  ;;  %v28587_v27 = vld [vmem:[#allocation10_spill] sm:$0xff] }
  0x99   : > { %19488 = vmatprep.mubr.msk.bf16.mxu0 %vm524_vm4, %v22556_v42  ;;  %v1241_v42 = vshrl.u32 %v22898_v54, 16  ;;  %v17560_v54 = vcombine.low %v22838_v41, %v4602_v16  ;;  %v1573_v41 = vrot.slane %v1571_v51, 4  ;;  %v23056_v16 = vld [vmem:[%s22244_s6 + $0x88] sm:$0xf]  ;;  %v1590_v51 = vrot.slane %v1588_v1, 5 }
  0x9a   : > { %28594 = vst [vmem:[#allocation8_spill] sm:$0xff] %v23056_v16 }
  0x9b   : > { %v1243_v12 = vrot.slane %v1241_v42, 4  ;;  %v22978_v42 = vsel %vm22570_vm7, %v17565_v40, %v4688_v3  ;;  %v23047_v3 = vld [vmem:[%s22244_s6 + $0xc0] sm:$0xf] }
  0x9c   : > { %28591 = vst [vmem:[#allocation5_spill] sm:$0xff] %v23047_v3  ;;  %v4961_v52 = vshll.u32 %v23047_v3, 16 }
  0x9d   : > { %19753 = vmatmul.mubr.msk.bf16.gmra.mrb[4].mxu1 %vm524_vm4, %v17548_v44  ;;  %v1247_v6 = vor.u32 %v1246_v26, %v1243_v12  ;;  %v4905_v44 = vshll.u32 %v22956_v36, 16  ;;  %v1576_v26 = vrot.slane %v1574_v33, 5 }
  0x9e   : > { %19758 = vmatprep.mubr.msk.bf16.mxu1 %vm524_vm4, %v22587_v22  ;;  %v4610_v22 = vsel %vm537_vm0, %v17559_v30, 0  ;;  %v4902_v30 = vshrl.u32 %v22956_v36, 16 }
  0x9f   : > { %v1248_v31 = vrot.slane %v1247_v6, 4  ;;  %v4907_v38 = vrot.slane %v4905_v44, 5  ;;  %v17287_v6 = vld [vmem:[%s28387_s1 + $0x14] sm:$0x3] }
  0xa0   : > { %19489 = vmatmul.mubr.msk.bf16.vlgmr.msra.gmra.mrb[0].mxu0 %vm524_vm4, %v22561_v48  ;;  %v17566_v48 = vld [vmem:[%s28387_s1 + $0x10] sm:$0x3]  ;;  %v4904_v37 = vrot.slane %v4902_v30, 4 }
  0xa1   : > { %19497 = vmatpush3.bf16.msra.mxu0 %v1262_v18  ;;  %19492 = vmatprep.mubr.msk.bf16.mxu0 %vm524_vm4, %v22609_v15  ;;  %v28581_v15 = vld [vmem:[#allocation12_spill] sm:$0xff]  ;;  %v1253_v7 = vsel %vm22306_vm3, %v1248_v31, %v1252_v21  ;;  %v4697_v47 = vsel %vm537_vm0, %v17566_v48, 0  ;;  %v22968_v18 = vsel %vm22570_vm7, %v17251_v35, %v1340_v19  ;;  %v23010_v31 = vld [vmem:[%s22244_s6 + $0x68] sm:$0xf]  ;;  %v23013_v21 = vld [vmem:[%s22244_s6 + $0xb0] sm:$0xf] }
  0xa2   : > { %21826 = vmatprep.subr.msk.bf16.mxu0 %vm537_vm0, %v17252_v4  ;;  %v17246_v2 = vcombine.low %v22818_v59, %v1253_v7  ;;  %v1560_v59 = vshll.u32 %v22944_v0, 16  ;;  %v17253_v46 = vcombine.low %v22862_v14, %v22968_v18  ;;  %28588 = vst [vmem:[#allocation6_spill] sm:$0xff] %v23013_v21  ;;  %28589 = vst [vmem:[#allocation12_spill] sm:$0xff] %v23017_v13  ;;  %v23022_v7 = vld [vmem:[%s22244_s6 + $0xac] sm:$0x1]  ;;  %v1599_v35 = vshrl.u32 %v23010_v31, 16 }
  0xa3   : > { %v1602_v19 = vshll.u32 %v23010_v31, 16  ;;  %v23044_v40 = vcombine.low %v22981_v29, %v23010_v31  ;;  %v23065_v33 = vcombine.low %v23013_v21, %v23017_v13  ;;  %v4925_v44 = vshll.u32 %v23022_v7, 16 }
  0xa4   : > { %v1562_v12 = vrot.slane %v1560_v59, 5  ;;  %v1613_v18 = vshrl.u32 %v23030_v5, 16 }
  0xa5   : > { %19759 = vmatmul.mubr.msk.bf16.vlgmr.msra.gmra.mrb[0].mxu1 %vm524_vm4, %v28581_v15  ;;  %v22990_v15 = vld [vmem:[%s22244_s6 + $0x5c] sm:$0x1]  ;;  %28590 = vst [vmem:[#allocation4_spill] sm:$0xff] %v23044_v40  ;;  %28595 = vst [vmem:[#allocation10_spill] sm:$0xff] %v23065_v33 }
  0xa6   : > { %19767 = vmatpush3.bf16.msra.mxu1 %v4610_v22  ;;  %19762 = vmatprep.mubr.msk.bf16.mxu1 %vm524_vm4, %v22647_v8  ;;  %v1350_v8 = vsel %vm537_vm0, %v17252_v4, 0  ;;  %v22971_v4 = vld [vmem:[%s22244_s6 + $0xa8] sm:$0xf] }
  0xa7   : > { %21853 = vmatprep.subr.msk.bf16.mxu1 %vm537_vm0, %v17566_v48  ;;  %v4916_v22 = vshrl.u32 %v22971_v4, 16  ;;  %v1559_v48 = vrot.slane %v1557_v20, 4  ;;  %v23050_v20 = vld [vmem:[%s22244_s6 + $0xc8] sm:$0xf] }
  0xa8   : > { %19493 = vmatmul.mubr.msk.bf16.gmra.mrb[4].mxu0 %vm524_vm4, %v17240_v63  ;;  %v4919_v63 = vshll.u32 %v22971_v4, 16  ;;  %28592 = vst [vmem:[#allocation7_spill] sm:$0xff] %v23050_v20 }
  0xa9   : > { %19498 = vmatprep.mubr.msk.bf16.mxu0 %vm524_vm4, %v28582_v60  ;;  %v17279_v60 = vcombine.low %v22944_v0, %v22947_v34 }
  0xaa   : > { %v4921_v58 = vrot.slane %v4919_v63, 5 }
  0xad   : > { %19763 = vmatmul.mubr.msk.bf16.gmra.mrb[4].mxu1 %vm524_vm4, %v17554_v43  ;;  %v1585_v43 = vshrl.u32 %v22981_v29, 16 }
  0xae   : > { %19768 = vmatprep.mubr.msk.bf16.mxu1 %vm524_vm4, %v28583_v25  ;;  %v1563_v25 = vor.u32 %v1562_v12, %v1559_v48 }
  0xaf   : > { %v1587_v59 = vrot.slane %v1585_v43, 4  ;;  %v23082_v43 = vsel %vm537_vm0, %v17601_v39, 0 }
  0xb0   : > { %19499 = vmatmul.mubr.msk.bf16.vlgmr.msra.gmra.mrb[0].mxu0 %vm524_vm4, %v28584_v17  ;;  %v1577_v17 = vor.u32 %v1576_v26, %v1573_v41  ;;  %v1564_v63 = vrot.slane %v1563_v25, 4 }
  0xb1   : > { %19507 = vmatpush3.bf16.msra.mxu0 %v1350_v8  ;;  %19502 = vmatprep.mubr.msk.bf16.mxu0 %vm524_vm4, %v28585_v9  ;;  %v4918_v8 = vrot.slane %v4916_v22, 4  ;;  %v1580_v9 = vshll.u32 %v22990_v15, 16  ;;  %v23076_v22 = vld [vmem:[%s22244_s6 + $0xd8] sm:$0xf] }
  0xb2   : > { %21827 = vmatprep.subr.msk.bf16.mxu0 %vm537_vm0, %v17278_v45  ;;  %v1578_v48 = vrot.slane %v1577_v17, 4  ;;  %v4927_v17 = vrot.slane %v4925_v44, 5  ;;  %v4933_v44 = vshll.u32 %v23013_v21, 16 }
  0xb3   : > { %v4922_v30 = vor.u32 %v4921_v58, %v4918_v8  ;;  %v1582_v12 = vrot.slane %v1580_v9, 5  ;;  %v23091_v58 = vcombine.low %v23047_v3, %v23050_v20  ;;  %v23098_v9 = vld [vmem:[%s22244_s6 + $0xb4] sm:$0x1] }
  0xb4   : > { %28599 = vst [vmem:[#allocation16_spill] sm:$0xff] %v23098_v9 }
  0xb5   : > { %19769 = vmatmul.mubr.msk.bf16.vlgmr.msra.gmra.mrb[0].mxu1 %vm524_vm4, %v28586_v55  ;;  %v23053_v55 = vld [vmem:[%s22244_s6 + $0x80] sm:$0xf]  ;;  %28597 = vst [vmem:[#allocation14_spill] sm:$0xff] %v23091_v58 }
  0xb6   : > { %19777 = vmatpush3.bf16.msra.mxu1 %v4697_v47  ;;  %19772 = vmatprep.mubr.msk.bf16.mxu1 %vm524_vm4, %v28587_v27  ;;  %v4908_v47 = vor.u32 %v4907_v38, %v4904_v37  ;;  %28593 = vst [vmem:[#allocation9_spill] sm:$0xff] %v23053_v55  ;;  %v23068_v27 = vld [vmem:[%s22244_s6 + $0xd0] sm:$0xf]  ;;  %v1601_v37 = vrot.slane %v1599_v35, 4  ;;  %v1604_v38 = vrot.slane %v1602_v19, 5  ;;  %v23095_v25 = vcombine.low %v23053_v55, %v23056_v16 }
  0xb7   : > { %21854 = vmatprep.subr.msk.bf16.mxu1 %vm537_vm0, %v17592_v23  ;;  %v23033_v23 = vld [vmem:[%s22244_s6 + $0x78] sm:$0xf]  ;;  %v23110_v35 = vsel %vm22306_vm3, %v1578_v48, %v1582_v12 }
  0xb8   : > { %19503 = vmatmul.mubr.msk.bf16.gmra.mrb[4].mxu0 %vm524_vm4, %v17246_v2  ;;  %v4911_v2 = vshll.u32 %v23001_v11, 16  ;;  %v4909_v41 = vrot.slane %v4908_v47, 4  ;;  %v23086_v1 = vcombine.low %v23030_v5, %v23033_v23  ;;  %28598 = vst [vmem:[#allocation15_spill] sm:$0xff] %v23095_v25  ;;  %v23104_v47 = vcombine.low %v23068_v27, %v23076_v22  ;;  %28600 = vst [vmem:[#allocation17_spill] sm:$0xff] %v23110_v35 }
  0xb9   : > { %19508 = vmatprep.mubr.msk.bf16.mxu0 %vm524_vm4, %v22664_v61  ;;  %v1481_v61 = vsel %vm537_vm0, %v17278_v45, 0  ;;  %v1566_v45 = vshll.u32 %v22986_v53, 16 }
  0xba   : > { %v4913_v26 = vrot.slane %v4911_v2, 5  ;;  %28596 = vst [vmem:[#allocation13_spill] sm:$0xff] %v23086_v1 }
  0xbd   : > { %19773 = vmatmul.mubr.msk.bf16.gmra.mrb[4].mxu1 %vm524_vm4, %v17560_v54  ;;  %v23072_v54 = vld [vmem:[%s22244_s6 + $0x64] sm:$0x1] }
  0xbe   : > { %19778 = vmatprep.mubr.msk.bf16.mxu1 %vm524_vm4, %v22711_v10  ;;  %v1594_v8 = vshll.u32 %v23072_v54, 16  ;;  %v23164_v10 = vld [vmem:[%s22244_s6 + $0x74] sm:$0x1] }
  0xc0   : > { %19509 = vmatmul.mubr.msk.bf16.vlgmr.msra.gmra.mrb[0].mxu0 %vm524_vm4, %v22669_v50  ;;  %v23061_v50 = vsel %vm537_vm0, %v17287_v6, 0 }
  0xc1   : > { %19517 = vmatpush3.bf16.msra.mxu0 %v1481_v61  ;;  %19512 = vmatprep.mubr.msk.bf16.mxu0 %vm524_vm4, %v22725_v24  ;;  %v1568_v24 = vrot.slane %v1566_v45, 5  ;;  %v23079_v61 = vld [vmem:[%s22244_s6 + $0x6c] sm:$0x1]  ;;  %v4923_v45 = vrot.slane %v4922_v30, 4  ;;  %v4930_v30 = vshrl.u32 %v23013_v21, 16 }
  0xc2   : > { %21828 = vmatprep.subr.msk.bf16.mxu0 %vm537_vm0, %v17287_v6  ;;  %v1591_v6 = vor.u32 %v1590_v51, %v1587_v59  ;;  %v1608_v19 = vshll.u32 %v23079_v61, 16  ;;  %v4914_v59 = vsel %vm22306_vm3, %v4909_v41, %v4913_v26  ;;  %v1605_v51 = vor.u32 %v1604_v38, %v1601_v37  ;;  %v23219_v21 = vld [vmem:[%s22244_s6 + $0x8c] sm:$0x1] }
  0xc3   : > { %v1569_v2 = vsel %vm22306_vm3, %v1564_v63, %v1568_v24  ;;  %v4939_v63 = vshll.u32 %v23098_v9, 16  ;;  %v4944_v24 = vshrl.u32 %v23017_v13, 16  ;;  %v23139_v14 = vsel %vm22306_vm3, %v4923_v45, %v4927_v17  ;;  %v23157_v17 = vld [vmem:[%s22244_s6 + $0xbc] sm:$0x1] }
  0xc4   : > { %v23135_v48 = vcombine.low %v1569_v2, %v23110_v35  ;;  %28601 = vst [vmem:[#allocation18_spill] sm:$0xff] %v23139_v14  ;;  %v1627_v41 = vshrl.u32 %v23033_v23, 16  ;;  %v1606_v26 = vrot.slane %v1605_v51, 4  ;;  %v4932_v37 = vrot.slane %v4930_v30, 4  ;;  %28602 = vst [vmem:[#allocation19_spill] sm:$0xff] %v23157_v17 }
  0xc5   : > { %19779 = vmatmul.mubr.msk.bf16.vlgmr.msra.gmra.mrb[0].mxu1 %vm524_vm4, %v22715_v57  ;;  %v17304_v57 = vld [vmem:[%s28387_s1 + $0x16] sm:$0x3]  ;;  %v4935_v38 = vrot.slane %v4933_v44, 5  ;;  %v23159_v2 = vrot.slane %v4939_v63, 5  ;;  %v1615_v51 = vrot.slane %v1613_v18, 4  ;;  %v4958_v44 = vshrl.u32 %v23047_v3, 16 }
  0xc6   : > { %19787 = vmatpush3.bf16.msra.mxu1 %v22993_v28  ;;  %19782 = vmatprep.mubr.msk.bf16.mxu1 %vm524_vm4, %v22751_v49  ;;  %v1592_v49 = vrot.slane %v1591_v6, 4  ;;  %v1596_v28 = vrot.slane %v1594_v8, 5  ;;  %v23144_v12 = vsel %vm537_vm0, %v17304_v57, 0  ;;  %v4947_v6 = vshll.u32 %v23017_v13, 16 }
  0xc7   : > { %21855 = vmatprep.subr.msk.bf16.mxu1 %vm537_vm0, %v17601_v39  ;;  %v1610_v39 = vrot.slane %v1608_v19, 5  ;;  %v23150_v8 = vcombine.low %v4914_v59, %v23139_v14  ;;  %v23161_v19 = vrot.slane %v4944_v24, 4  ;;  %v28603_v59 = vcombine.low %v22880_v56, %v22978_v42 }
  0xc8   : > { %19513 = vmatmul.mubr.msk.bf16.gmra.mrb[4].mxu0 %vm524_vm4, %v17253_v46  ;;  %v1616_v46 = vshll.u32 %v23030_v5, 16  ;;  %v23154_v45 = vsel %vm22306_vm3, %v1592_v49, %v1596_v28  ;;  %v23173_v49 = vld [vmem:[%s22244_s6 + $0x7c] sm:$0x1]  ;;  %v1629_v28 = vrot.slane %v1627_v41, 4  ;;  %v4972_v24 = vshrl.u32 %v23050_v20, 16 }
  0xc9   : > { %19518 = vmatprep.mubr.msk.bf16.mxu0 %vm524_vm4, %v17279_v60  ;;  %v1630_v60 = vshll.u32 %v23033_v23, 16  ;;  %v4975_v14 = vshll.u32 %v23050_v20, 16  ;;  %v28604_v18 = vcombine.low %v22956_v36, %v22971_v4  ;;  %v4936_v56 = vor.u32 %v4935_v38, %v4932_v37 }
  0xca   : > { %v1618_v30 = vrot.slane %v1616_v46, 5  ;;  %v23183_v46 = vsel %vm22306_vm3, %v1606_v26, %v1610_v39  ;;  %v4949_v42 = vrot.slane %v4947_v6, 5  ;;  %v1641_v41 = vshrl.u32 %v23053_v55, 16 }
  0xcb   : > { %v1632_v63 = vrot.slane %v1630_v60, 5  ;;  %v1644_v60 = vshll.u32 %v23053_v55, 16  ;;  %v1655_v35 = vshrl.u32 %v23056_v16, 16  ;;  %v1622_v39 = vshll.u32 %v23164_v10, 16  ;;  %v23199_v55 = vld [vmem:[%s22244_s6 + $0xc4] sm:$0x1] }
  0xcc   : > { %v1636_v26 = vshll.u32 %v23173_v49, 16  ;;  %v4960_v37 = vrot.slane %v4958_v44, 4  ;;  %v4963_v38 = vrot.slane %v4961_v52, 5  ;;  %v1619_v6 = vor.u32 %v1618_v30, %v1615_v51  ;;  %v23212_v51 = vld [vmem:[%s22244_s6 + $0xcc] sm:$0x1] }
  0xcd   : > { %19783 = vmatmul.mubr.msk.bf16.gmra.mrb[4].mxu1 %vm524_vm4, %v28603_v59  ;;  %v4953_v59 = vshll.u32 %v23157_v17, 16  ;;  %v4977_v20 = vrot.slane %v4975_v14, 5  ;;  %v4937_v44 = vrot.slane %v4936_v56, 4  ;;  %v4950_v52 = vor.u32 %v4949_v42, %v23161_v19  ;;  %v23215_v30 = vld [vmem:[%s22244_s6 + $0x84] sm:$0x1] }
  0xce   : > { %19788 = vmatprep.mubr.msk.bf16.mxu1 %vm524_vm4, %v28604_v18  ;;  %v1658_v18 = vshll.u32 %v23056_v16, 16  ;;  %v4974_v16 = vrot.slane %v4972_v24, 4  ;;  %v1646_v14 = vrot.slane %v1644_v60, 5  ;;  %v1624_v3 = vrot.slane %v1622_v39, 5 }
  0xcf   : > { %v1638_v17 = vrot.slane %v1636_v26, 5  ;;  %v4964_v13 = vor.u32 %v4963_v38, %v4960_v37  ;;  %v4967_v9 = vshll.u32 %v23199_v55, 16  ;;  %v1620_v19 = vrot.slane %v1619_v6, 4 }
  0xd0   : > { %19519 = vmatmul.mubr.msk.bf16.vlgmr.msra.gmra.mrb[0].mxu0 %vm524_vm4, %v23044_v40  ;;  %v1633_v40 = vor.u32 %v1632_v63, %v1629_v28  ;;  %v1643_v28 = vrot.slane %v1641_v41, 4  ;;  %v1657_v63 = vrot.slane %v1655_v35, 4  ;;  %v1660_v24 = vrot.slane %v1658_v18, 5 }
  0xd1   : > { %19527 = vmatpush3.bf16.msra.mxu0 %v23061_v50  ;;  %19522 = vmatprep.mubr.msk.bf16.mxu0 %vm524_vm4, %v23086_v1  ;;  %v23204_v50 = vld [vmem:[%s28387_s1 + $0x16] sm:$0x3]  ;;  %v23208_v1 = vcombine.low %v23154_v45, %v23183_v46  ;;  %v4978_v42 = vor.u32 %v4977_v20, %v4974_v16  ;;  %v4986_v35 = vshrl.u32 %v23068_v27, 16  ;;  %v4989_v41 = vshll.u32 %v23068_v27, 16 }
  0xd2   : > { %21829 = vmatprep.subr.msk.bf16.mxu0 %vm537_vm0, %v17304_v57  ;;  %v4955_v57 = vrot.slane %v4953_v59, 5  ;;  %v1634_v56 = vrot.slane %v1633_v40, 4  ;;  %v4981_v59 = vshll.u32 %v23212_v51, 16  ;;  %v5000_v60 = vshrl.u32 %v23076_v22, 16 }
  0xd3   : > { %v5003_v18 = vshll.u32 %v23076_v22, 16  ;;  %v1647_v40 = vor.u32 %v1646_v14, %v1643_v28  ;;  %v1650_v20 = vshll.u32 %v23215_v30, 16  ;;  %v1661_v16 = vor.u32 %v1660_v24, %v1657_v63 }
  0xd4   : > { %v23242_v39 = vsel %vm22306_vm3, %v4937_v44, %v23159_v2  ;;  %v4951_v26 = vrot.slane %v4950_v52, 4  ;;  %v4965_v37 = vrot.slane %v4964_v13, 4  ;;  %v4969_v38 = vrot.slane %v4967_v9, 5 }
  0xd5   : > { %19789 = vmatmul.mubr.msk.bf16.vlgmr.msra.gmra.mrb[0].mxu1 %vm524_vm4, %v23065_v33  ;;  %v23246_v6 = vsel %vm22306_vm3, %v1620_v19, %v1624_v3  ;;  %v23250_v28 = vsel %vm22306_vm3, %v1634_v56, %v1638_v17  ;;  %v4979_v14 = vrot.slane %v4978_v42, 4  ;;  %v4983_v63 = vrot.slane %v4981_v59, 5  ;;  %v23256_v33 = vld [vmem:[%s22244_s6 + $0xdc] sm:$0x1] }
  0xd6   : > { %19797 = vmatpush3.bf16.msra.mxu1 %v23082_v43  ;;  %19792 = vmatprep.mubr.msk.bf16.mxu1 %vm524_vm4, %v23091_v58  ;;  %v1664_v43 = vshll.u32 %v23219_v21, 16  ;;  %v4988_v24 = vrot.slane %v4986_v35, 4  ;;  %v4991_v58 = vrot.slane %v4989_v41, 5  ;;  %v5002_v2 = vrot.slane %v5000_v60, 4 }
  0xd7   : > { %21856 = vmatprep.subr.msk.bf16.mxu1 %vm537_vm0, %v23204_v50  ;;  %v5005_v44 = vrot.slane %v5003_v18, 5  ;;  %v1648_v52 = vrot.slane %v1647_v40, 4  ;;  %v1662_v13 = vrot.slane %v1661_v16, 4  ;;  %v23260_v3 = vsel %vm22306_vm3, %v4951_v26, %v4955_v57 }
  0xd8   : > { %19523 = vmatmul.mubr.msk.bf16.gmra.mrb[4].mxu0 %vm524_vm4, %v23095_v25  ;;  %v1652_v25 = vrot.slane %v1650_v20, 5  ;;  %v1666_v9 = vrot.slane %v1664_v43, 5  ;;  %v23264_v17 = vcombine.low %v23246_v6, %v23250_v28  ;;  %v23268_v19 = vsel %vm22306_vm3, %v4965_v37, %v4969_v38 }
  0xd9   : > { %19528 = vmatprep.mubr.msk.bf16.mxu0 %vm524_vm4, %v23135_v48  ;;  %v23253_v48 = vld [vmem:[%s22244_s6 + $0xd4] sm:$0x1]  ;;  %v17296_v42 = vrot.slane %v22944_v0, 9  ;;  %v1780_v59 = vrot.slane %v22986_v53, 5  ;;  %v17297_v57 = vrot.slane %v22947_v34, 9  ;;  %v1784_v35 = vrot.slane %v22990_v15, 5 }
  0xda   : > { %v4995_v56 = vshll.u32 %v23253_v48, 16  ;;  %v23281_v41 = vsel %vm22306_vm3, %v4979_v14, %v4983_v63  ;;  %v4992_v60 = vor.u32 %v4991_v58, %v4988_v24  ;;  %v5006_v18 = vor.u32 %v5005_v44, %v5002_v2  ;;  %v17313_v0 = vld [vmem:[%s28387_s1 + $0x18] sm:$0x3] }
  0xdb   : > { %v5009_v40 = vshll.u32 %v23256_v33, 16  ;;  %v23291_v53 = vcombine.low %v23242_v39, %v23260_v3  ;;  %v5180_v15 = vsel %vm537_vm0, %v23204_v50, 0  ;;  %v23297_v58 = vsel %vm22306_vm3, %v1648_v52, %v1652_v25 }
  0xdc   : > { %v17610_v20 = vrot.slane %v22956_v36, 9  ;;  %v5124_v16 = vrot.slane %v23001_v11, 5  ;;  %v17611_v43 = vrot.slane %v22971_v4, 9  ;;  %v5128_v50 = vrot.slane %v23022_v7, 5 }
  0xdd   : > { %19793 = vmatmul.mubr.msk.bf16.gmra.mrb[4].mxu1 %vm524_vm4, %v23104_v47  ;;  %v23312_v25 = vcombine.low %v23268_v19, %v23281_v41  ;;  %v4997_v26 = vrot.slane %v4995_v56, 5  ;;  %v1781_v37 = vsel %vm22570_vm7, %v17296_v42, %v1780_v59  ;;  %v4993_v11 = vrot.slane %v4992_v60, 4  ;;  %v28606_v60 = vld [vmem:[#allocation6_spill] sm:$0xff] }
  0xde   : > { %19798 = vmatprep.mubr.msk.bf16.mxu1 %vm524_vm4, %v23150_v8  ;;  %v23301_v8 = vsel %vm22306_vm3, %v1662_v13, %v1666_v9  ;;  %v5007_v7 = vrot.slane %v5006_v18, 4  ;;  %v5011_v38 = vrot.slane %v5009_v40, 5  ;;  %v17298_v14 = vrot.slane %v22981_v29, 9  ;;  %v17627_v9 = vld [vmem:[%s28387_s1 + $0x18] sm:$0x3] }
  0xdf   : > { %28605 = vst [vmem:[#allocation20_spill] sm:$0xff] %v23312_v25  ;;  %v23323_v36 = vcombine.low %v23297_v58, %v23301_v8  ;;  %v1788_v63 = vrot.slane %v23072_v54, 5  ;;  %v17299_v24 = vrot.slane %v23010_v31, 9  ;;  %v1792_v2 = vrot.slane %v23079_v61, 5 }
  0xe0   : > { %19529 = vmatmul.mubr.msk.bf16.vlgmr.msra.gmra.mrb[0].mxu0 %vm524_vm4, %v23208_v1  ;;  %v5125_v52 = vsel %vm22570_vm7, %v17610_v20, %v5124_v16  ;;  %v23334_v13 = vsel %vm22570_vm7, %v17611_v43, %v5128_v50  ;;  %v17300_v54 = vrot.slane %v23030_v5, 9  ;;  %v1796_v61 = vrot.slane %v23164_v10, 5 }
  0xe1   : > { %19537 = vmatpush3.bf16.msra.mxu0 %v23144_v12  ;;  %19532 = vmatprep.mubr.msk.bf16.mxu0 %vm524_vm4, %v23264_v17  ;;  %v23318_v12 = vsel %vm22570_vm7, %v17297_v57, %v1784_v35  ;;  %v17301_v56 = vrot.slane %v23033_v23, 9  ;;  %v1800_v42 = vrot.slane %v23173_v49, 5  ;;  %v23349_v59 = vsel %vm22306_vm3, %v4993_v11, %v4997_v26  ;;  %v28608_v26 = vld [vmem:[#allocation12_spill] sm:$0xff]  ;;  %v28609_v11 = vld [vmem:[#allocation19_spill] sm:$0xff] }
  0xe2   : > { %21830 = vmatprep.subr.msk.bf16.mxu0 %vm537_vm0, %v17313_v0  ;;  %v17305_v44 = vcombine.low %v1781_v37, %v23318_v12  ;;  %v23353_v57 = vsel %vm22306_vm3, %v5007_v7, %v5011_v38  ;;  %v23360_v10 = vsel %vm22570_vm7, %v17298_v14, %v1788_v63  ;;  %v23364_v49 = vsel %vm22570_vm7, %v17299_v24, %v1792_v2  ;;  %v28610_v38 = vld [vmem:[#allocation5_spill] sm:$0xff]  ;;  %v28611_v24 = vld [vmem:[#allocation7_spill] sm:$0xff] }
  0xe3   : > { %v17619_v35 = vcombine.low %v5125_v52, %v23334_v13  ;;  %v17612_v18 = vrot.slane %v28606_v60, 9  ;;  %v23371_v40 = vcombine.low %v23349_v59, %v23353_v57  ;;  %v23376_v16 = vsel %vm22570_vm7, %v17300_v54, %v1796_v61  ;;  %v28612_v52 = vld [vmem:[#allocation9_spill] sm:$0xff] }
  0xe4   : > { %v23380_v43 = vsel %vm22570_vm7, %v17301_v56, %v1800_v42  ;;  %v23384_v50 = vcombine.low %v23360_v10, %v23364_v49  ;;  %v17613_v37 = vrot.slane %v28608_v26, 9  ;;  %v5136_v7 = vrot.slane %v28609_v11, 5  ;;  %v28613_v42 = vld [vmem:[#allocation8_spill] sm:$0xff] }
  0xe5   : > { %19799 = vmatmul.mubr.msk.bf16.vlgmr.msra.gmra.mrb[0].mxu1 %vm524_vm4, %v23291_v53  ;;  %v17614_v14 = vrot.slane %v28610_v38, 9  ;;  %v5140_v63 = vrot.slane %v23199_v55, 5  ;;  %v17615_v2 = vrot.slane %v28611_v24, 9  ;;  %v17302_v54 = vrot.slane %v28612_v52, 9 }
  0xe6   : > { %19807 = vmatpush3.bf16.msra.mxu1 %v5180_v15  ;;  %19802 = vmatprep.mubr.msk.bf16.mxu1 %vm524_vm4, %v23312_v25  ;;  %v28607_v15 = vld [vmem:[#allocation16_spill] sm:$0xff]  ;;  %v23395_v61 = vcombine.low %v23376_v16, %v23380_v43  ;;  %v1804_v56 = vrot.slane %v23215_v30, 5  ;;  %v1808_v11 = vrot.slane %v23219_v21, 5  ;;  %v1933_v55 = vsel %vm537_vm0, %v17313_v0, 0  ;;  %v17322_v30 = vld [vmem:[%s28387_s1 + $0x1a] sm:$0x3] }
  0xe7   : > { %21857 = vmatprep.subr.msk.bf16.mxu1 %vm537_vm0, %v17627_v9  ;;  %v5132_v20 = vrot.slane %v28607_v15, 5  ;;  %v17303_v15 = vrot.slane %v28613_v42, 9  ;;  %v23410_v25 = vsel %vm22570_vm7, %v17613_v37, %v5136_v7  ;;  %v23419_v21 = vsel %vm22570_vm7, %v17614_v14, %v5140_v63 }
  0xe8   : > { %19533 = vmatmul.mubr.msk.bf16.gmra.mrb[4].mxu0 %vm524_vm4, %v23323_v36  ;;  %v17616_v37 = vrot.slane %v23068_v27, 9  ;;  %v5148_v14 = vrot.slane %v23253_v48, 5  ;;  %v17617_v63 = vrot.slane %v23076_v22, 9 }
  0xe9   : > { %19538 = vmatprep.mubr.msk.bf16.mxu0 %vm524_vm4, %v17305_v44  ;;  %v5144_v44 = vrot.slane %v23212_v51, 5  ;;  %v23406_v51 = vsel %vm22570_vm7, %v17612_v18, %v5132_v20  ;;  %v23433_v18 = vsel %vm22570_vm7, %v17303_v15, %v1808_v11  ;;  %v17636_v15 = vld [vmem:[%s28387_s1 + $0x1a] sm:$0x3]  ;;  %v17316_v11 = vcombine.low %v23033_v23, %v28612_v52 }
  0xea   : > { %v23437_v20 = vcombine.low %v23406_v51, %v23410_v25  ;;  %v17629_v23 = vcombine.low %v28608_v26, %v28610_v38  ;;  %v5383_v52 = vsel %vm537_vm0, %v17636_v15, 0  ;;  %v23513_v26 = vld [vmem:[%s22244_s6 + $0xe0] sm:$0xf] }
  0xeb   : > { %v23423_v0 = vsel %vm22570_vm7, %v17615_v2, %v5144_v44  ;;  %v5152_v2 = vrot.slane %v23256_v33, 5  ;;  %v5275_v44 = vsel %vm537_vm0, %v17627_v9, 0  ;;  %v23464_v33 = vsel %vm22570_vm7, %v17616_v37, %v5148_v14  ;;  %v17332_v37 = vld [vmem:[%s28387_s1 + $0x1c] sm:$0x3]  ;;  %v28614_v14 = vld [vmem:[#allocation17_spill] sm:$0xff] }
  0xec   : > { %v23443_v7 = vcombine.low %v23419_v21, %v23423_v0  ;;  %v17315_v9 = vcombine.low %v23010_v31, %v23030_v5  ;;  %v5351_v38 = vshrl.u32 %v23513_v26, 16 }
  0xed   : > { %19803 = vmatmul.mubr.msk.bf16.gmra.mrb[4].mxu1 %vm524_vm4, %v23371_v40  ;;  %v23468_v48 = vsel %vm22570_vm7, %v17617_v63, %v5152_v2  ;;  %v17323_v63 = vcombine.low %v28614_v14, %v23154_v45  ;;  %v17646_v2 = vld [vmem:[%s28387_s1 + $0x1c] sm:$0x3] }
  0xee   : > { %19808 = vmatprep.mubr.msk.bf16.mxu1 %vm524_vm4, %v17619_v35  ;;  %v23429_v35 = vsel %vm22570_vm7, %v17302_v54, %v1804_v56  ;;  %v17314_v56 = vcombine.low %v22947_v34, %v22981_v29  ;;  %v23476_v34 = vcombine.low %v23464_v33, %v23468_v48  ;;  %v17628_v29 = vcombine.low %v22971_v4, %v28606_v60  ;;  %v23493_v4 = vld [vmem:[%s22244_s6 + $0x90] sm:$0xf] }
  0xef   : > { %v23451_v54 = vcombine.low %v23429_v35, %v23433_v18  ;;  %v2009_v31 = vshrl.u32 %v23493_v4, 16  ;;  %v2012_v5 = vshll.u32 %v23493_v4, 16  ;;  %v17630_v60 = vcombine.low %v28611_v24, %v23068_v27  ;;  %v17275_v27 = vld [vmem:[%s22244_s6 + $0x94] sm:$0x1] }
  0xf0   : > { %19539 = vmatmul.mubr.msk.bf16.vlgmr.msra.gmra.mrb[0].mxu0 %vm524_vm4, %v23384_v50  ;;  %v5354_v24 = vshll.u32 %v23513_v26, 16 }
  0xf1   : > { %19547 = vmatpush3.bf16.msra.mxu0 %v1933_v55  ;;  %19542 = vmatprep.mubr.msk.bf16.mxu0 %vm524_vm4, %v23395_v61  ;;  %v2042_v55 = vsel %vm537_vm0, %v17322_v30, 0 }
  0xf2   : > { %21831 = vmatprep.subr.msk.bf16.mxu0 %vm537_vm0, %v17322_v30  ;;  %v17317_v30 = vcombine.low %v28613_v42, %v23493_v4  ;;  %v2018_v42 = vshll.u32 %v17275_v27, 16 }
  0xf5   : > { %19809 = vmatmul.mubr.msk.bf16.vlgmr.msra.gmra.mrb[0].mxu1 %vm524_vm4, %v23437_v20 }
  0xf6   : > { %19817 = vmatpush3.bf16.msra.mxu1 %v5275_v44  ;;  %19812 = vmatprep.mubr.msk.bf16.mxu1 %vm524_vm4, %v23443_v7  ;;  %v2011_v44 = vrot.slane %v2009_v31, 4  ;;  %v17324_v31 = vcombine.low %v23183_v46, %v23246_v6  ;;  %v17638_v6 = vcombine.low %v23260_v3, %v23268_v19 }
  0xf7   : > { %21858 = vmatprep.subr.msk.bf16.mxu1 %vm537_vm0, %v17636_v15  ;;  %v17631_v15 = vcombine.low %v23076_v22, %v23513_v26 }
  0xf8   : > { %19543 = vmatmul.mubr.msk.bf16.gmra.mrb[4].mxu0 %vm524_vm4, %v23451_v54 }
  0xf9   : > { %19548 = vmatprep.mubr.msk.bf16.mxu0 %vm524_vm4, %v17314_v56  ;;  %v2014_v56 = vrot.slane %v2012_v5, 5  ;;  %v17589_v5 = vld [vmem:[%s22244_s6 + $0xe4] sm:$0x1] }
  0xfa   : > { %v5360_v14 = vshll.u32 %v17589_v5, 16 }
  0xfb   : > { %v2015_v45 = vor.u32 %v2014_v56, %v2011_v44  ;;  %v17333_v56 = vcombine.low %v23318_v12, %v23360_v10  ;;  %v17335_v12 = vcombine.low %v23380_v43, %v23429_v35  ;;  %v2120_v10 = vrot.slane %v17275_v27, 5 }
  0xfc   : > { %v17645_v43 = vrot.slane %v23513_v26, 9 }
  0xfd   : > { %19813 = vmatmul.mubr.msk.bf16.gmra.mrb[4].mxu1 %vm524_vm4, %v23476_v34 }
  0xfe   : > { %19818 = vmatprep.mubr.msk.bf16.mxu1 %vm524_vm4, %v17628_v29  ;;  %v28615_v29 = vld [vmem:[#allocation18_spill] sm:$0xff] }
 0x100   : > { %19549 = vmatmul.mubr.msk.bf16.vlgmr.msra.gmra.mrb[0].mxu0 %vm524_vm4, %v17315_v9  ;;  %v17637_v9 = vcombine.low %v28615_v29, %v23242_v39  ;;  %v17341_v39 = vld [vmem:[%s28387_s1 + $0x1e] sm:$0x3] }
 0x101   : > { %19557 = vmatpush3.bf16.msra.mxu0 %v2042_v55  ;;  %19552 = vmatprep.mubr.msk.bf16.mxu0 %vm524_vm4, %v17316_v11  ;;  %v5353_v11 = vrot.slane %v5351_v38, 4  ;;  %v5356_v55 = vrot.slane %v5354_v24, 5  ;;  %v17655_v38 = vld [vmem:[%s28387_s1 + $0x1e] sm:$0x3]  ;;  %v17661_v24 = vld [vmem:[%s28387_s1 + $0x20] sm:$0x3] }
 0x102   : > { %21832 = vmatprep.subr.msk.bf16.mxu0 %vm537_vm0, %v17332_v37  ;;  %v5565_v35 = vsel %vm537_vm0, %v17655_v38, 0  ;;  %v28619_v29 = vld [vmem:[#allocation15_spill] sm:$0xff] }
 0x103   : > { %v5357_v22 = vor.u32 %v5356_v55, %v5353_v11  ;;  %v5661_v11 = vsel %vm537_vm0, %v17661_v24, 0 }
 0x105   : > { %19819 = vmatmul.mubr.msk.bf16.vlgmr.msra.gmra.mrb[0].mxu1 %vm524_vm4, %v17629_v23  ;;  %v17325_v23 = vcombine.low %v23250_v28, %v23297_v58  ;;  %v17639_v28 = vcombine.low %v23281_v41, %v23349_v59  ;;  %v5358_v58 = vrot.slane %v5357_v22, 4  ;;  %v17647_v41 = vcombine.low %v23334_v13, %v23406_v51 }
 0x106   : > { %19827 = vmatpush3.bf16.msra.mxu1 %v5383_v52  ;;  %19822 = vmatprep.mubr.msk.bf16.mxu1 %vm524_vm4, %v17630_v60  ;;  %v2016_v60 = vrot.slane %v2015_v45, 4  ;;  %v2020_v52 = vrot.slane %v2018_v42, 5  ;;  %v17331_v59 = vrot.slane %v23493_v4, 9  ;;  %v5461_v51 = vrot.slane %v17589_v5, 5  ;;  %v17354_v45 = vld [vmem:[%s28387_s1 + $0x22] sm:$0x3] }
 0x107   : > { %21859 = vmatprep.subr.msk.bf16.mxu1 %vm537_vm0, %v17646_v2  ;;  %v28618_v42 = vld [vmem:[#allocation13_spill] sm:$0xff]  ;;  %v17668_v5 = vld [vmem:[%s28387_s1 + $0x22] sm:$0x3] }
 0x108   : > { %19553 = vmatmul.mubr.msk.bf16.gmra.mrb[4].mxu0 %vm524_vm4, %v17317_v30  ;;  %v2142_v30 = vsel %vm537_vm0, %v17332_v37, 0  ;;  %v23541_v46 = vsel %vm22306_vm3, %v2016_v60, %v2020_v52  ;;  %v5362_v37 = vrot.slane %v5360_v14, 5  ;;  %v23584_v13 = vsel %vm22570_vm7, %v17331_v59, %v2120_v10  ;;  %v28620_v52 = vld [vmem:[#allocation14_spill] sm:$0xff]  ;;  %v23641_v14 = vld [vmem:[%s22244_s6 + $0x9c] sm:$0x1] }
 0x109   : > { %19558 = vmatprep.mubr.msk.bf16.mxu0 %vm524_vm4, %v17323_v63  ;;  %v5482_v63 = vsel %vm537_vm0, %v17646_v2, 0  ;;  %v17326_v44 = vcombine.low %v23301_v8, %v23541_v46  ;;  %v17334_v8 = vcombine.low %v23364_v49, %v23376_v16  ;;  %v2226_v2 = vsel %vm537_vm0, %v17341_v39, 0  ;;  %v23673_v59 = vld [vmem:[%s22244_s6 + $0xa8] sm:$0xf]  ;;  %v23678_v10 = vld [vmem:[%s22244_s6 + $0xf0] sm:$0xf] }
 0x10a   : > { %v23560_v3 = vsel %vm22306_vm3, %v5358_v58, %v5362_v37  ;;  %v17648_v49 = vcombine.low %v23410_v25, %v23419_v21  ;;  %v17649_v16 = vcombine.low %v23423_v0, %v23464_v33  ;;  %v17336_v27 = vcombine.low %v23433_v18, %v23584_v13  ;;  %v28616_v21 = vld [vmem:[#allocation4_spill] sm:$0xff]  ;;  %v28617_v33 = vld [vmem:[#allocation10_spill] sm:$0xff]  ;;  %v17591_v37 = vld [vmem:[%s22244_s6 + $0xec] sm:$0x1] }
 0x10b   : > { %v17640_v19 = vcombine.low %v23353_v57, %v23560_v3  ;;  %v17347_v57 = vld [vmem:[%s28387_s1 + $0x20] sm:$0x3]  ;;  %v23602_v25 = vsel %vm22570_vm7, %v17645_v43, %v5461_v51 }
 0x10c   : > { %v17650_v0 = vcombine.low %v23468_v48, %v23602_v25  ;;  %v2323_v18 = vsel %vm537_vm0, %v17347_v57, 0  ;;  %v28621_v43 = vld [vmem:[#allocation20_spill] sm:$0xff] }
 0x10d   : > { %19823 = vmatmul.mubr.msk.bf16.gmra.mrb[4].mxu1 %vm524_vm4, %v17631_v15  ;;  %v23620_v15 = vld [vmem:[%s22244_s6 + $0x98] sm:$0xf] }
 0x10e   : > { %19828 = vmatprep.mubr.msk.bf16.mxu1 %vm524_vm4, %v17637_v9  ;;  %v2302_v48 = vshrl.u32 %v23620_v15, 16  ;;  %v2305_v9 = vshll.u32 %v23620_v15, 16  ;;  %v17342_v55 = vcombine.low %v23493_v4, %v23620_v15 }
 0x110   : > { %19559 = vmatmul.mubr.msk.bf16.vlgmr.msra.gmra.mrb[0].mxu0 %vm524_vm4, %v17324_v31  ;;  %v23631_v31 = vld [vmem:[%s22244_s6 + $0xe8] sm:$0xf]  ;;  %v2307_v60 = vrot.slane %v2305_v9, 5 }
 0x111   : > { %19567 = vmatpush3.bf16.msra.mxu0 %v2142_v30  ;;  %19562 = vmatprep.mubr.msk.bf16.mxu0 %vm524_vm4, %v17325_v23  ;;  %v2304_v23 = vrot.slane %v2302_v48, 4  ;;  %v5641_v30 = vshrl.u32 %v23631_v31, 16  ;;  %v5644_v22 = vshll.u32 %v23631_v31, 16  ;;  %v23715_v48 = vld [vmem:[%s22244_s6 + $0xa4] sm:$0x1] }
 0x112   : > { %21833 = vmatprep.subr.msk.bf16.mxu0 %vm537_vm0, %v17341_v39  ;;  %v2311_v39 = vshll.u32 %v23641_v14, 16 }
 0x113   : > { %v2308_v4 = vor.u32 %v2307_v60, %v2304_v23  ;;  %v5646_v58 = vrot.slane %v5644_v22, 5  ;;  %v23719_v23 = vld [vmem:[%s22244_s6 + $0xac] sm:$0x1]  ;;  %v23722_v60 = vld [vmem:[%s22244_s6 + $0xf4] sm:$0x1] }
 0x115   : > { %19829 = vmatmul.mubr.msk.bf16.vlgmr.msra.gmra.mrb[0].mxu1 %vm524_vm4, %v17638_v6  ;;  %v17656_v6 = vcombine.low %v23513_v26, %v23631_v31 }
 0x116   : > { %19837 = vmatpush3.bf16.msra.mxu1 %v5482_v63  ;;  %19832 = vmatprep.mubr.msk.bf16.mxu1 %vm524_vm4, %v17639_v28  ;;  %v5643_v28 = vrot.slane %v5641_v30, 4  ;;  %v2309_v63 = vrot.slane %v2308_v4, 4 }
 0x117   : > { %21860 = vmatprep.subr.msk.bf16.mxu1 %vm537_vm0, %v17655_v38  ;;  %v5650_v38 = vshll.u32 %v17591_v37, 16 }
 0x118   : > { %19563 = vmatmul.mubr.msk.bf16.gmra.mrb[4].mxu0 %vm524_vm4, %v17326_v44  ;;  %v2313_v44 = vrot.slane %v2311_v39, 5 }
 0x119   : > { %19568 = vmatprep.mubr.msk.bf16.mxu0 %vm524_vm4, %v17333_v56  ;;  %v5647_v56 = vor.u32 %v5646_v58, %v5643_v28  ;;  %v2627_v28 = vshll.u32 %v23715_v48, 16  ;;  %v23742_v58 = vld [vmem:[%s22244_s6 + $0xfc] sm:$0x1] }
 0x11a   : > { %v2314_v26 = vsel %vm22306_vm3, %v2309_v63, %v2313_v44  ;;  %v2641_v44 = vshll.u32 %v23719_v23, 16 }
 0x11d   : > { %19833 = vmatmul.mubr.msk.bf16.gmra.mrb[4].mxu1 %vm524_vm4, %v17640_v19  ;;  %v5648_v19 = vrot.slane %v5647_v56, 4  ;;  %v5963_v56 = vshll.u32 %v23722_v60, 16 }
 0x11e   : > { %19838 = vmatprep.mubr.msk.bf16.mxu1 %vm524_vm4, %v17647_v41  ;;  %v5652_v41 = vrot.slane %v5650_v38, 5 }
 0x120   : > { %19569 = vmatmul.mubr.msk.bf16.vlgmr.msra.gmra.mrb[0].mxu0 %vm524_vm4, %v17334_v8  ;;  %v23669_v8 = vld [vmem:[%s22244_s6 + $0xa0] sm:$0xf]  ;;  %v5653_v51 = vsel %vm22306_vm3, %v5648_v19, %v5652_v41  ;;  %v23758_v19 = vld [vmem:[%s22244_s6 + $0x108] sm:$0xf] }
 0x121   : > { %19577 = vmatpush3.bf16.msra.mxu0 %v2226_v2  ;;  %19572 = vmatprep.mubr.msk.bf16.mxu0 %vm524_vm4, %v17335_v12  ;;  %v17348_v12 = vcombine.low %v23541_v46, %v2314_v26  ;;  %v17694_v2 = vld [vmem:[%s28387_s1 + $0x24] sm:$0x3]  ;;  %v2635_v46 = vshll.u32 %v23673_v59, 16  ;;  %v23755_v26 = vld [vmem:[%s22244_s6 + $0x100] sm:$0xf]  ;;  %28622 = vst [vmem:[#allocation6_spill] sm:$0xff] %v23758_v19 }
 0x122   : > { %21834 = vmatprep.subr.msk.bf16.mxu0 %vm537_vm0, %v17347_v57  ;;  %v5954_v57 = vshrl.u32 %v23678_v10, 16  ;;  %v23735_v4 = vsel %vm537_vm0, %v17694_v2, 0 }
 0x125   : > { %19839 = vmatmul.mubr.msk.bf16.vlgmr.msra.gmra.mrb[0].mxu1 %vm524_vm4, %v17648_v49  ;;  %v5957_v49 = vshll.u32 %v23678_v10, 16 }
 0x126   : > { %19847 = vmatpush3.bf16.msra.mxu1 %v5565_v35  ;;  %19842 = vmatprep.mubr.msk.bf16.mxu1 %vm524_vm4, %v17649_v16  ;;  %v2632_v16 = vshrl.u32 %v23673_v59, 16 }
 0x127   : > { %21861 = vmatprep.subr.msk.bf16.mxu1 %vm537_vm0, %v17661_v24  ;;  %v2401_v24 = vrot.slane %v23641_v14, 5 }
 0x128   : > { %19573 = vmatmul.mubr.msk.bf16.gmra.mrb[4].mxu0 %vm524_vm4, %v17336_v27  ;;  %v17353_v27 = vrot.slane %v23620_v15, 9  ;;  %v23710_v15 = vld [vmem:[%s22244_s6 + $0xb0] sm:$0xf]  ;;  %v2634_v9 = vrot.slane %v2632_v16, 4  ;;  %v23776_v16 = vld [vmem:[%s22244_s6 + $0xb4] sm:$0x1] }
 0x129   : > { %19578 = vmatprep.mubr.msk.bf16.mxu0 %vm524_vm4, %v28616_v21  ;;  %v23697_v21 = vld [vmem:[%s22244_s6 + $0xf8] sm:$0xf]  ;;  %v2649_v30 = vshll.u32 %v23710_v15, 16 }
 0x12d   : > { %19843 = vmatmul.mubr.msk.bf16.gmra.mrb[4].mxu1 %vm524_vm4, %v17650_v0  ;;  %v17667_v0 = vrot.slane %v23631_v31, 9  ;;  %v5959_v31 = vrot.slane %v5957_v49, 5  ;;  %v5977_v49 = vshll.u32 %v23742_v58, 16 }
 0x12e   : > { %19848 = vmatprep.mubr.msk.bf16.mxu1 %vm524_vm4, %v28617_v33  ;;  %v5968_v33 = vshrl.u32 %v23697_v21, 16 }
 0x130   : > { %19579 = vmatmul.mubr.msk.bf16.vlgmr.msra.gmra.mrb[0].mxu0 %vm524_vm4, %v28618_v42  ;;  %v17389_v42 = vld [vmem:[%s28387_s1 + $0x26] sm:$0x3]  ;;  %v5970_v14 = vrot.slane %v5968_v33, 4 }
 0x131   : > { %19587 = vmatpush3.bf16.msra.mxu0 %v2323_v18  ;;  %19582 = vmatprep.mubr.msk.bf16.mxu0 %vm524_vm4, %v28619_v29  ;;  %v5739_v18 = vrot.slane %v17591_v37, 5  ;;  %v23738_v39 = vsel %vm537_vm0, %v17389_v42, 0  ;;  %v23745_v37 = vld [vmem:[%s22244_s6 + $0xb8] sm:$0xf] }
 0x132   : > { %21835 = vmatprep.subr.msk.bf16.mxu0 %vm537_vm0, %v17354_v45 }
 0x133   : > { %v23732_v22 = vsel %vm22570_vm7, %v17667_v0, %v5739_v18  ;;  %v2629_v18 = vrot.slane %v2627_v28, 5 }
 0x135   : > { %19849 = vmatmul.mubr.msk.bf16.vlgmr.msra.gmra.mrb[0].mxu1 %vm524_vm4, %v28620_v52  ;;  %v2646_v52 = vshrl.u32 %v23710_v15, 16 }
 0x136   : > { %19857 = vmatpush3.bf16.msra.mxu1 %v5661_v11  ;;  %19852 = vmatprep.mubr.msk.bf16.mxu1 %vm524_vm4, %v23104_v47  ;;  %v2411_v47 = vsel %vm537_vm0, %v17354_v45, 0  ;;  %v5971_v45 = vshll.u32 %v23697_v21, 16  ;;  %v2637_v11 = vrot.slane %v2635_v46, 5  ;;  %v2660_v46 = vshrl.u32 %v23745_v37, 16 }
 0x137   : > { %21862 = vmatprep.subr.msk.bf16.mxu1 %vm537_vm0, %v17668_v5  ;;  %v2648_v41 = vrot.slane %v2646_v52, 4  ;;  %v5979_v52 = vrot.slane %v5977_v49, 5 }
 0x138   : > { %19583 = vmatmul.mubr.msk.bf16.gmra.mrb[4].mxu0 %vm524_vm4, %v17342_v55  ;;  %v5956_v55 = vrot.slane %v5954_v57, 4  ;;  %v2638_v63 = vor.u32 %v2637_v11, %v2634_v9  ;;  %v23801_v9 = vcombine.low %v23710_v15, %v23745_v37  ;;  %v23808_v11 = vld [vmem:[%s22244_s6 + $0x120] sm:$0xf] }
 0x139   : > { %19588 = vmatprep.mubr.msk.bf16.mxu0 %vm524_vm4, %v23208_v1  ;;  %v17380_v1 = vld [vmem:[%s28387_s1 + $0x24] sm:$0x3]  ;;  %28628 = vst [vmem:[#allocation9_spill] sm:$0xff] %v23808_v11 }
 0x13a   : > { %v23692_v35 = vsel %vm537_vm0, %v17380_v1, 0  ;;  %v2639_v33 = vrot.slane %v2638_v63, 4  ;;  %28627 = vst [vmem:[#allocation7_spill] sm:$0xff] %v23801_v9 }
 0x13d   : > { %19853 = vmatmul.mubr.msk.bf16.gmra.mrb[4].mxu1 %vm524_vm4, %v17656_v6 }
 0x13e   : > { %19858 = vmatprep.mubr.msk.bf16.mxu1 %vm524_vm4, %v23291_v53  ;;  %v5748_v53 = vsel %vm537_vm0, %v17668_v5, 0  ;;  %v17662_v5 = vcombine.low %v23560_v3, %v5653_v51  ;;  %v5973_v3 = vrot.slane %v5971_v45, 5  ;;  %v2643_v45 = vrot.slane %v2641_v44, 5  ;;  %v23833_v44 = vld [vmem:[%s22244_s6 + $0x104] sm:$0x1] }
 0x140   : > { %19589 = vmatmul.mubr.msk.bf16.vlgmr.msra.gmra.mrb[0].mxu0 %vm524_vm4, %v23264_v17  ;;  %v2618_v17 = vshrl.u32 %v23669_v8, 16  ;;  %v5974_v57 = vor.u32 %v5973_v3, %v5970_v14 }
 0x141   : > { %19597 = vmatpush3.bf16.msra.mxu0 %v2411_v47  ;;  %19592 = vmatprep.mubr.msk.bf16.mxu0 %vm524_vm4, %v23323_v36  ;;  %v2621_v36 = vshll.u32 %v23669_v8, 16  ;;  %v5960_v47 = vor.u32 %v5959_v31, %v5956_v55  ;;  %v2655_v31 = vshll.u32 %v23776_v16, 16 }
 0x142   : > { %21836 = vmatprep.subr.msk.bf16.mxu0 %vm537_vm0, %v17380_v1 }
 0x143   : > { %v2623_v29 = vrot.slane %v2621_v36, 5  ;;  %v23769_v36 = vld [vmem:[%s22244_s6 + $0xc8] sm:$0xf] }
 0x145   : > { %19859 = vmatmul.mubr.msk.bf16.vlgmr.msra.gmra.mrb[0].mxu1 %vm524_vm4, %v28621_v43  ;;  %v17381_v43 = vcombine.low %v23669_v8, %v23673_v59 }
 0x146   : > { %19867 = vmatpush3.bf16.msra.mxu1 %v5748_v53  ;;  %19862 = vmatprep.mubr.msk.bf16.mxu1 %vm524_vm4, %v23371_v40  ;;  %v2620_v40 = vrot.slane %v2618_v17, 4  ;;  %v2651_v53 = vrot.slane %v2649_v30, 5  ;;  %v23766_v17 = vld [vmem:[%s22244_s6 + $0xc0] sm:$0xf]  ;;  %v23815_v30 = vld [vmem:[%s22244_s6 + $0xbc] sm:$0x1] }
 0x147   : > { %21863 = vmatprep.subr.msk.bf16.mxu1 %vm537_vm0, %v17694_v2  ;;  %v23772_v2 = vld [vmem:[%s22244_s6 + $0x110] sm:$0xf] }
 0x148   : > { %19593 = vmatmul.mubr.msk.bf16.gmra.mrb[4].mxu0 %vm524_vm4, %v17348_v12  ;;  %v2624_v6 = vor.u32 %v2623_v29, %v2620_v40  ;;  %v17703_v12 = vld [vmem:[%s28387_s1 + $0x26] sm:$0x3]  ;;  %28623 = vst [vmem:[#allocation16_spill] sm:$0xff] %v23772_v2  ;;  %v5961_v40 = vrot.slane %v5960_v47, 4  ;;  %v5965_v29 = vrot.slane %v5963_v56, 5  ;;  %v2652_v55 = vor.u32 %v2651_v53, %v2648_v41 }
 0x149   : > { %19598 = vmatprep.mubr.msk.bf16.mxu0 %vm524_vm4, %v23384_v50  ;;  %v23728_v50 = vsel %vm22570_vm7, %v17353_v27, %v2401_v24  ;;  %v23787_v27 = vld [vmem:[%s22244_s6 + $0x118] sm:$0xf]  ;;  %v23790_v24 = vld [vmem:[%s22244_s6 + $0xd0] sm:$0xf]  ;;  %v23818_v3 = vsel %vm537_vm0, %v17703_v12, 0  ;;  %v23843_v41 = vsel %vm22306_vm3, %v2639_v33, %v2643_v45  ;;  %v5985_v33 = vshll.u32 %v23755_v26, 16 }
 0x14a   : > { %v17355_v38 = vcombine.low %v23584_v13, %v23728_v50  ;;  %28624 = vst [vmem:[#allocation12_spill] sm:$0xff] %v23787_v27  ;;  %28625 = vst [vmem:[#allocation19_spill] sm:$0xff] %v23790_v24  ;;  %v2625_v0 = vrot.slane %v2624_v6, 4  ;;  %v23822_v6 = vcombine.low %v23766_v17, %v23769_v36  ;;  %v23826_v28 = vcombine.low %v23772_v2, %v23787_v27 }
 0x14b   : > { %28632 = vst [vmem:[#allocation4_spill] sm:$0xff] %v23843_v41  ;;  %v5966_v53 = vsel %vm22306_vm3, %v5961_v40, %v5965_v29  ;;  %v2653_v49 = vrot.slane %v2652_v55, 4  ;;  %v5991_v45 = vshll.u32 %v23833_v44, 16  ;;  %v5999_v40 = vshll.u32 %v23758_v19, 16 }
 0x14c   : > { %28630 = vst [vmem:[#allocation17_spill] sm:$0xff] %v23822_v6  ;;  %28631 = vst [vmem:[#allocation18_spill] sm:$0xff] %v23826_v28  ;;  %v2630_v56 = vsel %vm22306_vm3, %v2625_v0, %v2629_v18  ;;  %v5982_v0 = vshrl.u32 %v23755_v26, 16  ;;  %v2674_v29 = vshrl.u32 %v23766_v17, 16  ;;  %v2677_v55 = vshll.u32 %v23766_v17, 16 }
 0x14d   : > { %19863 = vmatmul.mubr.msk.bf16.gmra.mrb[4].mxu1 %vm524_vm4, %v17662_v5  ;;  %v5975_v5 = vrot.slane %v5974_v57, 4  ;;  %v23852_v57 = vld [vmem:[%s28387_s1 + $0x28] sm:$0x3]  ;;  %v2688_v50 = vshrl.u32 %v23769_v36, 16 }
 0x14e   : > { %19868 = vmatprep.mubr.msk.bf16.mxu1 %vm524_vm4, %v23437_v20  ;;  %v2663_v20 = vshll.u32 %v23745_v37, 16  ;;  %v23883_v13 = vsel %vm537_vm0, %v23852_v57, 0 }
 0x14f   : > { %v23861_v18 = vsel %vm22306_vm3, %v5975_v5, %v5979_v52  ;;  %v23894_v52 = vrot.slane %v5982_v0, 4  ;;  %v6010_v0 = vshrl.u32 %v23772_v2, 16 }
 0x150   : > { %19599 = vmatmul.mubr.msk.bf16.vlgmr.msra.gmra.mrb[0].mxu0 %vm524_vm4, %v23395_v61  ;;  %v23796_v61 = vld [vmem:[%s22244_s6 + $0xd8] sm:$0xf]  ;;  %v2665_v14 = vrot.slane %v2663_v20, 5  ;;  %v2669_v20 = vshll.u32 %v23815_v30, 16  ;;  %28633 = vst [vmem:[#allocation10_spill] sm:$0xff] %v23861_v18 }
 0x151   : > { %19607 = vmatpush3.bf16.msra.mxu0 %v23692_v35  ;;  %19602 = vmatprep.mubr.msk.bf16.mxu0 %vm524_vm4, %v23451_v54  ;;  %28626 = vst [vmem:[#allocation5_spill] sm:$0xff] %v23796_v61  ;;  %v23805_v35 = vcombine.low %v23755_v26, %v23758_v19  ;;  %v23811_v54 = vld [vmem:[%s22244_s6 + $0x128] sm:$0xf]  ;;  %v23830_v63 = vcombine.low %v23790_v24, %v23796_v61 }
 0x152   : > { %21837 = vmatprep.subr.msk.bf16.mxu0 %vm537_vm0, %v17389_v42  ;;  %28629 = vst [vmem:[#allocation8_spill] sm:$0xff] %v23811_v54  ;;  %v2662_v42 = vrot.slane %v2660_v46, 4  ;;  %v23837_v47 = vcombine.low %v23808_v11, %v23811_v54  ;;  %v2657_v46 = vrot.slane %v2655_v31, 5  ;;  %v23879_v31 = vcombine.low %v2630_v56, %v23843_v41 }
 0x153   : > { %v23898_v56 = vrot.slane %v5991_v45, 5  ;;  %v23903_v41 = vrot.slane %v5999_v40, 5  ;;  %v6024_v45 = vshrl.u32 %v23787_v27, 16  ;;  %v2702_v40 = vshrl.u32 %v23790_v24, 16 }
 0x154   : > { %v23892_v5 = vsel %vm22306_vm3, %v2653_v49, %v2657_v46  ;;  %v23909_v49 = vld [vmem:[%s22244_s6 + $0xcc] sm:$0x1]  ;;  %v2690_v46 = vrot.slane %v2688_v50, 4 }
 0x155   : > { %19869 = vmatmul.mubr.msk.bf16.vlgmr.msra.gmra.mrb[0].mxu1 %vm524_vm4, %v23443_v7  ;;  %v2666_v7 = vor.u32 %v2665_v14, %v2662_v42  ;;  %v23896_v14 = vrot.slane %v5985_v33, 5  ;;  %v28635_v33 = vcombine.low %v23602_v25, %v23732_v22  ;;  %v2716_v22 = vshrl.u32 %v23796_v61, 16 }
 0x156   : > { %19877 = vmatpush3.bf16.msra.mxu1 %v23735_v4  ;;  %19872 = vmatprep.mubr.msk.bf16.mxu1 %vm524_vm4, %v23476_v34  ;;  %v23871_v4 = vld [vmem:[%s22244_s6 + $0x10c] sm:$0x1]  ;;  %v5996_v34 = vshrl.u32 %v23758_v19, 16  ;;  %v2679_v19 = vrot.slane %v2677_v55, 5  ;;  %v28636_v55 = vcombine.low %v23678_v10, %v23697_v21 }
 0x157   : > { %21864 = vmatprep.subr.msk.bf16.mxu1 %vm537_vm0, %v17703_v12  ;;  %28634 = vst [vmem:[#allocation13_spill] sm:$0xff] %v23871_v4  ;;  %v23888_v12 = vcombine.low %v5966_v53, %v23861_v18  ;;  %v2667_v42 = vrot.slane %v2666_v7, 4  ;;  %v6005_v51 = vshll.u32 %v23871_v4, 16  ;;  %v23906_v53 = vld [vmem:[%s22244_s6 + $0xc4] sm:$0x1]  ;;  %v2676_v18 = vrot.slane %v2674_v29, 4 }
 0x158   : > { %19603 = vmatmul.mubr.msk.bf16.gmra.mrb[4].mxu0 %vm524_vm4, %v17355_v38  ;;  %v2691_v38 = vshll.u32 %v23769_v36, 16  ;;  %v23901_v1 = vrot.slane %v5996_v34, 4  ;;  %v6013_v7 = vshll.u32 %v23772_v2, 16  ;;  %v6027_v34 = vshll.u32 %v23787_v27, 16  ;;  %v23953_v2 = vld [vmem:[%s22244_s6 + $0xd4] sm:$0x1] }
 0x159   : > { %19608 = vmatprep.mubr.msk.bf16.mxu0 %vm524_vm4, %v17381_v43  ;;  %v2671_v43 = vrot.slane %v2669_v20, 5  ;;  %v2705_v29 = vshll.u32 %v23790_v24, 16  ;;  %v5988_v25 = vor.u32 %v23896_v14, %v23894_v52  ;;  %v2680_v24 = vor.u32 %v2679_v19, %v2676_v18  ;;  %v23945_v14 = vld [vmem:[%s22244_s6 + $0x114] sm:$0x1]  ;;  %v23950_v19 = vld [vmem:[%s22244_s6 + $0x11c] sm:$0x1] }
 0x15a   : > { %v2693_v20 = vrot.slane %v2691_v38, 5  ;;  %v2719_v38 = vshll.u32 %v23796_v61, 16  ;;  %v6002_v52 = vor.u32 %v23903_v41, %v23901_v1  ;;  %28637 = vst [vmem:[#allocation15_spill] sm:$0xff] %v23945_v14  ;;  %28638 = vst [vmem:[#allocation14_spill] sm:$0xff] %v23950_v19  ;;  %v6026_v18 = vrot.slane %v6024_v45, 4 }
 0x15b   : > { %v23927_v50 = vsel %vm22306_vm3, %v2667_v42, %v2671_v43  ;;  %v2697_v43 = vshll.u32 %v23909_v49, 16  ;;  %v6029_v61 = vrot.slane %v6027_v34, 5  ;;  %v2707_v27 = vrot.slane %v2705_v29, 5  ;;  %v23964_v45 = vld [vmem:[%s28387_s1 + $0x28] sm:$0x3] }
 0x15c   : > { %v2694_v42 = vor.u32 %v2693_v20, %v2690_v46  ;;  %v2721_v4 = vrot.slane %v2719_v38, 5  ;;  %v6038_v1 = vshrl.u32 %v23808_v11, 16  ;;  %v6041_v41 = vshll.u32 %v23808_v11, 16 }
 0x15d   : > { %19873 = vmatmul.mubr.msk.bf16.gmra.mrb[4].mxu1 %vm524_vm4, %v28635_v33  ;;  %v23935_v33 = vrot.slane %v6005_v51, 5  ;;  %v6015_v51 = vrot.slane %v6013_v7, 5  ;;  %v2681_v46 = vrot.slane %v2680_v24, 4  ;;  %v6019_v7 = vshll.u32 %v23945_v14, 16 }
 0x15e   : > { %19878 = vmatprep.mubr.msk.bf16.mxu1 %vm524_vm4, %v28636_v55  ;;  %v2683_v55 = vshll.u32 %v23906_v53, 16  ;;  %v2695_v34 = vrot.slane %v2694_v42, 4  ;;  %v6052_v29 = vshrl.u32 %v23811_v54, 16  ;;  %v6030_v38 = vor.u32 %v6029_v61, %v6026_v18 }
 0x15f   : > { %v6043_v14 = vrot.slane %v6041_v41, 5  ;;  %v6003_v61 = vrot.slane %v6002_v52, 4 }
 0x160   : > { %19609 = vmatmul.mubr.msk.bf16.vlgmr.msra.gmra.mrb[0].mxu0 %vm524_vm4, %v23801_v9  ;;  %v6012_v9 = vrot.slane %v6010_v0, 4  ;;  %v2685_v20 = vrot.slane %v2683_v55, 5  ;;  %v2699_v0 = vrot.slane %v2697_v43, 5  ;;  %v2711_v43 = vshll.u32 %v23953_v2, 16 }
 0x161   : > { %19617 = vmatpush3.bf16.msra.mxu0 %v23738_v39  ;;  %19612 = vmatprep.mubr.msk.bf16.mxu0 %vm524_vm4, %v23822_v6  ;;  %v2704_v39 = vrot.slane %v2702_v40, 4  ;;  %v2718_v6 = vrot.slane %v2716_v22, 4  ;;  %v6033_v40 = vshll.u32 %v23950_v19, 16  ;;  %v6055_v22 = vshll.u32 %v23811_v54, 16  ;;  %v23977_v19 = vld [vmem:[%s22244_s6 + $0x124] sm:$0x1] }
 0x162   : > { %21838 = vmatprep.subr.msk.bf16.mxu0 %vm537_vm0, %v23852_v57  ;;  %v23959_v57 = vld [vmem:[%s22244_s6 + $0xdc] sm:$0x1]  ;;  %v6016_v24 = vor.u32 %v6015_v51, %v6012_v9  ;;  %v6040_v54 = vrot.slane %v6038_v1, 4  ;;  %v23985_v9 = vsel %vm22306_vm3, %v2681_v46, %v2685_v20  ;;  %v23994_v51 = vld [vmem:[%s22244_s6 + $0x12c] sm:$0x1]  ;;  %v6054_v18 = vrot.slane %v6052_v29, 4 }
 0x163   : > { %v2708_v55 = vor.u32 %v2707_v27, %v2704_v39  ;;  %v2722_v42 = vor.u32 %v2721_v4, %v2718_v6  ;;  %v2725_v11 = vshll.u32 %v23959_v57, 16  ;;  %v5989_v27 = vrot.slane %v5988_v25, 4 }
 0x164   : > { %v23991_v6 = vsel %vm22306_vm3, %v2695_v34, %v2699_v0  ;;  %v6035_v4 = vrot.slane %v6033_v40, 5  ;;  %v6057_v39 = vrot.slane %v6055_v22, 5  ;;  %v6017_v1 = vrot.slane %v6016_v24, 4 }
 0x165   : > { %19879 = vmatmul.mubr.msk.bf16.vlgmr.msra.gmra.mrb[0].mxu1 %vm524_vm4, %v23805_v35  ;;  %v6031_v25 = vrot.slane %v6030_v38, 4  ;;  %v2713_v52 = vrot.slane %v2711_v43, 5  ;;  %v6047_v41 = vshll.u32 %v23977_v19, 16  ;;  %v2709_v46 = vrot.slane %v2708_v55, 4  ;;  %v17415_v55 = vld [vmem:[%s28387_s1 + $0x2a] sm:$0x3] }
 0x166   : > { %19887 = vmatpush3.bf16.msra.mxu1 %v23818_v3  ;;  %19882 = vmatprep.mubr.msk.bf16.mxu1 %vm524_vm4, %v23826_v28  ;;  %v6021_v3 = vrot.slane %v6019_v7, 5  ;;  %v2723_v20 = vrot.slane %v2722_v42, 4  ;;  %v2727_v7 = vrot.slane %v2725_v11, 5  ;;  %v6044_v28 = vor.u32 %v6043_v14, %v6040_v54 }
 0x167   : > { %21865 = vmatprep.subr.msk.bf16.mxu1 %vm537_vm0, %v23964_v45  ;;  %v24003_v0 = vcombine.low %v23985_v9, %v23991_v6  ;;  %v6061_v34 = vshll.u32 %v23994_v51, 16  ;;  %v17398_v40 = vrot.slane %v23669_v8, 9  ;;  %v6058_v29 = vor.u32 %v6057_v39, %v6054_v18 }
 0x168   : > { %19613 = vmatmul.mubr.msk.bf16.gmra.mrb[4].mxu0 %vm524_vm4, %v23830_v63  ;;  %v2841_v22 = vrot.slane %v23715_v48, 5  ;;  %v17399_v24 = vrot.slane %v23673_v59, 9  ;;  %v2845_v11 = vrot.slane %v23719_v23, 5  ;;  %v24015_v54 = vsel %vm22306_vm3, %v5989_v27, %v23898_v56 }
 0x169   : > { %19618 = vmatprep.mubr.msk.bf16.mxu0 %vm524_vm4, %v23879_v31  ;;  %v23999_v31 = vcombine.low %v23892_v5, %v23927_v50  ;;  %v24020_v14 = vsel %vm22306_vm3, %v6003_v61, %v23935_v33  ;;  %v24024_v8 = vsel %vm22306_vm3, %v6017_v1, %v6021_v3  ;;  %v24028_v48 = vsel %vm22306_vm3, %v6031_v25, %v6035_v4 }
 0x16a   : > { %v24034_v23 = vsel %vm22306_vm3, %v2709_v46, %v2713_v52  ;;  %v24038_v56 = vsel %vm22306_vm3, %v2723_v20, %v2727_v7  ;;  %v6045_v33 = vrot.slane %v6044_v28, 4  ;;  %v6049_v38 = vrot.slane %v6047_v41, 5  ;;  %v17729_v41 = vld [vmem:[%s28387_s1 + $0x2a] sm:$0x3] }
 0x16b   : > { %v17712_v43 = vrot.slane %v23678_v10, 9  ;;  %v17713_v42 = vrot.slane %v23697_v21, 9  ;;  %v6180_v27 = vrot.slane %v23742_v58, 5  ;;  %v6059_v28 = vrot.slane %v6058_v29, 4 }
 0x16c   : > { %v6063_v61 = vrot.slane %v6061_v34, 5  ;;  %v2842_v3 = vsel %vm22570_vm7, %v17398_v40, %v2841_v22  ;;  %v24056_v4 = vsel %vm22570_vm7, %v17399_v24, %v2845_v11  ;;  %v24060_v10 = vcombine.low %v24015_v54, %v24020_v14 }
 0x16d   : > { %19883 = vmatmul.mubr.msk.bf16.gmra.mrb[4].mxu1 %vm524_vm4, %v23837_v47  ;;  %v24067_v58 = vcombine.low %v24024_v8, %v24028_v48  ;;  %v24075_v18 = vsel %vm22306_vm3, %v6045_v33, %v6049_v38  ;;  %v17407_v39 = vcombine.low %v2842_v3, %v24056_v4  ;;  %v17400_v25 = vrot.slane %v23710_v15, 9  ;;  %v28640_v33 = vld [vmem:[#allocation6_spill] sm:$0xff]  ;;  %v28643_v3 = vld [vmem:[#allocation15_spill] sm:$0xff] }
 0x16e   : > { %19888 = vmatprep.mubr.msk.bf16.mxu1 %vm524_vm4, %v23888_v12  ;;  %v6176_v12 = vrot.slane %v23722_v60, 5  ;;  %v6232_v60 = vsel %vm537_vm0, %v23964_v45, 0  ;;  %v24082_v45 = vsel %vm22570_vm7, %v17713_v42, %v6180_v27  ;;  %v24087_v52 = vsel %vm22306_vm3, %v6059_v28, %v6063_v61  ;;  %v28642_v28 = vld [vmem:[#allocation16_spill] sm:$0xff] }
 0x16f   : > { %28639 = vst [vmem:[#allocation20_spill] sm:$0xff] %v24067_v58  ;;  %v2849_v46 = vrot.slane %v23776_v16, 5  ;;  %v17401_v20 = vrot.slane %v23745_v37, 9  ;;  %v2853_v7 = vrot.slane %v23815_v30, 5  ;;  %v17402_v34 = vrot.slane %v23766_v17, 9 }
 0x170   : > { %19619 = vmatmul.mubr.msk.bf16.vlgmr.msra.gmra.mrb[0].mxu0 %vm524_vm4, %v23999_v31  ;;  %v6177_v1 = vsel %vm22570_vm7, %v17712_v43, %v6176_v12  ;;  %v2857_v40 = vrot.slane %v23906_v53, 5  ;;  %v17403_v29 = vrot.slane %v23769_v36, 9  ;;  %v2861_v22 = vrot.slane %v23909_v49, 5  ;;  %v28641_v43 = vld [vmem:[#allocation13_spill] sm:$0xff] }
 0x171   : > { %19627 = vmatpush3.bf16.msra.mxu0 %v23883_v13  ;;  %19622 = vmatprep.mubr.msk.bf16.mxu0 %vm524_vm4, %v24003_v0  ;;  %v24071_v13 = vcombine.low %v24034_v23, %v24038_v56  ;;  %v17721_v16 = vcombine.low %v6177_v1, %v24082_v45  ;;  %v17714_v30 = vrot.slane %v23755_v26, 9  ;;  %v24110_v53 = vcombine.low %v24075_v18, %v24087_v52 }
 0x172   : > { %21839 = vmatprep.subr.msk.bf16.mxu0 %vm537_vm0, %v17415_v55  ;;  %v24115_v49 = vsel %vm22570_vm7, %v17400_v25, %v2849_v46  ;;  %v24119_v24 = vsel %vm22570_vm7, %v17401_v20, %v2853_v7  ;;  %v6184_v11 = vrot.slane %v23833_v44, 5  ;;  %v17715_v38 = vrot.slane %v28640_v33, 9  ;;  %v28645_v25 = vld [vmem:[#allocation14_spill] sm:$0xff]  ;;  %v28646_v20 = vld [vmem:[#allocation19_spill] sm:$0xff] }
 0x173   : > { %v6188_v12 = vrot.slane %v28641_v43, 5  ;;  %v24126_v42 = vsel %vm22570_vm7, %v17402_v34, %v2857_v40  ;;  %v24130_v27 = vsel %vm22570_vm7, %v17403_v29, %v2861_v22  ;;  %v17716_v61 = vrot.slane %v28642_v28, 9  ;;  %v28647_v29 = vld [vmem:[#allocation5_spill] sm:$0xff] }
 0x174   : > { %v6196_v44 = vrot.slane %v28645_v25, 5  ;;  %v24138_v46 = vcombine.low %v24115_v49, %v24119_v24  ;;  %v17404_v7 = vrot.slane %v28646_v20, 9  ;;  %v24143_v34 = vcombine.low %v24126_v42, %v24130_v27 }
 0x175   : > { %19889 = vmatmul.mubr.msk.bf16.vlgmr.msra.gmra.mrb[0].mxu1 %vm524_vm4, %v24060_v10  ;;  %v2865_v40 = vrot.slane %v23953_v2, 5  ;;  %v17405_v22 = vrot.slane %v28647_v29, 9  ;;  %v2869_v43 = vrot.slane %v23959_v57, 5  ;;  %v24154_v25 = vsel %vm22570_vm7, %v17714_v30, %v6184_v11 }
 0x176   : > { %19897 = vmatpush3.bf16.msra.mxu1 %v6232_v60  ;;  %19892 = vmatprep.mubr.msk.bf16.mxu1 %vm524_vm4, %v24067_v58  ;;  %v6192_v60 = vrot.slane %v28643_v3, 5  ;;  %v2994_v3 = vsel %vm537_vm0, %v17415_v55, 0  ;;  %v24158_v58 = vsel %vm22570_vm7, %v17715_v38, %v6188_v12  ;;  %v17424_v55 = vld [vmem:[%s28387_s1 + $0x2c] sm:$0x3] }
 0x177   : > { %21866 = vmatprep.subr.msk.bf16.mxu1 %vm537_vm0, %v17729_v41  ;;  %v24181_v30 = vsel %vm22570_vm7, %v17405_v22, %v2869_v43  ;;  %v24185_v11 = vcombine.low %v24154_v25, %v24158_v58  ;;  %v28648_v12 = vld [vmem:[#allocation9_spill] sm:$0xff]  ;;  %v17416_v43 = vcombine.low %v23673_v59, %v23710_v15  ;;  %v17730_v15 = vcombine.low %v23697_v21, %v23755_v26  ;;  %v24241_v21 = vld [vmem:[%s22244_s6 + $0xe0] sm:$0xf] }
 0x178   : > { %19623 = vmatmul.mubr.msk.bf16.gmra.mrb[4].mxu0 %vm524_vm4, %v24071_v13  ;;  %v24162_v2 = vsel %vm22570_vm7, %v17716_v61, %v6192_v60  ;;  %v17718_v61 = vrot.slane %v28648_v12, 9  ;;  %v6200_v60 = vrot.slane %v23977_v19, 5  ;;  %v3073_v26 = vshll.u32 %v24241_v21, 16 }
 0x179   : > { %19628 = vmatprep.mubr.msk.bf16.mxu0 %vm524_vm4, %v17407_v39  ;;  %v28644_v39 = vld [vmem:[#allocation12_spill] sm:$0xff] }
 0x17a   : > { %v17717_v1 = vrot.slane %v28644_v39, 9  ;;  %v24212_v19 = vsel %vm22570_vm7, %v17718_v61, %v6200_v60  ;;  %v17418_v61 = vcombine.low %v23769_v36, %v28646_v20  ;;  %v3103_v60 = vsel %vm537_vm0, %v17424_v55, 0 }
 0x17b   : > { %v17732_v36 = vcombine.low %v28644_v39, %v28648_v12 }
 0x17c   : > { %v24166_v57 = vsel %vm22570_vm7, %v17717_v1, %v6196_v44  ;;  %v28649_v1 = vld [vmem:[#allocation8_spill] sm:$0xff] }
 0x17d   : > { %19893 = vmatmul.mubr.msk.bf16.gmra.mrb[4].mxu1 %vm524_vm4, %v24110_v53  ;;  %v24189_v38 = vcombine.low %v24162_v2, %v24166_v57  ;;  %v17719_v44 = vrot.slane %v28649_v1, 9 }
 0x17e   : > { %19898 = vmatprep.mubr.msk.bf16.mxu1 %vm524_vm4, %v17721_v16  ;;  %v24177_v16 = vsel %vm22570_vm7, %v17404_v7, %v2865_v40  ;;  %v6204_v7 = vrot.slane %v23994_v51, 5  ;;  %v6327_v40 = vsel %vm537_vm0, %v17729_v41, 0  ;;  %v17417_v41 = vcombine.low %v23745_v37, %v23766_v17 }
 0x17f   : > { %v24199_v22 = vcombine.low %v24177_v16, %v24181_v30  ;;  %v3070_v37 = vshrl.u32 %v24241_v21, 16  ;;  %v17731_v17 = vcombine.low %v28640_v33, %v28642_v28  ;;  %v24261_v33 = vld [vmem:[%s22244_s6 + $0x130] sm:$0xf]  ;;  %v17377_v28 = vld [vmem:[%s22244_s6 + $0xe4] sm:$0x1] }
 0x180   : > { %19629 = vmatmul.mubr.msk.bf16.vlgmr.msra.gmra.mrb[0].mxu0 %vm524_vm4, %v24138_v46  ;;  %v24216_v51 = vsel %vm22570_vm7, %v17719_v44, %v6204_v7  ;;  %v17434_v44 = vld [vmem:[%s28387_s1 + $0x2e] sm:$0x3]  ;;  %v28650_v7 = vld [vmem:[#allocation4_spill] sm:$0xff]  ;;  %v6403_v39 = vshrl.u32 %v24261_v33, 16  ;;  %v3079_v12 = vshll.u32 %v17377_v28, 16 }
 0x181   : > { %19637 = vmatpush3.bf16.msra.mxu0 %v2994_v3  ;;  %19632 = vmatprep.mubr.msk.bf16.mxu0 %vm524_vm4, %v24143_v34  ;;  %v17738_v3 = vld [vmem:[%s28387_s1 + $0x2c] sm:$0x3]  ;;  %v24224_v59 = vcombine.low %v24212_v19, %v24216_v51 }
 0x182   : > { %21840 = vmatprep.subr.msk.bf16.mxu0 %vm537_vm0, %v17424_v55  ;;  %v6435_v20 = vsel %vm537_vm0, %v17738_v3, 0  ;;  %v17419_v55 = vcombine.low %v28647_v29, %v24241_v21  ;;  %v6406_v29 = vshll.u32 %v24261_v33, 16 }
 0x185   : > { %19899 = vmatmul.mubr.msk.bf16.vlgmr.msra.gmra.mrb[0].mxu1 %vm524_vm4, %v24185_v11 }
 0x186   : > { %19907 = vmatpush3.bf16.msra.mxu1 %v6327_v40  ;;  %19902 = vmatprep.mubr.msk.bf16.mxu1 %vm524_vm4, %v24189_v38  ;;  %v17425_v40 = vcombine.low %v28650_v7, %v23892_v5  ;;  %v3081_v7 = vrot.slane %v3079_v12, 5  ;;  %v17763_v12 = vld [vmem:[%s28387_s1 + $0x32] sm:$0x3] }
 0x187   : > { %21867 = vmatprep.subr.msk.bf16.mxu1 %vm537_vm0, %v17738_v3  ;;  %v17733_v3 = vcombine.low %v28649_v1, %v24261_v33 }
 0x188   : > { %19633 = vmatmul.mubr.msk.bf16.gmra.mrb[4].mxu0 %vm524_vm4, %v24199_v22 }
 0x189   : > { %19638 = vmatprep.mubr.msk.bf16.mxu0 %vm524_vm4, %v17416_v43  ;;  %v17748_v43 = vld [vmem:[%s28387_s1 + $0x2e] sm:$0x3] }
 0x18d   : > { %19903 = vmatmul.mubr.msk.bf16.gmra.mrb[4].mxu1 %vm524_vm4, %v24224_v59 }
 0x18e   : > { %19908 = vmatprep.mubr.msk.bf16.mxu1 %vm524_vm4, %v17730_v15  ;;  %v3072_v15 = vrot.slane %v3070_v37, 4  ;;  %v6405_v37 = vrot.slane %v6403_v39, 4 }
 0x190   : > { %19639 = vmatmul.mubr.msk.bf16.vlgmr.msra.gmra.mrb[0].mxu0 %vm524_vm4, %v17417_v41  ;;  %v3075_v41 = vrot.slane %v3073_v26, 5  ;;  %v6408_v26 = vrot.slane %v6406_v29, 5  ;;  %v17435_v29 = vcombine.low %v24056_v4, %v24115_v49  ;;  %v17437_v4 = vcombine.low %v24130_v27, %v24177_v16 }
 0x191   : > { %19647 = vmatpush3.bf16.msra.mxu0 %v3103_v60  ;;  %19642 = vmatprep.mubr.msk.bf16.mxu0 %vm524_vm4, %v17418_v61  ;;  %v28651_v61 = vld [vmem:[#allocation10_spill] sm:$0xff]  ;;  %v3181_v49 = vrot.slane %v17377_v28, 5  ;;  %v17747_v27 = vrot.slane %v24261_v33, 9 }
 0x192   : > { %21841 = vmatprep.subr.msk.bf16.mxu0 %vm537_vm0, %v17434_v44  ;;  %v3076_v5 = vor.u32 %v3075_v41, %v3072_v15  ;;  %v17739_v60 = vcombine.low %v28651_v61, %v24015_v54  ;;  %v6409_v1 = vor.u32 %v6408_v26, %v6405_v37  ;;  %v17443_v54 = vld [vmem:[%s28387_s1 + $0x30] sm:$0x3]  ;;  %v6534_v41 = vsel %vm537_vm0, %v17748_v43, 0  ;;  %v24364_v61 = vld [vmem:[%s22244_s6 + $0x138] sm:$0xf] }
 0x193   : > { %v6696_v37 = vshll.u32 %v24364_v61, 16  ;;  %v17456_v26 = vld [vmem:[%s28387_s1 + $0x34] sm:$0x3] }
 0x195   : > { %19909 = vmatmul.mubr.msk.bf16.vlgmr.msra.gmra.mrb[0].mxu1 %vm524_vm4, %v17731_v17  ;;  %v17426_v17 = vcombine.low %v23927_v50, %v23985_v9  ;;  %v17740_v9 = vcombine.low %v24020_v14, %v24024_v8 }
 0x196   : > { %19917 = vmatpush3.bf16.msra.mxu1 %v6435_v20  ;;  %19912 = vmatprep.mubr.msk.bf16.mxu1 %vm524_vm4, %v17732_v36  ;;  %v17691_v36 = vld [vmem:[%s22244_s6 + $0x134] sm:$0x1]  ;;  %v17427_v20 = vcombine.low %v23991_v6, %v24034_v23  ;;  %v17741_v6 = vcombine.low %v24028_v48, %v24075_v18  ;;  %v6410_v23 = vrot.slane %v6409_v1, 4  ;;  %v17749_v48 = vcombine.low %v24082_v45, %v24154_v25  ;;  %v24387_v1 = vld [vmem:[%s22244_s6 + $0xa0] sm:$0xf] }
 0x197   : > { %21868 = vmatprep.subr.msk.bf16.mxu1 %vm537_vm0, %v17748_v43  ;;  %v6412_v15 = vshll.u32 %v17691_v36, 16  ;;  %v17433_v18 = vrot.slane %v24241_v21, 9  ;;  %v3287_v43 = vsel %vm537_vm0, %v17443_v54, 0  ;;  %v6513_v25 = vrot.slane %v17691_v36, 5 }
 0x198   : > { %19643 = vmatmul.mubr.msk.bf16.gmra.mrb[4].mxu0 %vm524_vm4, %v17419_v55  ;;  %v3077_v55 = vrot.slane %v3076_v5, 4  ;;  %v17757_v5 = vld [vmem:[%s28387_s1 + $0x30] sm:$0x3] }
 0x199   : > { %19648 = vmatprep.mubr.msk.bf16.mxu0 %vm524_vm4, %v17425_v40  ;;  %v3203_v40 = vsel %vm537_vm0, %v17434_v44, 0  ;;  %v6414_v44 = vrot.slane %v6412_v15, 5  ;;  %v24332_v45 = vsel %vm22570_vm7, %v17433_v18, %v3181_v49  ;;  %v6617_v16 = vsel %vm537_vm0, %v17757_v5, 0  ;;  %v24390_v15 = vld [vmem:[%s22244_s6 + $0xa8] sm:$0xf] }
 0x19a   : > { %v24289_v50 = vsel %vm22306_vm3, %v3077_v55, %v3081_v7  ;;  %v17438_v28 = vcombine.low %v24181_v30, %v24332_v45  ;;  %v24359_v30 = vld [vmem:[%s22244_s6 + $0xe8] sm:$0xf]  ;;  %v24380_v55 = vld [vmem:[%s22244_s6 + $0xec] sm:$0x1]  ;;  %v17758_v49 = vcombine.low %v24261_v33, %v24364_v61 }
 0x19b   : > { %v17428_v39 = vcombine.low %v24038_v56, %v24289_v50  ;;  %v24308_v14 = vsel %vm22306_vm3, %v6410_v23, %v6414_v44  ;;  %v17436_v56 = vcombine.low %v24119_v24, %v24126_v42  ;;  %v17750_v24 = vcombine.low %v24158_v58, %v24162_v2  ;;  %v28652_v2 = vld [vmem:[#allocation7_spill] sm:$0xff]  ;;  %v24397_v23 = vld [vmem:[%s22244_s6 + $0xf0] sm:$0xf]  ;;  %v17770_v44 = vld [vmem:[%s28387_s1 + $0x34] sm:$0x3] }
 0x19c   : > { %v17742_v8 = vcombine.low %v24087_v52, %v24308_v14  ;;  %v17449_v52 = vld [vmem:[%s28387_s1 + $0x32] sm:$0x3]  ;;  %v17751_v42 = vcombine.low %v24166_v57, %v24212_v19  ;;  %v24350_v58 = vsel %vm22570_vm7, %v17747_v27, %v6513_v25  ;;  %v3363_v19 = vshrl.u32 %v24359_v30, 16 }
 0x19d   : > { %19913 = vmatmul.mubr.msk.bf16.gmra.mrb[4].mxu1 %vm524_vm4, %v17733_v3  ;;  %v17752_v57 = vcombine.low %v24216_v51, %v24350_v58  ;;  %v3366_v3 = vshll.u32 %v24359_v30, 16  ;;  %v3384_v51 = vsel %vm537_vm0, %v17449_v52, 0  ;;  %v10406_v18 = vshll.u32 %v24397_v23, 16  ;;  %v24425_v25 = vld [vmem:[%s22244_s6 + $0xb0] sm:$0xf] }
 0x19e   : > { %19918 = vmatprep.mubr.msk.bf16.mxu1 %vm524_vm4, %v17739_v60  ;;  %v6693_v60 = vshrl.u32 %v24364_v61, 16  ;;  %v3365_v36 = vrot.slane %v3363_v19, 4 }
 0x1a0   : > { %19649 = vmatmul.mubr.msk.bf16.vlgmr.msra.gmra.mrb[0].mxu0 %vm524_vm4, %v17426_v17  ;;  %v28653_v17 = vld [vmem:[#allocation17_spill] sm:$0xff]  ;;  %v6695_v7 = vrot.slane %v6693_v60, 4  ;;  %v7109_v60 = vshrl.u32 %v24425_v25, 16 }
 0x1a1   : > { %19657 = vmatpush3.bf16.msra.mxu0 %v3203_v40  ;;  %19652 = vmatprep.mubr.msk.bf16.mxu0 %vm524_vm4, %v17427_v20  ;;  %v3368_v20 = vrot.slane %v3366_v3, 5  ;;  %v6698_v40 = vrot.slane %v6696_v37, 5  ;;  %v10408_v3 = vrot.slane %v10406_v18, 5  ;;  %v7112_v37 = vshll.u32 %v24425_v25, 16 }
 0x1a2   : > { %21842 = vmatprep.subr.msk.bf16.mxu0 %vm537_vm0, %v17443_v54  ;;  %v6713_v54 = vsel %vm537_vm0, %v17763_v12, 0 }
 0x1a5   : > { %19919 = vmatmul.mubr.msk.bf16.vlgmr.msra.gmra.mrb[0].mxu1 %vm524_vm4, %v17740_v9  ;;  %v17444_v9 = vcombine.low %v24241_v21, %v24359_v30  ;;  %v7095_v21 = vshrl.u32 %v24390_v15, 16 }
 0x1a6   : > { %19927 = vmatpush3.bf16.msra.mxu1 %v6534_v41  ;;  %19922 = vmatprep.mubr.msk.bf16.mxu1 %vm524_vm4, %v17741_v6  ;;  %v3369_v6 = vor.u32 %v3368_v20, %v3365_v36  ;;  %v6699_v41 = vor.u32 %v6698_v40, %v6695_v7 }
 0x1a7   : > { %21869 = vmatprep.subr.msk.bf16.mxu1 %vm537_vm0, %v17757_v5  ;;  %v7081_v5 = vshrl.u32 %v24387_v1, 16 }
 0x1a8   : > { %19653 = vmatmul.mubr.msk.bf16.gmra.mrb[4].mxu0 %vm524_vm4, %v17428_v39 }
 0x1a9   : > { %19658 = vmatprep.mubr.msk.bf16.mxu0 %vm524_vm4, %v17435_v29  ;;  %v28654_v29 = vld [vmem:[#allocation18_spill] sm:$0xff] }
 0x1ad   : > { %19923 = vmatmul.mubr.msk.bf16.gmra.mrb[4].mxu1 %vm524_vm4, %v17742_v8  ;;  %v7084_v8 = vshll.u32 %v24387_v1, 16 }
 0x1ae   : > { %19928 = vmatprep.mubr.msk.bf16.mxu1 %vm524_vm4, %v17749_v48  ;;  %v7098_v48 = vshll.u32 %v24390_v15, 16 }
 0x1b0   : > { %19659 = vmatmul.mubr.msk.bf16.vlgmr.msra.gmra.mrb[0].mxu0 %vm524_vm4, %v17436_v56  ;;  %v24410_v56 = vld [vmem:[%s22244_s6 + $0xf8] sm:$0xf]  ;;  %v7100_v33 = vrot.slane %v7098_v48, 5  ;;  %v17769_v48 = vrot.slane %v24364_v61, 9 }
 0x1b1   : > { %19667 = vmatpush3.bf16.msra.mxu0 %v3287_v43  ;;  %19662 = vmatprep.mubr.msk.bf16.mxu0 %vm524_vm4, %v17437_v4  ;;  %v10403_v4 = vshrl.u32 %v24397_v23, 16  ;;  %v3370_v43 = vrot.slane %v3369_v6, 4  ;;  %v10420_v27 = vshll.u32 %v24410_v56, 16  ;;  %v24444_v6 = vld [vmem:[%s22244_s6 + $0xfc] sm:$0x1] }
 0x1b2   : > { %21843 = vmatprep.subr.msk.bf16.mxu0 %vm537_vm0, %v17449_v52 }
 0x1b3   : > { %v10405_v19 = vrot.slane %v10403_v4, 4  ;;  %v10422_v20 = vrot.slane %v10420_v27, 5 }
 0x1b5   : > { %19929 = vmatmul.mubr.msk.bf16.vlgmr.msra.gmra.mrb[0].mxu1 %vm524_vm4, %v17750_v24 }
 0x1b6   : > { %19937 = vmatpush3.bf16.msra.mxu1 %v6617_v16  ;;  %19932 = vmatprep.mubr.msk.bf16.mxu1 %vm524_vm4, %v17751_v42  ;;  %v10417_v42 = vshrl.u32 %v24410_v56, 16  ;;  %v7083_v16 = vrot.slane %v7081_v5, 4  ;;  %v24461_v5 = vld [vmem:[%s22244_s6 + $0xb8] sm:$0xf] }
 0x1b7   : > { %21870 = vmatprep.subr.msk.bf16.mxu1 %vm537_vm0, %v17763_v12  ;;  %v7097_v12 = vrot.slane %v7095_v21, 4  ;;  %v7114_v21 = vrot.slane %v7112_v37, 5  ;;  %v7123_v61 = vshrl.u32 %v24461_v5, 16 }
 0x1b8   : > { %19663 = vmatmul.mubr.msk.bf16.gmra.mrb[4].mxu0 %vm524_vm4, %v17438_v28  ;;  %v7086_v28 = vrot.slane %v7084_v8, 5  ;;  %v10419_v36 = vrot.slane %v10417_v42, 4  ;;  %v7111_v8 = vrot.slane %v7109_v60, 4  ;;  %v24487_v60 = vld [vmem:[%s22244_s6 + $0x104] sm:$0x1] }
 0x1b9   : > { %19668 = vmatprep.mubr.msk.bf16.mxu0 %vm524_vm4, %v28652_v2  ;;  %v24428_v2 = vld [vmem:[%s22244_s6 + $0xa4] sm:$0x1]  ;;  %28657 = vst [vmem:[#allocation16_spill] sm:$0xff] %v24487_v60 }
 0x1ba   : > { %v7087_v7 = vor.u32 %v7086_v28, %v7083_v16  ;;  %v7090_v40 = vshll.u32 %v24428_v2, 16  ;;  %v10423_v18 = vor.u32 %v10422_v20, %v10419_v36  ;;  %v18119_v16 = vld [vmem:[%s28387_s1 + $0x2] sm:$0x3]  ;;  %v24483_v28 = vld [vmem:[%s22244_s6 + $0xbc] sm:$0x1] }
 0x1bb   : > { %28656 = vst [vmem:[#allocation13_spill] sm:$0xff] %v24483_v28 }
 0x1bd   : > { %19933 = vmatmul.mubr.msk.bf16.gmra.mrb[4].mxu1 %vm524_vm4, %v17752_v57  ;;  %v24431_v57 = vld [vmem:[%s22244_s6 + $0xac] sm:$0x1] }
 0x1be   : > { %19938 = vmatprep.mubr.msk.bf16.mxu1 %vm524_vm4, %v23805_v35  ;;  %v24384_v35 = vld [vmem:[%s22244_s6 + $0x13c] sm:$0x1] }
 0x1bf   : > { %v6702_v39 = vshll.u32 %v24384_v35, 16  ;;  %v6791_v4 = vrot.slane %v24384_v35, 5  ;;  %v7126_v35 = vshll.u32 %v24461_v5, 16 }
 0x1c0   : > { %19669 = vmatmul.mubr.msk.bf16.vlgmr.msra.gmra.mrb[0].mxu0 %vm524_vm4, %v28653_v17  ;;  %v6800_v17 = vsel %vm537_vm0, %v17770_v44, 0 }
 0x1c1   : > { %19677 = vmatpush3.bf16.msra.mxu0 %v3384_v51  ;;  %19672 = vmatprep.mubr.msk.bf16.mxu0 %vm524_vm4, %v23830_v63  ;;  %v3372_v63 = vshll.u32 %v24380_v55, 16  ;;  %v6704_v24 = vrot.slane %v6702_v39, 5  ;;  %v3472_v51 = vsel %vm537_vm0, %v17456_v26, 0  ;;  %v24500_v20 = vsel %vm22570_vm7, %v17769_v48, %v6791_v4 }
 0x1c2   : > { %21844 = vmatprep.subr.msk.bf16.mxu0 %vm537_vm0, %v17456_v26 }
 0x1c3   : > { %v3374_v52 = vrot.slane %v3372_v63, 5 }
 0x1c5   : > { %19939 = vmatmul.mubr.msk.bf16.vlgmr.msra.gmra.mrb[0].mxu1 %vm524_vm4, %v28654_v29  ;;  %v3375_v26 = vsel %vm22306_vm3, %v3370_v43, %v3374_v52  ;;  %v17455_v29 = vrot.slane %v24359_v30, 9  ;;  %v24469_v30 = vld [vmem:[%s22244_s6 + $0xb4] sm:$0x1] }
 0x1c6   : > { %19947 = vmatpush3.bf16.msra.mxu1 %v6713_v54  ;;  %19942 = vmatprep.mubr.msk.bf16.mxu1 %vm524_vm4, %v23837_v47  ;;  %v6700_v47 = vrot.slane %v6699_v41, 4  ;;  %v7101_v54 = vor.u32 %v7100_v33, %v7097_v12  ;;  %v10409_v41 = vor.u32 %v10408_v3, %v10405_v19  ;;  %28655 = vst [vmem:[#allocation6_spill] sm:$0xff] %v24469_v30  ;;  %v7118_v33 = vshll.u32 %v24469_v30, 16  ;;  %v24629_v30 = vld [vmem:[%s22244_s6 + $0xd4] sm:$0x1] }
 0x1c7   : > { %21871 = vmatprep.subr.msk.bf16.mxu1 %vm537_vm0, %v17770_v44  ;;  %v17805_v44 = vld [vmem:[%s28387_s1 + $0x2] sm:$0x3]  ;;  %v17450_v42 = vcombine.low %v24289_v50, %v3375_v26  ;;  %v7115_v12 = vor.u32 %v7114_v21, %v7111_v8  ;;  %v10424_v19 = vrot.slane %v10423_v18, 4  ;;  %v7125_v26 = vrot.slane %v7123_v61, 4 }
 0x1c8   : > { %19673 = vmatmul.mubr.msk.bf16.gmra.mrb[4].mxu0 %vm524_vm4, %v17444_v9  ;;  %v7104_v9 = vshll.u32 %v24431_v57, 16  ;;  %v6705_v63 = vsel %vm22306_vm3, %v6700_v47, %v6704_v24  ;;  %v7102_v43 = vrot.slane %v7101_v54, 4  ;;  %v24473_v47 = vld [vmem:[%s22244_s6 + $0x100] sm:$0xf] }
 0x1c9   : > { %19678 = vmatprep.mubr.msk.bf16.mxu0 %vm524_vm4, %v23999_v31  ;;  %v24434_v31 = vld [vmem:[%s22244_s6 + $0xf4] sm:$0x1]  ;;  %v17764_v27 = vcombine.low %v24308_v14, %v6705_v63  ;;  %v10431_v50 = vshrl.u32 %v24473_v47, 16  ;;  %v10434_v37 = vshll.u32 %v24473_v47, 16  ;;  %v28658_v14 = vld [vmem:[#allocation20_spill] sm:$0xff]  ;;  %v7128_v63 = vrot.slane %v7126_v35, 5 }
 0x1ca   : > { %v10412_v39 = vshll.u32 %v24434_v31, 16  ;;  %v7106_v52 = vrot.slane %v7104_v9, 5 }
 0x1cb   : > { %v10433_v8 = vrot.slane %v10431_v50, 4  ;;  %v10436_v21 = vrot.slane %v10434_v37, 5 }
 0x1cc   : > { %v10414_v24 = vrot.slane %v10412_v39, 5  ;;  %v24511_v54 = vsel %vm22306_vm3, %v7102_v43, %v7106_v52  ;;  %v7132_v39 = vshll.u32 %v24483_v28, 16  ;;  %v7129_v43 = vor.u32 %v7128_v63, %v7125_v26  ;;  %v24542_v52 = vld [vmem:[%s22244_s6 + $0x10c] sm:$0x1]  ;;  %v24626_v28 = vld [vmem:[%s22244_s6 + $0x128] sm:$0xf] }
 0x1cd   : > { %19943 = vmatmul.mubr.msk.bf16.gmra.mrb[4].mxu1 %vm524_vm4, %v17758_v49  ;;  %v7092_v49 = vrot.slane %v7090_v40, 5  ;;  %v24505_v40 = vld [vmem:[%s22244_s6 + $0x108] sm:$0xf]  ;;  %28659 = vst [vmem:[#allocation15_spill] sm:$0xff] %v24511_v54  ;;  %28661 = vst [vmem:[#allocation14_spill] sm:$0xff] %v24542_v52 }
 0x1ce   : > { %19948 = vmatprep.mubr.msk.bf16.mxu1 %vm524_vm4, %v24060_v10  ;;  %v3462_v10 = vrot.slane %v24380_v55, 5  ;;  %v7088_v55 = vrot.slane %v7087_v7, 4  ;;  %v10445_v48 = vshrl.u32 %v24505_v40, 16 }
 0x1d0   : > { %19679 = vmatmul.mubr.msk.bf16.vlgmr.msra.gmra.mrb[0].mxu0 %vm524_vm4, %v24003_v0  ;;  %v10426_v0 = vshll.u32 %v24444_v6, 16  ;;  %v24496_v36 = vsel %vm22570_vm7, %v17455_v29, %v3462_v10  ;;  %v7093_v7 = vsel %vm22306_vm3, %v7088_v55, %v7092_v49  ;;  %v10440_v29 = vshll.u32 %v24487_v60, 16  ;;  %v24607_v49 = vld [vmem:[%s22244_s6 + $0x114] sm:$0x1] }
 0x1d1   : > { %19687 = vmatpush3.bf16.msra.mxu0 %v3472_v51  ;;  %19682 = vmatprep.mubr.msk.bf16.mxu0 %vm524_vm4, %v24071_v13  ;;  %v10410_v13 = vrot.slane %v10409_v41, 4  ;;  %v7218_v51 = vsel %vm537_vm0, %v17805_v44, 0  ;;  %v24519_v41 = vld [vmem:[%s22244_s6 + $0xc8] sm:$0xf]  ;;  %v24548_v61 = vcombine.low %v7093_v7, %v24511_v54  ;;  %v24570_v37 = vrot.slane %v10445_v48, 4 }
 0x1d2   : > { %21872 = vmatprep.subr.msk.bf16.mxu0 %vm537_vm0, %v17805_v44  ;;  %v10428_v3 = vrot.slane %v10426_v0, 5  ;;  %v24516_v44 = vld [vmem:[%s22244_s6 + $0xc0] sm:$0xf]  ;;  %v7151_v0 = vshrl.u32 %v24519_v41, 16  ;;  %v7154_v55 = vshll.u32 %v24519_v41, 16  ;;  %v24568_v50 = vrot.slane %v10440_v29, 5 }
 0x1d3   : > { %v10415_v9 = vsel %vm22306_vm3, %v10410_v13, %v10414_v24  ;;  %v7137_v4 = vshrl.u32 %v24516_v44, 16  ;;  %v7140_v18 = vshll.u32 %v24516_v44, 16  ;;  %v10448_v13 = vshll.u32 %v24505_v40, 16  ;;  %v24576_v7 = vld [vmem:[%s22244_s6 + $0xd0] sm:$0xf] }
 0x1d4   : > { %v24529_v10 = vsel %vm22306_vm3, %v10424_v19, %v10428_v3  ;;  %v10437_v3 = vor.u32 %v10436_v21, %v10433_v8  ;;  %28663 = vst [vmem:[#allocation5_spill] sm:$0xff] %v24576_v7  ;;  %v7153_v63 = vrot.slane %v7151_v0, 4  ;;  %v24580_v24 = vld [vmem:[%s22244_s6 + $0xd8] sm:$0xf]  ;;  %v10454_v29 = vshll.u32 %v24542_v52, 16 }
 0x1d5   : > { %19949 = vmatmul.mubr.msk.bf16.vlgmr.msra.gmra.mrb[0].mxu1 %vm524_vm4, %v28658_v14  ;;  %28660 = vst [vmem:[#allocation12_spill] sm:$0xff] %v24529_v10  ;;  %v24551_v35 = vcombine.low %v10415_v9, %v24529_v10  ;;  %v24573_v14 = vld [vmem:[%s22244_s6 + $0x118] sm:$0xf]  ;;  %v7139_v9 = vrot.slane %v7137_v4, 4  ;;  %v7142_v26 = vrot.slane %v7140_v18, 5  ;;  %28664 = vst [vmem:[#allocation9_spill] sm:$0xff] %v24580_v24 }
 0x1d6   : > { %19957 = vmatpush3.bf16.msra.mxu1 %v6800_v17  ;;  %19952 = vmatprep.mubr.msk.bf16.mxu1 %vm524_vm4, %v24110_v53  ;;  %v7116_v17 = vrot.slane %v7115_v12, 4  ;;  %v7120_v53 = vrot.slane %v7118_v33, 5  ;;  %v24557_v12 = vld [vmem:[%s22244_s6 + $0x110] sm:$0xf]  ;;  %v24562_v33 = vld [vmem:[%s28387_s1] sm:$0x3] }
 0x1d7   : > { %21899 = vmatprep.subr.msk.bf16.mxu1 %vm537_vm0, %v18119_v16  ;;  %v24586_v8 = vld [vmem:[%s22244_s6 + $0xcc] sm:$0x1]  ;;  %v10462_v48 = vshll.u32 %v24557_v12, 16  ;;  %v10473_v4 = vshrl.u32 %v24573_v14, 16  ;;  %v7165_v18 = vshrl.u32 %v24576_v7, 16  ;;  %v7168_v0 = vshll.u32 %v24576_v7, 16 }
 0x1d8   : > { %19683 = vmatmul.mubr.msk.bf16.gmra.mrb[4].mxu0 %vm524_vm4, %v17450_v42  ;;  %v7134_v42 = vrot.slane %v7132_v39, 5  ;;  %v24566_v19 = vsel %vm22306_vm3, %v7116_v17, %v7120_v53  ;;  %v7156_v39 = vrot.slane %v7154_v55, 5  ;;  %v7130_v17 = vrot.slane %v7129_v43, 4  ;;  %28665 = vst [vmem:[#allocation8_spill] sm:$0xff] %v24586_v8  ;;  %v24612_v10 = vld [vmem:[%s28387_s1] sm:$0x3] }
 0x1d9   : > { %19688 = vmatprep.mubr.msk.bf16.mxu0 %vm524_vm4, %v24138_v46  ;;  %v24537_v46 = vsel %vm537_vm0, %v18119_v16, 0  ;;  %v24554_v16 = vld [vmem:[%s22244_s6 + $0xc4] sm:$0x1]  ;;  %v10450_v53 = vrot.slane %v10448_v13, 5  ;;  %v7182_v55 = vshll.u32 %v24580_v24, 16  ;;  %v24603_v43 = vrot.slane %v10437_v3, 4 }
 0x1da   : > { %28662 = vst [vmem:[#allocation19_spill] sm:$0xff] %v24554_v16  ;;  %v7146_v21 = vshll.u32 %v24554_v16, 16  ;;  %v7157_v13 = vor.u32 %v7156_v39, %v7153_v63  ;;  %v24616_v54 = vsel %vm22306_vm3, %v7130_v17, %v7134_v42  ;;  %v10456_v52 = vrot.slane %v10454_v29, 5 }
 0x1db   : > { %28666 = vst [vmem:[#allocation4_spill] sm:$0xff] %v24616_v54  ;;  %v10451_v3 = vor.u32 %v10450_v53, %v24570_v37  ;;  %v10464_v39 = vrot.slane %v10462_v48, 5  ;;  %v7167_v7 = vrot.slane %v7165_v18, 4  ;;  %v7170_v42 = vrot.slane %v7168_v0, 5 }
 0x1dc   : > { %v7148_v60 = vrot.slane %v7146_v21, 5  ;;  %v7158_v53 = vrot.slane %v7157_v13, 4  ;;  %v10468_v21 = vshll.u32 %v24607_v49, 16  ;;  %v28667_v18 = vcombine.low %v24332_v45, %v24496_v36 }
 0x1dd   : > { %19953 = vmatmul.mubr.msk.bf16.gmra.mrb[4].mxu1 %vm524_vm4, %v17764_v27  ;;  %v10459_v27 = vshrl.u32 %v24557_v12, 16  ;;  %v7171_v45 = vor.u32 %v7170_v42, %v7167_v7  ;;  %v10452_v13 = vrot.slane %v10451_v3, 4  ;;  %v24671_v3 = vld [vmem:[%s22244_s6 + $0x12c] sm:$0x1] }
 0x1de   : > { %19958 = vmatprep.mubr.msk.bf16.mxu1 %vm524_vm4, %v24185_v11  ;;  %v10476_v11 = vshll.u32 %v24573_v14, 16 }
 0x1df   : > { %v10461_v63 = vrot.slane %v10459_v27, 4  ;;  %v24635_v27 = vld [vmem:[%s22244_s6 + $0xdc] sm:$0x1] }
 0x1e0   : > { %19689 = vmatmul.mubr.msk.bf16.vlgmr.msra.gmra.mrb[0].mxu0 %vm524_vm4, %v24143_v34  ;;  %v7179_v34 = vshrl.u32 %v24580_v24, 16  ;;  %v10478_v16 = vrot.slane %v10476_v11, 5  ;;  %v7184_v24 = vrot.slane %v7182_v55, 5  ;;  %v10501_v11 = vshrl.u32 %v24626_v28, 16 }
 0x1e1   : > { %19967 = vmatpush3.bf16.msra.mxu0 %v7218_v51  ;;  %19692 = vmatprep.mubr.msk.bf16.mxu0 %vm524_vm4, %v24199_v22  ;;  %v7143_v51 = vor.u32 %v7142_v26, %v7139_v9  ;;  %v7160_v22 = vshll.u32 %v24586_v8, 16  ;;  %v24620_v9 = vld [vmem:[%s22244_s6 + $0x11c] sm:$0x1]  ;;  %v24623_v26 = vld [vmem:[%s22244_s6 + $0x120] sm:$0xf]  ;;  %v10475_v8 = vrot.slane %v10473_v4, 4  ;;  %v24656_v55 = vcombine.low %v24566_v19, %v24616_v54 }
 0x1e2   : > { %21873 = vmatprep.subr.msk.bf16.mxu0 %vm537_vm0, %v24562_v33  ;;  %v7181_v17 = vrot.slane %v7179_v34, 4  ;;  %v10487_v48 = vshrl.u32 %v24623_v26, 16  ;;  %v10490_v4 = vshll.u32 %v24623_v26, 16  ;;  %v7174_v34 = vshll.u32 %v24629_v30, 16 }
 0x1e3   : > { %v7144_v37 = vrot.slane %v7143_v51, 4  ;;  %v7162_v29 = vrot.slane %v7160_v22, 5  ;;  %v10479_v0 = vor.u32 %v10478_v16, %v10475_v8  ;;  %v7188_v51 = vshll.u32 %v24635_v27, 16 }
 0x1e4   : > { %v7185_v36 = vor.u32 %v7184_v24, %v7181_v17  ;;  %v10470_v22 = vrot.slane %v10468_v21, 5  ;;  %v7176_v54 = vrot.slane %v7174_v34, 5  ;;  %v28669_v21 = vcombine.low %v24350_v58, %v24500_v20 }
 0x1e5   : > { %19959 = vmatmul.mubr.msk.bf16.vlgmr.msra.gmra.mrb[0].mxu1 %vm524_vm4, %v24189_v38  ;;  %v10504_v38 = vshll.u32 %v24626_v28, 16  ;;  %v24661_v16 = vsel %vm22306_vm3, %v7144_v37, %v7148_v60  ;;  %v24665_v8 = vsel %vm22306_vm3, %v7158_v53, %v7162_v29  ;;  %v10480_v24 = vrot.slane %v10479_v0, 4 }
 0x1e6   : > { %20237 = vmatpush3.bf16.msra.mxu1 %v24537_v46  ;;  %19962 = vmatprep.mubr.msk.bf16.mxu1 %vm524_vm4, %v24224_v59  ;;  %v10465_v46 = vor.u32 %v10464_v39, %v10461_v63  ;;  %v10482_v59 = vshll.u32 %v24620_v9, 16  ;;  %v10489_v63 = vrot.slane %v10487_v48, 4  ;;  %v10492_v39 = vrot.slane %v10490_v4, 5 }
 0x1e7   : > { %21900 = vmatprep.subr.msk.bf16.mxu1 %vm537_vm0, %v24612_v10  ;;  %v10506_v7 = vrot.slane %v10504_v38, 5  ;;  %v24675_v60 = vcombine.low %v24661_v16, %v24665_v8  ;;  %v7172_v37 = vrot.slane %v7171_v45, 4  ;;  %v7186_v53 = vrot.slane %v7185_v36, 4 }
 0x1e8   : > { %19693 = vmatmul.mubr.msk.bf16.gmra.mrb[4].mxu0 %vm524_vm4, %v28667_v18  ;;  %v10503_v18 = vrot.slane %v10501_v11, 4  ;;  %v10466_v42 = vrot.slane %v10465_v46, 4  ;;  %v10484_v17 = vrot.slane %v10482_v59, 5  ;;  %v7190_v29 = vrot.slane %v7188_v51, 5 }
 0x1e9   : > { %19968 = vmatprep.mubr.msk.bf16.mxu0 %vm524_vm4, %v24548_v61  ;;  %v24668_v61 = vld [vmem:[%s22244_s6 + $0x124] sm:$0x1]  ;;  %28668 = vst [vmem:[#allocation10_spill] sm:$0xff] %v24675_v60  ;;  %v7318_v48 = vsel %vm537_vm0, %v24562_v33, 0  ;;  %v24687_v4 = vsel %vm22306_vm3, %v24603_v43, %v24568_v50  ;;  %v24694_v38 = vsel %vm22306_vm3, %v10452_v13, %v10456_v52  ;;  %v10493_v58 = vor.u32 %v10492_v39, %v10489_v63 }
 0x1ea   : > { %v10496_v11 = vshll.u32 %v24668_v61, 16  ;;  %v10507_v20 = vor.u32 %v10506_v7, %v10503_v18  ;;  %v10510_v46 = vshll.u32 %v24671_v3, 16  ;;  %v17830_v33 = vld [vmem:[%s28387_s1 + $0x4] sm:$0x3]  ;;  %v24704_v50 = vsel %vm22306_vm3, %v10466_v42, %v10470_v22 }
 0x1eb   : > { %v24714_v52 = vsel %vm22306_vm3, %v7172_v37, %v7176_v54  ;;  %v24718_v43 = vsel %vm22306_vm3, %v7186_v53, %v7190_v29  ;;  %v24722_v0 = vcombine.low %v24687_v4, %v24694_v38  ;;  %v10494_v45 = vrot.slane %v10493_v58, 4  ;;  %v18144_v63 = vld [vmem:[%s28387_s1 + $0x4] sm:$0x3] }
 0x1ec   : > { %v10498_v59 = vrot.slane %v10496_v11, 5  ;;  %v10508_v36 = vrot.slane %v10507_v20, 4  ;;  %v10512_v51 = vrot.slane %v10510_v46, 5  ;;  %v10640_v54 = vsel %vm537_vm0, %v24612_v10, 0 }
 0x1ed   : > { %19963 = vmatmul.mubr.msk.bf16.gmra.mrb[4].mxu1 %vm524_vm4, %v28669_v21  ;;  %28670 = vst [vmem:[#allocation7_spill] sm:$0xff] %v24722_v0  ;;  %v24733_v13 = vcombine.low %v24714_v52, %v24718_v43  ;;  %v17814_v22 = vcombine.low %v24387_v1, %v24390_v15  ;;  %v18128_v7 = vcombine.low %v24397_v23, %v24410_v56  ;;  %v17822_v37 = vrot.slane %v24387_v1, 9 }
 0x1ee   : > { %20238 = vmatprep.mubr.msk.bf16.mxu1 %vm524_vm4, %v24551_v35  ;;  %v24708_v35 = vsel %vm22306_vm3, %v10480_v24, %v10484_v17  ;;  %v24746_v10 = vsel %vm22306_vm3, %v10494_v45, %v10498_v59  ;;  %v24750_v39 = vsel %vm22306_vm3, %v10508_v36, %v10512_v51  ;;  %v24764_v42 = vcombine.low %v24425_v25, %v24461_v5  ;;  %v28676_v51 = vld [vmem:[#allocation6_spill] sm:$0xff] }
 0x1ef   : > { %v24727_v34 = vcombine.low %v24704_v50, %v24708_v35  ;;  %28672 = vst [vmem:[#allocation18_spill] sm:$0xff] %v24733_v13  ;;  %v24758_v18 = vcombine.low %v24746_v10, %v24750_v39  ;;  %v7451_v24 = vsel %vm537_vm0, %v17830_v33, 0  ;;  %v24769_v17 = vcombine.low %v24516_v44, %v24519_v41 }
 0x1f0   : > { %19969 = vmatmul.mubr.msk.bf16.vlgmr.msra.gmra.mrb[8].mxu0 %vm524_vm4, %v24656_v55  ;;  %v7395_v53 = vrot.slane %v24428_v2, 5  ;;  %v17823_v29 = vrot.slane %v24390_v15, 9  ;;  %v7399_v21 = vrot.slane %v24431_v57, 5  ;;  %v18136_v11 = vrot.slane %v24397_v23, 9 }
 0x1f1   : > { %19977 = vmatpush3.bf16.msra.mxu0 %v7318_v48  ;;  %19972 = vmatprep.mubr.msk.bf16.mxu0 %vm524_vm4, %v24675_v60  ;;  %28671 = vst [vmem:[#allocation17_spill] sm:$0xff] %v24727_v34  ;;  %28673 = vst [vmem:[#allocation20_spill] sm:$0xff] %v24758_v18  ;;  %v17839_v48 = vld [vmem:[%s28387_s1 + $0x6] sm:$0x3]  ;;  %v10717_v58 = vrot.slane %v24434_v31, 5  ;;  %v18137_v1 = vrot.slane %v24410_v56, 9  ;;  %v24791_v57 = vcombine.low %v24473_v47, %v24505_v40 }
 0x1f2   : > { %21874 = vmatprep.subr.msk.bf16.mxu0 %vm537_vm0, %v17830_v33  ;;  %v10721_v2 = vrot.slane %v24444_v6, 5  ;;  %v7396_v20 = vsel %vm22570_vm7, %v17822_v37, %v7395_v53  ;;  %v24797_v23 = vsel %vm22570_vm7, %v17823_v29, %v7399_v21  ;;  %v10773_v31 = vsel %vm537_vm0, %v18144_v63, 0  ;;  %v28674_v6 = vld [vmem:[#allocation9_spill] sm:$0xff]  ;;  %v28678_v21 = vld [vmem:[#allocation19_spill] sm:$0xff] }
 0x1f3   : > { %v24803_v46 = vcombine.low %v24557_v12, %v24573_v14  ;;  %v28675_v33 = vld [vmem:[#allocation5_spill] sm:$0xff]  ;;  %v10718_v45 = vsel %vm22570_vm7, %v18136_v11, %v10717_v58  ;;  %v17824_v36 = vrot.slane %v24425_v25, 9  ;;  %v17826_v29 = vrot.slane %v24516_v44, 9 }
 0x1f4   : > { %v24807_v59 = vcombine.low %v28675_v33, %v28674_v6  ;;  %v28677_v37 = vld [vmem:[#allocation13_spill] sm:$0xff]  ;;  %v7411_v11 = vrot.slane %v28678_v21, 5  ;;  %v17827_v58 = vrot.slane %v24519_v41, 9  ;;  %v18138_v21 = vrot.slane %v24473_v47, 9 }
 0x1f5   : > { %20239 = vmatmul.mubr.msk.bf16.vlgmr.msra.gmra.mrb[8].mxu1 %vm524_vm4, %v24722_v0  ;;  %v7407_v53 = vrot.slane %v28677_v37, 5 }
 0x1f6   : > { %20247 = vmatpush3.bf16.msra.mxu1 %v10640_v54  ;;  %20242 = vmatprep.mubr.msk.bf16.mxu1 %vm524_vm4, %v24727_v34  ;;  %v7403_v54 = vrot.slane %v28676_v51, 5  ;;  %v18139_v34 = vrot.slane %v24505_v40, 9  ;;  %v24854_v60 = vsel %vm22570_vm7, %v17826_v29, %v7411_v11  ;;  %v7419_v11 = vrot.slane %v24629_v30, 5 }
 0x1f7   : > { %21901 = vmatprep.subr.msk.bf16.mxu1 %vm537_vm0, %v18144_v63  ;;  %v24816_v63 = vsel %vm22570_vm7, %v18137_v1, %v10721_v2  ;;  %v24835_v2 = vcombine.low %v24623_v26, %v24626_v28 }
 0x1f8   : > { %19973 = vmatmul.mubr.msk.bf16.gmra.mrb[12].mxu0 %vm524_vm4, %v24733_v13  ;;  %v18145_v51 = vcombine.low %v10718_v45, %v24816_v63  ;;  %v24842_v37 = vsel %vm22570_vm7, %v17824_v36, %v7403_v54  ;;  %v28681_v13 = vld [vmem:[#allocation14_spill] sm:$0xff]  ;;  %v18140_v54 = vrot.slane %v24557_v12, 9 }
 0x1f9   : > { %19978 = vmatprep.mubr.msk.bf16.mxu0 %vm524_vm4, %v17814_v22  ;;  %v17831_v22 = vcombine.low %v7396_v20, %v24797_v23  ;;  %v28679_v20 = vld [vmem:[#allocation8_spill] sm:$0xff]  ;;  %v10729_v45 = vrot.slane %v28681_v13, 5  ;;  %v17828_v13 = vrot.slane %v28675_v33, 9 }
 0x1fa   : > { %v7415_v1 = vrot.slane %v28679_v20, 5  ;;  %v28680_v20 = vld [vmem:[#allocation16_spill] sm:$0xff] }
 0x1fb   : > { %v24886_v0 = vsel %vm22570_vm7, %v18139_v34, %v10729_v45  ;;  %v24905_v34 = vsel %vm22570_vm7, %v17828_v13, %v7419_v11  ;;  %v18142_v45 = vrot.slane %v24623_v26, 9  ;;  %v17840_v11 = vcombine.low %v24390_v15, %v24425_v25 }
 0x1fc   : > { %v24858_v36 = vsel %vm22570_vm7, %v17827_v58, %v7415_v1  ;;  %v17829_v58 = vrot.slane %v28674_v6, 9  ;;  %v18154_v25 = vcombine.low %v24410_v56, %v24473_v47  ;;  %v24969_v56 = vld [vmem:[%s22244_s6 + $0xe0] sm:$0xf] }
 0x1fd   : > { %20243 = vmatmul.mubr.msk.bf16.gmra.mrb[12].mxu1 %vm524_vm4, %v24758_v18  ;;  %v10725_v18 = vrot.slane %v28680_v20, 5  ;;  %v24871_v29 = vcombine.low %v24854_v60, %v24858_v36  ;;  %v7625_v47 = vshll.u32 %v24969_v56, 16 }
 0x1fe   : > { %20248 = vmatprep.mubr.msk.bf16.mxu1 %vm524_vm4, %v18128_v7  ;;  %v18153_v7 = vld [vmem:[%s28387_s1 + $0x6] sm:$0x3] }
 0x1ff   : > { %v24882_v1 = vsel %vm22570_vm7, %v18138_v21, %v10725_v18 }
 0x200   : > { %19979 = vmatmul.mubr.msk.bf16.vlgmr.msra.gmra.mrb[8].mxu0 %vm524_vm4, %v24764_v42 }
 0x201   : > { %19987 = vmatpush3.bf16.msra.mxu0 %v7451_v24  ;;  %19982 = vmatprep.mubr.msk.bf16.mxu0 %vm524_vm4, %v24769_v17  ;;  %v17825_v24 = vrot.slane %v24461_v5, 9 }
 0x202   : > { %21875 = vmatprep.subr.msk.bf16.mxu0 %vm537_vm0, %v17839_v48 }
 0x205   : > { %20249 = vmatmul.mubr.msk.bf16.vlgmr.msra.gmra.mrb[8].mxu1 %vm524_vm4, %v24791_v57 }
 0x206   : > { %20257 = vmatpush3.bf16.msra.mxu1 %v10773_v31  ;;  %20252 = vmatprep.mubr.msk.bf16.mxu1 %vm524_vm4, %v24803_v46  ;;  %v24846_v31 = vsel %vm22570_vm7, %v17825_v24, %v7407_v53  ;;  %v18141_v24 = vrot.slane %v24573_v14, 9  ;;  %v10737_v53 = vrot.slane %v24620_v9, 5  ;;  %v7546_v9 = vsel %vm537_vm0, %v17839_v48, 0  ;;  %v17848_v48 = vld [vmem:[%s28387_s1 + $0x8] sm:$0x3] }
 0x207   : > { %21902 = vmatprep.subr.msk.bf16.mxu1 %vm537_vm0, %v18153_v7  ;;  %v24866_v20 = vcombine.low %v24842_v37, %v24846_v31 }
 0x208   : > { %19983 = vmatmul.mubr.msk.bf16.gmra.mrb[12].mxu0 %vm524_vm4, %v24807_v59 }
 0x209   : > { %19988 = vmatprep.mubr.msk.bf16.mxu0 %vm524_vm4, %v17831_v22  ;;  %v10733_v22 = vrot.slane %v24607_v49, 5  ;;  %v7423_v49 = vrot.slane %v24635_v27, 5  ;;  %v24894_v27 = vsel %vm22570_vm7, %v18141_v24, %v10737_v53  ;;  %v10745_v24 = vrot.slane %v24671_v3, 5 }
 0x20a   : > { %v10868_v53 = vsel %vm537_vm0, %v18153_v7, 0  ;;  %v17841_v7 = vcombine.low %v24461_v5, %v24516_v44  ;;  %v7622_v5 = vshrl.u32 %v24969_v56, 16  ;;  %v18155_v44 = vcombine.low %v24505_v40, %v24557_v12  ;;  %v24989_v40 = vld [vmem:[%s22244_s6 + $0x130] sm:$0xf]  ;;  %v17802_v12 = vld [vmem:[%s22244_s6 + $0xe4] sm:$0x1] }
 0x20b   : > { %v24890_v30 = vsel %vm22570_vm7, %v18140_v54, %v10733_v22  ;;  %v24909_v18 = vsel %vm22570_vm7, %v17829_v58, %v7423_v49  ;;  %v10741_v54 = vrot.slane %v24668_v61, 5  ;;  %v18143_v22 = vrot.slane %v24626_v28, 9  ;;  %v18162_v58 = vld [vmem:[%s28387_s1 + $0x8] sm:$0x3] }
 0x20c   : > { %v24917_v21 = vcombine.low %v24890_v30, %v24894_v27  ;;  %v24927_v13 = vcombine.low %v24905_v34, %v24909_v18  ;;  %v17842_v49 = vcombine.low %v24519_v41, %v28675_v33  ;;  %v18156_v41 = vcombine.low %v24573_v14, %v24623_v26 }
 0x20d   : > { %20253 = vmatmul.mubr.msk.bf16.gmra.mrb[12].mxu1 %vm524_vm4, %v24835_v2  ;;  %v24940_v61 = vsel %vm22570_vm7, %v18142_v45, %v10741_v54  ;;  %v24944_v3 = vsel %vm22570_vm7, %v18143_v22, %v10745_v24  ;;  %v17858_v45 = vld [vmem:[%s28387_s1 + $0xa] sm:$0x3]  ;;  %v10976_v33 = vsel %vm537_vm0, %v18162_v58, 0  ;;  %v28682_v54 = vld [vmem:[#allocation15_spill] sm:$0xff]  ;;  %v10944_v14 = vshrl.u32 %v24989_v40, 16 }
 0x20e   : > { %20258 = vmatprep.mubr.msk.bf16.mxu1 %vm524_vm4, %v18145_v51  ;;  %v24913_v51 = vcombine.low %v24882_v1, %v24886_v0  ;;  %v24952_v15 = vcombine.low %v24940_v61, %v24944_v3  ;;  %v17849_v22 = vcombine.low %v28682_v54, %v24566_v19  ;;  %v18172_v24 = vld [vmem:[%s28387_s1 + $0xa] sm:$0x3]  ;;  %v10947_v26 = vshll.u32 %v24989_v40, 16 }
 0x20f   : > { %v7753_v54 = vsel %vm537_vm0, %v17858_v45, 0 }
 0x210   : > { %19989 = vmatmul.mubr.msk.bf16.vlgmr.msra.gmra.mrb[8].mxu0 %vm524_vm4, %v24866_v20 }
 0x211   : > { %19997 = vmatpush3.bf16.msra.mxu0 %v7546_v9  ;;  %19992 = vmatprep.mubr.msk.bf16.mxu0 %vm524_vm4, %v24871_v29  ;;  %v7654_v9 = vsel %vm537_vm0, %v17848_v48, 0 }
 0x212   : > { %21876 = vmatprep.subr.msk.bf16.mxu0 %vm537_vm0, %v17848_v48  ;;  %v17843_v48 = vcombine.low %v28674_v6, %v24969_v56  ;;  %v7631_v6 = vshll.u32 %v17802_v12, 16 }
 0x215   : > { %20259 = vmatmul.mubr.msk.bf16.vlgmr.msra.gmra.mrb[8].mxu1 %vm524_vm4, %v24913_v51 }
 0x216   : > { %20267 = vmatpush3.bf16.msra.mxu1 %v10868_v53  ;;  %20262 = vmatprep.mubr.msk.bf16.mxu1 %vm524_vm4, %v24917_v21  ;;  %v7624_v53 = vrot.slane %v7622_v5, 4  ;;  %v28684_v5 = vld [vmem:[#allocation4_spill] sm:$0xff] }
 0x217   : > { %21903 = vmatprep.subr.msk.bf16.mxu1 %vm537_vm0, %v18162_v58  ;;  %v18157_v58 = vcombine.low %v24626_v28, %v24989_v40 }
 0x218   : > { %19993 = vmatmul.mubr.msk.bf16.gmra.mrb[12].mxu0 %vm524_vm4, %v24927_v13 }
 0x219   : > { %19998 = vmatprep.mubr.msk.bf16.mxu0 %vm524_vm4, %v17840_v11  ;;  %v7627_v11 = vrot.slane %v7625_v47, 5  ;;  %v17850_v47 = vcombine.low %v28684_v5, %v24661_v16  ;;  %v17867_v16 = vld [vmem:[%s28387_s1 + $0xc] sm:$0x3] }
 0x21b   : > { %v7628_v19 = vor.u32 %v7627_v11, %v7624_v53  ;;  %v11075_v11 = vsel %vm537_vm0, %v18172_v24, 0 }
 0x21d   : > { %20263 = vmatmul.mubr.msk.bf16.gmra.mrb[12].mxu1 %vm524_vm4, %v24952_v15 }
 0x21e   : > { %20268 = vmatprep.mubr.msk.bf16.mxu1 %vm524_vm4, %v18154_v25  ;;  %v28683_v25 = vld [vmem:[#allocation12_spill] sm:$0xff] }
 0x220   : > { %19999 = vmatmul.mubr.msk.bf16.vlgmr.msra.gmra.mrb[8].mxu0 %vm524_vm4, %v17841_v7  ;;  %v18163_v7 = vcombine.low %v28683_v25, %v24687_v4 }
 0x221   : > { %20007 = vmatpush3.bf16.msra.mxu0 %v7654_v9  ;;  %20002 = vmatprep.mubr.msk.bf16.mxu0 %vm524_vm4, %v17842_v49  ;;  %v10946_v49 = vrot.slane %v10944_v14, 4  ;;  %v10949_v9 = vrot.slane %v10947_v26, 5  ;;  %v17859_v26 = vcombine.low %v24797_v23, %v24842_v37  ;;  %v17857_v23 = vrot.slane %v24969_v56, 9 }
 0x222   : > { %21877 = vmatprep.subr.msk.bf16.mxu0 %vm537_vm0, %v17858_v45  ;;  %v18165_v45 = vcombine.low %v24708_v35, %v24746_v10  ;;  %v18173_v35 = vcombine.low %v24816_v63, %v24882_v1  ;;  %v17861_v10 = vcombine.low %v24858_v36, %v24905_v34  ;;  %v7732_v37 = vrot.slane %v17802_v12, 5 }
 0x223   : > { %v10950_v28 = vor.u32 %v10949_v9, %v10946_v49  ;;  %v18174_v63 = vcombine.low %v24886_v0, %v24890_v30  ;;  %v18171_v36 = vrot.slane %v24989_v40, 9  ;;  %v22176_v34 = vmov 0  }
 0x224   : > { %253 = vst.msk [vmem:[#allocation2] sm:$0xf] %vm252_vm8, %v22176_v34  ;;  %256 = vst.msk [vmem:[#allocation2 + $0x8] sm:$0xf] %vm252_vm8, %v22176_v34 }
 0x225   : > { %20269 = vmatmul.mubr.msk.bf16.vlgmr.msra.gmra.mrb[8].mxu1 %vm524_vm4, %v18155_v44  ;;  %v25005_v44 = vld [vmem:[%s22244_s6 + $0x134] sm:$0x1]  ;;  %255 = vst.msk [vmem:[#allocation2 + $0x4] sm:$0x1] %vm254_vm9, %v22176_v34  ;;  %257 = vst.msk [vmem:[#allocation2 + $0xc] sm:$0x1] %vm254_vm9, %v22176_v34 }
 0x226   : > { %20277 = vmatpush3.bf16.msra.mxu1 %v10976_v33  ;;  %20272 = vmatprep.mubr.msk.bf16.mxu1 %vm524_vm4, %v18156_v41  ;;  %v17851_v41 = vcombine.low %v24665_v8, %v24714_v52  ;;  %v7629_v33 = vrot.slane %v7628_v19, 4  ;;  %v10953_v4 = vshll.u32 %v25005_v44, 16  ;;  %v18164_v52 = vcombine.low %v24694_v38, %v24704_v50  ;;  %v25035_v19 = vld [vmem:[%s28387_s1 + $0xc] sm:$0x3]  ;;  %258 = vst.msk [vmem:[#allocation2 + $0x10] sm:$0xf] %vm252_vm8, %v22176_v34 }
 0x227   : > { %21904 = vmatprep.subr.msk.bf16.mxu1 %vm537_vm0, %v18172_v24  ;;  %v7836_v24 = vsel %vm537_vm0, %v17867_v16, 0  ;;  %v11054_v1 = vrot.slane %v25005_v44, 5  ;;  %259 = vst.msk [vmem:[#allocation2 + $0x14] sm:$0x1] %vm254_vm9, %v22176_v34  ;;  %261 = vst.msk [vmem:[#allocation2 + $0x1c] sm:$0x1] %vm254_vm9, %v22176_v34 }
 0x228   : > { %20003 = vmatmul.mubr.msk.bf16.gmra.mrb[12].mxu0 %vm524_vm4, %v17843_v48  ;;  %v7633_v48 = vrot.slane %v7631_v6, 5  ;;  %v10955_v53 = vrot.slane %v10953_v4, 5  ;;  %260 = vst.msk [vmem:[#allocation2 + $0x18] sm:$0xf] %vm252_vm8, %v22176_v34  ;;  %262 = vst.msk [vmem:[#allocation2 + $0x20] sm:$0xf] %vm252_vm8, %v22176_v34 }
 0x229   : > { %20008 = vmatprep.mubr.msk.bf16.mxu0 %vm524_vm4, %v17849_v22  ;;  %v10951_v22 = vrot.slane %v10950_v28, 4  ;;  %263 = vst.msk [vmem:[#allocation2 + $0x24] sm:$0x1] %vm254_vm9, %v22176_v34  ;;  %265 = vst.msk [vmem:[#allocation2 + $0x2c] sm:$0x1] %vm254_vm9, %v22176_v34  ;;  %v11158_v12 = vsel %vm537_vm0, %v25035_v19, 0 }
 0x22a   : > { %v25020_v8 = vsel %vm22306_vm3, %v7629_v33, %v7633_v48  ;;  %264 = vst.msk [vmem:[#allocation2 + $0x28] sm:$0xf] %vm252_vm8, %v22176_v34  ;;  %266 = vst.msk [vmem:[#allocation2 + $0x30] sm:$0xf] %vm252_vm8, %v22176_v34 }
 0x22b   : > { %v17852_v14 = vcombine.low %v24718_v43, %v25020_v8  ;;  %v25041_v38 = vsel %vm22306_vm3, %v10951_v22, %v10955_v53  ;;  %v17860_v43 = vcombine.low %v24846_v31, %v24854_v60  ;;  %v25068_v60 = vsel %vm22570_vm7, %v17857_v23, %v7732_v37  ;;  %267 = vst.msk [vmem:[#allocation2 + $0x34] sm:$0x1] %vm254_vm9, %v22176_v34  ;;  %v28687_v22 = vld [vmem:[#allocation18_spill] sm:$0xff] }
 0x22c   : > { %v18166_v50 = vcombine.low %v24750_v39, %v25041_v38  ;;  %v25062_v39 = vld [vmem:[%s28387_s1 + $0xe] sm:$0x3]  ;;  %v18175_v31 = vcombine.low %v24894_v27, %v24940_v61  ;;  %268 = vst.msk [vmem:[#allocation2 + $0x38] sm:$0xf] %vm252_vm8, %v22176_v34  ;;  %270 = vst.msk [vmem:[#allocation2 + $0x40] sm:$0xf] %vm252_vm8, %v22176_v34  ;;  %v17862_v6 = vcombine.low %v24909_v18, %v25068_v60 }
 0x22d   : > { %20273 = vmatmul.mubr.msk.bf16.gmra.mrb[12].mxu1 %vm524_vm4, %v18157_v58  ;;  %269 = vst.msk [vmem:[#allocation2 + $0x3c] sm:$0x1] %vm254_vm9, %v22176_v34  ;;  %271 = vst.msk [vmem:[#allocation2 + $0x44] sm:$0x1] %vm254_vm9, %v22176_v34  ;;  %v18187_v58 = vld [vmem:[%s28387_s1 + $0xe] sm:$0x3]  ;;  %v25339_v18 = vsel %vm22570_vm7, %v18171_v36, %v11054_v1 }
 0x22e   : > { %20278 = vmatprep.mubr.msk.bf16.mxu1 %vm524_vm4, %v18163_v7  ;;  %272 = vst.msk [vmem:[#allocation2 + $0x48] sm:$0xf] %vm252_vm8, %v22176_v34  ;;  %274 = vst.msk [vmem:[#allocation2 + $0x50] sm:$0xf] %vm252_vm8, %v22176_v34  ;;  %v18176_v0 = vcombine.low %v24944_v3, %v25339_v18  ;;  %v7932_v30 = vsel %vm537_vm0, %v25062_v39, 0 }
 0x22f   : > { %273 = vst.msk [vmem:[#allocation2 + $0x4c] sm:$0x1] %vm254_vm9, %v22176_v34  ;;  %275 = vst.msk [vmem:[#allocation2 + $0x54] sm:$0x1] %vm254_vm9, %v22176_v34  ;;  %v25353_v27 = vld [vmem:[%s22244_s6 + $0xe8] sm:$0xf] }
 0x230   : > { %20009 = vmatmul.mubr.msk.bf16.vlgmr.msra.gmra.mrb[8].mxu0 %vm524_vm4, %v17850_v47  ;;  %280 = vst.msk [vmem:[#allocation2 + $0x68] sm:$0xf] %vm252_vm8, %v22176_v34  ;;  %292 = vst.msk [vmem:[#allocation2 + $0x98] sm:$0xf] %vm252_vm8, %v22176_v34  ;;  %v17880_v61 = vld [vmem:[%s28387_s1 + $0x10] sm:$0x3]  ;;  %v17868_v25 = vcombine.low %v24969_v56, %v25353_v27 }
 0x231   : > { %20017 = vmatpush3.bf16.msra.mxu0 %v7753_v54  ;;  %20012 = vmatprep.mubr.msk.bf16.mxu0 %vm524_vm4, %v17851_v41  ;;  %281 = vst.msk [vmem:[#allocation2 + $0x6c] sm:$0x1] %vm254_vm9, %v22176_v34  ;;  %293 = vst.msk [vmem:[#allocation2 + $0x9c] sm:$0x1] %vm254_vm9, %v22176_v34  ;;  %v7915_v3 = vshll.u32 %v25353_v27, 16  ;;  %v17879_v36 = vrot.slane %v25353_v27, 9 }
 0x232   : > { %21878 = vmatprep.subr.msk.bf16.mxu0 %vm537_vm0, %v17867_v16  ;;  %294 = vst.msk [vmem:[#allocation2 + $0xa0] sm:$0xf] %vm252_vm8, %v22176_v34  ;;  %312 = vst.msk [vmem:[#allocation2 + $0xe8] sm:$0xf] %vm252_vm8, %v22176_v34  ;;  %v25369_v7 = vld [vmem:[%s22244_s6 + $0x138] sm:$0xf] }
 0x233   : > { %295 = vst.msk [vmem:[#allocation2 + $0xa4] sm:$0x1] %vm254_vm9, %v22176_v34  ;;  %313 = vst.msk [vmem:[#allocation2 + $0xec] sm:$0x1] %vm254_vm9, %v22176_v34  ;;  %v7917_v9 = vrot.slane %v7915_v3, 5  ;;  %v11237_v5 = vshll.u32 %v25369_v7, 16  ;;  %v18182_v48 = vcombine.low %v24989_v40, %v25369_v7 }
 0x234   : > { %314 = vst.msk [vmem:[#allocation2 + $0xf0] sm:$0xf] %vm252_vm8, %v22176_v34  ;;  %332 = vst.msk [vmem:[#allocation2 + $0x138] sm:$0xf] %vm252_vm8, %v22176_v34  ;;  %v25377_v47 = vld [vmem:[%s22244_s6 + $0xec] sm:$0x1] }
 0x235   : > { %20279 = vmatmul.mubr.msk.bf16.vlgmr.msra.gmra.mrb[8].mxu1 %vm524_vm4, %v18164_v52  ;;  %315 = vst.msk [vmem:[#allocation2 + $0xf4] sm:$0x1] %vm254_vm9, %v22176_v34  ;;  %333 = vst.msk [vmem:[#allocation2 + $0x13c] sm:$0x1] %vm254_vm9, %v22176_v34  ;;  %v7921_v44 = vshll.u32 %v25377_v47, 16  ;;  %v11239_v33 = vrot.slane %v11237_v5, 5 }
 0x236   : > { %20287 = vmatpush3.bf16.msra.mxu1 %v11075_v11  ;;  %20282 = vmatprep.mubr.msk.bf16.mxu1 %vm524_vm4, %v18165_v45  ;;  %334 = vst.msk [vmem:[#allocation2 + $0x140] sm:$0xf] %vm252_vm8, %v22176_v34  ;;  %352 = vst.msk [vmem:[#allocation2 + $0x188] sm:$0xf] %vm252_vm8, %v22176_v34  ;;  %v8019_v16 = vsel %vm537_vm0, %v17880_v61, 0  ;;  %v28685_v52 = vld [vmem:[#allocation7_spill] sm:$0xff] }
 0x237   : > { %21905 = vmatprep.subr.msk.bf16.mxu1 %vm537_vm0, %v25035_v19  ;;  %335 = vst.msk [vmem:[#allocation2 + $0x144] sm:$0x1] %vm254_vm9, %v22176_v34  ;;  %353 = vst.msk [vmem:[#allocation2 + $0x18c] sm:$0x1] %vm254_vm9, %v22176_v34  ;;  %v7923_v28 = vrot.slane %v7921_v44, 5  ;;  %v28686_v40 = vld [vmem:[#allocation10_spill] sm:$0xff] }
 0x238   : > { %20013 = vmatmul.mubr.msk.bf16.gmra.mrb[12].mxu0 %vm524_vm4, %v17852_v14  ;;  %354 = vst.msk [vmem:[#allocation2 + $0x190] sm:$0xf] %vm252_vm8, %v22176_v34  ;;  %356 = vst.msk [vmem:[#allocation2 + $0x198] sm:$0xf] %vm252_vm8, %v22176_v34  ;;  %v18220_v23 = vld [vmem:[%s28387_s1 + $0x12] sm:$0x3] }
 0x239   : > { %20018 = vmatprep.mubr.msk.bf16.mxu0 %vm524_vm4, %v17859_v26  ;;  %355 = vst.msk [vmem:[#allocation2 + $0x194] sm:$0x1] %vm254_vm9, %v22176_v34  ;;  %357 = vst.msk [vmem:[#allocation2 + $0x19c] sm:$0x1] %vm254_vm9, %v22176_v34  ;;  %v25407_v26 = vld [vmem:[%s22244_s6 + $0xf0] sm:$0xf] }
 0x23a   : > { %358 = vst.msk [vmem:[#allocation2 + $0x1a0] sm:$0xf] %vm252_vm8, %v22176_v34  ;;  %360 = vst.msk [vmem:[#allocation2 + $0x1a8] sm:$0xf] %vm252_vm8, %v22176_v34  ;;  %v8010_v1 = vrot.slane %v25377_v47, 5 }
 0x23b   : > { %359 = vst.msk [vmem:[#allocation2 + $0x1a4] sm:$0x1] %vm254_vm9, %v22176_v34  ;;  %361 = vst.msk [vmem:[#allocation2 + $0x1ac] sm:$0x1] %vm254_vm9, %v22176_v34  ;;  %v25462_v47 = vld [vmem:[%s22244_s6 + $0x144] sm:$0x1] }
 0x23c   : > { %362 = vst.msk [vmem:[#allocation2 + $0x1b0] sm:$0xf] %vm252_vm8, %v22176_v34  ;;  %364 = vst.msk [vmem:[#allocation2 + $0x1b8] sm:$0xf] %vm252_vm8, %v22176_v34 }
 0x23d   : > { %20283 = vmatmul.mubr.msk.bf16.gmra.mrb[12].mxu1 %vm524_vm4, %v18166_v50  ;;  %363 = vst.msk [vmem:[#allocation2 + $0x1b4] sm:$0x1] %vm254_vm9, %v22176_v34  ;;  %365 = vst.msk [vmem:[#allocation2 + $0x1bc] sm:$0x1] %vm254_vm9, %v22176_v34  ;;  %v25411_v50 = vld [vmem:[%s22244_s6 + $0xf8] sm:$0xf] }
 0x23e   : > { %20288 = vmatprep.mubr.msk.bf16.mxu1 %vm524_vm4, %v18173_v35  ;;  %366 = vst.msk [vmem:[#allocation2 + $0x1c0] sm:$0xf] %vm252_vm8, %v22176_v34  ;;  %368 = vst.msk [vmem:[#allocation2 + $0x1c8] sm:$0xf] %vm252_vm8, %v22176_v34  ;;  %v8224_v35 = vshrl.u32 %v25407_v26, 16 }
 0x23f   : > { %367 = vst.msk [vmem:[#allocation2 + $0x1c4] sm:$0x1] %vm254_vm9, %v22176_v34  ;;  %369 = vst.msk [vmem:[#allocation2 + $0x1cc] sm:$0x1] %vm254_vm9, %v22176_v34 }
 0x240   : > { %20019 = vmatmul.mubr.msk.bf16.vlgmr.msra.gmra.mrb[8].mxu0 %vm524_vm4, %v17860_v43  ;;  %370 = vst.msk [vmem:[#allocation2 + $0x1d0] sm:$0xf] %vm252_vm8, %v22176_v34  ;;  %372 = vst.msk [vmem:[#allocation2 + $0x1d8] sm:$0xf] %vm252_vm8, %v22176_v34  ;;  %v8227_v43 = vshll.u32 %v25407_v26, 16  ;;  %v8226_v3 = vrot.slane %v8224_v35, 4 }
 0x241   : > { %20027 = vmatpush3.bf16.msra.mxu0 %v7836_v24  ;;  %20022 = vmatprep.mubr.msk.bf16.mxu0 %vm524_vm4, %v17861_v10  ;;  %371 = vst.msk [vmem:[#allocation2 + $0x1d4] sm:$0x1] %vm254_vm9, %v22176_v34  ;;  %373 = vst.msk [vmem:[#allocation2 + $0x1dc] sm:$0x1] %vm254_vm9, %v22176_v34  ;;  %v25416_v10 = vld [vmem:[%s22244_s6 + $0x140] sm:$0xf] }
 0x242   : > { %21879 = vmatprep.subr.msk.bf16.mxu0 %vm537_vm0, %v25062_v39  ;;  %276 = vst.msk [vmem:[#allocation2 + $0x58] sm:$0xf] %vm252_vm8, %v22176_v34  ;;  %278 = vst.msk [vmem:[#allocation2 + $0x60] sm:$0xf] %vm252_vm8, %v22176_v34  ;;  %v11546_v37 = vshrl.u32 %v25416_v10, 16  ;;  %v11549_v24 = vshll.u32 %v25416_v10, 16 }
 0x243   : > { %277 = vst.msk [vmem:[#allocation2 + $0x5c] sm:$0x1] %vm254_vm9, %v22176_v34  ;;  %279 = vst.msk [vmem:[#allocation2 + $0x64] sm:$0x1] %vm254_vm9, %v22176_v34  ;;  %v8238_v39 = vshrl.u32 %v25411_v50, 16 }
 0x244   : > { %282 = vst.msk [vmem:[#allocation2 + $0x70] sm:$0xf] %vm252_vm8, %v22176_v34  ;;  %284 = vst.msk [vmem:[#allocation2 + $0x78] sm:$0xf] %vm252_vm8, %v22176_v34  ;;  %v25504_v35 = vld [vmem:[%s28387_s1 + $0x14] sm:$0x3] }
 0x245   : > { %283 = vst.msk [vmem:[#allocation2 + $0x74] sm:$0x1] %vm254_vm9, %v22176_v34  ;;  %285 = vst.msk [vmem:[#allocation2 + $0x7c] sm:$0x1] %vm254_vm9, %v22176_v34  ;;  %20289 = vmatmul.mubr.msk.bf16.vlgmr.msra.gmra.mrb[8].mxu1 %vm524_vm4, %v18174_v63 }
 0x246   : > { %286 = vst.msk [vmem:[#allocation2 + $0x80] sm:$0xf] %vm252_vm8, %v22176_v34  ;;  %288 = vst.msk [vmem:[#allocation2 + $0x88] sm:$0xf] %vm252_vm8, %v22176_v34  ;;  %20297 = vmatpush3.bf16.msra.mxu1 %v11158_v12  ;;  %20292 = vmatprep.mubr.msk.bf16.mxu1 %vm524_vm4, %v18175_v31  ;;  %v28688_v12 = vld [vmem:[#allocation17_spill] sm:$0xff] }
 0x247   : > { %287 = vst.msk [vmem:[#allocation2 + $0x84] sm:$0x1] %vm254_vm9, %v22176_v34  ;;  %289 = vst.msk [vmem:[#allocation2 + $0x8c] sm:$0x1] %vm254_vm9, %v22176_v34  ;;  %21906 = vmatprep.subr.msk.bf16.mxu1 %vm537_vm0, %v18187_v58 }
 0x248   : > { %290 = vst.msk [vmem:[#allocation2 + $0x90] sm:$0xf] %vm252_vm8, %v22176_v34  ;;  %296 = vst.msk [vmem:[#allocation2 + $0xa8] sm:$0xf] %vm252_vm8, %v22176_v34  ;;  %20023 = vmatmul.mubr.msk.bf16.gmra.mrb[12].mxu0 %vm524_vm4, %v17862_v6  ;;  %v18193_v6 = vrot.slane %v25369_v7, 9 }
 0x249   : > { %291 = vst.msk [vmem:[#allocation2 + $0x94] sm:$0x1] %vm254_vm9, %v22176_v34  ;;  %297 = vst.msk [vmem:[#allocation2 + $0xac] sm:$0x1] %vm254_vm9, %v22176_v34  ;;  %20028 = vmatprep.mubr.msk.bf16.mxu0 %vm524_vm4, %v24764_v42  ;;  %v7912_v42 = vshrl.u32 %v25353_v27, 16 }
 0x24a   : > { %298 = vst.msk [vmem:[#allocation2 + $0xb0] sm:$0xf] %vm252_vm8, %v22176_v34  ;;  %300 = vst.msk [vmem:[#allocation2 + $0xb8] sm:$0xf] %vm252_vm8, %v22176_v34  ;;  %v25445_v27 = vld [vmem:[%s28387_s1 + $0x14] sm:$0x3] }
 0x24b   : > { %299 = vst.msk [vmem:[#allocation2 + $0xb4] sm:$0x1] %vm254_vm9, %v22176_v34  ;;  %301 = vst.msk [vmem:[#allocation2 + $0xbc] sm:$0x1] %vm254_vm9, %v22176_v34  ;;  %v7914_v49 = vrot.slane %v7912_v42, 4 }
 0x24c   : > { %302 = vst.msk [vmem:[#allocation2 + $0xc0] sm:$0xf] %vm252_vm8, %v22176_v34  ;;  %304 = vst.msk [vmem:[#allocation2 + $0xc8] sm:$0xf] %vm252_vm8, %v22176_v34  ;;  %v25448_v42 = vld [vmem:[%s22244_s6 + $0x100] sm:$0xf] }
 0x24d   : > { %303 = vst.msk [vmem:[#allocation2 + $0xc4] sm:$0x1] %vm254_vm9, %v22176_v34  ;;  %305 = vst.msk [vmem:[#allocation2 + $0xcc] sm:$0x1] %vm254_vm9, %v22176_v34  ;;  %20293 = vmatmul.mubr.msk.bf16.gmra.mrb[12].mxu1 %vm524_vm4, %v18176_v0  ;;  %v7918_v56 = vor.u32 %v7917_v9, %v7914_v49  ;;  %v11548_v9 = vrot.slane %v11546_v37, 4  ;;  %v8255_v44 = vshll.u32 %v25448_v42, 16 }
 0x24e   : > { %306 = vst.msk [vmem:[#allocation2 + $0xd0] sm:$0xf] %vm252_vm8, %v22176_v34  ;;  %308 = vst.msk [vmem:[#allocation2 + $0xd8] sm:$0xf] %vm252_vm8, %v22176_v34  ;;  %20298 = vmatprep.mubr.msk.bf16.mxu1 %vm524_vm4, %v24791_v57  ;;  %v11254_v57 = vsel %vm537_vm0, %v18187_v58, 0 }
 0x24f   : > { %307 = vst.msk [vmem:[#allocation2 + $0xd4] sm:$0x1] %vm254_vm9, %v22176_v34  ;;  %309 = vst.msk [vmem:[#allocation2 + $0xdc] sm:$0x1] %vm254_vm9, %v22176_v34  ;;  %v7919_v54 = vrot.slane %v7918_v56, 4  ;;  %v8252_v56 = vshrl.u32 %v25448_v42, 16 }
 0x250   : > { %310 = vst.msk [vmem:[#allocation2 + $0xe0] sm:$0xf] %vm252_vm8, %v22176_v34  ;;  %316 = vst.msk [vmem:[#allocation2 + $0xf8] sm:$0xf] %vm252_vm8, %v22176_v34  ;;  %20029 = vmatmul.mubr.msk.bf16.vlgmr.msra.gmra.mrb[8].mxu0 %vm524_vm4, %v24769_v17  ;;  %v11234_v17 = vshrl.u32 %v25369_v7, 16  ;;  %v8240_v7 = vrot.slane %v8238_v39, 4 }
 0x251   : > { %311 = vst.msk [vmem:[#allocation2 + $0xe4] sm:$0x1] %vm254_vm9, %v22176_v34  ;;  %317 = vst.msk [vmem:[#allocation2 + $0xfc] sm:$0x1] %vm254_vm9, %v22176_v34  ;;  %20037 = vmatpush3.bf16.msra.mxu0 %v7932_v30  ;;  %20032 = vmatprep.mubr.msk.bf16.mxu0 %vm524_vm4, %v24807_v59  ;;  %v18194_v59 = vld [vmem:[%s28387_s1 + $0x10] sm:$0x3]  ;;  %v7924_v45 = vsel %vm22306_vm3, %v7919_v54, %v7923_v28 }
 0x252   : > { %318 = vst.msk [vmem:[#allocation2 + $0x100] sm:$0xf] %vm252_vm8, %v22176_v34  ;;  %320 = vst.msk [vmem:[#allocation2 + $0x108] sm:$0xf] %vm252_vm8, %v22176_v34  ;;  %21880 = vmatprep.subr.msk.bf16.mxu0 %vm537_vm0, %v17880_v61  ;;  %v11236_v41 = vrot.slane %v11234_v17, 4  ;;  %v11341_v14 = vsel %vm537_vm0, %v18194_v59, 0  ;;  %v17874_v19 = vcombine.low %v25020_v8, %v7924_v45 }
 0x253   : > { %319 = vst.msk [vmem:[#allocation2 + $0x104] sm:$0x1] %vm254_vm9, %v22176_v34  ;;  %321 = vst.msk [vmem:[#allocation2 + $0x10c] sm:$0x1] %vm254_vm9, %v22176_v34  ;;  %v8241_v8 = vshll.u32 %v25411_v50, 16  ;;  %v28689_v61 = vld [vmem:[#allocation20_spill] sm:$0xff] }
 0x254   : > { %322 = vst.msk [vmem:[#allocation2 + $0x110] sm:$0xf] %vm252_vm8, %v22176_v34  ;;  %324 = vst.msk [vmem:[#allocation2 + $0x118] sm:$0xf] %vm252_vm8, %v22176_v34  ;;  %v11551_v17 = vrot.slane %v11549_v24, 5 }
 0x255   : > { %323 = vst.msk [vmem:[#allocation2 + $0x114] sm:$0x1] %vm254_vm9, %v22176_v34  ;;  %325 = vst.msk [vmem:[#allocation2 + $0x11c] sm:$0x1] %vm254_vm9, %v22176_v34  ;;  %20299 = vmatmul.mubr.msk.bf16.vlgmr.msra.gmra.mrb[8].mxu1 %vm524_vm4, %v24803_v46  ;;  %v18118_v46 = vld [vmem:[%s22244_s6 + $0x13c] sm:$0x1] }
 0x256   : > { %326 = vst.msk [vmem:[#allocation2 + $0x120] sm:$0xf] %vm252_vm8, %v22176_v34  ;;  %328 = vst.msk [vmem:[#allocation2 + $0x128] sm:$0xf] %vm252_vm8, %v22176_v34  ;;  %20307 = vmatpush3.bf16.msra.mxu1 %v11254_v57  ;;  %20302 = vmatprep.mubr.msk.bf16.mxu1 %vm524_vm4, %v24835_v2  ;;  %v11240_v2 = vor.u32 %v11239_v33, %v11236_v41  ;;  %v11243_v4 = vshll.u32 %v18118_v46, 16  ;;  %v11332_v58 = vrot.slane %v18118_v46, 5 }
 0x257   : > { %327 = vst.msk [vmem:[#allocation2 + $0x124] sm:$0x1] %vm254_vm9, %v22176_v34  ;;  %329 = vst.msk [vmem:[#allocation2 + $0x12c] sm:$0x1] %vm254_vm9, %v22176_v34  ;;  %21907 = vmatprep.subr.msk.bf16.mxu1 %vm537_vm0, %v18194_v59  ;;  %v8229_v57 = vrot.slane %v8227_v43, 5  ;;  %v8243_v49 = vrot.slane %v8241_v8, 5  ;;  %v25468_v41 = vsel %vm22570_vm7, %v17879_v36, %v8010_v1  ;;  %v17907_v1 = vcombine.low %v25407_v26, %v25411_v50 }
 0x258   : > { %330 = vst.msk [vmem:[#allocation2 + $0x130] sm:$0xf] %vm252_vm8, %v22176_v34  ;;  %336 = vst.msk [vmem:[#allocation2 + $0x148] sm:$0xf] %vm252_vm8, %v22176_v34  ;;  %20033 = vmatmul.mubr.msk.bf16.gmra.mrb[12].mxu0 %vm524_vm4, %v17868_v25  ;;  %v11241_v53 = vrot.slane %v11240_v2, 4  ;;  %v11245_v11 = vrot.slane %v11243_v4, 5  ;;  %v25472_v33 = vsel %vm22570_vm7, %v18193_v6, %v11332_v58  ;;  %v17881_v45 = vcombine.low %v25068_v60, %v25468_v41 }
 0x259   : > { %331 = vst.msk [vmem:[#allocation2 + $0x134] sm:$0x1] %vm254_vm9, %v22176_v34  ;;  %337 = vst.msk [vmem:[#allocation2 + $0x14c] sm:$0x1] %vm254_vm9, %v22176_v34  ;;  %20038 = vmatprep.mubr.msk.bf16.mxu0 %vm524_vm4, %v24656_v55  ;;  %v17906_v55 = vld [vmem:[%s28387_s1 + $0x12] sm:$0x3]  ;;  %v8230_v54 = vor.u32 %v8229_v57, %v8226_v3 }
 0x25a   : > { %338 = vst.msk [vmem:[#allocation2 + $0x150] sm:$0xf] %vm252_vm8, %v22176_v34  ;;  %340 = vst.msk [vmem:[#allocation2 + $0x158] sm:$0xf] %vm252_vm8, %v22176_v34  ;;  %v11246_v63 = vsel %vm22306_vm3, %v11241_v53, %v11245_v11  ;;  %v25428_v31 = vsel %vm537_vm0, %v17906_v55, 0  ;;  %v25479_v46 = vsel %vm537_vm0, %v25445_v27, 0 }
 0x25b   : > { %339 = vst.msk [vmem:[#allocation2 + $0x154] sm:$0x1] %vm254_vm9, %v22176_v34  ;;  %341 = vst.msk [vmem:[#allocation2 + $0x15c] sm:$0x1] %vm254_vm9, %v22176_v34  ;;  %v25453_v25 = vld [vmem:[%s22244_s6 + $0xf4] sm:$0x1]  ;;  %v18188_v5 = vcombine.low %v25041_v38, %v11246_v63 }
 0x25c   : > { %342 = vst.msk [vmem:[#allocation2 + $0x160] sm:$0xf] %vm252_vm8, %v22176_v34  ;;  %344 = vst.msk [vmem:[#allocation2 + $0x168] sm:$0xf] %vm252_vm8, %v22176_v34  ;;  %v25459_v59 = vld [vmem:[%s22244_s6 + $0xfc] sm:$0x1] }
 0x25d   : > { %343 = vst.msk [vmem:[#allocation2 + $0x164] sm:$0x1] %vm254_vm9, %v22176_v34  ;;  %345 = vst.msk [vmem:[#allocation2 + $0x16c] sm:$0x1] %vm254_vm9, %v22176_v34  ;;  %20303 = vmatmul.mubr.msk.bf16.gmra.mrb[12].mxu1 %vm524_vm4, %v18182_v48  ;;  %v25475_v48 = vsel %vm537_vm0, %v18220_v23, 0  ;;  %v8233_v28 = vshll.u32 %v25453_v25, 16 }
 0x25e   : > { %346 = vst.msk [vmem:[#allocation2 + $0x170] sm:$0xf] %vm252_vm8, %v22176_v34  ;;  %348 = vst.msk [vmem:[#allocation2 + $0x178] sm:$0xf] %vm252_vm8, %v22176_v34  ;;  %20308 = vmatprep.mubr.msk.bf16.mxu1 %vm524_vm4, %v28685_v52  ;;  %v25483_v2 = vld [vmem:[%s22244_s6 + $0x14c] sm:$0x1] }
 0x25f   : > { %347 = vst.msk [vmem:[#allocation2 + $0x174] sm:$0x1] %vm254_vm9, %v22176_v34  ;;  %349 = vst.msk [vmem:[#allocation2 + $0x17c] sm:$0x1] %vm254_vm9, %v22176_v34  ;;  %v25486_v4 = vld [vmem:[%s22244_s6 + $0x108] sm:$0xf] }
 0x260   : > { %350 = vst.msk [vmem:[#allocation2 + $0x180] sm:$0xf] %vm252_vm8, %v22176_v34  ;;  %20039 = vmatmul.mubr.msk.bf16.vlgmr.msra.gmra.mrb[8].mxu0 %vm524_vm4, %v28686_v40  ;;  %v8247_v52 = vshll.u32 %v25459_v59, 16  ;;  %v11555_v40 = vshll.u32 %v25462_v47, 16  ;;  %v25495_v53 = vld [vmem:[%s22244_s6 + $0x150] sm:$0xf] }
 0x261   : > { %351 = vst.msk [vmem:[#allocation2 + $0x184] sm:$0x1] %vm254_vm9, %v22176_v34  ;;  %20047 = vmatpush3.bf16.msra.mxu0 %v8019_v16  ;;  %20042 = vmatprep.mubr.msk.bf16.mxu0 %vm524_vm4, %v28687_v22  ;;  %v25433_v34 = vld [vmem:[%s22244_s6 + $0x148] sm:$0xf]  ;;  %v8244_v16 = vor.u32 %v8243_v49, %v8240_v7  ;;  %v25498_v11 = vld [vmem:[%s22244_s6 + $0x158] sm:$0xf]  ;;  %v25543_v49 = vcombine.low %v25448_v42, %v25486_v4 }
 0x262   : > { %21881 = vmatprep.subr.msk.bf16.mxu0 %vm537_vm0, %v17906_v55  ;;  %v11560_v0 = vshrl.u32 %v25433_v34, 16  ;;  %v11563_v30 = vshll.u32 %v25433_v34, 16  ;;  %v11552_v55 = vor.u32 %v11551_v17, %v11548_v9  ;;  %28690 = vst [vmem:[#allocation9_spill] sm:$0xff] %v25498_v11  ;;  %v25507_v43 = vld [vmem:[%s22244_s6 + $0x110] sm:$0xf]  ;;  %v11569_v39 = vshll.u32 %v25483_v2, 16 }
 0x263   : > { %v25513_v37 = vld [vmem:[%s22244_s6 + $0x160] sm:$0xf]  ;;  %v25517_v8 = vld [vmem:[%s22244_s6 + $0x104] sm:$0x1]  ;;  %v8266_v63 = vshrl.u32 %v25486_v4, 16  ;;  %v8269_v36 = vshll.u32 %v25486_v4, 16 }
 0x264   : > { %v11562_v38 = vrot.slane %v11560_v0, 4  ;;  %28691 = vst [vmem:[#allocation5_spill] sm:$0xff] %v25513_v37  ;;  %v25528_v6 = vld [vmem:[%s22244_s6 + $0x168] sm:$0xf]  ;;  %v25531_v58 = vld [vmem:[%s22244_s6 + $0x120] sm:$0xf] }
 0x265   : > { %20309 = vmatmul.mubr.msk.bf16.vlgmr.msra.gmra.mrb[8].mxu1 %vm524_vm4, %v28688_v12  ;;  %28692 = vst [vmem:[#allocation6_spill] sm:$0xff] %v25528_v6  ;;  %28693 = vst [vmem:[#allocation13_spill] sm:$0xff] %v25531_v58  ;;  %v8231_v0 = vrot.slane %v8230_v54, 4  ;;  %v8249_v3 = vrot.slane %v8247_v52, 5  ;;  %v11553_v57 = vrot.slane %v11552_v55, 4  ;;  %v11557_v7 = vrot.slane %v11555_v40, 5 }
 0x266   : > { %20317 = vmatpush3.bf16.msra.mxu1 %v11341_v14  ;;  %20312 = vmatprep.mubr.msk.bf16.mxu1 %vm524_vm4, %v28689_v61  ;;  %v8254_v14 = vrot.slane %v8252_v56, 4  ;;  %v25536_v61 = vld [vmem:[%s22244_s6 + $0x128] sm:$0xf]  ;;  %28695 = vst [vmem:[#allocation8_spill] sm:$0xff] %v25543_v49  ;;  %v25550_v9 = vld [vmem:[%s22244_s6 + $0x170] sm:$0xf] }
 0x267   : > { %21908 = vmatprep.subr.msk.bf16.mxu1 %vm537_vm0, %v18220_v23  ;;  %v25510_v23 = vld [vmem:[%s22244_s6 + $0x118] sm:$0xf]  ;;  %28694 = vst [vmem:[#allocation19_spill] sm:$0xff] %v25536_v61  ;;  %28697 = vst [vmem:[#allocation14_spill] sm:$0xff] %v25550_v9  ;;  %v8261_v56 = vshll.u32 %v25517_v8, 16  ;;  %v25563_v54 = vsel %vm537_vm0, %v25504_v35, 0 }
 0x268   : > { %20043 = vmatmul.mubr.msk.bf16.gmra.mrb[12].mxu0 %vm524_vm4, %v17874_v19  ;;  %v8257_v19 = vrot.slane %v8255_v44, 5  ;;  %v25553_v17 = vld [vmem:[%s22244_s6 + $0x178] sm:$0xf]  ;;  %v25559_v44 = vld [vmem:[%s22244_s6 + $0x10c] sm:$0x1]  ;;  %v11574_v12 = vshrl.u32 %v25495_v53, 16 }
 0x269   : > { %20048 = vmatprep.mubr.msk.bf16.mxu0 %vm524_vm4, %v24866_v20  ;;  %v11565_v20 = vrot.slane %v11563_v30, 5  ;;  %v8235_v30 = vrot.slane %v8233_v28, 5  ;;  %28698 = vst [vmem:[#allocation15_spill] sm:$0xff] %v25553_v17  ;;  %v25567_v28 = vcombine.low %v25507_v43, %v25510_v23  ;;  %v25578_v52 = vld [vmem:[%s22244_s6 + $0x154] sm:$0x1]  ;;  %v25582_v55 = vcombine.low %v25550_v9, %v25553_v17 }
 0x26b   : > { %v11566_v24 = vor.u32 %v11565_v20, %v11562_v38  ;;  %v8268_v38 = vrot.slane %v8266_v63, 4  ;;  %v8271_v20 = vrot.slane %v8269_v36, 5  ;;  %28699 = vst [vmem:[#allocation12_spill] sm:$0xff] %v25567_v28  ;;  %28702 = vst [vmem:[#allocation10_spill] sm:$0xff] %v25582_v55  ;;  %v8236_v40 = vsel %vm22306_vm3, %v8231_v0, %v8235_v30 }
 0x26c   : > { %v8263_v63 = vrot.slane %v8261_v56, 5  ;;  %v8275_v36 = vshll.u32 %v25559_v44, 16  ;;  %v8283_v56 = vshll.u32 %v25507_v43, 16 }
 0x26d   : > { %20313 = vmatmul.mubr.msk.bf16.gmra.mrb[12].mxu1 %vm524_vm4, %v18188_v5  ;;  %v8258_v5 = vor.u32 %v8257_v19, %v8254_v14  ;;  %v11558_v19 = vsel %vm22306_vm3, %v11553_v57, %v11557_v7  ;;  %v8272_v30 = vor.u32 %v8271_v20, %v8268_v38  ;;  %v25611_v57 = vld [vmem:[%s22244_s6 + $0x15c] sm:$0x1]  ;;  %v11588_v7 = vshrl.u32 %v25498_v11, 16 }
 0x26e   : > { %20318 = vmatprep.mubr.msk.bf16.mxu1 %vm524_vm4, %v24913_v51  ;;  %v8245_v51 = vrot.slane %v8244_v16, 4  ;;  %v25571_v16 = vcombine.low %v25513_v37, %v25528_v6  ;;  %28705 = vst [vmem:[#allocation20_spill] sm:$0xff] %v25611_v57  ;;  %v11597_v22 = vshll.u32 %v25611_v57, 16 }
 0x26f   : > { %v8273_v38 = vrot.slane %v8272_v30, 4  ;;  %v11605_v30 = vshll.u32 %v25513_v37, 16 }
 0x270   : > { %20049 = vmatmul.mubr.msk.bf16.vlgmr.msra.gmra.mrb[8].mxu0 %vm524_vm4, %v24871_v29  ;;  %v25547_v29 = vcombine.low %v25495_v53, %v25498_v11  ;;  %28700 = vst [vmem:[#allocation4_spill] sm:$0xff] %v25571_v16  ;;  %v25588_v14 = vsel %vm22306_vm3, %v8245_v51, %v8249_v3  ;;  %v11577_v51 = vshll.u32 %v25495_v53, 16  ;;  %v11583_v3 = vshll.u32 %v25578_v52, 16 }
 0x271   : > { %20057 = vmatpush3.bf16.msra.mxu0 %v25428_v31  ;;  %20052 = vmatprep.mubr.msk.bf16.mxu0 %vm524_vm4, %v24927_v13  ;;  %v11567_v13 = vrot.slane %v11566_v24, 4  ;;  %v11571_v31 = vrot.slane %v11569_v39, 5  ;;  %28703 = vst [vmem:[#allocation18_spill] sm:$0xff] %v25588_v14  ;;  %v25595_v24 = vld [vmem:[%s28387_s1 + $0x16] sm:$0x3]  ;;  %v8259_v39 = vrot.slane %v8258_v5, 4 }
 0x272   : > { %28696 = vst [vmem:[#allocation16_spill] sm:$0xff] %v25547_v29  ;;  %21882 = vmatprep.subr.msk.bf16.mxu0 %vm537_vm0, %v25445_v27  ;;  %v25575_v27 = vcombine.low %v25531_v58, %v25536_v61  ;;  %v8280_v5 = vshrl.u32 %v25507_v43, 16  ;;  %v25642_v20 = vrot.slane %v11577_v51, 5  ;;  %v11616_v51 = vshrl.u32 %v25528_v6, 16 }
 0x273   : > { %v25603_v0 = vsel %vm22306_vm3, %v11567_v13, %v11571_v31  ;;  %v8294_v13 = vshrl.u32 %v25510_v23, 16  ;;  %v8297_v31 = vshll.u32 %v25510_v23, 16  ;;  %v25638_v41 = vsel %vm22306_vm3, %v8259_v39, %v8263_v63  ;;  %v25655_v39 = vld [vmem:[%s22244_s6 + $0x11c] sm:$0x1] }
 0x274   : > { %28701 = vst [vmem:[#allocation7_spill] sm:$0xff] %v25575_v27  ;;  %28704 = vst [vmem:[#allocation17_spill] sm:$0xff] %v25603_v0  ;;  %v25634_v60 = vcombine.low %v11558_v19, %v25603_v0  ;;  %v25652_v19 = vld [vmem:[%s22244_s6 + $0x114] sm:$0x1]  ;;  %v8282_v0 = vrot.slane %v8280_v5, 4  ;;  %v28706_v5 = vcombine.low %v25339_v18, %v25472_v33  ;;  %v25679_v18 = vrot.slane %v11597_v22, 5 }
 0x275   : > { %20319 = vmatmul.mubr.msk.bf16.vlgmr.msra.gmra.mrb[8].mxu1 %vm524_vm4, %v24917_v21  ;;  %v11591_v21 = vshll.u32 %v25498_v11, 16  ;;  %v8285_v11 = vrot.slane %v8283_v56, 5  ;;  %v8296_v63 = vrot.slane %v8294_v13, 4  ;;  %v25694_v22 = vld [vmem:[%s22244_s6 + $0x16c] sm:$0x1] }
 0x276   : > { %20327 = vmatpush3.bf16.msra.mxu1 %v25475_v48  ;;  %20322 = vmatprep.mubr.msk.bf16.mxu1 %vm524_vm4, %v24952_v15  ;;  %v25624_v15 = vcombine.low %v8236_v40, %v25588_v14  ;;  %v25628_v48 = vsel %vm537_vm0, %v25595_v24, 0  ;;  %v25644_v40 = vrot.slane %v11583_v3, 5  ;;  %v25647_v14 = vrot.slane %v11588_v7, 4  ;;  %28709 = vst [vmem:[#allocation22_spill] sm:$0xff] %v25694_v22 }
 0x277   : > { %21909 = vmatprep.subr.msk.bf16.mxu1 %vm537_vm0, %v25504_v35  ;;  %v25640_v35 = vrot.slane %v11574_v12, 4  ;;  %v8299_v12 = vrot.slane %v8297_v31, 5  ;;  %v11619_v3 = vshll.u32 %v25528_v6, 16  ;;  %v8308_v7 = vshrl.u32 %v25531_v58, 16 }
 0x278   : > { %20053 = vmatmul.mubr.msk.bf16.gmra.mrb[12].mxu0 %vm524_vm4, %v17881_v45  ;;  %v8277_v45 = vrot.slane %v8275_v36, 5  ;;  %v11602_v36 = vshrl.u32 %v25513_v37, 16  ;;  %v8322_v31 = vshrl.u32 %v25536_v61, 16  ;;  %v8325_v6 = vshll.u32 %v25536_v61, 16 }
 0x279   : > { %20058 = vmatprep.mubr.msk.bf16.mxu0 %vm524_vm4, %v17907_v1  ;;  %v25649_v1 = vrot.slane %v11591_v21, 5  ;;  %v8311_v21 = vshll.u32 %v25531_v58, 16  ;;  %v11580_v13 = vor.u32 %v25642_v20, %v25640_v35  ;;  %v28707_v58 = vcombine.low %v25416_v10, %v25433_v34  ;;  %v25688_v20 = vld [vmem:[%s22244_s6 + $0x164] sm:$0x1] }
 0x27a   : > { %v25669_v56 = vsel %vm22306_vm3, %v8273_v38, %v8277_v45  ;;  %v8286_v33 = vor.u32 %v8285_v11, %v8282_v0  ;;  %v8303_v45 = vshll.u32 %v25655_v39, 16  ;;  %v8300_v38 = vor.u32 %v8299_v12, %v8296_v63  ;;  %28708 = vst [vmem:[#allocation21_spill] sm:$0xff] %v25688_v20 }
 0x27b   : > { %v11594_v35 = vor.u32 %v25649_v1, %v25647_v14  ;;  %v11604_v61 = vrot.slane %v11602_v36, 4  ;;  %v11607_v37 = vrot.slane %v11605_v30, 5  ;;  %v11618_v11 = vrot.slane %v11616_v51, 4  ;;  %v25699_v14 = vld [vmem:[%s22244_s6 + $0x124] sm:$0x1] }
 0x27c   : > { %v8310_v0 = vrot.slane %v8308_v7, 4  ;;  %v8324_v1 = vrot.slane %v8322_v31, 4  ;;  %v8327_v63 = vrot.slane %v8325_v6, 5  ;;  %v11630_v12 = vshrl.u32 %v25550_v9, 16  ;;  %v25713_v6 = vld [vmem:[%s28387_s1 + $0x16] sm:$0x3] }
 0x27d   : > { %20323 = vmatmul.mubr.msk.bf16.gmra.mrb[12].mxu1 %vm524_vm4, %v28706_v5  ;;  %v8289_v5 = vshll.u32 %v25652_v19, 16  ;;  %v8287_v36 = vrot.slane %v8286_v33, 4  ;;  %v11611_v51 = vshll.u32 %v25688_v20, 16  ;;  %v8301_v7 = vrot.slane %v8300_v38, 4  ;;  %v25720_v20 = vld [vmem:[%s22244_s6 + $0x174] sm:$0x1] }
 0x27e   : > { %20328 = vmatprep.mubr.msk.bf16.mxu1 %vm524_vm4, %v28707_v58  ;;  %v11621_v58 = vrot.slane %v11619_v3, 5  ;;  %v25705_v3 = vld [vmem:[%s22244_s6 + $0x12c] sm:$0x1]  ;;  %v11647_v31 = vshll.u32 %v25553_v17, 16  ;;  %v11608_v33 = vor.u32 %v11607_v37, %v11604_v61  ;;  %v8328_v38 = vor.u32 %v8327_v63, %v8324_v1 }
 0x27f   : > { %v8291_v30 = vrot.slane %v8289_v5, 5  ;;  %v11581_v37 = vrot.slane %v11580_v13, 4  ;;  %v11595_v61 = vrot.slane %v11594_v35, 4 }
 0x280   : > { %20059 = vmatmul.mubr.msk.bf16.vlgmr.msra.gmra.mrb[8].mxu0 %vm524_vm4, %v25543_v49  ;;  %v8313_v49 = vrot.slane %v8311_v21, 5  ;;  %v11625_v21 = vshll.u32 %v25694_v22, 16  ;;  %v11622_v5 = vor.u32 %v11621_v58, %v11618_v11  ;;  %v8331_v22 = vshll.u32 %v25705_v3, 16 }
 0x281   : > { %20067 = vmatpush3.bf16.msra.mxu0 %v25479_v46  ;;  %20062 = vmatprep.mubr.msk.bf16.mxu0 %vm524_vm4, %v25567_v28  ;;  %v11633_v46 = vshll.u32 %v25550_v9, 16  ;;  %v8305_v28 = vrot.slane %v8303_v45, 5  ;;  %v8317_v45 = vshll.u32 %v25699_v14, 16  ;;  %v11613_v11 = vrot.slane %v11611_v51, 5 }
 0x282   : > { %21883 = vmatprep.subr.msk.bf16.mxu0 %vm537_vm0, %v25595_v24  ;;  %v11644_v24 = vshrl.u32 %v25553_v17, 16  ;;  %v8314_v9 = vor.u32 %v8313_v49, %v8310_v0  ;;  %v11632_v17 = vrot.slane %v11630_v12, 4  ;;  %v25727_v49 = vsel %vm22306_vm3, %v8287_v36, %v8291_v30  ;;  %v25738_v0 = vld [vmem:[%s22244_s6 + $0x17c] sm:$0x1] }
 0x283   : > { %v11635_v57 = vrot.slane %v11633_v46, 5  ;;  %v25735_v58 = vsel %vm22306_vm3, %v8301_v7, %v8305_v28  ;;  %v11649_v35 = vrot.slane %v11647_v31, 5  ;;  %v11609_v1 = vrot.slane %v11608_v33, 4 }
 0x284   : > { %v11646_v13 = vrot.slane %v11644_v24, 4  ;;  %v11623_v63 = vrot.slane %v11622_v5, 4  ;;  %v8319_v12 = vrot.slane %v8317_v45, 5  ;;  %v11639_v46 = vshll.u32 %v25720_v20, 16 }
 0x285   : > { %20329 = vmatmul.mubr.msk.bf16.vlgmr.msra.gmra.mrb[8].mxu1 %vm524_vm4, %v25547_v29  ;;  %v8315_v36 = vrot.slane %v8314_v9, 4  ;;  %v8329_v30 = vrot.slane %v8328_v38, 4  ;;  %v8333_v51 = vrot.slane %v8331_v22, 5  ;;  %v25745_v28 = vcombine.low %v25638_v41, %v25669_v56  ;;  %v17941_v38 = vld [vmem:[%s28387_s1 + $0x18] sm:$0x3] }
 0x286   : > { %20337 = vmatpush3.bf16.msra.mxu1 %v25563_v54  ;;  %20332 = vmatprep.mubr.msk.bf16.mxu1 %vm524_vm4, %v25571_v16  ;;  %v11627_v54 = vrot.slane %v11625_v21, 5  ;;  %v11636_v16 = vor.u32 %v11635_v57, %v11632_v17  ;;  %v11653_v7 = vshll.u32 %v25738_v0, 16  ;;  %v17924_v21 = vrot.slane %v25407_v26, 9 }
 0x287   : > { %21910 = vmatprep.subr.msk.bf16.mxu1 %vm537_vm0, %v25713_v6  ;;  %28710 = vst [vmem:[#allocation23_spill] sm:$0xff] %v25745_v28  ;;  %v8446_v24 = vrot.slane %v25453_v25, 5  ;;  %v11650_v31 = vor.u32 %v11649_v35, %v11646_v13  ;;  %v17925_v9 = vrot.slane %v25411_v50, 9  ;;  %v8450_v17 = vrot.slane %v25459_v59, 5 }
 0x288   : > { %20063 = vmatmul.mubr.msk.bf16.gmra.mrb[12].mxu0 %vm524_vm4, %v25575_v27  ;;  %v25760_v57 = vsel %vm22306_vm3, %v11595_v61, %v25679_v18  ;;  %v25764_v26 = vcombine.low %v25727_v49, %v25735_v58  ;;  %v25768_v25 = vsel %vm22306_vm3, %v11609_v1, %v11613_v11  ;;  %v25778_v59 = vsel %vm22306_vm3, %v8315_v36, %v8319_v12  ;;  %v18255_v36 = vld [vmem:[%s28387_s1 + $0x18] sm:$0x3] }
 0x289   : > { %20068 = vmatprep.mubr.msk.bf16.mxu0 %vm524_vm4, %v25624_v15  ;;  %v25753_v15 = vsel %vm22306_vm3, %v11581_v37, %v25644_v40  ;;  %v25772_v40 = vsel %vm22306_vm3, %v11623_v63, %v11627_v54  ;;  %v25782_v18 = vsel %vm22306_vm3, %v8329_v30, %v8333_v51  ;;  %v11637_v22 = vrot.slane %v11636_v16, 4 }
 0x28a   : > { %28711 = vst [vmem:[#allocation24_spill] sm:$0xff] %v25764_v26  ;;  %v11641_v33 = vrot.slane %v11639_v46, 5  ;;  %v11655_v5 = vrot.slane %v11653_v7, 5  ;;  %v8447_v45 = vsel %vm22570_vm7, %v17924_v21, %v8446_v24  ;;  %v18238_v37 = vrot.slane %v25416_v10, 9 }
 0x28b   : > { %v11768_v61 = vrot.slane %v25462_v47, 5  ;;  %v11651_v16 = vrot.slane %v11650_v31, 4  ;;  %v25797_v11 = vsel %vm22570_vm7, %v17925_v9, %v8450_v17  ;;  %v11772_v54 = vrot.slane %v25483_v2, 5 }
 0x28c   : > { %v17926_v10 = vrot.slane %v25448_v42, 9  ;;  %v8454_v47 = vrot.slane %v25517_v8, 5  ;;  %v17927_v13 = vrot.slane %v25486_v4, 9  ;;  %v8458_v35 = vrot.slane %v25559_v44, 5 }
 0x28d   : > { %20333 = vmatmul.mubr.msk.bf16.gmra.mrb[12].mxu1 %vm524_vm4, %v25582_v55  ;;  %v25810_v1 = vcombine.low %v25753_v15, %v25760_v57  ;;  %v11824_v2 = vsel %vm537_vm0, %v25713_v6, 0  ;;  %v25821_v8 = vcombine.low %v25778_v59, %v25782_v18  ;;  %v25825_v44 = vsel %vm22306_vm3, %v11637_v22, %v11641_v33  ;;  %v28717_v33 = vld [vmem:[#allocation9_spill] sm:$0xff] }
 0x28e   : > { %20338 = vmatprep.mubr.msk.bf16.mxu1 %vm524_vm4, %v25634_v60  ;;  %v18239_v60 = vrot.slane %v25433_v34, 9  ;;  %v17933_v63 = vcombine.low %v8447_v45, %v25797_v11  ;;  %v11769_v12 = vsel %vm22570_vm7, %v18238_v37, %v11768_v61  ;;  %v25832_v6 = vsel %vm22306_vm3, %v11651_v16, %v11655_v5  ;;  %v28718_v45 = vld [vmem:[#allocation20_spill] sm:$0xff] }
 0x28f   : > { %28712 = vst [vmem:[#allocation25_spill] sm:$0xff] %v25810_v1  ;;  %28714 = vst [vmem:[#allocation27_spill] sm:$0xff] %v25821_v8  ;;  %v25843_v30 = vsel %vm22570_vm7, %v17926_v10, %v8454_v47  ;;  %v25847_v51 = vsel %vm22570_vm7, %v17927_v13, %v8458_v35  ;;  %v17928_v7 = vrot.slane %v25507_v43, 9  ;;  %v8462_v21 = vrot.slane %v25652_v19, 5  ;;  %v28720_v10 = vld [vmem:[#allocation21_spill] sm:$0xff]  ;;  %v28721_v13 = vld [vmem:[#allocation6_spill] sm:$0xff] }
 0x290   : > { %20069 = vmatmul.mubr.msk.bf16.vlgmr.msra.gmra.mrb[8].mxu0 %vm524_vm4, %v25745_v28  ;;  %v25836_v46 = vsel %vm22570_vm7, %v18239_v60, %v11772_v54  ;;  %v17929_v24 = vrot.slane %v25510_v23, 9  ;;  %v8466_v31 = vrot.slane %v25655_v39, 5  ;;  %v25863_v17 = vcombine.low %v25825_v44, %v25832_v6  ;;  %v28719_v60 = vld [vmem:[#allocation5_spill] sm:$0xff] }
 0x291   : > { %20077 = vmatpush3.bf16.msra.mxu0 %v25628_v48  ;;  %20072 = vmatprep.mubr.msk.bf16.mxu0 %vm524_vm4, %v25764_v26  ;;  %v25817_v48 = vcombine.low %v25768_v25, %v25772_v40  ;;  %v18247_v9 = vcombine.low %v11769_v12, %v25836_v46  ;;  %v25868_v19 = vcombine.low %v25843_v30, %v25847_v51  ;;  %v18240_v39 = vrot.slane %v25495_v53, 9 }
 0x292   : > { %21884 = vmatprep.subr.msk.bf16.mxu0 %vm537_vm0, %v17941_v38  ;;  %28715 = vst [vmem:[#allocation28_spill] sm:$0xff] %v25863_v17  ;;  %v11776_v22 = vrot.slane %v25578_v52, 5  ;;  %v18241_v5 = vrot.slane %v28717_v33, 9  ;;  %v11780_v37 = vrot.slane %v28718_v45, 5  ;;  %v25876_v61 = vsel %vm22570_vm7, %v17928_v7, %v8462_v21 }
 0x293   : > { %28713 = vst [vmem:[#allocation26_spill] sm:$0xff] %v25817_v48  ;;  %28716 = vst [vmem:[#allocation29_spill] sm:$0xff] %v25868_v19  ;;  %v25880_v16 = vsel %vm22570_vm7, %v17929_v24, %v8466_v31  ;;  %v18242_v54 = vrot.slane %v28719_v60, 9  ;;  %v11784_v47 = vrot.slane %v28720_v10, 5  ;;  %v18243_v35 = vrot.slane %v28721_v13, 9 }
 0x294   : > { %v8470_v45 = vrot.slane %v25699_v14, 5  ;;  %v8474_v21 = vrot.slane %v25705_v3, 5  ;;  %v25892_v24 = vcombine.low %v25876_v61, %v25880_v16  ;;  %v8597_v31 = vsel %vm537_vm0, %v17941_v38, 0  ;;  %v17950_v38 = vld [vmem:[%s28387_s1 + $0x1a] sm:$0x3] }
 0x295   : > { %20339 = vmatmul.mubr.msk.bf16.vlgmr.msra.gmra.mrb[8].mxu1 %vm524_vm4, %v25810_v1  ;;  %v25900_v10 = vsel %vm22570_vm7, %v18240_v39, %v11776_v22  ;;  %v25904_v14 = vsel %vm22570_vm7, %v18241_v5, %v11780_v37  ;;  %v25908_v3 = vsel %vm22570_vm7, %v18242_v54, %v11784_v47  ;;  %v25928_v22 = vld [vmem:[%s22244_s6 + $0x130] sm:$0xf]  ;;  %v25931_v5 = vld [vmem:[%s22244_s6 + $0x180] sm:$0xf]  ;;  %v17942_v26 = vcombine.low %v25411_v50, %v25448_v42  ;;  %v18264_v1 = vld [vmem:[%s28387_s1 + $0x1a] sm:$0x3] }
 0x296   : > { %20347 = vmatpush3.bf16.msra.mxu1 %v11824_v2  ;;  %20342 = vmatprep.mubr.msk.bf16.mxu1 %vm524_vm4, %v25817_v48  ;;  %v28722_v2 = vld [vmem:[#allocation22_spill] sm:$0xff]  ;;  %v28724_v48 = vld [vmem:[#allocation19_spill] sm:$0xff]  ;;  %28725 = vst [vmem:[#allocation9_spill] sm:$0xff] %v25892_v24  ;;  %28728 = vst [vmem:[#allocation21_spill] sm:$0xff] %v25928_v22  ;;  %v8673_v37 = vshrl.u32 %v25928_v22, 16  ;;  %v8676_v54 = vshll.u32 %v25928_v22, 16 }
 0x297   : > { %21911 = vmatprep.subr.msk.bf16.mxu1 %vm537_vm0, %v18255_v36  ;;  %v11788_v52 = vrot.slane %v28722_v2, 5  ;;  %v17931_v7 = vrot.slane %v28724_v48, 9  ;;  %v11995_v47 = vshrl.u32 %v25931_v5, 16 }
 0x298   : > { %20073 = vmatmul.mubr.msk.bf16.gmra.mrb[12].mxu0 %vm524_vm4, %v25821_v8  ;;  %v8675_v28 = vrot.slane %v8673_v37, 4  ;;  %v8678_v55 = vrot.slane %v8676_v54, 5 }
 0x299   : > { %20078 = vmatprep.mubr.msk.bf16.mxu0 %vm524_vm4, %v17933_v63  ;;  %v28723_v63 = vld [vmem:[#allocation13_spill] sm:$0xff]  ;;  %v25912_v2 = vsel %vm22570_vm7, %v18243_v35, %v11788_v52  ;;  %v25925_v39 = vsel %vm22570_vm7, %v17931_v7, %v8474_v21  ;;  %v11998_v35 = vshll.u32 %v25931_v5, 16  ;;  %v25941_v52 = vcombine.low %v25900_v10, %v25904_v14 }
 0x29a   : > { %v17930_v12 = vrot.slane %v28723_v63, 9  ;;  %28726 = vst [vmem:[#allocation20_spill] sm:$0xff] %v25912_v2  ;;  %28727 = vst [vmem:[#allocation5_spill] sm:$0xff] %v25925_v39  ;;  %v11792_v21 = vrot.slane %v25720_v20, 5  ;;  %v11997_v20 = vrot.slane %v11995_v47, 4  ;;  %v8679_v37 = vor.u32 %v8678_v55, %v8675_v28 }
 0x29b   : > { %28729 = vst [vmem:[#allocation6_spill] sm:$0xff] %v25941_v52  ;;  %v12000_v27 = vrot.slane %v11998_v35, 5 }
 0x29d   : > { %20343 = vmatmul.mubr.msk.bf16.gmra.mrb[12].mxu1 %vm524_vm4, %v25863_v17  ;;  %v11919_v17 = vsel %vm537_vm0, %v18255_v36, 0  ;;  %v25968_v36 = vld [vmem:[%s22244_s6 + $0x184] sm:$0x1]  ;;  %v12001_v54 = vor.u32 %v12000_v27, %v11997_v20  ;;  %v8705_v27 = vsel %vm537_vm0, %v17950_v38, 0 }
 0x29e   : > { %20348 = vmatprep.mubr.msk.bf16.mxu1 %vm524_vm4, %v18247_v9  ;;  %v25921_v9 = vsel %vm22570_vm7, %v17930_v12, %v8470_v45  ;;  %v25945_v12 = vcombine.low %v25908_v3, %v25912_v2  ;;  %v28731_v45 = vld [vmem:[#allocation14_spill] sm:$0xff]  ;;  %v12004_v47 = vshll.u32 %v25968_v36, 16 }
 0x29f   : > { %v18244_v7 = vrot.slane %v28731_v45, 9  ;;  %v25955_v8 = vcombine.low %v25921_v9, %v25925_v39  ;;  %v12002_v28 = vrot.slane %v12001_v54, 4 }
 0x2a0   : > { %20079 = vmatmul.mubr.msk.bf16.vlgmr.msra.gmra.mrb[8].mxu0 %vm524_vm4, %v25868_v19  ;;  %28730 = vst [vmem:[#allocation22_spill] sm:$0xff] %v25945_v12  ;;  %v11796_v19 = vrot.slane %v25738_v0, 5  ;;  %v25965_v0 = vld [vmem:[%s22244_s6 + $0x134] sm:$0x1] }
 0x2a1   : > { %20087 = vmatpush3.bf16.msra.mxu0 %v8597_v31  ;;  %20082 = vmatprep.mubr.msk.bf16.mxu0 %vm524_vm4, %v25892_v24  ;;  %v28732_v31 = vld [vmem:[#allocation15_spill] sm:$0xff]  ;;  %28733 = vst [vmem:[#allocation13_spill] sm:$0xff] %v25955_v8  ;;  %v25974_v50 = vsel %vm22570_vm7, %v18244_v7, %v11792_v21  ;;  %v17944_v7 = vcombine.low %v25510_v23, %v28723_v63  ;;  %v12006_v21 = vrot.slane %v12004_v47, 5  ;;  %v12027_v63 = vsel %vm537_vm0, %v18264_v1, 0 }
 0x2a2   : > { %21885 = vmatprep.subr.msk.bf16.mxu0 %vm537_vm0, %v17950_v38  ;;  %v18245_v24 = vrot.slane %v28732_v31, 9  ;;  %28734 = vst [vmem:[#allocation19_spill] sm:$0xff] %v25974_v50  ;;  %v18257_v23 = vcombine.low %v28717_v33, %v28719_v60  ;;  %v18258_v38 = vcombine.low %v28721_v13, %v28731_v45  ;;  %v18274_v33 = vld [vmem:[%s28387_s1 + $0x1c] sm:$0x3]  ;;  %v28737_v45 = vld [vmem:[#allocation18_spill] sm:$0xff]  ;;  %v8783_v47 = vrot.slane %v25965_v0, 5 }
 0x2a3   : > { %v26034_v60 = vsel %vm22306_vm3, %v12002_v28, %v12006_v21  ;;  %v17951_v54 = vcombine.low %v28737_v45, %v25638_v41  ;;  %v12105_v45 = vrot.slane %v25968_v36, 5  ;;  %v28748_v39 = vcombine.low %v28732_v31, %v25931_v5 }
 0x2a4   : > { %v25978_v42 = vsel %vm22570_vm7, %v18245_v24, %v11796_v19  ;;  %v18256_v19 = vcombine.low %v25433_v34, %v25495_v53  ;;  %v17943_v24 = vcombine.low %v25486_v4, %v25507_v43  ;;  %v17960_v53 = vld [vmem:[%s28387_s1 + $0x1c] sm:$0x3]  ;;  %v26068_v43 = vld [vmem:[%s28387_s1 + $0x1e] sm:$0x3] }
 0x2a5   : > { %20349 = vmatmul.mubr.msk.bf16.vlgmr.msra.gmra.mrb[8].mxu1 %vm524_vm4, %v25941_v52  ;;  %28735 = vst [vmem:[#allocation14_spill] sm:$0xff] %v25978_v42  ;;  %v25988_v35 = vcombine.low %v25974_v50, %v25978_v42 }
 0x2a6   : > { %20357 = vmatpush3.bf16.msra.mxu1 %v11919_v17  ;;  %20352 = vmatprep.mubr.msk.bf16.mxu1 %vm524_vm4, %v25945_v12  ;;  %v8682_v17 = vshll.u32 %v25965_v0, 16  ;;  %v18273_v0 = vrot.slane %v25931_v5, 9 }
 0x2a7   : > { %21912 = vmatprep.subr.msk.bf16.mxu1 %vm537_vm0, %v18264_v1  ;;  %28736 = vst [vmem:[#allocation15_spill] sm:$0xff] %v25988_v35 }
 0x2a8   : > { %20083 = vmatmul.mubr.msk.bf16.gmra.mrb[12].mxu0 %vm524_vm4, %v25955_v8  ;;  %v8684_v55 = vrot.slane %v8682_v17, 5  ;;  %v17945_v17 = vcombine.low %v28724_v48, %v25928_v22  ;;  %v17959_v48 = vrot.slane %v25928_v22, 9 }
 0x2a9   : > { %20088 = vmatprep.mubr.msk.bf16.mxu0 %vm524_vm4, %v17942_v26  ;;  %v8680_v26 = vrot.slane %v8679_v37, 4  ;;  %v26020_v37 = vld [vmem:[%s28388_s2] ss:$0 sm:$0xff] }
 0x2ab   : > { %v26030_v1 = vsel %vm22306_vm3, %v8680_v26, %v8684_v55  ;;  %v26046_v26 = vsel %vm537_vm0, %v17960_v53, 0 }
 0x2ad   : > { %20353 = vmatmul.mubr.msk.bf16.gmra.mrb[12].mxu1 %vm524_vm4, %v25988_v35  ;;  %v3701_v35 = vld [vmem:[#allocation2 + $0x68] sm:$0xf] }
 0x2ae   : > { %20358 = vmatprep.mubr.msk.bf16.mxu1 %vm524_vm4, %v18256_v19 }
 0x2b0   : > { %20089 = vmatmul.mubr.msk.bf16.vlgmr.msra.gmra.mrb[8].mxu0 %vm524_vm4, %v17943_v24  ;;  %v28738_v24 = vld [vmem:[#allocation17_spill] sm:$0xff] }
 0x2b1   : > { %20097 = vmatpush3.bf16.msra.mxu0 %v8705_v27  ;;  %20092 = vmatprep.mubr.msk.bf16.mxu0 %vm524_vm4, %v17944_v7  ;;  %v26054_v27 = vsel %vm537_vm0, %v18274_v33, 0 }
 0x2b2   : > { %21886 = vmatprep.subr.msk.bf16.mxu0 %vm537_vm0, %v17960_v53  ;;  %v26063_v53 = vld [vmem:[%s28387_s1 + $0x1e] sm:$0x3] }
 0x2b3   : > { %v19690_v19 = vpop.f32.mrb[0].mxu0  ;;  %v26087_v36 = vsel %vm537_vm0, %v26063_v53, 0 }
 0x2b4   : > { %v3556_v41 = vadd.f32 %v19690_v19, %v26020_v37  ;;  %v3508_v21 = vpop.f32.mrb[1].mxu0 }
 0x2b5   : > { %v3554_v19 = vadd.f32 %v26020_v37, %v3508_v21  ;;  %v19691_v4 = vpop.f32.mrb[2].mxu0  ;;  %20359 = vmatmul.mubr.msk.bf16.vlgmr.msra.gmra.mrb[8].mxu1 %vm524_vm4, %v18257_v23  ;;  %v26081_v21 = vsel %vm22570_vm7, %v17959_v48, %v8783_v47 }
 0x2b6   : > { %v3564_v34 = vmax.f32 %v3556_v41, 0.0  ;;  %v3557_v55 = vadd.f32 %v19691_v4, %v26020_v37  ;;  %v3511_v20 = vpop.f32.mrb[3].mxu0  ;;  %28739 = vst [vmem:[#allocation18_spill] sm:$0xff] %v26081_v21  ;;  %20367 = vmatpush3.bf16.msra.mxu1 %v12027_v63  ;;  %20362 = vmatprep.mubr.msk.bf16.mxu1 %vm524_vm4, %v18258_v38  ;;  %v26091_v4 = vsel %vm537_vm0, %v26068_v43, 0 }
 0x2b7   : > { %v3562_v13 = vmax.f32 %v3554_v19, 0.0  ;;  %v3555_v28 = vadd.f32 %v26020_v37, %v3511_v20  ;;  %28740 = vst [vmem:[#allocation17_spill] sm:$0xff] %v26091_v4  ;;  %21913 = vmatprep.subr.msk.bf16.mxu1 %vm537_vm0, %v18274_v33  ;;  %v3704_v20 = vld [vmem:[#allocation2 + $0x6c] sm:$0x1]  ;;  %v28749_v4 = vcombine.low %v28738_v24, %v25753_v15 }
 0x2b8   : > { %v18720_v23 = vpack.c.bf16 %v3564_v34, %v3564_v34  ;;  %v3565_v41 = vmax.f32 %v3557_v55, 0.0  ;;  %20093 = vmatmul.mubr.msk.bf16.gmra.mrb[12].mxu0 %vm524_vm4, %v17945_v17  ;;  %v19960_v38 = vpop.f32.mrb[0].mxu1  ;;  %v26104_v34 = vsel %vm22570_vm7, %v18273_v0, %v12105_v45  ;;  %v28742_v0 = vmov 0 }
 0x2b9   : > { %v18718_v48 = vpack.c.bf16 %v3562_v13, %v3562_v13  ;;  %v3563_v47 = vmax.f32 %v3555_v28, 0.0  ;;  %20098 = vmatprep.mubr.msk.bf16.mxu0 %vm524_vm4, %v17951_v54  ;;  %28741 = vst [vmem:[#allocation30_spill] sm:$0xff] %v26104_v34  ;;  %v6884_v55 = vadd.f32 %v19960_v38, %v26020_v37  ;;  %v6836_v63 = vpop.f32.mrb[1].mxu1  ;;  %v28743_v0 = vsel %vm26114_vm12, 4294967295, %v28742_v0  ;;  %v3692_v34 = vld [vmem:[#allocation2 + $0x5c] sm:$0x1] }
 0x2ba   : > { %v3619_v17 = vshrl.u32 %v18720_v23, 16  ;;  %v3622_v33 = vshll.u32 %v18720_v23, 16  ;;  %v18721_v7 = vpack.c.bf16 %v3565_v41, %v3565_v41  ;;  %v6882_v28 = vadd.f32 %v26020_v37, %v6836_v63  ;;  %v19961_v54 = vpop.f32.mrb[2].mxu1  ;;  %28744 = vst [vmem:[#allocation31_spill] sm:$0xff] %v28743_v0 }
 0x2bb   : > { %v3603_v12 = vshrl.u32 %v18718_v48, 16  ;;  %v3606_v13 = vshll.u32 %v18718_v48, 16  ;;  %v26108_v8 = vpack.c.bf16 %v3563_v47, %v3563_v47  ;;  %v26110_v19 = vpop.f32.mrb[4].mxu0  ;;  %v6892_v45 = vmax.f32 %v6884_v55, 0.0  ;;  %v6839_v38 = vpop.f32.mrb[3].mxu1 }
 0x2bc   : > { %v3621_v52 = vrot.slane %v3619_v17, 7  ;;  %v3627_v23 = vshrl.u32 %v18721_v7, 16  ;;  %v3630_v41 = vshll.u32 %v18721_v7, 16  ;;  %v26118_v62 = vpop.f32.mrb[5].mxu0  ;;  %v28745_v63 = vmov 0 }
 0x2bd   : > { %v28746_v63 = vsel %vm26122_vm13, 4294967295, %v28745_v63  ;;  %v3605_v48 = vrot.slane %v3603_v12, 7  ;;  %v3686_v47 = vld [vmem:[#allocation2 + $0x58] sm:$0xf]  ;;  %v6890_v17 = vmax.f32 %v6882_v28, 0.0  ;;  %v6885_v32 = vadd.f32 %v19961_v54, %v26020_v37  ;;  %v26128_v29 = vpop.f32.mrb[6].mxu0  ;;  %20363 = vmatmul.mubr.msk.bf16.gmra.mrb[12].mxu1 %vm524_vm4, %v28748_v39 }
 0x2be   : > { %28747 = vst [vmem:[#allocation32_spill] sm:$0xff] %v28746_v63  ;;  %v3611_v22 = vshrl.u32 %v26108_v8, 16  ;;  %v3624_v55 = vor.u32 %v3622_v33, %v3621_v52  ;;  %v3625_v7 = vrot.slane %v3621_v52, 4  ;;  %v18728_v42 = vpack.c.bf16 %v6892_v45, %v6892_v45  ;;  %v26134_v50 = vpop.f32.mrb[7].mxu0  ;;  %20368 = vmatprep.mubr.msk.bf16.mxu1 %vm524_vm4, %v28749_v4  ;;  %v3707_v39 = vld [vmem:[#allocation2 + $0x70] sm:$0xf] }
 0x2bf   : > { %v3629_v21 = vrot.slane %v3627_v23, 7  ;;  %v3608_v12 = vor.u32 %v3606_v13, %v3605_v48  ;;  %v3609_v28 = vrot.slane %v3605_v48, 4  ;;  %v18726_v2 = vpack.c.bf16 %v6890_v17, %v6890_v17 }
 0x2c0   : > { %v6893_v54 = vmax.f32 %v6885_v32, 0.0  ;;  %v3702_v52 = vsel %vm26114_vm12, %v3624_v55, %v3701_v35  ;;  %v3705_v33 = vsel %vm26122_vm13, %v3625_v7, %v3704_v20  ;;  %v6947_v31 = vshrl.u32 %v18728_v42, 16  ;;  %v7023_v32 = vld [vmem:[#allocation2 + $0xb8] sm:$0xf]  ;;  %v3710_v20 = vld [vmem:[#allocation2 + $0x74] sm:$0x1] }
 0x2c1   : > { %v6950_v45 = vshll.u32 %v18728_v42, 16  ;;  %v28750_v13 = vcombine.low %v25669_v56, %v25727_v49  ;;  %3703 = vst [vmem:[#allocation2 + $0x68] sm:$0xf] %v3702_v52  ;;  %3706 = vst [vmem:[#allocation2 + $0x6c] sm:$0x1] %v3705_v33  ;;  %v3687_v15 = vsel %vm26114_vm12, %v3608_v12, %v3686_v47  ;;  %v3693_v35 = vsel %vm26122_vm13, %v3609_v28, %v3692_v34  ;;  %v19964_v23 = vpop.f32.mrb[4].mxu1 }
 0x2c2   : > { %v6931_v24 = vshrl.u32 %v18726_v2, 16  ;;  %v6934_v4 = vshll.u32 %v18726_v2, 16  ;;  %v28751_v56 = vcombine.low %v25735_v58, %v25778_v59  ;;  %v6949_v49 = vrot.slane %v6947_v31, 7  ;;  %v7026_v42 = vld [vmem:[#allocation2 + $0xbc] sm:$0x1]  ;;  %v6852_v55 = vpop.f32.mrb[5].mxu1 }
 0x2c3   : > { %20099 = vmatmul.mubr.msk.bf16.vlgmr.msra.gmra.mrb[8].mxu0 %vm524_vm4, %v28750_v13  ;;  %3688 = vst [vmem:[#allocation2 + $0x58] sm:$0xf] %v3687_v15  ;;  %3694 = vst [vmem:[#allocation2 + $0x5c] sm:$0x1] %v3693_v35  ;;  %v3632_v48 = vor.u32 %v3630_v41, %v3629_v21  ;;  %v3633_v47 = vrot.slane %v3629_v21, 4  ;;  %v18729_v17 = vpack.c.bf16 %v6893_v54, %v6893_v54  ;;  %v3613_v7 = vrot.slane %v3611_v22, 7 }
 0x2c4   : > { %20107 = vmatpush3.bf16.msra.mxu0 %v26046_v26  ;;  %20102 = vmatprep.mubr.msk.bf16.mxu0 %vm524_vm4, %v28751_v56  ;;  %v6933_v2 = vrot.slane %v6931_v24, 7  ;;  %v7011_v34 = vld [vmem:[#allocation2 + $0xa8] sm:$0xf]  ;;  %v3614_v26 = vshll.u32 %v26108_v8, 16  ;;  %v6883_v58 = vadd.f32 %v26020_v37, %v6839_v38  ;;  %v19965_v59 = vpop.f32.mrb[6].mxu1  ;;  %v6952_v12 = vor.u32 %v6950_v45, %v6949_v49 }
 0x2c5   : > { %21887 = vmatprep.subr.msk.bf16.mxu0 %vm537_vm0, %v26063_v53  ;;  %v6953_v28 = vrot.slane %v6949_v49, 4  ;;  %v7014_v52 = vld [vmem:[#allocation2 + $0xac] sm:$0x1]  ;;  %v3708_v41 = vsel %vm26114_vm12, %v3632_v48, %v3707_v39  ;;  %v3711_v21 = vsel %vm26122_vm13, %v3633_v47, %v3710_v20  ;;  %v3695_v54 = vld [vmem:[#allocation2 + $0x60] sm:$0xf]  ;;  %v26165_v33 = vpop.f32.mrb[7].mxu1  ;;  %v28752_v35 = vcombine.low %v25760_v57, %v25768_v25 }
 0x2c6   : > { %v6936_v53 = vor.u32 %v6934_v4, %v6933_v2  ;;  %v6937_v31 = vrot.slane %v6933_v2, 4  ;;  %3709 = vst [vmem:[#allocation2 + $0x70] sm:$0xf] %v3708_v41  ;;  %3712 = vst [vmem:[#allocation2 + $0x74] sm:$0x1] %v3711_v21  ;;  %v6955_v8 = vshrl.u32 %v18729_v17, 16  ;;  %v7024_v45 = vsel %vm26114_vm12, %v6952_v12, %v7023_v32 }
 0x2c7   : > { %v6958_v22 = vshll.u32 %v18729_v17, 16  ;;  %v3698_v38 = vld [vmem:[#allocation2 + $0x64] sm:$0x1]  ;;  %v7027_v13 = vsel %vm26122_vm13, %v6953_v28, %v7026_v42  ;;  %v3616_v39 = vor.u32 %v3614_v26, %v3613_v7  ;;  %v3617_v15 = vrot.slane %v3613_v7, 4  ;;  %20369 = vmatmul.mubr.msk.bf16.vlgmr.msra.gmra.mrb[8].mxu1 %vm524_vm4, %v28752_v35  ;;  %7025 = vst [vmem:[#allocation2 + $0xb8] sm:$0xf] %v7024_v45 }
 0x2c8   : > { %7028 = vst [vmem:[#allocation2 + $0xbc] sm:$0x1] %v7027_v13  ;;  %v7012_v24 = vsel %vm26114_vm12, %v6936_v53, %v7011_v34  ;;  %v7015_v4 = vsel %vm26122_vm13, %v6937_v31, %v7014_v52  ;;  %v6957_v20 = vrot.slane %v6955_v8, 7  ;;  %v6891_v32 = vmax.f32 %v6883_v58, 0.0  ;;  %20377 = vmatpush3.bf16.msra.mxu1 %v26054_v27  ;;  %v7029_v57 = vld [vmem:[#allocation2 + $0xc0] sm:$0xf] }
 0x2c9   : > { %v28753_v56 = vcombine.low %v25772_v40, %v25825_v44  ;;  %7013 = vst [vmem:[#allocation2 + $0xa8] sm:$0xf] %v7012_v24  ;;  %7016 = vst [vmem:[#allocation2 + $0xac] sm:$0x1] %v7015_v4  ;;  %v7032_v25 = vld [vmem:[#allocation2 + $0xc4] sm:$0x1]  ;;  %v3696_v49 = vsel %vm26114_vm12, %v3616_v39, %v3695_v54  ;;  %v3699_v42 = vsel %vm26122_vm13, %v3617_v15, %v3698_v38  ;;  %21914 = vmatprep.subr.msk.bf16.mxu1 %vm537_vm0, %v26068_v43 }
 0x2ca   : > { %v3560_v48 = vadd.f32 %v26110_v19, %v26020_v37  ;;  %v6888_v27 = vadd.f32 %v19964_v23, %v26020_v37  ;;  %v28754_v40 = vcombine.low %v25782_v18, %v26030_v1  ;;  %v6960_v44 = vor.u32 %v6958_v22, %v6957_v20  ;;  %3697 = vst [vmem:[#allocation2 + $0x60] sm:$0xf] %v3696_v49  ;;  %v7017_v41 = vld [vmem:[#allocation2 + $0xb0] sm:$0xf]  ;;  %v7020_v54 = vld [vmem:[#allocation2 + $0xb4] sm:$0x1] }
 0x2cb   : > { %20372 = vmatprep.mubr.msk.bf16.mxu1 %vm524_vm4, %v28753_v56  ;;  %v6961_v47 = vrot.slane %v6957_v20, 4  ;;  %3700 = vst [vmem:[#allocation2 + $0x64] sm:$0x1] %v3699_v42  ;;  %v18727_v17 = vpack.c.bf16 %v6891_v32, %v6891_v32  ;;  %v3558_v2 = vadd.f32 %v26020_v37, %v26118_v62  ;;  %v28755_v34 = vcombine.low %v25797_v11, %v25843_v30  ;;  %v3725_v39 = vld [vmem:[#allocation2 + $0x88] sm:$0xf] }
 0x2cc   : > { %20103 = vmatmul.mubr.msk.bf16.gmra.mrb[12].mxu0 %vm524_vm4, %v28754_v40  ;;  %v3568_v19 = vmax.f32 %v3560_v48, 0.0  ;;  %v6896_v18 = vmax.f32 %v6888_v27, 0.0  ;;  %v6886_v23 = vadd.f32 %v26020_v37, %v6852_v55  ;;  %v3561_v7 = vadd.f32 %v26128_v29, %v26020_v37  ;;  %v3728_v4 = vld [vmem:[#allocation2 + $0x8c] sm:$0x1] }
 0x2cd   : > { %20108 = vmatprep.mubr.msk.bf16.mxu0 %vm524_vm4, %v28755_v34  ;;  %v7030_v26 = vsel %vm26114_vm12, %v6960_v44, %v7029_v57  ;;  %v7033_v62 = vsel %vm26122_vm13, %v6961_v47, %v7032_v25  ;;  %v6939_v58 = vshrl.u32 %v18727_v17, 16  ;;  %v6942_v11 = vshll.u32 %v18727_v17, 16  ;;  %v7047_v57 = vld [vmem:[#allocation2 + $0xd8] sm:$0xf]  ;;  %v7050_v25 = vld [vmem:[#allocation2 + $0xdc] sm:$0x1] }
 0x2ce   : > { %7031 = vst [vmem:[#allocation2 + $0xc0] sm:$0xf] %v7030_v26  ;;  %7034 = vst [vmem:[#allocation2 + $0xc4] sm:$0x1] %v7033_v62  ;;  %v18724_v30 = vpack.c.bf16 %v3568_v19, %v3568_v19  ;;  %v18732_v12 = vpack.c.bf16 %v6896_v18, %v6896_v18  ;;  %v3566_v43 = vmax.f32 %v3558_v2, 0.0  ;;  %v6894_v28 = vmax.f32 %v6886_v23, 0.0 }
 0x2cf   : > { %v6941_v52 = vrot.slane %v6939_v58, 7  ;;  %v3569_v55 = vmax.f32 %v3561_v7, 0.0  ;;  %v6889_v21 = vadd.f32 %v19965_v59, %v26020_v37  ;;  %v26213_v29 = vadd.f32 %v26020_v37, %v26134_v50  ;;  %v26226_v50 = vld [vmem:[%s28387_s1 + $0x20] sm:$0x3]  ;;  %v3713_v19 = vld [vmem:[#allocation2 + $0x78] sm:$0xf] }
 0x2d0   : > { %v3651_v53 = vshrl.u32 %v18724_v30, 16  ;;  %v3654_v31 = vshll.u32 %v18724_v30, 16  ;;  %v6979_v8 = vshrl.u32 %v18732_v12, 16  ;;  %v6982_v22 = vshll.u32 %v18732_v12, 16  ;;  %v3716_v18 = vld [vmem:[#allocation2 + $0x7c] sm:$0x1] }
 0x2d1   : > { %v28756_v38 = vcombine.low %v25832_v6, %v26034_v60  ;;  %v6944_v45 = vor.u32 %v6942_v11, %v6941_v52  ;;  %v6945_v13 = vrot.slane %v6941_v52, 4  ;;  %v18722_v15 = vpack.c.bf16 %v3566_v43, %v3566_v43  ;;  %v26254_v58 = vld [vmem:[%s28387_s1 + $0x20] sm:$0x3]  ;;  %v7035_v11 = vld [vmem:[#allocation2 + $0xc8] sm:$0xf] }
 0x2d2   : > { %v18730_v35 = vpack.c.bf16 %v6894_v28, %v6894_v28  ;;  %v28757_v59 = vcombine.low %v25836_v46, %v25900_v10  ;;  %v3653_v24 = vrot.slane %v3651_v53, 7  ;;  %v6981_v6 = vrot.slane %v6979_v8, 7  ;;  %v7038_v30 = vld [vmem:[#allocation2 + $0xcc] sm:$0x1]  ;;  %v3734_v8 = vld [vmem:[#allocation2 + $0x94] sm:$0x1] }
 0x2d3   : > { %20373 = vmatmul.mubr.msk.bf16.gmra.mrb[12].mxu1 %vm524_vm4, %v28756_v38  ;;  %v18725_v20 = vpack.c.bf16 %v3569_v55, %v3569_v55  ;;  %v6897_v32 = vmax.f32 %v6889_v21, 0.0  ;;  %v28758_v56 = vcombine.low %v25847_v51, %v25876_v61  ;;  %v7018_v46 = vsel %vm26114_vm12, %v6944_v45, %v7017_v41  ;;  %v28763_v38 = vld [vmem:[#allocation19_spill] sm:$0xff]  ;;  %v28765_v45 = vld [vmem:[#allocation5_spill] sm:$0xff] }
 0x2d4   : > { %20378 = vmatprep.mubr.msk.bf16.mxu1 %vm524_vm4, %v28757_v59  ;;  %v7021_v10 = vsel %vm26122_vm13, %v6945_v13, %v7020_v54  ;;  %v3635_v49 = vshrl.u32 %v18722_v15, 16  ;;  %v3638_v42 = vshll.u32 %v18722_v15, 16  ;;  %v28759_v48 = vcombine.low %v25880_v16, %v25921_v9  ;;  %7019 = vst [vmem:[#allocation2 + $0xb0] sm:$0xf] %v7018_v46  ;;  %v28766_v13 = vld [vmem:[#allocation18_spill] sm:$0xff] }
 0x2d5   : > { %20109 = vmatmul.mubr.msk.bf16.vlgmr.msra.gmra.mrb[8].mxu0 %vm524_vm4, %v28758_v56  ;;  %7022 = vst [vmem:[#allocation2 + $0xb4] sm:$0x1] %v7021_v10  ;;  %v3656_v51 = vor.u32 %v3654_v31, %v3653_v24  ;;  %v3657_v61 = vrot.slane %v3653_v24, 4  ;;  %v6984_v27 = vor.u32 %v6982_v22, %v6981_v6  ;;  %v6985_v40 = vrot.slane %v6981_v6, 4  ;;  %v3731_v31 = vld [vmem:[#allocation2 + $0x90] sm:$0xf] }
 0x2d6   : > { %20117 = vmatpush3.bf16.msra.mxu0 %v26087_v36  ;;  %20112 = vmatprep.mubr.msk.bf16.mxu0 %vm524_vm4, %v28759_v48  ;;  %v3637_v44 = vrot.slane %v3635_v49, 7  ;;  %v6963_v47 = vshrl.u32 %v18730_v35, 16  ;;  %v6966_v17 = vshll.u32 %v18730_v35, 16  ;;  %v3659_v2 = vshrl.u32 %v18725_v20, 16  ;;  %v28761_v22 = vld [vmem:[#allocation17_spill] sm:$0xff]  ;;  %v28768_v15 = vld [vmem:[#allocation30_spill] sm:$0xff] }
 0x2d7   : > { %21888 = vmatprep.subr.msk.bf16.mxu0 %vm537_vm0, %v26226_v50  ;;  %v3726_v36 = vsel %vm26114_vm12, %v3656_v51, %v3725_v39  ;;  %v3729_v16 = vsel %vm26122_vm13, %v3657_v61, %v3728_v4  ;;  %v7048_v9 = vsel %vm26114_vm12, %v6984_v27, %v7047_v57  ;;  %v7051_v34 = vsel %vm26122_vm13, %v6985_v40, %v7050_v25  ;;  %v28769_v35 = vld [vmem:[#allocation14_spill] sm:$0xff]  ;;  %v7053_v25 = vld [vmem:[#allocation2 + $0xe0] sm:$0xf]  ;;  %v7056_v49 = vld [vmem:[#allocation2 + $0xe4] sm:$0x1] }
 0x2d8   : > { %3727 = vst [vmem:[#allocation2 + $0x88] sm:$0xf] %v3726_v36  ;;  %3730 = vst [vmem:[#allocation2 + $0x8c] sm:$0x1] %v3729_v16  ;;  %v3640_v23 = vor.u32 %v3638_v42, %v3637_v44  ;;  %v3641_v7 = vrot.slane %v3637_v44, 4  ;;  %v6965_v26 = vrot.slane %v6963_v47, 7  ;;  %v18733_v43 = vpack.c.bf16 %v6897_v32, %v6897_v32 }
 0x2d9   : > { %7049 = vst [vmem:[#allocation2 + $0xd8] sm:$0xf] %v7048_v9  ;;  %7052 = vst [vmem:[#allocation2 + $0xdc] sm:$0x1] %v7051_v34  ;;  %v3661_v62 = vrot.slane %v3659_v2, 7  ;;  %v3662_v12 = vshll.u32 %v18725_v20, 16  ;;  %v6887_v52 = vadd.f32 %v26020_v37, %v26165_v33  ;;  %v28760_v41 = vcombine.low %v25904_v14, %v25908_v3 }
 0x2da   : > { %v3567_v28 = vmax.f32 %v26213_v29, 0.0  ;;  %v3714_v55 = vsel %vm26114_vm12, %v3640_v23, %v3713_v19  ;;  %v3717_v21 = vsel %vm26122_vm13, %v3641_v7, %v3716_v18  ;;  %v6968_v54 = vor.u32 %v6966_v17, %v6965_v26  ;;  %v28762_v29 = vld [vmem:[#allocation20_spill] sm:$0xff]  ;;  %v26298_v9 = vld [vmem:[%s22244_s6 + $0x138] sm:$0xf] }
 0x2db   : > { %20379 = vmatmul.mubr.msk.bf16.vlgmr.msra.gmra.mrb[8].mxu1 %vm524_vm4, %v28760_v41  ;;  %v6969_v53 = vrot.slane %v6965_v26, 4  ;;  %v28764_v37 = vcombine.low %v28762_v29, %v28763_v38  ;;  %3715 = vst [vmem:[#allocation2 + $0x78] sm:$0xf] %v3714_v55  ;;  %3718 = vst [vmem:[#allocation2 + $0x7c] sm:$0x1] %v3717_v21  ;;  %v3664_v14 = vor.u32 %v3662_v12, %v3661_v62  ;;  %v3665_v3 = vrot.slane %v3661_v62, 4 }
 0x2dc   : > { %20387 = vmatpush3.bf16.msra.mxu1 %v28761_v22  ;;  %v6987_v33 = vshrl.u32 %v18733_v43, 16  ;;  %v28767_v39 = vcombine.low %v28765_v45, %v28766_v13  ;;  %v18278_v59 = vcombine.low %v28769_v35, %v28768_v15  ;;  %v7036_v24 = vsel %vm26114_vm12, %v6968_v54, %v7035_v11  ;;  %v28770_v32 = vld [vmem:[#allocation8_spill] sm:$0xff]  ;;  %v7041_v62 = vld [vmem:[#allocation2 + $0xd0] sm:$0xf]  ;;  %v7044_v11 = vld [vmem:[#allocation2 + $0xd4] sm:$0x1] }
 0x2dd   : > { %20382 = vmatprep.mubr.msk.bf16.mxu1 %vm524_vm4, %v28764_v37  ;;  %21915 = vmatprep.subr.msk.bf16.mxu1 %vm537_vm0, %v26254_v58  ;;  %v7039_v4 = vsel %vm26122_vm13, %v6969_v53, %v7038_v30  ;;  %v18723_v6 = vpack.c.bf16 %v3567_v28, %v3567_v28  ;;  %v6895_v20 = vmax.f32 %v6887_v52, 0.0  ;;  %7037 = vst [vmem:[#allocation2 + $0xc8] sm:$0xf] %v7036_v24  ;;  %v6990_v57 = vshll.u32 %v18733_v43, 16  ;;  %v3719_v44 = vld [vmem:[#allocation2 + $0x80] sm:$0xf] }
 0x2de   : > { %20113 = vmatmul.mubr.msk.bf16.gmra.mrb[12].mxu0 %vm524_vm4, %v28767_v39  ;;  %7040 = vst [vmem:[#allocation2 + $0xcc] sm:$0x1] %v7039_v4  ;;  %v3732_v56 = vsel %vm26114_vm12, %v3664_v14, %v3731_v31  ;;  %v3735_v46 = vsel %vm26122_vm13, %v3665_v3, %v3734_v8  ;;  %v6989_v10 = vrot.slane %v6987_v33, 7  ;;  %v3722_v36 = vld [vmem:[#allocation2 + $0x84] sm:$0x1]  ;;  %v8983_v16 = vsel %vm537_vm0, %v26226_v50, 0 }
 0x2df   : > { %20118 = vmatprep.mubr.msk.bf16.mxu0 %vm524_vm4, %v28770_v32  ;;  %3733 = vst [vmem:[#allocation2 + $0x90] sm:$0xf] %v3732_v56  ;;  %3736 = vst [vmem:[#allocation2 + $0x94] sm:$0x1] %v3735_v46  ;;  %v3643_v42 = vshrl.u32 %v18723_v6, 16  ;;  %v18731_v48 = vpack.c.bf16 %v6895_v20, %v6895_v20  ;;  %v3646_v40 = vshll.u32 %v18723_v6, 16 }
 0x2e0   : > { %v6992_v51 = vor.u32 %v6990_v57, %v6989_v10  ;;  %v6993_v61 = vrot.slane %v6989_v10, 4  ;;  %v28771_v7 = vld [vmem:[#allocation16_spill] sm:$0xff]  ;;  %v8963_v50 = vshrl.u32 %v26298_v9, 16  ;;  %v8966_v12 = vshll.u32 %v26298_v9, 16  ;;  %v28773_v55 = vld [vmem:[#allocation7_spill] sm:$0xff]  ;;  %v28774_v8 = vld [vmem:[#allocation21_spill] sm:$0xff] }
 0x2e1   : > { %v3645_v27 = vrot.slane %v3643_v42, 7  ;;  %v6971_v47 = vshrl.u32 %v18731_v48, 16  ;;  %v6974_v23 = vshll.u32 %v18731_v48, 16  ;;  %v17982_v26 = vld [vmem:[%s28387_s1 + $0x22] sm:$0x3]  ;;  %v12305_v31 = vsel %vm537_vm0, %v26254_v58, 0 }
 0x2e2   : > { %v7054_v17 = vsel %vm26114_vm12, %v6992_v51, %v7053_v25  ;;  %v7057_v2 = vsel %vm26122_vm13, %v6993_v61, %v7056_v49  ;;  %v28772_v30 = vld [vmem:[#allocation12_spill] sm:$0xff]  ;;  %v26321_v53 = vld [vmem:[%s22244_s6 + $0x188] sm:$0xf]  ;;  %v17970_v22 = vcombine.low %v28774_v8, %v26298_v9  ;;  %v8965_v14 = vrot.slane %v8963_v50, 4  ;;  %v17905_v45 = vld [vmem:[%s22244_s6 + $0x13c] sm:$0x1] }
 0x2e3   : > { %20383 = vmatmul.mubr.msk.bf16.gmra.mrb[12].mxu1 %vm524_vm4, %v18278_v59  ;;  %7055 = vst [vmem:[#allocation2 + $0xe0] sm:$0xf] %v7054_v17  ;;  %7058 = vst [vmem:[#allocation2 + $0xe4] sm:$0x1] %v7057_v2  ;;  %v3648_v34 = vor.u32 %v3646_v40, %v3645_v27  ;;  %v3649_v19 = vrot.slane %v3645_v27, 4  ;;  %v6973_v18 = vrot.slane %v6971_v47, 7  ;;  %v18284_v20 = vcombine.low %v25931_v5, %v26321_v53 }
 0x2e4   : > { %20388 = vmatprep.mubr.msk.bf16.mxu1 %vm524_vm4, %v28771_v7  ;;  %v12285_v29 = vshrl.u32 %v26321_v53, 16  ;;  %v12288_v38 = vshll.u32 %v26321_v53, 16  ;;  %v18296_v37 = vld [vmem:[%s28387_s1 + $0x22] sm:$0x3]  ;;  %v8968_v3 = vrot.slane %v8966_v12, 5  ;;  %v28776_v58 = vld [vmem:[#allocation10_spill] sm:$0xff] }
 0x2e5   : > { %v3720_v43 = vsel %vm26114_vm12, %v3648_v34, %v3719_v44  ;;  %v3723_v28 = vsel %vm26122_vm13, %v3649_v19, %v3722_v36  ;;  %v6976_v52 = vor.u32 %v6974_v23, %v6973_v18  ;;  %v6977_v41 = vrot.slane %v6973_v18, 4  ;;  %v28775_v33 = vld [vmem:[#allocation4_spill] sm:$0xff]  ;;  %v28777_v59 = vld [vmem:[#allocation23_spill] sm:$0xff]  ;;  %v18219_v6 = vld [vmem:[%s22244_s6 + $0x18c] sm:$0x1] }
 0x2e6   : > { %20119 = vmatmul.mubr.msk.bf16.vlgmr.msra.gmra.mrb[8].mxu0 %vm524_vm4, %v28772_v30  ;;  %3721 = vst [vmem:[#allocation2 + $0x80] sm:$0xf] %v3720_v43  ;;  %3724 = vst [vmem:[#allocation2 + $0x84] sm:$0x1] %v3723_v28  ;;  %v12287_v39 = vrot.slane %v12285_v29, 4  ;;  %v12290_v35 = vrot.slane %v12288_v38, 5  ;;  %v8969_v24 = vor.u32 %v8968_v3, %v8965_v14 }
 0x2e7   : > { %20127 = vmatpush3.bf16.msra.mxu0 %v8983_v16  ;;  %20122 = vmatprep.mubr.msk.bf16.mxu0 %vm524_vm4, %v28773_v55  ;;  %v7042_v21 = vsel %vm26114_vm12, %v6976_v52, %v7041_v62  ;;  %v7045_v54 = vsel %vm26122_vm13, %v6977_v41, %v7044_v11  ;;  %v8972_v4 = vshll.u32 %v17905_v45, 16  ;;  %v12294_v56 = vshll.u32 %v18219_v6, 16  ;;  %v28778_v25 = vld [vmem:[#allocation25_spill] sm:$0xff]  ;;  %v18008_v49 = vld [vmem:[%s28387_s1 + $0x24] sm:$0x3]  ;;  %v28780_v51 = vld [vmem:[#allocation27_spill] sm:$0xff] }
 0x2e8   : > { %21889 = vmatprep.subr.msk.bf16.mxu0 %vm537_vm0, %v17982_v26  ;;  %7043 = vst [vmem:[#allocation2 + $0xd0] sm:$0xf] %v7042_v21  ;;  %7046 = vst [vmem:[#allocation2 + $0xd4] sm:$0x1] %v7045_v54  ;;  %v12291_v32 = vor.u32 %v12290_v35, %v12287_v39  ;;  %v8970_v46 = vrot.slane %v8969_v24, 4  ;;  %v9070_v57 = vsel %vm537_vm0, %v17982_v26, 0 }
 0x2e9   : > { %v8974_v10 = vrot.slane %v8972_v4, 5  ;;  %v28779_v42 = vld [vmem:[#allocation24_spill] sm:$0xff]  ;;  %v12296_v48 = vrot.slane %v12294_v56, 5  ;;  %v12392_v40 = vsel %vm537_vm0, %v18296_v37, 0  ;;  %v17981_v47 = vrot.slane %v26298_v9, 9  ;;  %v28782_v50 = vld [vmem:[#allocation26_spill] sm:$0xff] }
 0x2ea   : > { %v12292_v5 = vrot.slane %v12291_v32, 4  ;;  %v18322_v44 = vld [vmem:[%s28387_s1 + $0x24] sm:$0x3]  ;;  %v9061_v17 = vrot.slane %v17905_v45, 5  ;;  %v18295_v2 = vrot.slane %v26321_v53, 9  ;;  %v12383_v36 = vrot.slane %v18219_v6, 5 }
 0x2eb   : > { %20389 = vmatmul.mubr.msk.bf16.vlgmr.msra.gmra.mrb[8].mxu1 %vm524_vm4, %v28775_v33  ;;  %v8975_v27 = vsel %vm22306_vm3, %v8970_v46, %v8974_v10  ;;  %v26365_v16 = vld [vmem:[%s22244_s6 + $0x140] sm:$0xf]  ;;  %v26371_v18 = vld [vmem:[%s22244_s6 + $0x148] sm:$0xf]  ;;  %v26376_v26 = vld [vmem:[%s22244_s6 + $0x190] sm:$0xf] }
 0x2ec   : > { %20397 = vmatpush3.bf16.msra.mxu1 %v12305_v31  ;;  %20392 = vmatprep.mubr.msk.bf16.mxu1 %vm524_vm4, %v28776_v58  ;;  %v17976_v34 = vcombine.low %v26030_v1, %v8975_v27  ;;  %v12297_v19 = vsel %vm22306_vm3, %v12292_v5, %v12296_v48  ;;  %v9276_v23 = vshrl.u32 %v26365_v16, 16  ;;  %v9279_v7 = vshll.u32 %v26365_v16, 16  ;;  %v26379_v9 = vld [vmem:[%s22244_s6 + $0x198] sm:$0xf]  ;;  %v28783_v28 = vld [vmem:[#allocation28_spill] sm:$0xff] }
 0x2ed   : > { %21916 = vmatprep.subr.msk.bf16.mxu1 %vm537_vm0, %v18296_v37  ;;  %v12598_v62 = vshrl.u32 %v26376_v26, 16  ;;  %v12601_v11 = vshll.u32 %v26376_v26, 16  ;;  %v9290_v1 = vshrl.u32 %v26371_v18, 16  ;;  %v9293_v30 = vshll.u32 %v26371_v18, 16  ;;  %v26404_v53 = vld [vmem:[%s22244_s6 + $0x150] sm:$0xf] }
 0x2ee   : > { %20123 = vmatmul.mubr.msk.bf16.gmra.mrb[12].mxu0 %vm524_vm4, %v17970_v22  ;;  %v12612_v12 = vshrl.u32 %v26379_v9, 16  ;;  %v12615_v43 = vshll.u32 %v26379_v9, 16  ;;  %v18290_v52 = vcombine.low %v26034_v60, %v12297_v19  ;;  %v9200_v41 = vsel %vm537_vm0, %v18008_v49, 0  ;;  %v26407_v31 = vld [vmem:[%s22244_s6 + $0x144] sm:$0x1]  ;;  %v28785_v22 = vld [vmem:[#allocation29_spill] sm:$0xff] }
 0x2ef   : > { %20128 = vmatprep.mubr.msk.bf16.mxu0 %vm524_vm4, %v28777_v59  ;;  %v26397_v21 = vsel %vm22570_vm7, %v17981_v47, %v9061_v17  ;;  %v26401_v54 = vsel %vm22570_vm7, %v18295_v2, %v12383_v36  ;;  %v9278_v60 = vrot.slane %v9276_v23, 4  ;;  %v9281_v8 = vrot.slane %v9279_v7, 5  ;;  %v26412_v29 = vld [vmem:[%s22244_s6 + $0x14c] sm:$0x1]  ;;  %v26415_v33 = vld [vmem:[%s22244_s6 + $0x194] sm:$0x1] }
 0x2f0   : > { %v9292_v38 = vrot.slane %v9290_v1, 4  ;;  %v9295_v37 = vrot.slane %v9293_v30, 5  ;;  %v12600_v14 = vrot.slane %v12598_v62, 4  ;;  %v12603_v3 = vrot.slane %v12601_v11, 5  ;;  %v26427_v6 = vld [vmem:[%s22244_s6 + $0x158] sm:$0xf] }
 0x2f1   : > { %v12614_v45 = vrot.slane %v12612_v12, 4  ;;  %v12617_v58 = vrot.slane %v12615_v43, 5  ;;  %v9304_v39 = vshrl.u32 %v26404_v53, 16  ;;  %v9307_v35 = vshll.u32 %v26404_v53, 16  ;;  %v26431_v32 = vld [vmem:[%s22244_s6 + $0x19c] sm:$0x1] }
 0x2f2   : > { %v26420_v59 = vsel %vm537_vm0, %v18322_v44, 0  ;;  %v17983_v24 = vcombine.low %v28766_v13, %v26397_v21  ;;  %v18017_v56 = vld [vmem:[%s28387_s1 + $0x26] sm:$0x3]  ;;  %v9282_v46 = vor.u32 %v9281_v8, %v9278_v60  ;;  %v9299_v10 = vshll.u32 %v26412_v29, 16  ;;  %v26445_v5 = vld [vmem:[%s22244_s6 + $0x1a8] sm:$0xf] }
 0x2f3   : > { %20393 = vmatmul.mubr.msk.bf16.gmra.mrb[12].mxu1 %vm524_vm4, %v18284_v20  ;;  %v9285_v20 = vshll.u32 %v26407_v31, 16  ;;  %v9296_v48 = vor.u32 %v9295_v37, %v9292_v38  ;;  %v12607_v27 = vshll.u32 %v26415_v33, 16  ;;  %v12618_v47 = vor.u32 %v12617_v58, %v12614_v45  ;;  %v26457_v2 = vld [vmem:[%s22244_s6 + $0x154] sm:$0x1]  ;;  %v26471_v11 = vld [vmem:[%s22244_s6 + $0x168] sm:$0xf] }
 0x2f4   : > { %20398 = vmatprep.mubr.msk.bf16.mxu1 %vm524_vm4, %v28778_v25  ;;  %v9321_v25 = vshll.u32 %v26427_v6, 16  ;;  %v12621_v17 = vshll.u32 %v26431_v32, 16  ;;  %v9306_v36 = vrot.slane %v9304_v39, 4  ;;  %v28786_v19 = vld [vmem:[#allocation6_spill] sm:$0xff]  ;;  %v26465_v7 = vcombine.low %v26404_v53, %v26427_v6  ;;  %v26479_v12 = vld [vmem:[%s22244_s6 + $0x1b8] sm:$0xf] }
 0x2f5   : > { %v26468_v62 = vsel %vm537_vm0, %v18017_v56, 0  ;;  %v26474_v1 = vld [vmem:[%s22244_s6 + $0x1b0] sm:$0xf]  ;;  %v9287_v30 = vrot.slane %v9285_v20, 5  ;;  %28790 = vst [vmem:[#allocation19_spill] sm:$0xff] %v26479_v12  ;;  %v9283_v43 = vrot.slane %v9282_v46, 4 }
 0x2f6   : > { %20129 = vmatmul.mubr.msk.bf16.vlgmr.msra.gmra.mrb[8].mxu0 %vm524_vm4, %v28779_v42  ;;  %v26442_v42 = vld [vmem:[%s22244_s6 + $0x1a0] sm:$0xf]  ;;  %28787 = vst [vmem:[#allocation17_spill] sm:$0xff] %v26465_v7  ;;  %28788 = vst [vmem:[#allocation20_spill] sm:$0xff] %v26474_v1  ;;  %v9323_v60 = vrot.slane %v9321_v25, 5  ;;  %v28791_v8 = vld [vmem:[#allocation13_spill] sm:$0xff] }
 0x2f7   : > { %20137 = vmatpush3.bf16.msra.mxu0 %v9070_v57  ;;  %20132 = vmatprep.mubr.msk.bf16.mxu0 %vm524_vm4, %v28780_v51  ;;  %v9318_v57 = vshrl.u32 %v26427_v6, 16  ;;  %v12604_v51 = vor.u32 %v12603_v3, %v12600_v14  ;;  %v12609_v37 = vrot.slane %v12607_v27, 5  ;;  %v26484_v14 = vld [vmem:[%s22244_s6 + $0x15c] sm:$0x1]  ;;  %v9313_v3 = vshll.u32 %v26457_v2, 16  ;;  %v28800_v23 = vld [vmem:[#allocation22_spill] sm:$0xff] }
 0x2f8   : > { %21890 = vmatprep.subr.msk.bf16.mxu0 %vm537_vm0, %v18008_v49  ;;  %v18009_v49 = vcombine.low %v26365_v16, %v26371_v18  ;;  %v26490_v45 = vcombine.low %v26442_v42, %v26445_v5  ;;  %v12623_v58 = vrot.slane %v12621_v17, 5  ;;  %v26509_v25 = vld [vmem:[%s22244_s6 + $0x170] sm:$0xf]  ;;  %v26518_v17 = vld [vmem:[%s22244_s6 + $0x1c0] sm:$0xf] }
 0x2f9   : > { %v12605_v38 = vrot.slane %v12604_v51, 4  ;;  %28795 = vst [vmem:[#allocation14_spill] sm:$0xff] %v26509_v25  ;;  %v9288_v51 = vsel %vm22306_vm3, %v9283_v43, %v9287_v30  ;;  %28797 = vst [vmem:[#allocation16_spill] sm:$0xff] %v26518_v17  ;;  %v26535_v30 = vld [vmem:[%s28387_s1 + $0x28] sm:$0x3] }
 0x2fa   : > { %28792 = vst [vmem:[#allocation5_spill] sm:$0xff] %v26490_v45 }
 0x2fb   : > { %20399 = vmatmul.mubr.msk.bf16.vlgmr.msra.gmra.mrb[8].mxu1 %vm524_vm4, %v28782_v50  ;;  %v28789_v50 = vld [vmem:[#allocation9_spill] sm:$0xff] }
 0x2fc   : > { %20407 = vmatpush3.bf16.msra.mxu1 %v12392_v40  ;;  %20402 = vmatprep.mubr.msk.bf16.mxu1 %vm524_vm4, %v28783_v28  ;;  %v18331_v40 = vld [vmem:[%s28387_s1 + $0x26] sm:$0x3]  ;;  %v9301_v28 = vrot.slane %v9299_v10, 5  ;;  %v12629_v10 = vshll.u32 %v26442_v42, 16 }
 0x2fd   : > { %21917 = vmatprep.subr.msk.bf16.mxu1 %vm537_vm0, %v18322_v44  ;;  %v26453_v44 = vld [vmem:[%s22244_s6 + $0x160] sm:$0xf]  ;;  %v26496_v20 = vsel %vm537_vm0, %v18331_v40, 0 }
 0x2fe   : > { %20133 = vmatmul.mubr.msk.bf16.gmra.mrb[12].mxu0 %vm524_vm4, %v17976_v34  ;;  %v9309_v34 = vrot.slane %v9307_v35, 5  ;;  %v26493_v35 = vld [vmem:[%s22244_s6 + $0x1a4] sm:$0x1]  ;;  %v26500_v46 = vcombine.low %v26453_v44, %v26471_v11 }
 0x2ff   : > { %20138 = vmatprep.mubr.msk.bf16.mxu0 %vm524_vm4, %v28785_v22  ;;  %v9297_v22 = vrot.slane %v9296_v48, 4  ;;  %v26512_v48 = vld [vmem:[%s22244_s6 + $0x178] sm:$0xf] }
 0x300   : > { %v9310_v39 = vor.u32 %v9309_v34, %v9306_v36  ;;  %28793 = vst [vmem:[#allocation18_spill] sm:$0xff] %v26500_v46  ;;  %28796 = vst [vmem:[#allocation8_spill] sm:$0xff] %v26512_v48  ;;  %v26521_v36 = vld [vmem:[%s22244_s6 + $0x1c8] sm:$0xf]  ;;  %v26561_v13 = vcombine.low %v26509_v25, %v26512_v48 }
 0x301   : > { %28798 = vst [vmem:[#allocation12_spill] sm:$0xff] %v26521_v36  ;;  %v26525_v34 = vsel %vm22306_vm3, %v9297_v22, %v9301_v28  ;;  %v28802_v22 = vld [vmem:[#allocation15_spill] sm:$0xff]  ;;  %v26565_v21 = vcombine.low %v26518_v17, %v26521_v36 }
 0x302   : > { %28799 = vst [vmem:[#allocation7_spill] sm:$0xff] %v26525_v34  ;;  %v9311_v28 = vrot.slane %v9310_v39, 4  ;;  %v9349_v39 = vshll.u32 %v26471_v11, 16  ;;  %28803 = vst [vmem:[#allocation4_spill] sm:$0xff] %v26561_v13 }
 0x303   : > { %20403 = vmatmul.mubr.msk.bf16.gmra.mrb[12].mxu1 %vm524_vm4, %v18290_v52  ;;  %v9320_v52 = vrot.slane %v9318_v57, 4  ;;  %v26506_v57 = vcombine.low %v26474_v1, %v26479_v12 }
 0x304   : > { %20408 = vmatprep.mubr.msk.bf16.mxu1 %vm524_vm4, %v28786_v19  ;;  %v12610_v19 = vsel %vm22306_vm3, %v12605_v38, %v12609_v37  ;;  %v12631_v38 = vrot.slane %v12629_v10, 5  ;;  %v9332_v37 = vshrl.u32 %v26453_v44, 16 }
 0x305   : > { %28794 = vst [vmem:[#allocation30_spill] sm:$0xff] %v26506_v57  ;;  %v9324_v27 = vor.u32 %v9323_v60, %v9320_v52  ;;  %v12640_v52 = vshrl.u32 %v26445_v5, 16  ;;  %v12643_v60 = vshll.u32 %v26445_v5, 16 }
 0x306   : > { %20139 = vmatmul.mubr.msk.bf16.vlgmr.msra.gmra.mrb[8].mxu0 %vm524_vm4, %v28789_v50  ;;  %v9315_v50 = vrot.slane %v9313_v3, 5  ;;  %v9335_v3 = vshll.u32 %v26453_v44, 16  ;;  %v9334_v63 = vrot.slane %v9332_v37, 4 }
 0x307   : > { %20147 = vmatpush3.bf16.msra.mxu0 %v9200_v41  ;;  %20142 = vmatprep.mubr.msk.bf16.mxu0 %vm524_vm4, %v28791_v8  ;;  %v12619_v41 = vrot.slane %v12618_v47, 4  ;;  %v9327_v47 = vshll.u32 %v26484_v14, 16  ;;  %v12635_v8 = vshll.u32 %v26493_v35, 16 }
 0x308   : > { %21891 = vmatprep.subr.msk.bf16.mxu0 %vm537_vm0, %v18017_v56  ;;  %v12626_v56 = vshrl.u32 %v26442_v42, 16  ;;  %v9337_v0 = vrot.slane %v9335_v3, 5 }
 0x309   : > { %v26539_v43 = vsel %vm22306_vm3, %v12619_v41, %v12623_v58  ;;  %v9325_v41 = vrot.slane %v9324_v27, 4  ;;  %v9346_v58 = vshrl.u32 %v26471_v11, 16  ;;  %v26580_v10 = vrot.slane %v12635_v8, 5 }
 0x30a   : > { %28801 = vst [vmem:[#allocation21_spill] sm:$0xff] %v26539_v43  ;;  %v26582_v27 = vrot.slane %v12640_v52, 4 }
 0x30b   : > { %20409 = vmatmul.mubr.msk.bf16.vlgmr.msra.gmra.mrb[8].mxu1 %vm524_vm4, %v28800_v23  ;;  %v12628_v23 = vrot.slane %v12626_v56, 4  ;;  %v26575_v56 = vld [vmem:[%s22244_s6 + $0x164] sm:$0x1]  ;;  %v9348_v52 = vrot.slane %v9346_v58, 4  ;;  %v28808_v58 = vcombine.low %v26376_v26, %v26379_v9 }
 0x30c   : > { %20417 = vmatpush3.bf16.msra.mxu1 %v26420_v59  ;;  %20412 = vmatprep.mubr.msk.bf16.mxu1 %vm524_vm4, %v28802_v22  ;;  %v9329_v59 = vrot.slane %v9327_v47, 5  ;;  %v26584_v47 = vrot.slane %v12643_v60, 5  ;;  %v26588_v22 = vsel %vm22306_vm3, %v9311_v28, %v9315_v50  ;;  %v9341_v8 = vshll.u32 %v26575_v56, 16 }
 0x30d   : > { %21918 = vmatprep.subr.msk.bf16.mxu1 %vm537_vm0, %v18331_v40  ;;  %v26572_v40 = vsel %vm537_vm0, %v26535_v30, 0  ;;  %28804 = vst [vmem:[#allocation10_spill] sm:$0xff] %v26588_v22  ;;  %v12632_v4 = vor.u32 %v12631_v38, %v12628_v23  ;;  %v9351_v60 = vrot.slane %v9349_v39, 5  ;;  %v12657_v50 = vshll.u32 %v26474_v1, 16 }
 0x30e   : > { %20143 = vmatmul.mubr.msk.bf16.gmra.mrb[12].mxu0 %vm524_vm4, %v17983_v24  ;;  %v26568_v24 = vcombine.low %v9288_v51, %v26525_v34  ;;  %v26591_v51 = vld [vmem:[%s22244_s6 + $0x1ac] sm:$0x1]  ;;  %v26595_v34 = vsel %vm22306_vm3, %v9325_v41, %v9329_v59  ;;  %v12668_v28 = vshrl.u32 %v26479_v12, 16  ;;  %v12671_v23 = vshll.u32 %v26479_v12, 16 }
 0x30f   : > { %20148 = vmatprep.mubr.msk.bf16.mxu0 %vm524_vm4, %v18009_v49  ;;  %v26578_v49 = vcombine.low %v12610_v19, %v26539_v43  ;;  %28805 = vst [vmem:[#allocation23_spill] sm:$0xff] %v26591_v51  ;;  %28806 = vst [vmem:[#allocation25_spill] sm:$0xff] %v26595_v34  ;;  %v26598_v19 = vld [vmem:[%s22244_s6 + $0x16c] sm:$0x1]  ;;  %v12654_v43 = vshrl.u32 %v26474_v1, 16  ;;  %v28807_v38 = vcombine.low %v28768_v15, %v26401_v54  ;;  %v12649_v3 = vshll.u32 %v26591_v51, 16 }
 0x310   : > { %v12646_v37 = vor.u32 %v26584_v47, %v26582_v27  ;;  %v9360_v41 = vshrl.u32 %v26509_v25, 16  ;;  %v9363_v59 = vshll.u32 %v26509_v25, 16  ;;  %v9338_v39 = vor.u32 %v9337_v0, %v9334_v63  ;;  %v26636_v0 = vld [vmem:[%s22244_s6 + $0x1bc] sm:$0x1] }
 0x311   : > { %v9355_v15 = vshll.u32 %v26598_v19, 16  ;;  %v9374_v54 = vshrl.u32 %v26512_v48, 16  ;;  %v9377_v27 = vshll.u32 %v26512_v48, 16  ;;  %v26625_v47 = vcombine.low %v26588_v22, %v26595_v34 }
 0x312   : > { %v9343_v25 = vrot.slane %v9341_v8, 5  ;;  %v9352_v12 = vor.u32 %v9351_v60, %v9348_v52  ;;  %v12656_v63 = vrot.slane %v12654_v43, 4  ;;  %v12670_v48 = vrot.slane %v12668_v28, 4  ;;  %v26647_v28 = vld [vmem:[%s22244_s6 + $0x17c] sm:$0x1] }
 0x313   : > { %20413 = vmatmul.mubr.msk.bf16.gmra.mrb[12].mxu1 %vm524_vm4, %v28807_v38  ;;  %v26627_v38 = vrot.slane %v12632_v4, 4  ;;  %v12673_v1 = vrot.slane %v12671_v23, 5  ;;  %v26641_v4 = vld [vmem:[%s22244_s6 + $0x174] sm:$0x1]  ;;  %v9362_v8 = vrot.slane %v9360_v41, 4  ;;  %v9365_v52 = vrot.slane %v9363_v59, 5 }
 0x314   : > { %20418 = vmatprep.mubr.msk.bf16.mxu1 %vm524_vm4, %v28808_v58  ;;  %v26630_v58 = vld [vmem:[%s22244_s6 + $0x1b4] sm:$0x1]  ;;  %v12682_v60 = vshrl.u32 %v26518_v17, 16  ;;  %v9339_v34 = vrot.slane %v9338_v39, 4  ;;  %v9376_v22 = vrot.slane %v9374_v54, 4  ;;  %v9379_v51 = vrot.slane %v9377_v27, 5 }
 0x315   : > { %28809 = vst [vmem:[#allocation24_spill] sm:$0xff] %v26630_v58  ;;  %v9353_v43 = vrot.slane %v9352_v12, 4  ;;  %28810 = vst [vmem:[#allocation27_spill] sm:$0xff] %v26647_v28  ;;  %v12696_v23 = vshrl.u32 %v26521_v36, 16  ;;  %v18348_v41 = vld [vmem:[%s28387_s1 + $0x28] sm:$0x3]  ;;  %v12674_v39 = vor.u32 %v12673_v1, %v12670_v48  ;;  %v9366_v27 = vor.u32 %v9365_v52, %v9362_v8 }
 0x316   : > { %20149 = vmatmul.mubr.msk.bf16.vlgmr.msra.gmra.mrb[8].mxu0 %vm524_vm4, %v26465_v7  ;;  %v12659_v7 = vrot.slane %v12657_v50, 5  ;;  %v12663_v50 = vshll.u32 %v26630_v58, 16  ;;  %v9369_v12 = vshll.u32 %v26641_v4, 16  ;;  %v12651_v54 = vrot.slane %v12649_v3, 5 }
 0x317   : > { %20157 = vmatpush3.bf16.msra.mxu0 %v26468_v62  ;;  %20152 = vmatprep.mubr.msk.bf16.mxu0 %vm524_vm4, %v26500_v46  ;;  %v12685_v62 = vshll.u32 %v26518_v17, 16  ;;  %v9357_v46 = vrot.slane %v9355_v15, 5  ;;  %v12677_v15 = vshll.u32 %v26636_v0, 16  ;;  %v12684_v17 = vrot.slane %v12682_v60, 4 }
 0x318   : > { %21892 = vmatprep.subr.msk.bf16.mxu0 %vm537_vm0, %v26535_v30  ;;  %v12699_v30 = vshll.u32 %v26521_v36, 16  ;;  %v12660_v59 = vor.u32 %v12659_v7, %v12656_v63  ;;  %v12647_v36 = vrot.slane %v12646_v37, 4  ;;  %v26663_v7 = vsel %vm22306_vm3, %v9339_v34, %v9343_v25  ;;  %v26667_v63 = vld [vmem:[%s22244_s6 + $0x1c4] sm:$0x1] }
 0x319   : > { %v12687_v58 = vrot.slane %v12685_v62, 5  ;;  %v9380_v1 = vor.u32 %v9379_v51, %v9376_v22  ;;  %v9383_v48 = vshll.u32 %v26647_v28, 16  ;;  %v12665_v37 = vrot.slane %v12663_v50, 5 }
 0x31a   : > { %v12698_v3 = vrot.slane %v12696_v23, 4  ;;  %v12701_v25 = vrot.slane %v12699_v30, 5  ;;  %v12661_v34 = vrot.slane %v12660_v59, 4  ;;  %v12675_v22 = vrot.slane %v12674_v39, 4 }
 0x31b   : > { %20419 = vmatmul.mubr.msk.bf16.vlgmr.msra.gmra.mrb[8].mxu1 %vm524_vm4, %v26490_v45  ;;  %v26670_v45 = vld [vmem:[%s22244_s6 + $0x1cc] sm:$0x1]  ;;  %v12679_v51 = vrot.slane %v12677_v15, 5  ;;  %v9371_v8 = vrot.slane %v9369_v12, 5  ;;  %v9367_v52 = vrot.slane %v9366_v27, 4  ;;  %v12688_v60 = vor.u32 %v12687_v58, %v12684_v17 }
 0x31c   : > { %20427 = vmatpush3.bf16.msra.mxu1 %v26496_v20  ;;  %20422 = vmatprep.mubr.msk.bf16.mxu1 %vm524_vm4, %v26506_v57  ;;  %v26677_v20 = vsel %vm22306_vm3, %v9353_v43, %v9357_v46  ;;  %v12691_v62 = vshll.u32 %v26667_v63, 16  ;;  %v12705_v57 = vshll.u32 %v26670_v45, 16  ;;  %v9385_v28 = vrot.slane %v9383_v48, 5  ;;  %v18043_v15 = vld [vmem:[%s28387_s1 + $0x2a] sm:$0x3] }
 0x31d   : > { %21919 = vmatprep.subr.msk.bf16.mxu1 %vm537_vm0, %v18348_v41  ;;  %v18026_v46 = vrot.slane %v26365_v16, 9  ;;  %v9498_v43 = vrot.slane %v26407_v31, 5  ;;  %v12702_v50 = vor.u32 %v12701_v25, %v12698_v3  ;;  %v18027_v23 = vrot.slane %v26371_v18, 9 }
 0x31e   : > { %20153 = vmatmul.mubr.msk.bf16.gmra.mrb[12].mxu0 %vm524_vm4, %v26561_v13  ;;  %v9381_v13 = vrot.slane %v9380_v1, 4  ;;  %v9502_v17 = vrot.slane %v26412_v29, 5  ;;  %v26695_v58 = vsel %vm22306_vm3, %v12647_v36, %v12651_v54  ;;  %v26699_v16 = vcombine.low %v26663_v7, %v26677_v20 }
 0x31f   : > { %20158 = vmatprep.mubr.msk.bf16.mxu0 %vm524_vm4, %v26568_v24  ;;  %v26689_v24 = vsel %vm22306_vm3, %v26627_v38, %v26580_v10  ;;  %v26703_v31 = vsel %vm22306_vm3, %v12661_v34, %v12665_v37  ;;  %v26707_v10 = vsel %vm22306_vm3, %v12675_v22, %v12679_v51  ;;  %v26713_v29 = vsel %vm22306_vm3, %v9367_v52, %v9371_v8  ;;  %v18357_v51 = vld [vmem:[%s28387_s1 + $0x2a] sm:$0x3] }
 0x320   : > { %v12689_v36 = vrot.slane %v12688_v60, 4  ;;  %v12693_v38 = vrot.slane %v12691_v62, 5  ;;  %v12707_v30 = vrot.slane %v12705_v57, 5  ;;  %v26719_v59 = vsel %vm22306_vm3, %v9381_v13, %v9385_v28 }
 0x321   : > { %v9499_v39 = vsel %vm22570_vm7, %v18026_v46, %v9498_v43  ;;  %v18340_v12 = vrot.slane %v26376_v26, 9  ;;  %v12820_v54 = vrot.slane %v26415_v33, 5  ;;  %v12703_v57 = vrot.slane %v12702_v50, 4 }
 0x322   : > { %v18341_v13 = vrot.slane %v26379_v9, 9  ;;  %v12824_v28 = vrot.slane %v26431_v32, 5  ;;  %v12876_v27 = vsel %vm537_vm0, %v18348_v41, 0  ;;  %v26742_v26 = vcombine.low %v26689_v24, %v26695_v58 }
 0x323   : > { %20423 = vmatmul.mubr.msk.bf16.gmra.mrb[12].mxu1 %vm524_vm4, %v26565_v21  ;;  %v26746_v33 = vcombine.low %v26703_v31, %v26707_v10  ;;  %v26750_v1 = vcombine.low %v26713_v29, %v26719_v59  ;;  %v26754_v32 = vsel %vm22306_vm3, %v12689_v36, %v12693_v38  ;;  %v12821_v41 = vsel %vm22570_vm7, %v18340_v12, %v12820_v54  ;;  %v28811_v36 = vld [vmem:[#allocation23_spill] sm:$0xff]  ;;  %v28813_v12 = vld [vmem:[#allocation24_spill] sm:$0xff] }
 0x324   : > { %20428 = vmatprep.mubr.msk.bf16.mxu1 %vm524_vm4, %v26578_v49  ;;  %v26732_v49 = vsel %vm22570_vm7, %v18027_v23, %v9502_v17  ;;  %v18028_v48 = vrot.slane %v26404_v53, 9  ;;  %v9506_v37 = vrot.slane %v26457_v2, 5  ;;  %v26764_v3 = vsel %vm22306_vm3, %v12703_v57, %v12707_v30  ;;  %v28812_v30 = vld [vmem:[#allocation20_spill] sm:$0xff]  ;;  %v28814_v57 = vld [vmem:[#allocation19_spill] sm:$0xff] }
 0x325   : > { %v26768_v25 = vsel %vm22570_vm7, %v18341_v13, %v12824_v28  ;;  %v18029_v34 = vrot.slane %v26427_v6, 9  ;;  %v9510_v22 = vrot.slane %v26484_v14, 5  ;;  %v18030_v8 = vrot.slane %v26453_v44, 9 }
 0x326   : > { %20159 = vmatmul.mubr.msk.bf16.vlgmr.msra.gmra.mrb[8].mxu0 %vm524_vm4, %v26625_v47  ;;  %v9514_v2 = vrot.slane %v26575_v56, 5  ;;  %v18031_v52 = vrot.slane %v26471_v11, 9  ;;  %v9518_v60 = vrot.slane %v26598_v19, 5  ;;  %v26787_v14 = vcombine.low %v26754_v32, %v26764_v3 }
 0x327   : > { %20167 = vmatpush3.bf16.msra.mxu0 %v26572_v40  ;;  %20162 = vmatprep.mubr.msk.bf16.mxu0 %vm524_vm4, %v26699_v16  ;;  %v18035_v40 = vcombine.low %v9499_v39, %v26732_v49  ;;  %v18349_v56 = vcombine.low %v12821_v41, %v26768_v25  ;;  %v26794_v19 = vsel %vm22570_vm7, %v18028_v48, %v9506_v37  ;;  %v18342_v50 = vrot.slane %v26442_v42, 9  ;;  %v28816_v37 = vld [vmem:[#allocation8_spill] sm:$0xff] }
 0x328   : > { %21893 = vmatprep.subr.msk.bf16.mxu0 %vm537_vm0, %v18043_v15  ;;  %v26798_v62 = vsel %vm22570_vm7, %v18029_v34, %v9510_v22  ;;  %v26802_v46 = vsel %vm22570_vm7, %v18030_v8, %v9514_v2  ;;  %v26806_v43 = vsel %vm22570_vm7, %v18031_v52, %v9518_v60  ;;  %v12828_v23 = vrot.slane %v26493_v35, 5  ;;  %v28815_v35 = vld [vmem:[#allocation14_spill] sm:$0xff]  ;;  %v28817_v22 = vld [vmem:[#allocation27_spill] sm:$0xff] }
 0x329   : > { %v18343_v17 = vrot.slane %v26445_v5, 9  ;;  %v12832_v38 = vrot.slane %v28811_v36, 5  ;;  %v18344_v39 = vrot.slane %v28812_v30, 9  ;;  %v12836_v54 = vrot.slane %v28813_v12, 5  ;;  %v28818_v36 = vld [vmem:[#allocation16_spill] sm:$0xff] }
 0x32a   : > { %v18345_v13 = vrot.slane %v28814_v57, 9  ;;  %v12840_v28 = vrot.slane %v26636_v0, 5  ;;  %v18032_v41 = vrot.slane %v28815_v35, 9  ;;  %v9522_v48 = vrot.slane %v26641_v4, 5  ;;  %v28819_v12 = vld [vmem:[#allocation12_spill] sm:$0xff] }
 0x32b   : > { %20429 = vmatmul.mubr.msk.bf16.vlgmr.msra.gmra.mrb[8].mxu1 %vm524_vm4, %v26742_v26  ;;  %v18033_v34 = vrot.slane %v28816_v37, 9  ;;  %v9526_v8 = vrot.slane %v28817_v22, 5  ;;  %v9649_v0 = vsel %vm537_vm0, %v18043_v15, 0  ;;  %v26834_v2 = vsel %vm22570_vm7, %v18342_v50, %v12828_v23  ;;  %v18052_v15 = vld [vmem:[%s28387_s1 + $0x2c] sm:$0x3] }
 0x32c   : > { %20437 = vmatpush3.bf16.msra.mxu1 %v12876_v27  ;;  %20432 = vmatprep.mubr.msk.bf16.mxu1 %vm524_vm4, %v26746_v33  ;;  %v26818_v27 = vcombine.low %v26794_v19, %v26798_v62  ;;  %v26838_v52 = vsel %vm22570_vm7, %v18343_v17, %v12832_v38  ;;  %v26842_v4 = vsel %vm22570_vm7, %v18344_v39, %v12836_v54  ;;  %v18346_v38 = vrot.slane %v28818_v36, 9 }
 0x32d   : > { %21920 = vmatprep.subr.msk.bf16.mxu1 %vm537_vm0, %v18357_v51  ;;  %v26846_v60 = vsel %vm22570_vm7, %v18345_v13, %v12840_v28  ;;  %v26861_v50 = vsel %vm22570_vm7, %v18033_v34, %v9526_v8  ;;  %v26865_v23 = vcombine.low %v26834_v2, %v26838_v52  ;;  %v12844_v39 = vrot.slane %v26667_v63, 5  ;;  %v18366_v34 = vld [vmem:[%s28387_s1 + $0x2c] sm:$0x3] }
 0x32e   : > { %20163 = vmatmul.mubr.msk.bf16.gmra.mrb[12].mxu0 %vm524_vm4, %v26750_v1  ;;  %v26869_v17 = vcombine.low %v26842_v4, %v26846_v60  ;;  %v18347_v54 = vrot.slane %v28819_v12, 9  ;;  %v12848_v13 = vrot.slane %v26670_v45, 5  ;;  %v12971_v28 = vsel %vm537_vm0, %v18357_v51, 0 }
 0x32f   : > { %20168 = vmatprep.mubr.msk.bf16.mxu0 %vm524_vm4, %v18035_v40  ;;  %v26822_v40 = vcombine.low %v26802_v46, %v26806_v43  ;;  %v26892_v45 = vsel %vm22570_vm7, %v18346_v38, %v12844_v39  ;;  %v18045_v51 = vcombine.low %v26427_v6, %v26453_v44  ;;  %v18046_v22 = vcombine.low %v26471_v11, %v28815_v35  ;;  %v28820_v38 = vld [vmem:[#allocation10_spill] sm:$0xff]  ;;  %v28821_v39 = vld [vmem:[#allocation7_spill] sm:$0xff] }
 0x330   : > { %v26896_v63 = vsel %vm22570_vm7, %v18347_v54, %v12848_v13  ;;  %v9757_v8 = vsel %vm537_vm0, %v18052_v15, 0  ;;  %v18359_v44 = vcombine.low %v26445_v5, %v28812_v30  ;;  %v18360_v11 = vcombine.low %v28814_v57, %v28818_v36  ;;  %v18376_v13 = vld [vmem:[%s28387_s1 + $0x2e] sm:$0x3]  ;;  %v26941_v5 = vld [vmem:[%s22244_s6 + $0x1d0] sm:$0xf] }
 0x331   : > { %v13079_v35 = vsel %vm537_vm0, %v18366_v34, 0  ;;  %v18053_v54 = vcombine.low %v28821_v39, %v28820_v38  ;;  %v18005_v30 = vld [vmem:[%s22244_s6 + $0x184] sm:$0x1]  ;;  %v13047_v57 = vshrl.u32 %v26941_v5, 16 }
 0x333   : > { %20433 = vmatmul.mubr.msk.bf16.gmra.mrb[12].mxu1 %vm524_vm4, %v26787_v14 }
 0x334   : > { %20438 = vmatprep.mubr.msk.bf16.mxu1 %vm524_vm4, %v18349_v56  ;;  %v26857_v56 = vsel %vm22570_vm7, %v18032_v41, %v9522_v48  ;;  %v18044_v48 = vcombine.low %v26371_v18, %v26404_v53  ;;  %v26904_v18 = vcombine.low %v26892_v45, %v26896_v63  ;;  %v18358_v53 = vcombine.low %v26379_v9, %v26442_v42  ;;  %v26921_v9 = vld [vmem:[%s22244_s6 + $0x180] sm:$0xf] }
 0x335   : > { %v26879_v41 = vcombine.low %v26857_v56, %v26861_v50  ;;  %v9725_v6 = vshrl.u32 %v26921_v9, 16  ;;  %v9728_v42 = vshll.u32 %v26921_v9, 16 }
 0x336   : > { %20169 = vmatmul.mubr.msk.bf16.vlgmr.msra.gmra.mrb[8].mxu0 %vm524_vm4, %v26818_v27 }
 0x337   : > { %20177 = vmatpush3.bf16.msra.mxu0 %v9649_v0  ;;  %20172 = vmatprep.mubr.msk.bf16.mxu0 %vm524_vm4, %v26822_v40  ;;  %v18062_v0 = vld [vmem:[%s28387_s1 + $0x2e] sm:$0x3] }
 0x338   : > { %21894 = vmatprep.subr.msk.bf16.mxu0 %vm537_vm0, %v18052_v15  ;;  %v18047_v15 = vcombine.low %v28816_v37, %v26921_v9  ;;  %v13050_v37 = vshll.u32 %v26941_v5, 16  ;;  %v9856_v39 = vsel %vm537_vm0, %v18062_v0, 0 }
 0x33b   : > { %20439 = vmatmul.mubr.msk.bf16.vlgmr.msra.gmra.mrb[8].mxu1 %vm524_vm4, %v26865_v23 }
 0x33c   : > { %20447 = vmatpush3.bf16.msra.mxu1 %v12971_v28  ;;  %20442 = vmatprep.mubr.msk.bf16.mxu1 %vm524_vm4, %v26869_v17  ;;  %v9727_v28 = vrot.slane %v9725_v6, 4  ;;  %v13052_v6 = vrot.slane %v13050_v37, 5  ;;  %v18063_v37 = vcombine.low %v26732_v49, %v26794_v19  ;;  %v18065_v49 = vcombine.low %v26806_v43, %v26857_v56 }
 0x33d   : > { %21921 = vmatprep.subr.msk.bf16.mxu1 %vm537_vm0, %v18366_v34  ;;  %v9734_v34 = vshll.u32 %v18005_v30, 16  ;;  %v9835_v19 = vrot.slane %v18005_v30, 5  ;;  %v18375_v43 = vrot.slane %v26941_v5, 9 }
 0x33e   : > { %20173 = vmatmul.mubr.msk.bf16.gmra.mrb[12].mxu0 %vm524_vm4, %v26879_v41 }
 0x33f   : > { %20178 = vmatprep.mubr.msk.bf16.mxu0 %vm524_vm4, %v18044_v48  ;;  %v9730_v48 = vrot.slane %v9728_v42, 5  ;;  %v28823_v42 = vld [vmem:[#allocation25_spill] sm:$0xff]  ;;  %v9736_v38 = vrot.slane %v9734_v34, 5  ;;  %v18391_v34 = vld [vmem:[%s28387_s1 + $0x32] sm:$0x3] }
 0x341   : > { %v9731_v36 = vor.u32 %v9730_v48, %v9727_v28  ;;  %v13178_v48 = vsel %vm537_vm0, %v18376_v13, 0 }
 0x343   : > { %20443 = vmatmul.mubr.msk.bf16.gmra.mrb[12].mxu1 %vm524_vm4, %v26904_v18 }
 0x344   : > { %20448 = vmatprep.mubr.msk.bf16.mxu1 %vm524_vm4, %v18358_v53  ;;  %v18361_v53 = vcombine.low %v28819_v12, %v26941_v5 }
 0x346   : > { %20179 = vmatmul.mubr.msk.bf16.vlgmr.msra.gmra.mrb[8].mxu0 %vm524_vm4, %v18045_v51  ;;  %v28822_v51 = vld [vmem:[#allocation21_spill] sm:$0xff] }
 0x347   : > { %20187 = vmatpush3.bf16.msra.mxu0 %v9757_v8  ;;  %20182 = vmatprep.mubr.msk.bf16.mxu0 %vm524_vm4, %v18046_v22  ;;  %v18367_v22 = vcombine.low %v28822_v51, %v26689_v24  ;;  %v13049_v8 = vrot.slane %v13047_v57, 4  ;;  %v18071_v24 = vld [vmem:[%s28387_s1 + $0x30] sm:$0x3] }
 0x348   : > { %21895 = vmatprep.subr.msk.bf16.mxu0 %vm537_vm0, %v18062_v0  ;;  %v28826_v51 = vld [vmem:[#allocation18_spill] sm:$0xff] }
 0x349   : > { %v13053_v12 = vor.u32 %v13052_v6, %v13049_v8  ;;  %v28827_v8 = vld [vmem:[#allocation4_spill] sm:$0xff] }
 0x34b   : > { %20449 = vmatmul.mubr.msk.bf16.vlgmr.msra.gmra.mrb[8].mxu1 %vm524_vm4, %v18359_v44  ;;  %v18054_v44 = vcombine.low %v28823_v42, %v26663_v7  ;;  %v13054_v0 = vrot.slane %v13053_v12, 4  ;;  %v13357_v42 = vsel %vm537_vm0, %v18391_v34, 0  ;;  %v18007_v12 = vld [vmem:[%s22244_s6 + $0x18c] sm:$0x1] }
 0x34c   : > { %20457 = vmatpush3.bf16.msra.mxu1 %v13079_v35  ;;  %20452 = vmatprep.mubr.msk.bf16.mxu1 %vm524_vm4, %v18360_v11  ;;  %v18319_v11 = vld [vmem:[%s22244_s6 + $0x1d4] sm:$0x1]  ;;  %v18055_v35 = vcombine.low %v26677_v20, %v26713_v29  ;;  %v18368_v20 = vcombine.low %v26695_v58, %v26703_v31  ;;  %v18369_v29 = vcombine.low %v26707_v10, %v26754_v32  ;;  %v18061_v32 = vrot.slane %v26921_v9, 9 }
 0x34d   : > { %21922 = vmatprep.subr.msk.bf16.mxu1 %vm537_vm0, %v18376_v13  ;;  %v18377_v10 = vcombine.low %v26768_v25, %v26834_v2  ;;  %v9939_v13 = vsel %vm537_vm0, %v18071_v24, 0  ;;  %v13157_v2 = vrot.slane %v18319_v11, 5 }
 0x34e   : > { %20183 = vmatmul.mubr.msk.bf16.gmra.mrb[12].mxu0 %vm524_vm4, %v18047_v15  ;;  %v9732_v15 = vrot.slane %v9731_v36, 4  ;;  %v18385_v36 = vld [vmem:[%s28387_s1 + $0x30] sm:$0x3]  ;;  %v27012_v25 = vsel %vm22570_vm7, %v18061_v32, %v9835_v19  ;;  %v10113_v32 = vrot.slane %v18007_v12, 5 }
 0x34f   : > { %20188 = vmatprep.mubr.msk.bf16.mxu0 %vm524_vm4, %v18053_v54  ;;  %v13056_v54 = vshll.u32 %v18319_v11, 16  ;;  %v13261_v56 = vsel %vm537_vm0, %v18385_v36, 0  ;;  %v18066_v30 = vcombine.low %v26861_v50, %v27012_v25  ;;  %v18398_v11 = vld [vmem:[%s28387_s1 + $0x34] sm:$0x3] }
 0x350   : > { %v26969_v7 = vsel %vm22306_vm3, %v9732_v15, %v9736_v38  ;;  %v28828_v38 = vld [vmem:[#allocation30_spill] sm:$0xff] }
 0x351   : > { %v13058_v28 = vrot.slane %v13056_v54, 5  ;;  %v18056_v57 = vcombine.low %v26719_v59, %v26969_v7  ;;  %v18064_v59 = vcombine.low %v26798_v62, %v26802_v46  ;;  %v18378_v62 = vcombine.low %v26838_v52, %v26842_v4  ;;  %v28824_v4 = vld [vmem:[#allocation17_spill] sm:$0xff] }
 0x352   : > { %v18379_v46 = vcombine.low %v26846_v60, %v26892_v45  ;;  %v27030_v52 = vsel %vm22570_vm7, %v18375_v43, %v13157_v2  ;;  %v28825_v45 = vld [vmem:[#allocation5_spill] sm:$0xff] }
 0x353   : > { %20453 = vmatmul.mubr.msk.bf16.gmra.mrb[12].mxu1 %vm524_vm4, %v18361_v53  ;;  %v26988_v58 = vsel %vm22306_vm3, %v13054_v0, %v13058_v28  ;;  %v18380_v60 = vcombine.low %v26896_v63, %v27030_v52  ;;  %v18084_v53 = vld [vmem:[%s28387_s1 + $0x34] sm:$0x3] }
 0x354   : > { %20458 = vmatprep.mubr.msk.bf16.mxu1 %vm524_vm4, %v18367_v22  ;;  %v18370_v31 = vcombine.low %v26764_v3, %v26988_v58  ;;  %v18077_v3 = vld [vmem:[%s28387_s1 + $0x32] sm:$0x3]  ;;  %v18006_v22 = vld [vmem:[%s22244_s6 + $0x188] sm:$0xf] }
 0x355   : > { %v10035_v50 = vsel %vm537_vm0, %v18077_v3, 0  ;;  %v10015_v63 = vshrl.u32 %v18006_v22, 16  ;;  %v10018_v6 = vshll.u32 %v18006_v22, 16 }
 0x356   : > { %20189 = vmatmul.mubr.msk.bf16.vlgmr.msra.gmra.mrb[8].mxu0 %vm524_vm4, %v18054_v44  ;;  %v18072_v44 = vcombine.low %v26921_v9, %v18006_v22 }
 0x357   : > { %20197 = vmatpush3.bf16.msra.mxu0 %v9856_v39  ;;  %20192 = vmatprep.mubr.msk.bf16.mxu0 %vm524_vm4, %v18055_v35  ;;  %v10017_v35 = vrot.slane %v10015_v63, 4  ;;  %v10020_v15 = vrot.slane %v10018_v6, 5  ;;  %v18320_v39 = vld [vmem:[%s22244_s6 + $0x1d8] sm:$0xf] }
 0x358   : > { %21896 = vmatprep.subr.msk.bf16.mxu0 %vm537_vm0, %v18071_v24  ;;  %v13337_v54 = vshrl.u32 %v18320_v39, 16  ;;  %v13340_v24 = vshll.u32 %v18320_v39, 16 }
 0x359   : > { %v10021_v9 = vor.u32 %v10020_v15, %v10017_v35 }
 0x35a   : > { %v13339_v0 = vrot.slane %v13337_v54, 4  ;;  %v13342_v28 = vrot.slane %v13340_v24, 5  ;;  %v10333_v54 = vld [vmem:[#allocation2 + $0xf8] sm:$0xf] }
 0x35b   : > { %20459 = vmatmul.mubr.msk.bf16.vlgmr.msra.gmra.mrb[8].mxu1 %vm524_vm4, %v18368_v20  ;;  %v10024_v20 = vshll.u32 %v18007_v12, 16 }
 0x35c   : > { %20467 = vmatpush3.bf16.msra.mxu1 %v13178_v48  ;;  %20462 = vmatprep.mubr.msk.bf16.mxu1 %vm524_vm4, %v18369_v29  ;;  %v18386_v29 = vcombine.low %v26941_v5, %v18320_v39  ;;  %v18321_v48 = vld [vmem:[%s22244_s6 + $0x1dc] sm:$0x1] }
 0x35d   : > { %21923 = vmatprep.subr.msk.bf16.mxu1 %vm537_vm0, %v18385_v36  ;;  %v13343_v36 = vor.u32 %v13342_v28, %v13339_v0 }
 0x35e   : > { %20193 = vmatmul.mubr.msk.bf16.gmra.mrb[12].mxu0 %vm524_vm4, %v18056_v57  ;;  %v10022_v57 = vrot.slane %v10021_v9, 4 }
 0x35f   : > { %20198 = vmatprep.mubr.msk.bf16.mxu0 %vm524_vm4, %v18063_v37  ;;  %v10026_v37 = vrot.slane %v10024_v20, 5  ;;  %v13344_v5 = vrot.slane %v13343_v36, 4 }
 0x363   : > { %20463 = vmatmul.mubr.msk.bf16.gmra.mrb[12].mxu1 %vm524_vm4, %v18370_v31  ;;  %v13346_v31 = vshll.u32 %v18321_v48, 16 }
 0x364   : > { %20468 = vmatprep.mubr.msk.bf16.mxu1 %vm524_vm4, %v18377_v10 }
 0x365   : > { %v13348_v10 = vrot.slane %v13346_v31, 5 }
 0x366   : > { %20199 = vmatmul.mubr.msk.bf16.vlgmr.msra.gmra.mrb[8].mxu0 %vm524_vm4, %v18064_v59  ;;  %v13444_v59 = vsel %vm537_vm0, %v18398_v11, 0 }
 0x367   : > { %20207 = vmatpush3.bf16.msra.mxu0 %v9939_v13  ;;  %20202 = vmatprep.mubr.msk.bf16.mxu0 %vm524_vm4, %v18065_v49 }
 0x368   : > { %21897 = vmatprep.subr.msk.bf16.mxu0 %vm537_vm0, %v18077_v3 }
 0x36b   : > { %20469 = vmatmul.mubr.msk.bf16.vlgmr.msra.gmra.mrb[8].mxu1 %vm524_vm4, %v18378_v62 }
 0x36c   : > { %20477 = vmatpush3.bf16.msra.mxu1 %v13261_v56  ;;  %20472 = vmatprep.mubr.msk.bf16.mxu1 %vm524_vm4, %v18379_v46 }
 0x36d   : > { %21924 = vmatprep.subr.msk.bf16.mxu1 %vm537_vm0, %v18391_v34 }
 0x36e   : > { %20203 = vmatmul.mubr.msk.bf16.gmra.mrb[12].mxu0 %vm524_vm4, %v18066_v30 }
 0x36f   : > { %20208 = vmatprep.mubr.msk.bf16.mxu0 %vm524_vm4, %v28824_v4 }
 0x373   : > { %20473 = vmatmul.mubr.msk.bf16.gmra.mrb[12].mxu1 %vm524_vm4, %v18380_v60 }
 0x374   : > { %20478 = vmatprep.mubr.msk.bf16.mxu1 %vm524_vm4, %v28825_v45  ;;  %v10345_v45 = vld [vmem:[#allocation2 + $0x108] sm:$0xf] }
 0x376   : > { %20209 = vmatmul.mubr.msk.bf16.vlgmr.msra.gmra.mrb[8].mxu0 %vm524_vm4, %v28826_v51 }
 0x377   : > { %20217 = vmatpush3.bf16.msra.mxu0 %v10035_v50  ;;  %20212 = vmatprep.mubr.msk.bf16.mxu0 %vm524_vm4, %v28827_v8 }
 0x378   : > { %21898 = vmatprep.subr.msk.bf16.mxu0 %vm537_vm0, %v18084_v53 }
 0x37b   : > { %20479 = vmatmul.mubr.msk.bf16.vlgmr.msra.gmra.mrb[8].mxu1 %vm524_vm4, %v28828_v38 }
 0x37c   : > { %20487 = vmatpush3.bf16.msra.mxu1 %v13357_v42  ;;  %20482 = vmatprep.mubr.msk.bf16.mxu1 %vm524_vm4, %v26565_v21  ;;  %v10122_v21 = vsel %vm537_vm0, %v18084_v53, 0  ;;  %v10348_v53 = vld [vmem:[#allocation2 + $0x10c] sm:$0x1] }
 0x37d   : > { %21925 = vmatprep.subr.msk.bf16.mxu1 %vm537_vm0, %v18398_v11 }
 0x37e   : > { %20213 = vmatmul.mubr.msk.bf16.gmra.mrb[12].mxu0 %vm524_vm4, %v18072_v44 }
 0x37f   : > { %20218 = vmatprep.mubr.msk.bf16.mxu0 %vm524_vm4, %v26625_v47  ;;  %v10027_v47 = vsel %vm22306_vm3, %v10022_v57, %v10026_v37  ;;  %v10336_v57 = vld [vmem:[#allocation2 + $0xfc] sm:$0x1] }
 0x380   : > { %v18078_v49 = vcombine.low %v26969_v7, %v10027_v47 }
 0x383   : > { %20483 = vmatmul.mubr.msk.bf16.gmra.mrb[12].mxu1 %vm524_vm4, %v18386_v29 }
 0x384   : > { %20488 = vmatprep.mubr.msk.bf16.mxu1 %vm524_vm4, %v26742_v26 }
 0x386   : > { %20219 = vmatmul.mubr.msk.bf16.vlgmr.msra.gmra.mrb[8].mxu0 %vm524_vm4, %v26699_v16  ;;  %v13349_v16 = vsel %vm22306_vm3, %v13344_v5, %v13348_v10 }
 0x387   : > { %20227 = vmatpush3.bf16.msra.mxu0 %v10122_v21  ;;  %20222 = vmatprep.mubr.msk.bf16.mxu0 %vm524_vm4, %v26750_v1  ;;  %v18392_v26 = vcombine.low %v26988_v58, %v13349_v16  ;;  %v18083_v1 = vrot.slane %v18006_v22, 9 }
 0x389   : > { %v10114_v61 = vsel %vm22570_vm7, %v18083_v1, %v10113_v32  ;;  %v10351_v32 = vld [vmem:[#allocation2 + $0x110] sm:$0xf] }
 0x38b   : > { %20489 = vmatmul.mubr.msk.bf16.vlgmr.msra.gmra.mrb[8].mxu1 %vm524_vm4, %v26746_v33  ;;  %v18397_v33 = vrot.slane %v18320_v39, 9 }
 0x38c   : > { %20497 = vmatpush3.bf16.msra.mxu1 %v13444_v59  ;;  %20492 = vmatprep.mubr.msk.bf16.mxu1 %vm524_vm4, %v26787_v14  ;;  %v13435_v14 = vrot.slane %v18321_v48, 5 }
 0x38e   : > { %20223 = vmatmul.mubr.msk.bf16.gmra.mrb[12].mxu0 %vm524_vm4, %v18078_v49 }
 0x38f   : > { %20228 = vmatprep.mubr.msk.bf16.mxu0 %vm524_vm4, %v26818_v27  ;;  %v18085_v27 = vcombine.low %v27012_v25, %v10114_v61  ;;  %v13667_v61 = vld [vmem:[#allocation2 + $0x158] sm:$0xf] }
 0x393   : > { %20493 = vmatmul.mubr.msk.bf16.gmra.mrb[12].mxu1 %vm524_vm4, %v18392_v26 }
 0x394   : > { %20498 = vmatprep.mubr.msk.bf16.mxu1 %vm524_vm4, %v26865_v23  ;;  %v13436_v23 = vsel %vm22570_vm7, %v18397_v33, %v13435_v14 }
 0x396   : > { %20229 = vmatmul.mubr.msk.bf16.vlgmr.msra.gmra.mrb[8].mxu0 %vm524_vm4, %v26822_v40  ;;  %v18399_v40 = vcombine.low %v27030_v52, %v13436_v23 }
 0x397   : > { %20232 = vmatprep.mubr.msk.bf16.mxu0 %vm524_vm4, %v26879_v41  ;;  %v27112_v41 = vld [vmem:[%s28388_s2] ss:$0 sm:$0xff] }
 0x39b   : > { %20499 = vmatmul.mubr.msk.bf16.vlgmr.msra.gmra.mrb[8].mxu1 %vm524_vm4, %v26869_v17 }
 0x39c   : > { %20502 = vmatprep.mubr.msk.bf16.mxu1 %vm524_vm4, %v26904_v18 }
 0x39e   : > { %20233 = vmatmul.mubr.msk.bf16.gmra.mrb[12].mxu0 %vm524_vm4, %v18085_v27 }
 0x3a3   : > { %20503 = vmatmul.mubr.msk.bf16.gmra.mrb[12].mxu1 %vm524_vm4, %v18399_v40  ;;  %v10354_v40 = vld [vmem:[#allocation2 + $0x114] sm:$0x1] }
 0x469   : > { %v20230_v7 = vpop.f32.mrb[8].mxu0 }
 0x46a   : > { %v10206_v17 = vadd.f32 %v20230_v7, %v27112_v41  ;;  %v10158_v58 = vpop.f32.mrb[9].mxu0 }
 0x46b   : > { %v10204_v18 = vadd.f32 %v27112_v41, %v10158_v58  ;;  %v20231_v19 = vpop.f32.mrb[10].mxu0  ;;  %v13670_v58 = vld [vmem:[#allocation2 + $0x15c] sm:$0x1] }
 0x46c   : > { %v10214_v55 = vmax.f32 %v10206_v17, 0.0  ;;  %v10207_v13 = vadd.f32 %v20231_v19, %v27112_v41  ;;  %v10161_v3 = vpop.f32.mrb[11].mxu0 }
 0x46d   : > { %v10212_v25 = vmax.f32 %v10204_v18, 0.0  ;;  %v10205_v62 = vadd.f32 %v27112_v41, %v10161_v3 }
 0x46e   : > { %v18736_v46 = vpack.c.bf16 %v10214_v55, %v10214_v55  ;;  %v10215_v43 = vmax.f32 %v10207_v13, 0.0  ;;  %v20500_v2 = vpop.f32.mrb[8].mxu1 }
 0x46f   : > { %v18734_v56 = vpack.c.bf16 %v10212_v25, %v10212_v25  ;;  %v10213_v30 = vmax.f32 %v10205_v62, 0.0  ;;  %v13528_v4 = vadd.f32 %v20500_v2, %v27112_v41  ;;  %v13480_v60 = vpop.f32.mrb[9].mxu1  ;;  %v13655_v25 = vld [vmem:[#allocation2 + $0x148] sm:$0xf] }
 0x470   : > { %v10269_v34 = vshrl.u32 %v18736_v46, 16  ;;  %v10272_v52 = vshll.u32 %v18736_v46, 16  ;;  %v18737_v50 = vpack.c.bf16 %v10215_v43, %v10215_v43  ;;  %v13526_v8 = vadd.f32 %v27112_v41, %v13480_v60  ;;  %v20501_v63 = vpop.f32.mrb[10].mxu1  ;;  %v10339_v60 = vld [vmem:[#allocation2 + $0x100] sm:$0xf] }
 0x471   : > { %v10253_v51 = vshrl.u32 %v18734_v56, 16  ;;  %v10256_v22 = vshll.u32 %v18734_v56, 16  ;;  %v27120_v6 = vpack.c.bf16 %v10213_v30, %v10213_v30  ;;  %v27122_v42 = vpop.f32.mrb[12].mxu0  ;;  %v13536_v11 = vmax.f32 %v13528_v4, 0.0  ;;  %v13483_v38 = vpop.f32.mrb[11].mxu1 }
 0x472   : > { %v10271_v44 = vrot.slane %v10269_v34, 7  ;;  %v10277_v35 = vshrl.u32 %v18737_v50, 16  ;;  %v10280_v15 = vshll.u32 %v18737_v50, 16  ;;  %v27124_v39 = vpop.f32.mrb[13].mxu0  ;;  %v13534_v24 = vmax.f32 %v13526_v8, 0.0 }
 0x473   : > { %v10255_v12 = vrot.slane %v10253_v51, 7  ;;  %v13529_v9 = vadd.f32 %v20501_v63, %v27112_v41  ;;  %v10261_v20 = vshrl.u32 %v27120_v6, 16  ;;  %v27128_v29 = vpop.f32.mrb[14].mxu0  ;;  %v18744_v48 = vpack.c.bf16 %v13536_v11, %v13536_v11  ;;  %v13658_v34 = vld [vmem:[#allocation2 + $0x14c] sm:$0x1] }
 0x474   : > { %v10274_v0 = vor.u32 %v10272_v52, %v10271_v44  ;;  %v10275_v28 = vrot.slane %v10271_v44, 4  ;;  %v10279_v37 = vrot.slane %v10277_v35, 7  ;;  %v27130_v21 = vpop.f32.mrb[15].mxu0  ;;  %v18742_v47 = vpack.c.bf16 %v13534_v24, %v13534_v24  ;;  %v10342_v8 = vld [vmem:[#allocation2 + $0x104] sm:$0x1] }
 0x475   : > { %v10258_v36 = vor.u32 %v10256_v22, %v10255_v12  ;;  %v10259_v31 = vrot.slane %v10255_v12, 4  ;;  %v13537_v5 = vmax.f32 %v13529_v9, 0.0  ;;  %v13591_v26 = vshrl.u32 %v18744_v48, 16  ;;  %v13676_v24 = vld [vmem:[#allocation2 + $0x164] sm:$0x1] }
 0x476   : > { %v10346_v59 = vsel %vm26114_vm12, %v10274_v0, %v10345_v45  ;;  %v10349_v16 = vsel %vm26122_vm13, %v10275_v28, %v10348_v53  ;;  %v13594_v1 = vshll.u32 %v18744_v48, 16  ;;  %v13575_v27 = vshrl.u32 %v18742_v47, 16  ;;  %v20504_v7 = vpop.f32.mrb[12].mxu1 }
 0x477   : > { %10347 = vst [vmem:[#allocation2 + $0x108] sm:$0xf] %v10346_v59  ;;  %10350 = vst [vmem:[#allocation2 + $0x10c] sm:$0x1] %v10349_v16  ;;  %v10334_v33 = vsel %vm26114_vm12, %v10258_v36, %v10333_v54  ;;  %v10337_v14 = vsel %vm26122_vm13, %v10259_v31, %v10336_v57  ;;  %v13578_v23 = vshll.u32 %v18742_v47, 16  ;;  %v13593_v17 = vrot.slane %v13591_v26, 7 }
 0x478   : > { %10335 = vst [vmem:[#allocation2 + $0xf8] sm:$0xf] %v10334_v33  ;;  %10338 = vst [vmem:[#allocation2 + $0xfc] sm:$0x1] %v10337_v14  ;;  %v10282_v18 = vor.u32 %v10280_v15, %v10279_v37  ;;  %v10283_v19 = vrot.slane %v10279_v37, 4  ;;  %v18745_v55 = vpack.c.bf16 %v13537_v5, %v13537_v5  ;;  %v13496_v13 = vpop.f32.mrb[13].mxu1  ;;  %v13527_v43 = vadd.f32 %v27112_v41, %v13483_v38 }
 0x479   : > { %v13577_v3 = vrot.slane %v13575_v27, 7  ;;  %v10263_v62 = vrot.slane %v10261_v20, 7  ;;  %v10264_v46 = vshll.u32 %v27120_v6, 16  ;;  %v20505_v2 = vpop.f32.mrb[14].mxu1  ;;  %v13596_v56 = vor.u32 %v13594_v1, %v13593_v17  ;;  %v13673_v54 = vld [vmem:[#allocation2 + $0x160] sm:$0xf] }
 0x47a   : > { %v13597_v30 = vrot.slane %v13593_v17, 4  ;;  %v10352_v52 = vsel %vm26114_vm12, %v10282_v18, %v10351_v32  ;;  %v10355_v4 = vsel %vm26122_vm13, %v10283_v19, %v10354_v40  ;;  %v27146_v50 = vpop.f32.mrb[15].mxu1  ;;  %v13599_v51 = vshrl.u32 %v18745_v55, 16  ;;  %v13661_v27 = vld [vmem:[#allocation2 + $0x150] sm:$0xf] }
 0x47b   : > { %v13580_v45 = vor.u32 %v13578_v23, %v13577_v3  ;;  %v13581_v53 = vrot.slane %v13577_v3, 4  ;;  %10353 = vst [vmem:[#allocation2 + $0x110] sm:$0xf] %v10352_v52  ;;  %10356 = vst [vmem:[#allocation2 + $0x114] sm:$0x1] %v10355_v4  ;;  %v13602_v22 = vshll.u32 %v18745_v55, 16  ;;  %v13668_v63 = vsel %vm26114_vm12, %v13596_v56, %v13667_v61 }
 0x47c   : > { %v13671_v6 = vsel %vm26122_vm13, %v13597_v30, %v13670_v58  ;;  %v10266_v44 = vor.u32 %v10264_v46, %v10263_v62  ;;  %v10267_v11 = vrot.slane %v10263_v62, 4  ;;  %13669 = vst [vmem:[#allocation2 + $0x158] sm:$0xf] %v13668_v63  ;;  %v13601_v38 = vrot.slane %v13599_v51, 7  ;;  %v10369_v3 = vld [vmem:[#allocation2 + $0x128] sm:$0xf] }
 0x47d   : > { %13672 = vst [vmem:[#allocation2 + $0x15c] sm:$0x1] %v13671_v6  ;;  %v13656_v35 = vsel %vm26114_vm12, %v13580_v45, %v13655_v25  ;;  %v13659_v15 = vsel %vm26122_vm13, %v13581_v53, %v13658_v34  ;;  %v13535_v12 = vmax.f32 %v13527_v43, 0.0  ;;  %v10210_v0 = vadd.f32 %v27122_v42, %v27112_v41  ;;  %v10372_v43 = vld [vmem:[#allocation2 + $0x12c] sm:$0x1] }
 0x47e   : > { %13657 = vst [vmem:[#allocation2 + $0x148] sm:$0xf] %v13656_v35  ;;  %13660 = vst [vmem:[#allocation2 + $0x14c] sm:$0x1] %v13659_v15  ;;  %v10340_v9 = vsel %vm26114_vm12, %v10266_v44, %v10339_v60  ;;  %v10343_v20 = vsel %vm26122_vm13, %v10267_v11, %v10342_v8  ;;  %v13532_v28 = vadd.f32 %v20504_v7, %v27112_v41  ;;  %v13605_v57 = vrot.slane %v13601_v38, 4 }
 0x47f   : > { %v13604_v48 = vor.u32 %v13602_v22, %v13601_v38  ;;  %10341 = vst [vmem:[#allocation2 + $0x100] sm:$0xf] %v10340_v9  ;;  %10344 = vst [vmem:[#allocation2 + $0x104] sm:$0x1] %v10343_v20  ;;  %v18743_v37 = vpack.c.bf16 %v13535_v12, %v13535_v12  ;;  %v10208_v36 = vadd.f32 %v27112_v41, %v27124_v39  ;;  %v10218_v31 = vmax.f32 %v10210_v0, 0.0 }
 0x480   : > { %v13540_v47 = vmax.f32 %v13532_v28, 0.0  ;;  %v13530_v5 = vadd.f32 %v27112_v41, %v13496_v13  ;;  %v10211_v59 = vadd.f32 %v27128_v29, %v27112_v41  ;;  %v13677_v16 = vsel %vm26122_vm13, %v13605_v57, %v13676_v24  ;;  %v13664_v7 = vld [vmem:[#allocation2 + $0x154] sm:$0x1]  ;;  %v13691_v52 = vld [vmem:[#allocation2 + $0x178] sm:$0xf] }
 0x481   : > { %v13674_v42 = vsel %vm26114_vm12, %v13604_v48, %v13673_v54  ;;  %v13583_v26 = vshrl.u32 %v18743_v37, 16  ;;  %v13586_v1 = vshll.u32 %v18743_v37, 16  ;;  %13678 = vst [vmem:[#allocation2 + $0x164] sm:$0x1] %v13677_v16  ;;  %v18740_v32 = vpack.c.bf16 %v10218_v31, %v10218_v31  ;;  %v13694_v4 = vld [vmem:[#allocation2 + $0x17c] sm:$0x1] }
 0x482   : > { %13675 = vst [vmem:[#allocation2 + $0x160] sm:$0xf] %v13674_v42  ;;  %v18748_v61 = vpack.c.bf16 %v13540_v47, %v13540_v47  ;;  %v10216_v39 = vmax.f32 %v10208_v36, 0.0  ;;  %v13538_v33 = vmax.f32 %v13530_v5, 0.0  ;;  %v10219_v23 = vmax.f32 %v10211_v59, 0.0 }
 0x483   : > { %v13585_v14 = vrot.slane %v13583_v26, 7  ;;  %v13533_v40 = vadd.f32 %v20505_v2, %v27112_v41  ;;  %v27175_v29 = vadd.f32 %v27112_v41, %v27130_v21  ;;  %v10301_v17 = vshrl.u32 %v18740_v32, 16  ;;  %v10357_v54 = vld [vmem:[#allocation2 + $0x118] sm:$0xf]  ;;  %v10360_v24 = vld [vmem:[#allocation2 + $0x11c] sm:$0x1] }
 0x484   : > { %v10304_v58 = vshll.u32 %v18740_v32, 16  ;;  %v13623_v18 = vshrl.u32 %v18748_v61, 16  ;;  %v13626_v19 = vshll.u32 %v18748_v61, 16  ;;  %v18738_v25 = vpack.c.bf16 %v10216_v39, %v10216_v39  ;;  %v13679_v48 = vld [vmem:[#allocation2 + $0x168] sm:$0xf] }
 0x485   : > { %v13588_v55 = vor.u32 %v13586_v1, %v13585_v14  ;;  %v13589_v13 = vrot.slane %v13585_v14, 4  ;;  %v18746_v62 = vpack.c.bf16 %v13538_v33, %v13538_v33  ;;  %v10303_v46 = vrot.slane %v10301_v17, 7  ;;  %v13682_v57 = vld [vmem:[#allocation2 + $0x16c] sm:$0x1]  ;;  %v10375_v26 = vld [vmem:[#allocation2 + $0x130] sm:$0xf] }
 0x486   : > { %v13625_v56 = vrot.slane %v13623_v18, 7  ;;  %v18741_v30 = vpack.c.bf16 %v10219_v23, %v10219_v23  ;;  %v13541_v34 = vmax.f32 %v13533_v40, 0.0  ;;  %v10285_v60 = vshrl.u32 %v18738_v25, 16  ;;  %v10378_v1 = vld [vmem:[#allocation2 + $0x134] sm:$0x1] }
 0x487   : > { %v13662_v2 = vsel %vm26114_vm12, %v13588_v55, %v13661_v27  ;;  %v13665_v21 = vsel %vm26122_vm13, %v13589_v13, %v13664_v7  ;;  %v10288_v45 = vshll.u32 %v18738_v25, 16  ;;  %v10306_v53 = vor.u32 %v10304_v58, %v10303_v46  ;;  %v13697_v7 = vld [vmem:[#allocation2 + $0x180] sm:$0xf]  ;;  %v13700_v17 = vld [vmem:[#allocation2 + $0x184] sm:$0x1] }
 0x488   : > { %13663 = vst [vmem:[#allocation2 + $0x150] sm:$0xf] %v13662_v2  ;;  %13666 = vst [vmem:[#allocation2 + $0x154] sm:$0x1] %v13665_v21  ;;  %v10307_v51 = vrot.slane %v10303_v46, 4  ;;  %v13628_v22 = vor.u32 %v13626_v19, %v13625_v56  ;;  %v13629_v8 = vrot.slane %v13625_v56, 4  ;;  %v18749_v36 = vpack.c.bf16 %v13541_v34, %v13541_v34 }
 0x489   : > { %v10287_v63 = vrot.slane %v10285_v60, 7  ;;  %v13607_v6 = vshrl.u32 %v18746_v62, 16  ;;  %v13610_v44 = vshll.u32 %v18746_v62, 16  ;;  %v10309_v11 = vshrl.u32 %v18741_v30, 16  ;;  %v10366_v56 = vld [vmem:[#allocation2 + $0x124] sm:$0x1] }
 0x48a   : > { %v10370_v35 = vsel %vm26114_vm12, %v10306_v53, %v10369_v3  ;;  %v10373_v15 = vsel %vm26122_vm13, %v10307_v51, %v10372_v43  ;;  %v13692_v38 = vsel %vm26114_vm12, %v13628_v22, %v13691_v52  ;;  %v13695_v12 = vsel %vm26122_vm13, %v13629_v8, %v13694_v4  ;;  %v10363_v43 = vld [vmem:[#allocation2 + $0x120] sm:$0xf]  ;;  %v13685_v52 = vld [vmem:[#allocation2 + $0x170] sm:$0xf]  ;;  %v13688_v4 = vld [vmem:[#allocation2 + $0x174] sm:$0x1] }
 0x48b   : > { %10371 = vst [vmem:[#allocation2 + $0x128] sm:$0xf] %v10370_v35  ;;  %10374 = vst [vmem:[#allocation2 + $0x12c] sm:$0x1] %v10373_v15  ;;  %v10290_v9 = vor.u32 %v10288_v45, %v10287_v63  ;;  %v10291_v20 = vrot.slane %v10287_v63, 4  ;;  %v13609_v0 = vrot.slane %v13607_v6, 7  ;;  %v13531_v47 = vadd.f32 %v27112_v41, %v27146_v50 }
 0x48c   : > { %13693 = vst [vmem:[#allocation2 + $0x178] sm:$0xf] %v13692_v38  ;;  %13696 = vst [vmem:[#allocation2 + $0x17c] sm:$0x1] %v13695_v12  ;;  %v10311_v28 = vrot.slane %v10309_v11, 7  ;;  %v10312_v37 = vshll.u32 %v18741_v30, 16 }
 0x48d   : > { %v10217_v31 = vmax.f32 %v27175_v29, 0.0  ;;  %v10358_v5 = vsel %vm26114_vm12, %v10290_v9, %v10357_v54  ;;  %v10361_v59 = vsel %vm26122_vm13, %v10291_v20, %v10360_v24  ;;  %v13612_v42 = vor.u32 %v13610_v44, %v13609_v0 }
 0x48e   : > { %v13613_v16 = vrot.slane %v13609_v0, 4  ;;  %10359 = vst [vmem:[#allocation2 + $0x118] sm:$0xf] %v10358_v5  ;;  %10362 = vst [vmem:[#allocation2 + $0x11c] sm:$0x1] %v10361_v59  ;;  %v10314_v32 = vor.u32 %v10312_v37, %v10311_v28  ;;  %v10315_v61 = vrot.slane %v10311_v28, 4 }
 0x48f   : > { %v13631_v39 = vshrl.u32 %v18749_v36, 16  ;;  %v13680_v33 = vsel %vm26114_vm12, %v13612_v42, %v13679_v48  ;;  %v18739_v50 = vpack.c.bf16 %v10217_v31, %v10217_v31  ;;  %v13539_v14 = vmax.f32 %v13531_v47, 0.0 }
 0x490   : > { %v13683_v41 = vsel %vm26122_vm13, %v13613_v16, %v13682_v57  ;;  %13681 = vst [vmem:[#allocation2 + $0x168] sm:$0xf] %v13680_v33  ;;  %v10376_v27 = vsel %vm26114_vm12, %v10314_v32, %v10375_v26  ;;  %v10379_v23 = vsel %vm26122_vm13, %v10315_v61, %v10378_v1  ;;  %v13634_v29 = vshll.u32 %v18749_v36, 16 }
 0x491   : > { %13684 = vst [vmem:[#allocation2 + $0x16c] sm:$0x1] %v13683_v41  ;;  %v13633_v40 = vrot.slane %v13631_v39, 7  ;;  %10377 = vst [vmem:[#allocation2 + $0x130] sm:$0xf] %v10376_v27  ;;  %v10293_v58 = vshrl.u32 %v18739_v50, 16  ;;  %v18747_v18 = vpack.c.bf16 %v13539_v14, %v13539_v14 }
 0x492   : > { %10380 = vst [vmem:[#allocation2 + $0x134] sm:$0x1] %v10379_v23  ;;  %v10296_v3 = vshll.u32 %v18739_v50, 16 }
 0x493   : > { %v13636_v19 = vor.u32 %v13634_v29, %v13633_v40  ;;  %v13637_v55 = vrot.slane %v13633_v40, 4  ;;  %v10295_v13 = vrot.slane %v10293_v58, 7  ;;  %v13615_v25 = vshrl.u32 %v18747_v18, 16 }
 0x494   : > { %v13618_v21 = vshll.u32 %v18747_v18, 16 }
 0x495   : > { %v13698_v62 = vsel %vm26114_vm12, %v13636_v19, %v13697_v7  ;;  %v13701_v46 = vsel %vm26122_vm13, %v13637_v55, %v13700_v17  ;;  %v10298_v30 = vor.u32 %v10296_v3, %v10295_v13  ;;  %v10299_v34 = vrot.slane %v10295_v13, 4 }
 0x496   : > { %13699 = vst [vmem:[#allocation2 + $0x180] sm:$0xf] %v13698_v62  ;;  %13702 = vst [vmem:[#allocation2 + $0x184] sm:$0x1] %v13701_v46  ;;  %v13617_v2 = vrot.slane %v13615_v25, 7 }
 0x497   : > { %v10364_v60 = vsel %vm26114_vm12, %v10298_v30, %v10363_v43  ;;  %v10367_v45 = vsel %vm26122_vm13, %v10299_v34, %v10366_v56 }
 0x498   : > { %v13620_v53 = vor.u32 %v13618_v21, %v13617_v2  ;;  %v13621_v51 = vrot.slane %v13617_v2, 4  ;;  %10365 = vst [vmem:[#allocation2 + $0x120] sm:$0xf] %v10364_v60  ;;  %10368 = vst [vmem:[#allocation2 + $0x124] sm:$0x1] %v10367_v45 }
 0x49a   : > { %v13686_v22 = vsel %vm26114_vm12, %v13620_v53, %v13685_v52  ;;  %v13689_v8 = vsel %vm26122_vm13, %v13621_v51, %v13688_v4 }
 0x49b   : > { %13687 = vst [vmem:[#allocation2 + $0x170] sm:$0xf] %v13686_v22  ;;  %13690 = vst [vmem:[#allocation2 + $0x174] sm:$0x1] %v13689_v8 }
 0x49c PF: > { %v18414_v63 = vld [vmem:[%s28389_s3 + $0x2] sm:$0x3]  ;;  %vm13869_vm14 = vcmask 1041408   ;;  %v18559_v6 = vld [vmem:[%s28389_s3 + $0x1a] sm:$0x3]  ;;  %s18750_s15 = smul.u32 80, %s22158_s18 }
 0x49d   : > { %21926 = vmatprep.subr.msk.bf16.mxu1 %vm13869_vm14, %v18414_v63  ;;  %21939 = vmatprep.subr.msk.bf16.mxu0 %vm13869_vm14, %v18559_v6  ;;  %v13871_v10 = vsel %vm13869_vm14, %v18414_v63, 0  ;;  %v27227_v49 = vsel %vm13869_vm14, %v18559_v6, 0  ;;  %v27233_v44 = vld [vmem:[%s28389_s3] sm:$0x3]  ;;  %vm13727_vm15 = vsmask.f32 3328 }
 0x49e   : > { %28831 = vst [vmem:[#allocation33_spill] sm:$0xff] %v27227_v49  ;;  %20507 = vmatpush3.bf16.msra.mxu1 %v13871_v10  ;;  %20637 = vmatpush3.bf16.msra.mxu0 %v27227_v49  ;;  %s27237_s19 = scalar_lea.vmem [#allocation2], %s18750_s15  ;;  %vm13728_vm0 = vsmask.f32 7440  ;;  %vm13856_vm2 = vcmask 31744   ;;  %vm14046_vm3 = vcmask 1042432  }
 0x49f   : > { %21927 = vmatprep.subr.msk.bf16.mxu1 %vm13869_vm14, %v27233_v44  ;;  %vm27280_vm1 = vmor %vm13727_vm15, %vm13728_vm0  ;;  %v27302_v30 = vld [vmem:[%s28389_s3 + $0x1c] sm:$0x3]  ;;  %vm14047_vm4 = vcmask 1046532   ;;  %v18584_v54 = vld [vmem:[%s28389_s3 + $0x20] sm:$0x3] }
 0x4a0   : > { %21941 = vmatprep.subr.msk.bf16.mxu0 %vm13869_vm14, %v27302_v30  ;;  %vm27432_vm5 = vmor %vm14046_vm3, %vm14047_vm4 }
 0x4a2   : > { %v27240_v11 = vld [vmem:[%s27237_s19] sm:$0xf]  ;;  %v27243_v35 = vld [vmem:[%s27237_s19 + $0x4] sm:$0x1]  ;;  %v27246_v15 = vld [vmem:[%s27237_s19 + $0x8] sm:$0xf] }
 0x4a3   : > { %v27251_v38 = vld [vmem:[%s27237_s19 + $0xc] sm:$0x1]  ;;  %v27254_v12 = vld [vmem:[%s27237_s19 + $0x10] sm:$0xf]  ;;  %v27259_v24 = vld [vmem:[%s27237_s19 + $0x14] sm:$0x1] }
 0x4a4   : > { %v13731_v9 = vshrl.u32 %v27240_v11, 16  ;;  %v13734_v20 = vshll.u32 %v27240_v11, 16  ;;  %v13740_v0 = vshll.u32 %v27243_v35, 16  ;;  %v13745_v28 = vshrl.u32 %v27246_v15, 16  ;;  %v27266_v48 = vld [vmem:[%s27237_s19 + $0x18] sm:$0xf] }
 0x4a5   : > { %v13748_v57 = vshll.u32 %v27246_v15, 16  ;;  %v13754_v37 = vshll.u32 %v27251_v38, 16  ;;  %v13759_v36 = vshrl.u32 %v27254_v12, 16  ;;  %v13762_v31 = vshll.u32 %v27254_v12, 16  ;;  %v27273_v47 = vld [vmem:[%s27237_s19 + $0x1c] sm:$0x1] }
 0x4a6   : > { %v13733_v5 = vrot.slane %v13731_v9, 4  ;;  %v13736_v59 = vrot.slane %v13734_v20, 5  ;;  %v13747_v42 = vrot.slane %v13745_v28, 4  ;;  %v13742_v16 = vrot.slane %v13740_v0, 5  ;;  %v27288_v25 = vld [vmem:[%s27237_s19 + $0x20] sm:$0xf] }
 0x4a7   : > { %v13750_v26 = vrot.slane %v13748_v57, 5  ;;  %v13761_v1 = vrot.slane %v13759_v36, 4  ;;  %v13764_v32 = vrot.slane %v13762_v31, 5  ;;  %v13768_v39 = vshll.u32 %v27259_v24, 16  ;;  %v27316_v4 = vld [vmem:[%s27237_s19 + $0x58] sm:$0xf] }
 0x4a8   : > { %v13737_v61 = vor.u32 %v13736_v59, %v13733_v5  ;;  %v13773_v33 = vshrl.u32 %v27266_v48, 16  ;;  %v13776_v41 = vshll.u32 %v27266_v48, 16  ;;  %v13756_v27 = vrot.slane %v13754_v37, 5  ;;  %v27323_v45 = vld [vmem:[%s27237_s19 + $0x60] sm:$0xf] }
 0x4a9   : > { %v13751_v14 = vor.u32 %v13750_v26, %v13747_v42  ;;  %v13765_v23 = vor.u32 %v13764_v32, %v13761_v1  ;;  %v13782_v40 = vshll.u32 %v27273_v47, 16  ;;  %v13770_v7 = vrot.slane %v13768_v39, 5  ;;  %v27326_v53 = vld [vmem:[%s27237_s19 + $0x24] sm:$0x1]  ;;  %v27329_v51 = vld [vmem:[%s27237_s19 + $0x5c] sm:$0x1] }
 0x4aa   : > { %v13738_v29 = vrot.slane %v13737_v61, 4  ;;  %v13775_v17 = vrot.slane %v13773_v33, 4  ;;  %v13778_v58 = vrot.slane %v13776_v41, 5  ;;  %v13787_v2 = vshrl.u32 %v27288_v25, 16  ;;  %v27332_v22 = vld [vmem:[%s27237_s19 + $0x64] sm:$0x1] }
 0x4ab   : > { %v13752_v18 = vrot.slane %v13751_v14, 4  ;;  %v13766_v19 = vrot.slane %v13765_v23, 4  ;;  %v13784_v3 = vrot.slane %v13782_v40, 5  ;;  %v13790_v21 = vshll.u32 %v27288_v25, 16  ;;  %v27335_v8 = vld [vmem:[%s27237_s19 + $0x68] sm:$0xf] }
 0x4ac   : > { %v13743_v55 = vsel %vm27280_vm1, %v13738_v29, %v13742_v16  ;;  %v13779_v13 = vor.u32 %v13778_v58, %v13775_v17  ;;  %v14906_v63 = vshrl.u32 %v27316_v4, 16  ;;  %v14909_v6 = vshll.u32 %v27316_v4, 16  ;;  %v27342_v20 = vld [vmem:[%s27237_s19 + $0x6c] sm:$0x1]  ;;  %v27347_v57 = vld [vmem:[%s27237_s19 + $0x70] sm:$0xf] }
 0x4ad   : > { %v27292_v62 = vsel %vm27280_vm1, %v13752_v18, %v13756_v27  ;;  %v27296_v46 = vsel %vm27280_vm1, %v13766_v19, %v13770_v7  ;;  %v13789_v10 = vrot.slane %v13787_v2, 4  ;;  %v13792_v9 = vrot.slane %v13790_v21, 5  ;;  %v27355_v39 = vld [vmem:[%s27237_s19 + $0x74] sm:$0x1] }
 0x4ae   : > { %v13780_v43 = vrot.slane %v13779_v13, 4  ;;  %v18415_v56 = vcombine.low %v13743_v55, %v27292_v62  ;;  %v14920_v0 = vshrl.u32 %v27323_v45, 16  ;;  %v14923_v28 = vshll.u32 %v27323_v45, 16 }
 0x4af   : > { %v14908_v37 = vrot.slane %v14906_v63, 4  ;;  %v14911_v36 = vrot.slane %v14909_v6, 5  ;;  %v14915_v31 = vshll.u32 %v27329_v51, 16  ;;  %v14929_v42 = vshll.u32 %v27332_v22, 16 }
 0x4b0   : > { %v27308_v34 = vsel %vm27280_vm1, %v13780_v43, %v13784_v3  ;;  %20508 = vmatprep.mubr.msk.bf16.mxu1 %vm13856_vm2, %v18415_v56  ;;  %v14922_v5 = vrot.slane %v14920_v0, 4  ;;  %v14925_v59 = vrot.slane %v14923_v28, 5  ;;  %v13796_v16 = vshll.u32 %v27326_v53, 16  ;;  %v27373_v0 = vld [vmem:[%s27237_s19 + $0x2c] sm:$0x1] }
 0x4b1   : > { %v27320_v60 = vcombine.low %v27296_v46, %v27308_v34  ;;  %v14912_v26 = vor.u32 %v14911_v36, %v14908_v37  ;;  %v14934_v1 = vshrl.u32 %v27335_v8, 16  ;;  %v14937_v32 = vshll.u32 %v27335_v8, 16 }
 0x4b2   : > { %v13793_v61 = vor.u32 %v13792_v9, %v13789_v10  ;;  %v14926_v33 = vor.u32 %v14925_v59, %v14922_v5  ;;  %v14943_v41 = vshll.u32 %v27342_v20, 16  ;;  %v14948_v14 = vshrl.u32 %v27347_v57, 16  ;;  %v27370_v9 = vld [vmem:[%s27237_s19 + $0x28] sm:$0xf]  ;;  %v27385_v5 = vld [vmem:[%s27237_s19 + $0x30] sm:$0xf] }
 0x4b3   : > { %28834 = vst [vmem:[#allocation34_spill] sm:$0xff] %v27320_v60  ;;  %20509 = vmatmul.mubr.msk.bf16.vlgmr.msra.gmra.mrb[0].mxu1 %vm13856_vm2, %v27320_v60  ;;  %v14917_v27 = vrot.slane %v14915_v31, 5  ;;  %v14931_v23 = vrot.slane %v14929_v42, 5  ;;  %v14936_v40 = vrot.slane %v14934_v1, 4  ;;  %v14939_v29 = vrot.slane %v14937_v32, 5 }
 0x4b4   : > { %v14913_v7 = vrot.slane %v14912_v26, 4  ;;  %v14927_v17 = vrot.slane %v14926_v33, 4  ;;  %v14950_v58 = vrot.slane %v14948_v14, 4  ;;  %v14951_v18 = vshll.u32 %v27347_v57, 16  ;;  %v27390_v59 = vld [vmem:[%s28389_s3 + $0x4] sm:$0x3] }
 0x4b5   : > { %v14940_v19 = vor.u32 %v14939_v29, %v14936_v40  ;;  %v14957_v55 = vshll.u32 %v27355_v39, 16  ;;  %v13794_v13 = vrot.slane %v13793_v61, 4  ;;  %v13798_v3 = vrot.slane %v13796_v16, 5  ;;  %v27399_v32 = vld [vmem:[%s27237_s19 + $0x34] sm:$0x1] }
 0x4b6   : > { %v14945_v43 = vrot.slane %v14943_v41, 5  ;;  %v14953_v56 = vrot.slane %v14951_v18, 5  ;;  %v27363_v21 = vsel %vm27280_vm1, %v14913_v7, %v14917_v27  ;;  %v27367_v63 = vsel %vm27280_vm1, %v14927_v17, %v14931_v23  ;;  %v27410_v41 = vld [vmem:[%s27237_s19 + $0x38] sm:$0xf]  ;;  %v27416_v27 = vld [vmem:[%s27237_s19 + $0x3c] sm:$0x1] }
 0x4b7   : > { %v14941_v2 = vrot.slane %v14940_v19, 4  ;;  %28835 = vst [vmem:[#allocation35_spill] sm:$0xff] %v27363_v21  ;;  %v14959_v10 = vrot.slane %v14957_v55, 5  ;;  %v27377_v28 = vsel %vm27280_vm1, %v13794_v13, %v13798_v3  ;;  %v15119_v31 = vrot.slane %v27329_v51, 5 }
 0x4b8   : > { %v14954_v6 = vor.u32 %v14953_v56, %v14950_v58  ;;  %v15123_v42 = vrot.slane %v27332_v22, 5  ;;  %v18560_v16 = vcombine.low %v27363_v21, %v27367_v63  ;;  %v13971_v26 = vsel %vm13869_vm14, %v27233_v44, 0  ;;  %v18578_v58 = vld [vmem:[%s28389_s3 + $0x1e] sm:$0x3] }
 0x4b9   : > { %v27381_v37 = vsel %vm27280_vm1, %v14941_v2, %v14945_v43  ;;  %v13801_v1 = vshrl.u32 %v27370_v9, 16  ;;  %20517 = vmatpush3.bf16.msra.mxu1 %v13971_v26  ;;  %v15477_v61 = vsel %vm13869_vm14, %v27302_v30, 0  ;;  %v13804_v22 = vshll.u32 %v27370_v9, 16 }
 0x4ba   : > { %v14955_v36 = vrot.slane %v14954_v6, 4  ;;  %v13810_v33 = vshll.u32 %v27373_v0, 16  ;;  %20638 = vmatprep.mubr.msk.bf16.mxu0 %vm13856_vm2, %v18560_v16  ;;  %v13815_v23 = vshrl.u32 %v27385_v5, 16  ;;  %v13818_v40 = vshll.u32 %v27385_v5, 16  ;;  %21928 = vmatprep.subr.msk.bf16.mxu1 %vm13869_vm14, %v27390_v59 }
 0x4bb   : > { %v13803_v14 = vrot.slane %v13801_v1, 4  ;;  %v15127_v30 = vrot.slane %v27342_v20, 5  ;;  %v15131_v29 = vrot.slane %v27355_v39, 5  ;;  %v13806_v7 = vrot.slane %v13804_v22, 5  ;;  %v27443_v22 = vld [vmem:[%s27237_s19 + $0x78] sm:$0xf] }
 0x4bc   : > { %v27403_v51 = vsel %vm27280_vm1, %v14955_v36, %v14959_v10  ;;  %v13824_v17 = vshll.u32 %v27399_v32, 16  ;;  %v13812_v18 = vrot.slane %v13810_v33, 5  ;;  %v13817_v19 = vrot.slane %v13815_v23, 4  ;;  %v27455_v23 = vld [vmem:[%s27237_s19 + $0x7c] sm:$0x1] }
 0x4bd   : > { %v18561_v44 = vcombine.low %v27381_v37, %v27403_v51  ;;  %v13820_v55 = vrot.slane %v13818_v40, 5  ;;  %v13829_v13 = vshrl.u32 %v27410_v41, 16  ;;  %v13807_v39 = vor.u32 %v13806_v7, %v13803_v14 }
 0x4be   : > { %v13826_v3 = vrot.slane %v13824_v17, 5  ;;  %v13832_v43 = vshll.u32 %v27410_v41, 16  ;;  %v13838_v56 = vshll.u32 %v27416_v27, 16  ;;  %v18534_v10 = vrot.slane %v27316_v4, 9 }
 0x4bf   : > { %20639 = vmatmul.mubr.msk.bf16.vlgmr.msra.gmra.mrb[0].mxu0 %vm13856_vm2, %v18561_v44  ;;  %v13821_v2 = vor.u32 %v13820_v55, %v13817_v19  ;;  %v13831_v6 = vrot.slane %v13829_v13, 4  ;;  %v18535_v36 = vrot.slane %v27323_v45, 9  ;;  %v13808_v16 = vrot.slane %v13807_v39, 4  ;;  %v27468_v19 = vld [vmem:[%s27237_s19 + $0x80] sm:$0xf] }
 0x4c0   : > { %20647 = vmatpush3.bf16.msra.mxu0 %v15477_v61  ;;  %v13834_v26 = vrot.slane %v13832_v43, 5  ;;  %v13840_v1 = vrot.slane %v13838_v56, 5  ;;  %v18536_v61 = vrot.slane %v27335_v8, 9  ;;  %v27447_v4 = vsel %vm27432_vm5, %v18534_v10, %v15119_v31  ;;  %v27484_v39 = vld [vmem:[%s27237_s19 + $0x88] sm:$0xf] }
 0x4c1   : > { %21942 = vmatprep.subr.msk.bf16.mxu0 %vm13869_vm14, %v18578_v58  ;;  %v13822_v33 = vrot.slane %v13821_v2, 4  ;;  %28838 = vst [vmem:[#allocation36_spill] sm:$0xff] %v27447_v4  ;;  %v27451_v44 = vsel %vm27432_vm5, %v18535_v36, %v15123_v42  ;;  %v18537_v14 = vrot.slane %v27347_v57, 9  ;;  %v27459_v40 = vsel %vm27280_vm1, %v13808_v16, %v13812_v18  ;;  %v27471_v42 = vld [vmem:[%s27237_s19 + $0x84] sm:$0x1] }
 0x4c2   : > { %28839 = vst [vmem:[#allocation37_spill] sm:$0xff] %v27459_v40  ;;  %v13835_v7 = vor.u32 %v13834_v26, %v13831_v6  ;;  %v18570_v17 = vcombine.low %v27447_v4, %v27451_v44  ;;  %v27465_v31 = vsel %vm27432_vm5, %v18536_v61, %v15127_v30  ;;  %v27475_v55 = vcombine.low %v27377_v28, %v27459_v40  ;;  %v27487_v43 = vld [vmem:[%s27237_s19 + $0x8c] sm:$0x1]  ;;  %v27490_v30 = vld [vmem:[%s27237_s19 + $0x90] sm:$0xf] }
 0x4c3   : > { %v27479_v18 = vsel %vm27432_vm5, %v18537_v14, %v15131_v29  ;;  %v18423_v13 = vcombine.low %v27240_v11, %v27246_v15  ;;  %v27494_v56 = vsel %vm27280_vm1, %v13822_v33, %v13826_v3  ;;  %v15561_v6 = vsel %vm13869_vm14, %v18578_v58, 0  ;;  %v27501_v10 = vld [vmem:[%s27237_s19 + $0x94] sm:$0x1] }
 0x4c4   : > { %28840 = vst [vmem:[#allocation38_spill] sm:$0xff] %v27475_v55  ;;  %v13836_v2 = vrot.slane %v13835_v7, 4  ;;  %20648 = vmatprep.mubr.msk.bf16.mxu0 %vm13856_vm2, %v18570_v17  ;;  %v18571_v29 = vcombine.low %v27465_v31, %v27479_v18  ;;  %20512 = vmatprep.mubr.msk.bf16.mxu1 %vm13856_vm2, %v27475_v55  ;;  %v18538_v36 = vrot.slane %v27443_v22, 9  ;;  %v15135_v16 = vrot.slane %v27455_v23, 5 }
 0x4c5   : > { %v18539_v3 = vrot.slane %v27468_v19, 9  ;;  %v15139_v26 = vrot.slane %v27471_v42, 5  ;;  %v18540_v33 = vrot.slane %v27484_v39, 9  ;;  %v15143_v58 = vrot.slane %v27487_v43, 5 }
 0x4c6   : > { %v27511_v61 = vsel %vm27280_vm1, %v13836_v2, %v13840_v1  ;;  %v18568_v14 = vrot.slane %v27490_v30, 9  ;;  %v27522_v17 = vsel %vm27432_vm5, %v18538_v36, %v15135_v16  ;;  %v15455_v1 = vrot.slane %v27501_v10, 5 }
 0x4c7   : > { %28841 = vst [vmem:[#allocation39_spill] sm:$0xff] %v27511_v61  ;;  %v27518_v7 = vcombine.low %v27494_v56, %v27511_v61  ;;  %v27526_v52 = vsel %vm27432_vm5, %v18539_v3, %v15139_v26  ;;  %v27540_v36 = vsel %vm27432_vm5, %v18540_v33, %v15143_v58  ;;  %v18433_v3 = vrot.slane %v27254_v12, 9 }
 0x4c8   : > { %v18572_v2 = vcombine.low %v27522_v17, %v27526_v52  ;;  %v27544_v16 = vsel %vm27432_vm5, %v18568_v14, %v15455_v1  ;;  %v14059_v26 = vrot.slane %v27259_v24, 5  ;;  %v14965_v33 = vshll.u32 %v27443_v22, 16 }
 0x4c9   : > { %28842 = vst [vmem:[#allocation40_spill] sm:$0xff] %v27518_v7  ;;  %20513 = vmatmul.mubr.msk.bf16.gmra.mrb[4].mxu1 %vm13856_vm2, %v27518_v7  ;;  %v27556_v58 = vcombine.low %v27254_v12, %v27266_v48  ;;  %v18573_v14 = vcombine.low %v27540_v36, %v27544_v16  ;;  %v14051_v1 = vrot.slane %v27243_v35, 5  ;;  %v27563_v24 = vcombine.low %v27288_v25, %v27370_v9 }
 0x4ca   : > { %20518 = vmatprep.mubr.msk.bf16.mxu1 %vm13856_vm2, %v18423_v13  ;;  %v14063_v13 = vrot.slane %v27273_v47, 5  ;;  %v14055_v47 = vrot.slane %v27251_v38, 5  ;;  %v14108_v49 = vsel %vm13869_vm14, %v27390_v59, 0  ;;  %v27571_v4 = vcombine.low %v27323_v45, %v27335_v8  ;;  %v27586_v59 = vld [vmem:[%s28389_s3 + $0x6] sm:$0x3] }
 0x4cb   : > { %20649 = vmatmul.mubr.msk.bf16.vlgmr.msra.gmra.mrb[0].mxu0 %vm13856_vm2, %v18571_v29  ;;  %v18434_v29 = vrot.slane %v27266_v48, 9  ;;  %28843 = vst [vmem:[#allocation41_spill] sm:$0xff] %v27556_v58  ;;  %28844 = vst [vmem:[#allocation42_spill] sm:$0xff] %v27563_v24  ;;  %v18432_v21 = vrot.slane %v27246_v15, 9  ;;  %v27576_v35 = vsel %vm27432_vm5, %v18433_v3, %v14059_v26  ;;  %v14971_v38 = vshll.u32 %v27455_v23, 16 }
 0x4cc   : > { %20657 = vmatpush3.bf16.msra.mxu0 %v15561_v6  ;;  %20652 = vmatprep.mubr.msk.bf16.mxu0 %vm13856_vm2, %v18572_v2  ;;  %v14962_v6 = vshrl.u32 %v27443_v22, 16  ;;  %v18431_v2 = vrot.slane %v27240_v11, 9  ;;  %28845 = vst [vmem:[#allocation43_spill] sm:$0xff] %v27571_v4  ;;  %v14967_v45 = vrot.slane %v14965_v33, 5  ;;  %v27593_v8 = vcombine.low %v27385_v5, %v27410_v41 }
 0x4cd   : > { %21943 = vmatprep.subr.msk.bf16.mxu0 %vm13869_vm14, %v18584_v54  ;;  %v27580_v7 = vsel %vm27432_vm5, %v18434_v29, %v14063_v13  ;;  %v27597_v3 = vcombine.low %v27347_v57, %v27443_v22  ;;  %v15658_v23 = vsel %vm13869_vm14, %v18584_v54, 0  ;;  %v27606_v29 = vcombine.low %v27468_v19, %v27484_v39 }
 0x4ce   : > { %v14964_v11 = vrot.slane %v14962_v6, 4  ;;  %v14052_v26 = vsel %vm27432_vm5, %v18431_v2, %v14051_v1  ;;  %v14990_v13 = vshrl.u32 %v27484_v39, 16  ;;  %v14993_v6 = vshll.u32 %v27484_v39, 16 }
 0x4cf   : > { %v14999_v54 = vshll.u32 %v27487_v43, 16  ;;  %v15344_v57 = vshrl.u32 %v27490_v30, 16  ;;  %v15347_v22 = vshll.u32 %v27490_v30, 16  ;;  %v14976_v33 = vshrl.u32 %v27468_v19, 16 }
 0x4d0   : > { %v14979_v39 = vshll.u32 %v27468_v19, 16  ;;  %v14995_v1 = vrot.slane %v14993_v6, 5  ;;  %v18435_v2 = vrot.slane %v27288_v25, 9  ;;  %v14067_v43 = vrot.slane %v27326_v53, 5  ;;  %v27637_v53 = vld [vmem:[%s27237_s19 + $0x98] sm:$0xf] }
 0x4d1   : > { %20519 = vmatmul.mubr.msk.bf16.vlgmr.msra.gmra.mrb[0].mxu1 %vm13856_vm2, %v27556_v58  ;;  %v18436_v60 = vrot.slane %v27370_v9, 9  ;;  %v14071_v58 = vrot.slane %v27373_v0, 5  ;;  %v15001_v61 = vrot.slane %v14999_v54, 5  ;;  %v14968_v6 = vor.u32 %v14967_v45, %v14964_v11 }
 0x4d2   : > { %20527 = vmatpush3.bf16.msra.mxu1 %v14108_v49  ;;  %20522 = vmatprep.mubr.msk.bf16.mxu1 %vm13856_vm2, %v27563_v24  ;;  %v27614_v49 = vsel %vm27432_vm5, %v18432_v21, %v14055_v47  ;;  %v15349_v21 = vrot.slane %v15347_v22, 5  ;;  %v15353_v47 = vshll.u32 %v27501_v10, 16  ;;  %v14978_v22 = vrot.slane %v14976_v33, 4 }
 0x4d3   : > { %20653 = vmatmul.mubr.msk.bf16.gmra.mrb[4].mxu0 %vm13856_vm2, %v18573_v14  ;;  %21929 = vmatprep.subr.msk.bf16.mxu1 %vm13869_vm14, %v27586_v59  ;;  %v14992_v14 = vrot.slane %v14990_v13, 4  ;;  %v18440_v55 = vcombine.low %v14052_v26, %v27614_v49  ;;  %v14981_v10 = vrot.slane %v14979_v39, 5  ;;  %v15637_v11 = vshrl.u32 %v27637_v53, 16 }
 0x4d4   : > { %20658 = vmatprep.mubr.msk.bf16.mxu0 %vm13856_vm2, %v27571_v4  ;;  %v15346_v4 = vrot.slane %v15344_v57, 4  ;;  %v15355_v13 = vrot.slane %v15353_v47, 5  ;;  %v18591_v57 = vld [vmem:[%s28389_s3 + $0x22] sm:$0x3]  ;;  %v27648_v45 = vsel %vm27432_vm5, %v18435_v2, %v14067_v43  ;;  %v14973_v26 = vrot.slane %v14971_v38, 5 }
 0x4d5   : > { %v14996_v24 = vor.u32 %v14995_v1, %v14992_v14  ;;  %v27654_v54 = vsel %vm27432_vm5, %v18436_v60, %v14071_v58  ;;  %v14969_v33 = vrot.slane %v14968_v6, 4  ;;  %v14982_v38 = vor.u32 %v14981_v10, %v14978_v22  ;;  %v27685_v43 = vld [vmem:[%s27237_s19 + $0x9c] sm:$0x1] }
 0x4d6   : > { %v15350_v19 = vor.u32 %v15349_v21, %v15346_v4  ;;  %v27641_v4 = vcombine.low %v27576_v35, %v27580_v7  ;;  %v14985_v39 = vshll.u32 %v27471_v42, 16  ;;  %v18579_v60 = vcombine.low %v27490_v30, %v27637_v53 }
 0x4d7   : > { %v14997_v40 = vrot.slane %v14996_v24, 4  ;;  %v15640_v24 = vshll.u32 %v27637_v53, 16  ;;  %v18437_v58 = vrot.slane %v27385_v5, 9  ;;  %v27675_v1 = vcombine.low %v27648_v45, %v27654_v54 }
 0x4d8   : > { %v15351_v0 = vrot.slane %v15350_v19, 4  ;;  %v14079_v2 = vrot.slane %v27416_v27, 5  ;;  %v15639_v21 = vrot.slane %v15637_v11, 4  ;;  %v27680_v47 = vcombine.low %v27367_v63, %v27381_v37 }
 0x4d9   : > { %20523 = vmatmul.mubr.msk.bf16.gmra.mrb[4].mxu1 %vm13856_vm2, %v27593_v8  ;;  %v15642_v42 = vrot.slane %v15640_v24, 5  ;;  %v14204_v30 = vsel %vm13869_vm14, %v27586_v59, 0  ;;  %v14983_v19 = vrot.slane %v14982_v38, 4  ;;  %v27692_v27 = vsel %vm27280_vm1, %v14969_v33, %v14973_v26  ;;  %v18617_v38 = vld [vmem:[%s28389_s3 + $0x24] sm:$0x3] }
 0x4da   : > { %20528 = vmatprep.mubr.msk.bf16.mxu1 %vm13856_vm2, %v18440_v55  ;;  %v27659_v55 = vsel %vm27280_vm1, %v14997_v40, %v15001_v61  ;;  %v14075_v40 = vrot.slane %v27399_v32, 5  ;;  %v18438_v61 = vrot.slane %v27410_v41, 9  ;;  %v18457_v32 = vld [vmem:[%s28389_s3 + $0x8] sm:$0x3]  ;;  %28848 = vst [vmem:[#allocation46_spill] sm:$0xff] %v27692_v27  ;;  %v15646_v6 = vshll.u32 %v27685_v43, 16 }
 0x4db   : > { %20659 = vmatmul.mubr.msk.bf16.vlgmr.msra.gmra.mrb[0].mxu0 %vm13856_vm2, %v27597_v3  ;;  %28846 = vst [vmem:[#allocation44_spill] sm:$0xff] %v27659_v55  ;;  %v15643_v59 = vor.u32 %v15642_v42, %v15639_v21  ;;  %v27717_v10 = vcombine.low %v27403_v51, %v27692_v27  ;;  %v15746_v26 = vsel %vm13869_vm14, %v18591_v57, 0  ;;  %v28851_v51 = vcombine.low %v27246_v15, %v27254_v12  ;;  %v27751_v12 = vld [vmem:[%s27237_s19 + $0x40] sm:$0xf] }
 0x4dc   : > { %20667 = vmatpush3.bf16.msra.mxu0 %v15658_v23  ;;  %20662 = vmatprep.mubr.msk.bf16.mxu0 %vm13856_vm2, %v27606_v29  ;;  %v27663_v23 = vsel %vm27280_vm1, %v15351_v0, %v15355_v13  ;;  %v14987_v13 = vrot.slane %v14985_v39, 5  ;;  %v27701_v63 = vsel %vm27432_vm5, %v18437_v58, %v14075_v40  ;;  %v27705_v37 = vsel %vm27432_vm5, %v18438_v61, %v14079_v2  ;;  %v18467_v61 = vld [vmem:[%s28389_s3 + $0xa] sm:$0x3]  ;;  %v27775_v2 = vld [vmem:[%s27237_s19 + $0x44] sm:$0x1] }
 0x4dd   : > { %21944 = vmatprep.subr.msk.bf16.mxu0 %vm13869_vm14, %v18591_v57  ;;  %28847 = vst [vmem:[#allocation45_spill] sm:$0xff] %v27663_v23  ;;  %v27721_v0 = vcombine.low %v27701_v63, %v27705_v37  ;;  %v15644_v11 = vrot.slane %v15643_v59, 4  ;;  %v15648_v24 = vrot.slane %v15646_v6, 5  ;;  %v18450_v39 = vcombine.low %v27266_v48, %v27288_v25 }
 0x4de   : > { %v27713_v22 = vsel %vm27280_vm1, %v14983_v19, %v14987_v13  ;;  %v18451_v58 = vcombine.low %v27370_v9, %v27385_v5  ;;  %v14313_v15 = vsel %vm13869_vm14, %v18457_v32, 0  ;;  %v27755_v40 = vcombine.low %v27451_v44, %v27465_v31 }
 0x4df   : > { %28849 = vst [vmem:[#allocation47_spill] sm:$0xff] %v27713_v22  ;;  %v27726_v33 = vcombine.low %v27713_v22, %v27659_v55  ;;  %v15649_v57 = vsel %vm27280_vm1, %v15644_v11, %v15648_v24  ;;  %v14280_v48 = vshrl.u32 %v27751_v12, 16  ;;  %v14283_v25 = vshll.u32 %v27751_v12, 16 }
 0x4e0   : > { %28852 = vst [vmem:[#allocation49_spill] sm:$0xff] %v27755_v40  ;;  %v27770_v44 = vcombine.low %v27479_v18, %v27522_v17  ;;  %v18452_v31 = vcombine.low %v27410_v41, %v27751_v12  ;;  %v18590_v21 = vrot.slane %v27637_v53, 9  ;;  %v15736_v42 = vrot.slane %v27685_v43, 5  ;;  %v18626_v17 = vld [vmem:[%s28389_s3 + $0x26] sm:$0x3] }
 0x4e1   : > { %20529 = vmatmul.mubr.msk.bf16.vlgmr.msra.gmra.mrb[0].mxu1 %vm13856_vm2, %v27641_v4  ;;  %28850 = vst [vmem:[#allocation48_spill] sm:$0xff] %v27726_v33  ;;  %v14282_v9 = vrot.slane %v14280_v48, 4  ;;  %v14285_v5 = vrot.slane %v14283_v25, 5  ;;  %v14289_v18 = vshll.u32 %v27775_v2, 16  ;;  %v28855_v41 = vcombine.low %v27292_v62, %v27296_v46  ;;  %v27801_v53 = vld [vmem:[%s27237_s19 + $0xa8] sm:$0xf] }
 0x4e2   : > { %20537 = vmatpush3.bf16.msra.mxu1 %v14204_v30  ;;  %20532 = vmatprep.mubr.msk.bf16.mxu1 %vm13856_vm2, %v27675_v1  ;;  %28853 = vst [vmem:[#allocation50_spill] sm:$0xff] %v27770_v44  ;;  %v15880_v30 = vsel %vm13869_vm14, %v18617_v38, 0  ;;  %v15970_v62 = vshrl.u32 %v27801_v53, 16  ;;  %v15973_v46 = vshll.u32 %v27801_v53, 16  ;;  %v18459_v11 = vcombine.low %v27308_v34, %v27377_v28 }
 0x4e3   : > { %20663 = vmatmul.mubr.msk.bf16.gmra.mrb[4].mxu0 %vm13856_vm2, %v18579_v60  ;;  %21930 = vmatprep.subr.msk.bf16.mxu1 %vm13869_vm14, %v18457_v32  ;;  %v18585_v60 = vcombine.low %v27663_v23, %v15649_v57  ;;  %v27782_v32 = vcombine.low %v27526_v52, %v27540_v36  ;;  %v14286_v19 = vor.u32 %v14285_v5, %v14282_v9  ;;  %v27798_v36 = vld [vmem:[%s27237_s19 + $0xa0] sm:$0xf]  ;;  %v14291_v6 = vrot.slane %v14289_v18, 5  ;;  %v27857_v18 = vld [vmem:[%s27237_s19 + $0xc8] sm:$0xf] }
 0x4e4   : > { %20668 = vmatprep.mubr.msk.bf16.mxu0 %vm13856_vm2, %v27680_v47  ;;  %v15737_v52 = vsel %vm27432_vm5, %v18590_v21, %v15736_v42  ;;  %v15956_v43 = vshrl.u32 %v27798_v36, 16  ;;  %v15959_v13 = vshll.u32 %v27798_v36, 16  ;;  %v18618_v57 = vcombine.low %v27798_v36, %v27801_v53 }
 0x4e5   : > { %28854 = vst [vmem:[#allocation51_spill] sm:$0xff] %v27782_v32  ;;  %v14287_v59 = vrot.slane %v14286_v19, 4  ;;  %v18592_v24 = vcombine.low %v27544_v16, %v15737_v52  ;;  %v15972_v25 = vrot.slane %v15970_v62, 4  ;;  %v15975_v34 = vrot.slane %v15973_v46, 5  ;;  %v27837_v16 = vld [vmem:[%s27237_s19 + $0xac] sm:$0x1] }
 0x4e6   : > { %v15961_v48 = vrot.slane %v15959_v13, 5  ;;  %v27854_v19 = vld [vmem:[%s27237_s19 + $0xc0] sm:$0xf]  ;;  %v28858_v52 = vld [vmem:[#allocation39_spill] sm:$0xff]  ;;  %v27869_v62 = vld [vmem:[%s27237_s19 + $0xd8] sm:$0xf]  ;;  %v18468_v14 = vcombine.low %v27614_v49, %v27576_v35 }
 0x4e7   : > { %v27829_v28 = vsel %vm27280_vm1, %v14287_v59, %v14291_v6  ;;  %v27866_v13 = vld [vmem:[%s27237_s19 + $0xd0] sm:$0xf]  ;;  %v15976_v46 = vor.u32 %v15975_v34, %v15972_v25  ;;  %v15979_v59 = vshll.u32 %v27837_v16, 16  ;;  %v16012_v6 = vshrl.u32 %v27854_v19, 16  ;;  %v27889_v34 = vld [vmem:[%s27237_s19 + $0xb4] sm:$0x1] }
 0x4e8   : > { %v18470_v25 = vcombine.low %v27654_v54, %v27701_v63  ;;  %v15993_v63 = vshll.u32 %v27889_v34, 16 }
 0x4e9   : > { %20533 = vmatmul.mubr.msk.bf16.gmra.mrb[4].mxu1 %vm13856_vm2, %v27721_v0  ;;  %v15977_v35 = vrot.slane %v15976_v46, 4  ;;  %v15981_v49 = vrot.slane %v15979_v59, 5  ;;  %v16014_v21 = vrot.slane %v16012_v6, 4  ;;  %v27905_v46 = vld [vmem:[%s27237_s19 + $0xc4] sm:$0x1]  ;;  %v16040_v6 = vshrl.u32 %v27866_v13, 16 }
 0x4ea   : > { %20538 = vmatprep.mubr.msk.bf16.mxu1 %vm13856_vm2, %v28851_v51  ;;  %v27908_v59 = vld [vmem:[%s27237_s19 + $0xcc] sm:$0x1] }
 0x4eb   : > { %20669 = vmatmul.mubr.msk.bf16.vlgmr.msra.gmra.mrb[0].mxu0 %vm13856_vm2, %v27717_v10  ;;  %v16035_v22 = vshll.u32 %v27908_v59, 16 }
 0x4ec   : > { %20677 = vmatpush3.bf16.msra.mxu0 %v15746_v26  ;;  %20672 = vmatprep.mubr.msk.bf16.mxu0 %vm13856_vm2, %v27726_v33  ;;  %v14413_v26 = vsel %vm13869_vm14, %v18467_v61, 0 }
 0x4ed   : > { %21945 = vmatprep.subr.msk.bf16.mxu0 %vm13869_vm14, %v18617_v38  ;;  %v28856_v38 = vld [vmem:[#allocation37_spill] sm:$0xff] }
 0x4ee   : > { %v18460_v51 = vcombine.low %v28856_v38, %v27494_v56  ;;  %v27834_v56 = vld [vmem:[%s28389_s3 + $0xc] sm:$0x3] }
 0x4f1   : > { %20539 = vmatmul.mubr.msk.bf16.vlgmr.msra.gmra.mrb[0].mxu1 %vm13856_vm2, %v18450_v39  ;;  %v27819_v39 = vld [vmem:[%s27237_s19 + $0xb0] sm:$0xf] }
 0x4f2   : > { %20547 = vmatpush3.bf16.msra.mxu1 %v14313_v15  ;;  %20542 = vmatprep.mubr.msk.bf16.mxu1 %vm13856_vm2, %v18451_v58  ;;  %v27825_v58 = vld [vmem:[%s27237_s19 + $0xa4] sm:$0x1]  ;;  %v15958_v15 = vrot.slane %v15956_v43, 4  ;;  %v15987_v9 = vshll.u32 %v27819_v39, 16  ;;  %v18461_v43 = vcombine.low %v28858_v52, %v27829_v28 }
 0x4f3   : > { %20673 = vmatmul.mubr.msk.bf16.gmra.mrb[4].mxu0 %vm13856_vm2, %v18585_v60  ;;  %21931 = vmatprep.subr.msk.bf16.mxu1 %vm13869_vm14, %v18467_v61  ;;  %v27822_v60 = vld [vmem:[%s27237_s19 + $0xb8] sm:$0xf]  ;;  %v15984_v61 = vshrl.u32 %v27819_v39, 16 }
 0x4f4   : > { %20678 = vmatprep.mubr.msk.bf16.mxu0 %vm13856_vm2, %v27755_v40  ;;  %v15998_v5 = vshrl.u32 %v27822_v60, 16  ;;  %v27850_v42 = vcombine.low %v27819_v39, %v27822_v60 }
 0x4f5   : > { %v15986_v38 = vrot.slane %v15984_v61, 4  ;;  %v27892_v61 = vld [vmem:[%s27237_s19 + $0xbc] sm:$0x1] }
 0x4f6   : > { %28857 = vst [vmem:[#allocation37_spill] sm:$0xff] %v27850_v42 }
 0x4f9   : > { %20543 = vmatmul.mubr.msk.bf16.gmra.mrb[4].mxu1 %vm13856_vm2, %v18452_v31  ;;  %v16001_v31 = vshll.u32 %v27822_v60, 16 }
 0x4fa   : > { %20548 = vmatprep.mubr.msk.bf16.mxu1 %vm13856_vm2, %v28855_v41  ;;  %v15965_v41 = vshll.u32 %v27825_v58, 16 }
 0x4fb   : > { %20679 = vmatmul.mubr.msk.bf16.vlgmr.msra.gmra.mrb[0].mxu0 %vm13856_vm2, %v27770_v44  ;;  %v16003_v52 = vrot.slane %v16001_v31, 5  ;;  %v27897_v31 = vld [vmem:[%s28389_s3 + $0x28] sm:$0x3] }
 0x4fc   : > { %20687 = vmatpush3.bf16.msra.mxu0 %v15880_v30  ;;  %20682 = vmatprep.mubr.msk.bf16.mxu0 %vm13856_vm2, %v27782_v32  ;;  %v16094_v30 = vsel %vm13869_vm14, %v18626_v17, 0 }
 0x4fd   : > { %21946 = vmatprep.subr.msk.bf16.mxu0 %vm13869_vm14, %v18626_v17  ;;  %v15962_v17 = vor.u32 %v15961_v48, %v15958_v15  ;;  %v27880_v15 = vcombine.low %v27854_v19, %v27857_v18  ;;  %v27884_v48 = vcombine.low %v27866_v13, %v27869_v62 }
 0x4ff   : > { %28859 = vst [vmem:[#allocation39_spill] sm:$0xff] %v27880_v15 }
 0x501   : > { %20549 = vmatmul.mubr.msk.bf16.vlgmr.msra.gmra.mrb[0].mxu1 %vm13856_vm2, %v18459_v11  ;;  %v16015_v11 = vshll.u32 %v27854_v19, 16 }
 0x502   : > { %20557 = vmatpush3.bf16.msra.mxu1 %v14413_v26  ;;  %20552 = vmatprep.mubr.msk.bf16.mxu1 %vm13856_vm2, %v18460_v51  ;;  %v16029_v26 = vshll.u32 %v27857_v18, 16  ;;  %v15989_v51 = vrot.slane %v15987_v9, 5  ;;  %v15963_v9 = vrot.slane %v15962_v17, 4  ;;  %v16007_v17 = vshll.u32 %v27892_v61, 16 }
 0x503   : > { %20683 = vmatmul.mubr.msk.bf16.gmra.mrb[4].mxu0 %vm13856_vm2, %v18592_v24  ;;  %21932 = vmatprep.subr.msk.bf16.mxu1 %vm13869_vm14, %v27834_v56  ;;  %v16026_v24 = vshrl.u32 %v27857_v18, 16  ;;  %v16017_v23 = vrot.slane %v16015_v11, 5  ;;  %v16054_v11 = vshrl.u32 %v27869_v62, 16 }
 0x504   : > { %20688 = vmatprep.mubr.msk.bf16.mxu0 %vm13856_vm2, %v18618_v57  ;;  %v16000_v57 = vrot.slane %v15998_v5, 4  ;;  %v15967_v5 = vrot.slane %v15965_v41, 5  ;;  %v16031_v27 = vrot.slane %v16029_v26, 5  ;;  %v15990_v54 = vor.u32 %v15989_v51, %v15986_v38 }
 0x505   : > { %v16028_v55 = vrot.slane %v16026_v24, 4  ;;  %v16057_v24 = vshll.u32 %v27869_v62, 16  ;;  %v18466_v26 = vrot.slane %v27751_v12, 9  ;;  %v14391_v38 = vrot.slane %v27775_v2, 5 }
 0x506   : > { %v16004_v41 = vor.u32 %v16003_v52, %v16000_v57  ;;  %v16018_v51 = vor.u32 %v16017_v23, %v16014_v21  ;;  %v16021_v57 = vshll.u32 %v27905_v46, 16  ;;  %v15991_v32 = vrot.slane %v15990_v54, 4  ;;  %v27936_v23 = vld [vmem:[%s27237_s19 + $0xdc] sm:$0x1] }
 0x507   : > { %v16032_v52 = vor.u32 %v16031_v27, %v16028_v55  ;;  %v15995_v2 = vrot.slane %v15993_v63, 5  ;;  %v16009_v40 = vrot.slane %v16007_v17, 5  ;;  %v18482_v55 = vld [vmem:[%s28389_s3 + $0xe] sm:$0x3]  ;;  %v16037_v63 = vrot.slane %v16035_v22, 5 }
 0x508   : > { %v16005_v44 = vrot.slane %v16004_v41, 4  ;;  %v16019_v27 = vrot.slane %v16018_v51, 4  ;;  %v16023_v21 = vrot.slane %v16021_v57, 5  ;;  %v28860_v41 = vcombine.low %v27580_v7, %v27648_v45 }
 0x509   : > { %20553 = vmatmul.mubr.msk.bf16.gmra.mrb[4].mxu1 %vm13856_vm2, %v18461_v43  ;;  %v16043_v43 = vshll.u32 %v27866_v13, 16  ;;  %v16033_v54 = vrot.slane %v16032_v52, 4  ;;  %v27953_v17 = vsel %vm27280_vm1, %v15991_v32, %v15995_v2  ;;  %v16179_v51 = vrot.slane %v27825_v58, 5  ;;  %v18652_v52 = vld [vmem:[%s28389_s3 + $0x2a] sm:$0x3] }
 0x50a   : > { %20558 = vmatprep.mubr.msk.bf16.mxu1 %vm13856_vm2, %v18468_v14  ;;  %v27923_v14 = vsel %vm27280_vm1, %v15977_v35, %v15981_v49  ;;  %v16059_v35 = vrot.slane %v16057_v24, 5  ;;  %v14497_v49 = vsel %vm13869_vm14, %v27834_v56, 0  ;;  %v27949_v56 = vsel %vm27432_vm5, %v18466_v26, %v14391_v38 }
 0x50b   : > { %20689 = vmatmul.mubr.msk.bf16.vlgmr.msra.gmra.mrb[0].mxu0 %vm13856_vm2, %v27850_v42  ;;  %v27933_v42 = vld [vmem:[%s27237_s19 + $0xd4] sm:$0x1]  ;;  %v27966_v32 = vsel %vm27280_vm1, %v16019_v27, %v16023_v21  ;;  %v16236_v26 = vsel %vm13869_vm14, %v27897_v31, 0  ;;  %v16183_v57 = vrot.slane %v27837_v16, 5  ;;  %v16191_v27 = vrot.slane %v27892_v61, 5 }
 0x50c   : > { %20697 = vmatpush3.bf16.msra.mxu0 %v16094_v30  ;;  %20692 = vmatprep.mubr.msk.bf16.mxu0 %vm13856_vm2, %v27880_v15  ;;  %v15968_v30 = vsel %vm27280_vm1, %v15963_v9, %v15967_v5  ;;  %v16042_v9 = vrot.slane %v16040_v6, 4  ;;  %v16045_v5 = vrot.slane %v16043_v43, 5  ;;  %v16056_v15 = vrot.slane %v16054_v11, 4  ;;  %v28035_v61 = vld [vmem:[%s27237_s19 + $0x48] sm:$0xf] }
 0x50d   : > { %21947 = vmatprep.subr.msk.bf16.mxu0 %vm13869_vm14, %v27897_v31  ;;  %v18627_v33 = vcombine.low %v15968_v30, %v27923_v14  ;;  %v27957_v6 = vsel %vm27280_vm1, %v16005_v44, %v16009_v40  ;;  %v16049_v45 = vshll.u32 %v27933_v42, 16  ;;  %v16063_v43 = vshll.u32 %v27936_v23, 16  ;;  %v28861_v31 = vld [vmem:[#allocation41_spill] sm:$0xff] }
 0x50e   : > { %v16046_v7 = vor.u32 %v16045_v5, %v16042_v9  ;;  %v16060_v22 = vor.u32 %v16059_v35, %v16056_v15  ;;  %v27970_v40 = vsel %vm27280_vm1, %v16033_v54, %v16037_v63  ;;  %v18471_v44 = vcombine.low %v27705_v37, %v27949_v56  ;;  %v18489_v63 = vld [vmem:[%s28389_s3 + $0x10] sm:$0x3] }
 0x50f   : > { %v27976_v15 = vcombine.low %v27953_v17, %v27957_v6  ;;  %v16051_v11 = vrot.slane %v16049_v45, 5  ;;  %v16065_v24 = vrot.slane %v16063_v43, 5  ;;  %v27982_v38 = vcombine.low %v27966_v32, %v27970_v40 }
 0x510   : > { %v18635_v30 = vrot.slane %v27798_v36, 9  ;;  %v18636_v37 = vrot.slane %v27801_v53, 9  ;;  %v18637_v5 = vrot.slane %v27819_v39, 9  ;;  %v16187_v35 = vrot.slane %v27889_v34, 5 }
 0x511   : > { %20559 = vmatmul.mubr.msk.bf16.vlgmr.msra.gmra.mrb[0].mxu1 %vm13856_vm2, %v28860_v41  ;;  %v14594_v21 = vsel %vm13869_vm14, %v18482_v55, 0  ;;  %v18639_v41 = vrot.slane %v27854_v19, 9  ;;  %v18640_v45 = vrot.slane %v27857_v18, 9  ;;  %v16199_v34 = vrot.slane %v27908_v59, 5 }
 0x512   : > { %20567 = vmatpush3.bf16.msra.mxu1 %v14497_v49  ;;  %20562 = vmatprep.mubr.msk.bf16.mxu1 %vm13856_vm2, %v18470_v25  ;;  %v16047_v25 = vrot.slane %v16046_v7, 4  ;;  %v16180_v16 = vsel %vm27432_vm5, %v18635_v30, %v16179_v51  ;;  %v28011_v2 = vsel %vm27432_vm5, %v18636_v37, %v16183_v57  ;;  %v18638_v49 = vrot.slane %v27822_v60, 9 }
 0x513   : > { %20693 = vmatmul.mubr.msk.bf16.gmra.mrb[4].mxu0 %vm13856_vm2, %v27884_v48  ;;  %21933 = vmatprep.subr.msk.bf16.mxu1 %vm13869_vm14, %v18482_v55  ;;  %v18644_v54 = vcombine.low %v16180_v16, %v28011_v2  ;;  %v16195_v7 = vrot.slane %v27905_v46, 5  ;;  %v14573_v55 = vshrl.u32 %v28035_v61, 16  ;;  %v14576_v46 = vshll.u32 %v28035_v61, 16  ;;  %v18661_v16 = vld [vmem:[%s28389_s3 + $0x2c] sm:$0x3] }
 0x514   : > { %20698 = vmatprep.mubr.msk.bf16.mxu0 %vm13856_vm2, %v18627_v33  ;;  %v16061_v33 = vrot.slane %v16060_v22, 4  ;;  %v27998_v36 = vsel %vm27280_vm1, %v16047_v25, %v16051_v11  ;;  %v28862_v22 = vld [vmem:[#allocation42_spill] sm:$0xff]  ;;  %v28043_v43 = vsel %vm27432_vm5, %v18637_v5, %v16187_v35  ;;  %v28047_v59 = vsel %vm27432_vm5, %v18638_v49, %v16191_v27 }
 0x515   : > { %v18477_v25 = vcombine.low %v27751_v12, %v28035_v61  ;;  %v28063_v11 = vcombine.low %v28043_v43, %v28047_v59  ;;  %v16207_v30 = vrot.slane %v27936_v23, 5  ;;  %v14575_v51 = vrot.slane %v14573_v55, 4  ;;  %v13725_v12 = vld [vmem:[%s27237_s19 + $0x4c] sm:$0x1] }
 0x516   : > { %v28002_v58 = vsel %vm27280_vm1, %v16061_v33, %v16065_v24  ;;  %v18641_v33 = vrot.slane %v27866_v13, 9  ;;  %v16203_v24 = vrot.slane %v27933_v42, 5  ;;  %v14578_v37 = vrot.slane %v14576_v46, 5  ;;  %v28863_v42 = vld [vmem:[#allocation34_spill] sm:$0xff] }
 0x517   : > { %v28015_v9 = vcombine.low %v27998_v36, %v28002_v58  ;;  %v16332_v57 = vsel %vm13869_vm14, %v18652_v52, 0  ;;  %v14582_v35 = vshll.u32 %v13725_v12, 16  ;;  %v18655_v55 = vcombine.low %v27857_v18, %v27866_v13  ;;  %v18671_v46 = vld [vmem:[%s28389_s3 + $0x2e] sm:$0x3] }
 0x518   : > { %v28085_v23 = vsel %vm27432_vm5, %v18641_v33, %v16203_v24  ;;  %v14579_v5 = vor.u32 %v14578_v37, %v14575_v51  ;;  %v18488_v18 = vrot.slane %v28035_v61, 9  ;;  %v14672_v13 = vrot.slane %v13725_v12, 5  ;;  %v18524_v51 = vld [vmem:[%s28389_s3 + $0x14] sm:$0x3] }
 0x519   : > { %20563 = vmatmul.mubr.msk.bf16.gmra.mrb[4].mxu1 %vm13856_vm2, %v18471_v44  ;;  %v28057_v44 = vsel %vm27432_vm5, %v18640_v45, %v16199_v34  ;;  %v28864_v45 = vld [vmem:[#allocation38_spill] sm:$0xff]  ;;  %v28865_v34 = vld [vmem:[#allocation40_spill] sm:$0xff] }
 0x51a   : > { %20568 = vmatprep.mubr.msk.bf16.mxu1 %vm13856_vm2, %v28861_v31  ;;  %v14580_v27 = vrot.slane %v14579_v5, 4 }
 0x51b   : > { %20699 = vmatmul.mubr.msk.bf16.vlgmr.msra.gmra.mrb[0].mxu0 %vm13856_vm2, %v27976_v15 }
 0x51c   : > { %20707 = vmatpush3.bf16.msra.mxu0 %v16236_v26  ;;  %20702 = vmatprep.mubr.msk.bf16.mxu0 %vm13856_vm2, %v27982_v38  ;;  %v18642_v26 = vrot.slane %v27869_v62, 9 }
 0x51d   : > { %21948 = vmatprep.subr.msk.bf16.mxu0 %vm13869_vm14, %v18652_v52 }
 0x51e   : > { %v28089_v52 = vsel %vm27432_vm5, %v18642_v26, %v16207_v30  ;;  %v18614_v30 = vld [vmem:[%s27237_s19 + $0xe4] sm:$0x1] }
 0x51f   : > { %v28096_v49 = vcombine.low %v28085_v23, %v28089_v52  ;;  %v16417_v61 = vshll.u32 %v18614_v30, 16 }
 0x521   : > { %20569 = vmatmul.mubr.msk.bf16.vlgmr.msra.gmra.mrb[0].mxu1 %vm13856_vm2, %v28862_v22  ;;  %v16441_v22 = vsel %vm13869_vm14, %v18661_v16, 0  ;;  %v16419_v5 = vrot.slane %v16417_v61, 5 }
 0x522   : > { %20577 = vmatpush3.bf16.msra.mxu1 %v14594_v21  ;;  %20572 = vmatprep.mubr.msk.bf16.mxu1 %vm13856_vm2, %v27593_v8  ;;  %v28053_v8 = vsel %vm27432_vm5, %v18639_v41, %v16195_v7  ;;  %v14584_v21 = vrot.slane %v14582_v35, 5  ;;  %v18653_v41 = vcombine.low %v27801_v53, %v27819_v39  ;;  %v18515_v7 = vld [vmem:[%s28389_s3 + $0x12] sm:$0x3]  ;;  %v18654_v39 = vcombine.low %v27822_v60, %v27854_v19 }
 0x523   : > { %20703 = vmatmul.mubr.msk.bf16.gmra.mrb[4].mxu0 %vm13856_vm2, %v28015_v9  ;;  %21934 = vmatprep.subr.msk.bf16.mxu1 %vm13869_vm14, %v18489_v63  ;;  %v28072_v31 = vcombine.low %v28053_v8, %v28057_v44  ;;  %v14816_v26 = vsel %vm13869_vm14, %v18515_v7, 0 }
 0x524   : > { %20708 = vmatprep.mubr.msk.bf16.mxu0 %vm13856_vm2, %v18644_v54  ;;  %v14682_v54 = vsel %vm13869_vm14, %v18489_v63, 0  ;;  %v14585_v63 = vsel %vm27280_vm1, %v14580_v27, %v14584_v21  ;;  %v16541_v21 = vsel %vm13869_vm14, %v18671_v46, 0 }
 0x525   : > { %v18483_v53 = vcombine.low %v27829_v28, %v14585_v63  ;;  %v18672_v63 = vcombine.low %v28011_v2, %v28043_v43  ;;  %v18673_v2 = vcombine.low %v28047_v59, %v28053_v8  ;;  %v28867_v43 = vld [vmem:[#allocation35_spill] sm:$0xff] }
 0x529   : > { %20573 = vmatmul.mubr.msk.bf16.gmra.mrb[4].mxu1 %vm13856_vm2, %v18477_v25  ;;  %v28126_v25 = vld [vmem:[%s27237_s19 + $0xe0] sm:$0xf] }
 0x52a   : > { %20578 = vmatprep.mubr.msk.bf16.mxu1 %vm13856_vm2, %v28863_v42  ;;  %v16408_v60 = vshrl.u32 %v28126_v25, 16  ;;  %v16411_v28 = vshll.u32 %v28126_v25, 16  ;;  %v18656_v19 = vcombine.low %v27869_v62, %v28126_v25  ;;  %v28148_v62 = vld [vmem:[%s27237_s19 + $0x50] sm:$0xf] }
 0x52b   : > { %20709 = vmatmul.mubr.msk.bf16.vlgmr.msra.gmra.mrb[0].mxu0 %vm13856_vm2, %v28063_v11  ;;  %v14892_v37 = vshrl.u32 %v28148_v62, 16 }
 0x52c   : > { %20717 = vmatpush3.bf16.msra.mxu0 %v16332_v57  ;;  %20712 = vmatprep.mubr.msk.bf16.mxu0 %vm13856_vm2, %v28072_v31  ;;  %v16410_v33 = vrot.slane %v16408_v60, 4  ;;  %v16413_v24 = vrot.slane %v16411_v28, 5  ;;  %v14895_v57 = vshll.u32 %v28148_v62, 16  ;;  %v18686_v28 = vld [vmem:[%s28389_s3 + $0x32] sm:$0x3] }
 0x52d   : > { %21949 = vmatprep.subr.msk.bf16.mxu0 %vm13869_vm14, %v18661_v16  ;;  %v14894_v35 = vrot.slane %v14892_v37, 4  ;;  %v18616_v37 = vld [vmem:[%s27237_s19 + $0xec] sm:$0x1] }
 0x52e   : > { %v14897_v27 = vrot.slane %v14895_v57, 5  ;;  %v28872_v57 = vld [vmem:[#allocation49_spill] sm:$0xff] }
 0x531   : > { %20579 = vmatmul.mubr.msk.bf16.vlgmr.msra.gmra.mrb[0].mxu1 %vm13856_vm2, %v28864_v45 }
 0x532   : > { %20587 = vmatpush3.bf16.msra.mxu1 %v14682_v54  ;;  %20582 = vmatprep.mubr.msk.bf16.mxu1 %vm13856_vm2, %v28865_v34  ;;  %v18664_v54 = vcombine.low %v27970_v40, %v27998_v36  ;;  %v15030_v34 = vsel %vm13869_vm14, %v18524_v51, 0 }
 0x533   : > { %20713 = vmatmul.mubr.msk.bf16.gmra.mrb[4].mxu0 %vm13856_vm2, %v28096_v49  ;;  %21935 = vmatprep.subr.msk.bf16.mxu1 %vm13869_vm14, %v18515_v7 }
 0x534   : > { %20718 = vmatprep.mubr.msk.bf16.mxu0 %vm13856_vm2, %v18653_v41  ;;  %v18496_v41 = vld [vmem:[%s27237_s19 + $0x54] sm:$0x1] }
 0x535   : > { %v14901_v7 = vshll.u32 %v18496_v41, 16 }
 0x537   : > { %v14903_v45 = vrot.slane %v14901_v7, 5  ;;  %v22133_v7 = vld [vmem:[%s27237_s19 + $0x80] sm:$0xf] }
 0x539   : > { %20583 = vmatmul.mubr.msk.bf16.gmra.mrb[4].mxu1 %vm13856_vm2, %v18483_v53  ;;  %v18541_v53 = vld [vmem:[%s28389_s3 + $0x16] sm:$0x3] }
 0x53a   : > { %20588 = vmatprep.mubr.msk.bf16.mxu1 %vm13856_vm2, %v27641_v4  ;;  %v18662_v4 = vcombine.low %v27923_v14, %v27953_v17  ;;  %v14673_v14 = vsel %vm27432_vm5, %v18488_v18, %v14672_v13  ;;  %v16414_v17 = vor.u32 %v16413_v24, %v16410_v33  ;;  %v28869_v13 = vld [vmem:[#allocation36_spill] sm:$0xff]  ;;  %v16722_v24 = vsel %vm13869_vm14, %v18686_v28, 0 }
 0x53b   : > { %20719 = vmatmul.mubr.msk.bf16.vlgmr.msra.gmra.mrb[0].mxu0 %vm13856_vm2, %v18654_v39  ;;  %v18490_v12 = vcombine.low %v27949_v56, %v14673_v14  ;;  %v28866_v39 = vld [vmem:[#allocation43_spill] sm:$0xff] }
 0x53c   : > { %20727 = vmatpush3.bf16.msra.mxu0 %v16441_v22  ;;  %20722 = vmatprep.mubr.msk.bf16.mxu0 %vm13856_vm2, %v18655_v55  ;;  %v16415_v42 = vrot.slane %v16414_v17, 4  ;;  %v18670_v55 = vrot.slane %v28126_v25, 9 }
 0x53d   : > { %21950 = vmatprep.subr.msk.bf16.mxu0 %vm13869_vm14, %v18671_v46  ;;  %v16519_v46 = vrot.slane %v18614_v30, 5 }
 0x53e   : > { %v28178_v56 = vsel %vm27280_vm1, %v16415_v42, %v16419_v5 }
 0x53f   : > { %v18665_v40 = vcombine.low %v28002_v58, %v28178_v56  ;;  %v28215_v59 = vsel %vm27432_vm5, %v18670_v55, %v16519_v46 }
 0x540   : > { %v18675_v8 = vcombine.low %v28089_v52, %v28215_v59  ;;  %v28868_v52 = vld [vmem:[#allocation37_spill] sm:$0xff] }
 0x541   : > { %20589 = vmatmul.mubr.msk.bf16.vlgmr.msra.gmra.mrb[0].mxu1 %vm13856_vm2, %v27675_v1  ;;  %v18663_v1 = vcombine.low %v27957_v6, %v27966_v32  ;;  %v18680_v6 = vld [vmem:[%s28389_s3 + $0x30] sm:$0x3]  ;;  %v14898_v32 = vor.u32 %v14897_v27, %v14894_v35 }
 0x542   : > { %20597 = vmatpush3.bf16.msra.mxu1 %v14816_v26  ;;  %20592 = vmatprep.mubr.msk.bf16.mxu1 %vm13856_vm2, %v27721_v0  ;;  %v28162_v0 = vld [vmem:[%s27237_s19 + $0x58] sm:$0xf]  ;;  %v16625_v60 = vsel %vm13869_vm14, %v18680_v6, 0 }
 0x543   : > { %20723 = vmatmul.mubr.msk.bf16.gmra.mrb[4].mxu0 %vm13856_vm2, %v18656_v19  ;;  %21936 = vmatprep.subr.msk.bf16.mxu1 %vm13869_vm14, %v18524_v51  ;;  %v18516_v16 = vcombine.low %v28148_v62, %v28162_v0  ;;  %v14899_v36 = vrot.slane %v14898_v32, 4  ;;  %v18550_v19 = vld [vmem:[%s28389_s3 + $0x18] sm:$0x3] }
 0x544   : > { %20728 = vmatprep.mubr.msk.bf16.mxu0 %vm13856_vm2, %v18662_v4  ;;  %v28870_v26 = vld [vmem:[#allocation48_spill] sm:$0xff]  ;;  %v18615_v4 = vld [vmem:[%s27237_s19 + $0xe8] sm:$0xf]  ;;  %v15268_v61 = vsel %vm13869_vm14, %v18550_v19, 0 }
 0x545   : > { %v14904_v58 = vsel %vm27280_vm1, %v14899_v36, %v14903_v45  ;;  %v16701_v30 = vshrl.u32 %v18615_v4, 16  ;;  %v16704_v51 = vshll.u32 %v18615_v4, 16  ;;  %v22132_v32 = vld [vmem:[%s27237_s19 + $0x78] sm:$0xf]  ;;  %v22135_v36 = vld [vmem:[%s27237_s19 + $0x90] sm:$0xf] }
 0x546   : > { %v18525_v22 = vcombine.low %v14904_v58, %v28867_v43  ;;  %v28879_v43 = vld [vmem:[#allocation45_spill] sm:$0xff] }
 0x547   : > { %v16703_v14 = vrot.slane %v16701_v30, 4  ;;  %v16706_v17 = vrot.slane %v16704_v51, 5 }
 0x549   : > { %20593 = vmatmul.mubr.msk.bf16.gmra.mrb[4].mxu1 %vm13856_vm2, %v18490_v12  ;;  %v16710_v12 = vshll.u32 %v18616_v37, 16 }
 0x54a   : > { %20598 = vmatprep.mubr.msk.bf16.mxu1 %vm13856_vm2, %v18516_v16  ;;  %v22129_v16 = vld [vmem:[%s27237_s19 + $0x60] sm:$0xf] }
 0x54b   : > { %20729 = vmatmul.mubr.msk.bf16.vlgmr.msra.gmra.mrb[0].mxu0 %vm13856_vm2, %v18663_v1  ;;  %v28873_v1 = vld [vmem:[#allocation50_spill] sm:$0xff]  ;;  %v18551_v42 = vcombine.low %v28162_v0, %v22129_v16  ;;  %v16712_v35 = vrot.slane %v16710_v12, 5 }
 0x54c   : > { %20737 = vmatpush3.bf16.msra.mxu0 %v16541_v21  ;;  %20732 = vmatprep.mubr.msk.bf16.mxu0 %vm13856_vm2, %v18664_v54  ;;  %v28874_v21 = vld [vmem:[#allocation51_spill] sm:$0xff]  ;;  %v22130_v0 = vld [vmem:[%s27237_s19 + $0x68] sm:$0xf] }
 0x54d   : > { %21951 = vmatprep.subr.msk.bf16.mxu0 %vm13869_vm14, %v18680_v6  ;;  %v22131_v54 = vld [vmem:[%s27237_s19 + $0x70] sm:$0xf] }
 0x551   : > { %20599 = vmatmul.mubr.msk.bf16.vlgmr.msra.gmra.mrb[0].mxu1 %vm13856_vm2, %v28866_v39  ;;  %v16800_v39 = vrot.slane %v18616_v37, 5 }
 0x552   : > { %20607 = vmatpush3.bf16.msra.mxu1 %v15030_v34  ;;  %20602 = vmatprep.mubr.msk.bf16.mxu1 %vm13856_vm2, %v27597_v3  ;;  %v18674_v3 = vcombine.low %v28057_v44, %v28085_v23  ;;  %v15115_v44 = vrot.slane %v18496_v41, 5  ;;  %v18533_v23 = vrot.slane %v28148_v62, 9  ;;  %v18681_v62 = vcombine.low %v28126_v25, %v18615_v4  ;;  %v22128_v25 = vld [vmem:[%s28389_s3 + $0x1a] sm:$0x3]  ;;  %v28877_v34 = vld [vmem:[#allocation46_spill] sm:$0xff] }
 0x553   : > { %20733 = vmatmul.mubr.msk.bf16.gmra.mrb[4].mxu0 %vm13856_vm2, %v18665_v40  ;;  %21937 = vmatprep.subr.msk.bf16.mxu1 %vm13869_vm14, %v18541_v53  ;;  %v18552_v41 = vcombine.low %v22130_v0, %v22131_v54  ;;  %v18553_v40 = vcombine.low %v22132_v32, %v22133_v7 }
 0x554   : > { %20738 = vmatprep.mubr.msk.bf16.mxu0 %vm13856_vm2, %v18672_v63  ;;  %v15116_v18 = vsel %vm27432_vm5, %v18533_v23, %v15115_v44 }
 0x555   : > { %v18542_v33 = vcombine.low %v15116_v18, %v28869_v13 }
 0x559   : > { %20603 = vmatmul.mubr.msk.bf16.gmra.mrb[4].mxu1 %vm13856_vm2, %v27606_v29  ;;  %v15172_v29 = vsel %vm13869_vm14, %v18541_v53, 0  ;;  %v18692_v53 = vrot.slane %v18615_v4, 9 }
 0x55a   : > { %20608 = vmatprep.mubr.msk.bf16.mxu1 %vm13856_vm2, %v18525_v22 }
 0x55b   : > { %20739 = vmatmul.mubr.msk.bf16.vlgmr.msra.gmra.mrb[0].mxu0 %vm13856_vm2, %v18673_v2  ;;  %v28878_v2 = vld [vmem:[#allocation44_spill] sm:$0xff] }
 0x55c   : > { %20747 = vmatpush3.bf16.msra.mxu0 %v16625_v60  ;;  %20742 = vmatprep.mubr.msk.bf16.mxu0 %vm13856_vm2, %v18674_v3  ;;  %v28880_v22 = vcombine.low %v28878_v2, %v28879_v43 }
 0x55d   : > { %21952 = vmatprep.subr.msk.bf16.mxu0 %vm13869_vm14, %v18686_v28 }
 0x561   : > { %20609 = vmatmul.mubr.msk.bf16.vlgmr.msra.gmra.mrb[0].mxu1 %vm13856_vm2, %v27680_v47  ;;  %v18693_v47 = vld [vmem:[%s28389_s3 + $0x34] sm:$0x3] }
 0x562   : > { %20617 = vmatpush3.bf16.msra.mxu1 %v15172_v29  ;;  %20612 = vmatprep.mubr.msk.bf16.mxu1 %vm13856_vm2, %v27717_v10  ;;  %v28871_v10 = vld [vmem:[#allocation39_spill] sm:$0xff]  ;;  %v16810_v27 = vsel %vm13869_vm14, %v18693_v47, 0 }
 0x563   : > { %20743 = vmatmul.mubr.msk.bf16.gmra.mrb[4].mxu0 %vm13856_vm2, %v18675_v8  ;;  %21938 = vmatprep.subr.msk.bf16.mxu1 %vm13869_vm14, %v18550_v19 }
 0x564   : > { %20748 = vmatprep.mubr.msk.bf16.mxu0 %vm13856_vm2, %v28868_v52 }
 0x569   : > { %20613 = vmatmul.mubr.msk.bf16.gmra.mrb[4].mxu1 %vm13856_vm2, %v28870_v26 }
 0x56a   : > { %20618 = vmatprep.mubr.msk.bf16.mxu1 %vm13856_vm2, %v18542_v33 }
 0x56b   : > { %20749 = vmatmul.mubr.msk.bf16.vlgmr.msra.gmra.mrb[0].mxu0 %vm13856_vm2, %v28871_v10 }
 0x56c   : > { %20757 = vmatpush3.bf16.msra.mxu0 %v16722_v24  ;;  %20752 = vmatprep.mubr.msk.bf16.mxu0 %vm13856_vm2, %v27884_v48  ;;  %v16707_v48 = vor.u32 %v16706_v17, %v16703_v14 }
 0x56d   : > { %21953 = vmatprep.subr.msk.bf16.mxu0 %vm13869_vm14, %v18693_v47 }
 0x56e   : > { %v16708_v5 = vrot.slane %v16707_v48, 4 }
 0x571   : > { %20619 = vmatmul.mubr.msk.bf16.vlgmr.msra.gmra.mrb[0].mxu1 %vm13856_vm2, %v28872_v57 }
 0x572   : > { %20627 = vmatpush3.bf16.msra.mxu1 %v15268_v61  ;;  %20622 = vmatprep.mubr.msk.bf16.mxu1 %vm13856_vm2, %v28873_v1 }
 0x573   : > { %20753 = vmatmul.mubr.msk.bf16.gmra.mrb[4].mxu0 %vm13856_vm2, %v18681_v62  ;;  %21940 = vmatprep.subr.msk.bf16.mxu1 %vm13869_vm14, %v22128_v25 }
 0x574   : > { %20758 = vmatprep.mubr.msk.bf16.mxu0 %vm13856_vm2, %v27976_v15  ;;  %v16713_v15 = vsel %vm27280_vm1, %v16708_v5, %v16712_v35 }
 0x575   : > { %v18687_v6 = vcombine.low %v28178_v56, %v16713_v15  ;;  %v28876_v56 = vld [vmem:[#allocation47_spill] sm:$0xff] }
 0x576   : > { %v18562_v63 = vcombine.low %v28877_v34, %v28876_v56 }
 0x579   : > { %20623 = vmatmul.mubr.msk.bf16.gmra.mrb[4].mxu1 %vm13856_vm2, %v28874_v21 }
 0x57a   : > { %20628 = vmatprep.mubr.msk.bf16.mxu1 %vm13856_vm2, %v18551_v42 }
 0x57b   : > { %20759 = vmatmul.mubr.msk.bf16.vlgmr.msra.gmra.mrb[0].mxu0 %vm13856_vm2, %v27982_v38  ;;  %v28875_v38 = vld [vmem:[#allocation33_spill] sm:$0xff] }
 0x57c   : > { %20767 = vmatpush3.bf16.msra.mxu0 %v16810_v27  ;;  %20762 = vmatprep.mubr.msk.bf16.mxu0 %vm13856_vm2, %v28015_v9  ;;  %v22134_v9 = vld [vmem:[%s27237_s19 + $0x88] sm:$0xf]  ;;  %s28308_s19 = scalar_lea.vmem %s22244_s6, %s18750_s15 }
 0x57d   : > { %v18554_v45 = vcombine.low %v22134_v9, %v22135_v36  ;;  %v18699_v20 = vld [vmem:[%s28308_s19 + $0x58] sm:$0xf]  ;;  %v18701_v8 = vld [vmem:[%s28308_s19 + $0x60] sm:$0xf]  ;;  %v18704_v23 = vld [vmem:[%s28308_s19 + $0x6c] sm:$0x1] }
 0x57e   : > { %v16904_v60 = vshrl.u32 %v18699_v20, 16  ;;  %v16907_v3 = vshll.u32 %v18699_v20, 16  ;;  %v16918_v19 = vshrl.u32 %v18701_v8, 16  ;;  %v16921_v52 = vshll.u32 %v18701_v8, 16  ;;  %v18700_v47 = vld [vmem:[%s28308_s19 + $0x5c] sm:$0x1] }
 0x57f   : > { %v16941_v10 = vshll.u32 %v18704_v23, 16  ;;  %v18706_v4 = vld [vmem:[%s28308_s19 + $0x74] sm:$0x1]  ;;  %v16913_v14 = vshll.u32 %v18700_v47, 16  ;;  %v18702_v61 = vld [vmem:[%s28308_s19 + $0x64] sm:$0x1] }
 0x580   : > { %v16906_v18 = vrot.slane %v16904_v60, 4  ;;  %v16909_v13 = vrot.slane %v16907_v3, 5  ;;  %v16920_v30 = vrot.slane %v16918_v19, 4  ;;  %v16923_v51 = vrot.slane %v16921_v52, 5  ;;  %v18711_v48 = vld [vmem:[%s28308_s19 + $0x88] sm:$0xf] }
 0x581   : > { %20629 = vmatmul.mubr.msk.bf16.vlgmr.msra.gmra.mrb[0].mxu1 %vm13856_vm2, %v18552_v41  ;;  %v16955_v37 = vshll.u32 %v18706_v4, 16  ;;  %v16943_v1 = vrot.slane %v16941_v10, 5  ;;  %v16927_v16 = vshll.u32 %v18702_v61, 16  ;;  %v18707_v42 = vld [vmem:[%s28308_s19 + $0x78] sm:$0xf]  ;;  %v16915_v27 = vrot.slane %v16913_v14, 5 }
 0x582   : > { %21609 = vmatpush3.bf16.msra.mxu1 %v28875_v38  ;;  %20632 = vmatprep.mubr.msk.bf16.mxu1 %vm13856_vm2, %v18553_v40  ;;  %v16910_v62 = vor.u32 %v16909_v13, %v16906_v18  ;;  %v16924_v25 = vor.u32 %v16923_v51, %v16920_v30  ;;  %v18713_v15 = vld [vmem:[%s28308_s19 + $0x90] sm:$0xf]  ;;  %v16988_v41 = vshrl.u32 %v18711_v48, 16  ;;  %v18709_v32 = vld [vmem:[%s28308_s19 + $0x80] sm:$0xf]  ;;  %v16960_v38 = vshrl.u32 %v18707_v42, 16 }
 0x583   : > { %20763 = vmatmul.mubr.msk.bf16.gmra.mrb[4].mxu0 %vm13856_vm2, %v18687_v6  ;;  %v16957_v54 = vrot.slane %v16955_v37, 5  ;;  %v16991_v6 = vshll.u32 %v18711_v48, 16  ;;  %v16963_v9 = vshll.u32 %v18707_v42, 16  ;;  %v17002_v56 = vshrl.u32 %v18713_v15, 16  ;;  %v18714_v23 = vld [vmem:[%s28308_s19 + $0x94] sm:$0x1] }
 0x584   : > { %20768 = vmatprep.mubr.msk.bf16.mxu0 %vm13856_vm2, %v28063_v11  ;;  %v16801_v11 = vsel %vm27432_vm5, %v18692_v53, %v16800_v39  ;;  %v16911_v35 = vrot.slane %v16910_v62, 4  ;;  %v16925_v36 = vrot.slane %v16924_v25, 4  ;;  %v17005_v34 = vshll.u32 %v18713_v15, 16 }
 0x585   : > { %v18694_v58 = vcombine.low %v28215_v59, %v16801_v11  ;;  %v16974_v53 = vshrl.u32 %v18709_v32, 16  ;;  %v16977_v39 = vshll.u32 %v18709_v32, 16  ;;  %v16993_v2 = vrot.slane %v16991_v6, 5 }
 0x586   : > { %v16962_v20 = vrot.slane %v16960_v38, 4  ;;  %v17011_v37 = vshll.u32 %v18714_v23, 16 }
 0x587   : > { %v16976_v19 = vrot.slane %v16974_v53, 4  ;;  %v16979_v52 = vrot.slane %v16977_v39, 5 }
 0x588   : > { %v17013_v32 = vrot.slane %v17011_v37, 5 }
 0x589   : > { %20633 = vmatmul.mubr.msk.bf16.gmra.mrb[4].mxu1 %vm13856_vm2, %v18554_v45  ;;  %v16929_v45 = vrot.slane %v16927_v16, 5  ;;  %v16980_v48 = vor.u32 %v16979_v52, %v16976_v19 }
 0x58a   : > { %20642 = vmatprep.mubr.msk.bf16.mxu1 %vm13856_vm2, %v18562_v63  ;;  %v16916_v63 = vsel %vm27280_vm1, %v16911_v35, %v16915_v27 }
 0x58b   : > { %20769 = vmatmul.mubr.msk.bf16.vlgmr.msra.gmra.mrb[0].mxu0 %vm13856_vm2, %v28072_v31  ;;  %v18703_v31 = vld [vmem:[%s28308_s19 + $0x68] sm:$0xf]  ;;  %v17038_v60 = vunpack.c.l.bf16 %v16916_v63  ;;  %v16930_v3 = vsel %vm27280_vm1, %v16925_v36, %v16929_v45  ;;  %v16981_v38 = vrot.slane %v16980_v48, 4 }
 0x58c   : > { %20772 = vmatprep.mubr.msk.bf16.mxu0 %vm13856_vm2, %v28096_v49  ;;  %v18705_v49 = vld [vmem:[%s28308_s19 + $0x70] sm:$0xf]  ;;  %v16932_v55 = vshrl.u32 %v18703_v31, 16  ;;  %v16935_v46 = vshll.u32 %v18703_v31, 16  ;;  %v18708_v31 = vld [vmem:[%s28308_s19 + $0x7c] sm:$0x1]  ;;  %v17039_v51 = vunpack.c.l.bf16 %v16930_v3 }
 0x58d   : > { %v16946_v28 = vshrl.u32 %v18705_v49, 16  ;;  %v16949_v59 = vshll.u32 %v18705_v49, 16  ;;  %v16965_v49 = vrot.slane %v16963_v9, 5  ;;  %v16969_v47 = vshll.u32 %v18708_v31, 16 }
 0x58e   : > { %v16934_v44 = vrot.slane %v16932_v55, 4  ;;  %v16937_v29 = vrot.slane %v16935_v46, 5  ;;  %v28333_v46 = vld [vmem:[%s28390_s4] ss:$0 sm:$0xff] }
 0x58f   : > { %v16948_v33 = vrot.slane %v16946_v28, 4  ;;  %v16951_v24 = vrot.slane %v16949_v59, 5  ;;  %v17004_v28 = vrot.slane %v17002_v56, 4  ;;  %v17007_v59 = vrot.slane %v17005_v34, 5 }
 0x590   : > { %v16938_v26 = vor.u32 %v16937_v29, %v16934_v44  ;;  %v16966_v62 = vor.u32 %v16965_v49, %v16962_v20  ;;  %v16971_v15 = vrot.slane %v16969_v47, 5 }
 0x591   : > { %v16952_v17 = vor.u32 %v16951_v24, %v16948_v33  ;;  %v17008_v61 = vor.u32 %v17007_v59, %v17004_v28 }
 0x592   : > { %v16939_v57 = vrot.slane %v16938_v26, 4  ;;  %v18710_v26 = vld [vmem:[%s28308_s19 + $0x84] sm:$0x1] }
 0x593   : > { %20773 = vmatmul.mubr.msk.bf16.gmra.mrb[4].mxu0 %vm13856_vm2, %v18694_v58  ;;  %v16953_v21 = vrot.slane %v16952_v17, 4  ;;  %v16990_v58 = vrot.slane %v16988_v41, 4  ;;  %v17009_v6 = vrot.slane %v17008_v61, 4 }
 0x594   : > { %v16944_v40 = vsel %vm27280_vm1, %v16939_v57, %v16943_v1 }
 0x595   : > { %20643 = vmatmul.mubr.msk.bf16.vlgmr.msra.gmra.mrb[4].mxu1 %vm13856_vm2, %v28880_v22  ;;  %v16958_v11 = vsel %vm27280_vm1, %v16953_v21, %v16957_v54  ;;  %v17040_v43 = vunpack.c.l.bf16 %v16944_v40  ;;  %v18712_v22 = vld [vmem:[%s28308_s19 + $0x8c] sm:$0x1]  ;;  %v16994_v33 = vor.u32 %v16993_v2, %v16990_v58  ;;  %v16967_v21 = vrot.slane %v16966_v62, 4 }
 0x596   : > { %v17041_v29 = vunpack.c.l.bf16 %v16958_v11  ;;  %v16997_v24 = vshll.u32 %v18712_v22, 16  ;;  %v17014_v39 = vsel %vm27280_vm1, %v17009_v6, %v17013_v32 }
 0x597   : > { %v16995_v42 = vrot.slane %v16994_v33, 4  ;;  %v16972_v34 = vsel %vm27280_vm1, %v16967_v21, %v16971_v15 }
 0x598   : > { %v17042_v31 = vunpack.c.l.bf16 %v16972_v34 }
 0x654   : > { %v20630_v12 = vpop.f32.mrb[0].mxu1 }
 0x655   : > { %v15304_v5 = vpop.f32.mrb[1].mxu1 }
 0x656   : > { %v20631_v0 = vpop.f32.mrb[2].mxu1 }
 0x657   : > { %v15307_v7 = vpop.f32.mrb[3].mxu1 }
 0x65e   : > { %v20770_v55 = vpop.f32.mrb[0].mxu0 }
 0x65f   : > { %v21610_v8 = vadd.f32 %v20770_v55, %v20630_v12  ;;  %v16846_v44 = vpop.f32.mrb[1].mxu0  ;;  %v16983_v12 = vshll.u32 %v18710_v26, 16 }
 0x660   : > { %v21611_v18 = vadd.f32 %v16846_v44, %v15304_v5  ;;  %v20771_v13 = vpop.f32.mrb[2].mxu0  ;;  %v16999_v5 = vrot.slane %v16997_v24, 5 }
 0x661   : > { %v17032_v10 = vadd.f32 %v21610_v8, %v28333_v46  ;;  %v21612_v4 = vadd.f32 %v20771_v13, %v20631_v0  ;;  %v16849_v30 = vpop.f32.mrb[3].mxu0  ;;  %v16985_v9 = vrot.slane %v16983_v12, 5 }
 0x662   : > { %v17030_v14 = vadd.f32 %v21611_v18, %v28333_v46  ;;  %v21613_v17 = vadd.f32 %v16849_v30, %v15307_v7  ;;  %v17000_v45 = vsel %vm27280_vm1, %v16995_v42, %v16999_v5 }
 0x663   : > { %v17048_v57 = vadd.f32 %v17040_v43, %v17032_v10  ;;  %v17033_v1 = vadd.f32 %v21612_v4, %v28333_v46  ;;  %v17044_v58 = vunpack.c.l.bf16 %v17000_v45  ;;  %v16986_v43 = vsel %vm27280_vm1, %v16981_v38, %v16985_v9 }
 0x664   : > { %v17046_v25 = vadd.f32 %v17038_v60, %v17030_v14  ;;  %v17031_v16 = vadd.f32 %v21613_v17, %v28333_v46  ;;  %v17045_v60 = vunpack.c.l.bf16 %v17014_v39  ;;  %v17043_v8 = vunpack.c.l.bf16 %v16986_v43 }
 0x665   : > { %v17056_v35 = vmax.f32 %v17048_v57, 0.0  ;;  %v17049_v27 = vadd.f32 %v17041_v29, %v17033_v1 }
 0x666   : > { %v17054_v0 = vmax.f32 %v17046_v25, 0.0  ;;  %v17047_v54 = vadd.f32 %v17039_v51, %v17031_v16  ;;  %v20774_v41 = vpop.f32.mrb[4].mxu0 }
 0x667   : > { %17064 = vst.msk [vmem:[%s22249_s11 + $0x10] sm:$0xff] %vm13856_vm2, %v17056_v35  ;;  %v17057_v7 = vmax.f32 %v17049_v27, 0.0  ;;  %v16862_v40 = vpop.f32.mrb[5].mxu0 }
 0x668   : > { %17062 = vst.msk [vmem:[%s22249_s11] sm:$0xff] %vm13856_vm2, %v17054_v0  ;;  %v17055_v36 = vmax.f32 %v17047_v54, 0.0  ;;  %v20775_v56 = vpop.f32.mrb[6].mxu0  ;;  %v20644_v53 = vpop.f32.mrb[4].mxu1 }
 0x669   : > { %17065 = vst.msk [vmem:[%s22249_s11 + $0x18] sm:$0xff] %vm13856_vm2, %v17057_v7  ;;  %v16865_v63 = vpop.f32.mrb[7].mxu0  ;;  %v21614_v11 = vadd.f32 %v20774_v41, %v20644_v53  ;;  %v15429_v2 = vpop.f32.mrb[5].mxu1 }
 0x66a   : > { %17063 = vst.msk [vmem:[%s22249_s11 + $0x8] sm:$0xff] %vm13856_vm2, %v17055_v36  ;;  %v21615_v22 = vadd.f32 %v16862_v40, %v15429_v2  ;;  %v20645_v20 = vpop.f32.mrb[6].mxu1 }
 0x66b   : > { %v17036_v49 = vadd.f32 %v21614_v11, %v28333_v46  ;;  %v21616_v55 = vadd.f32 %v20775_v56, %v20645_v20  ;;  %v15432_v3 = vpop.f32.mrb[7].mxu1 }
 0x66c   : > { %v17034_v28 = vadd.f32 %v21615_v22, %v28333_v46  ;;  %v21617_v59 = vadd.f32 %v16865_v63, %v15432_v3 }
 0x66d   : > { %v17052_v44 = vadd.f32 %v17044_v58, %v17036_v49  ;;  %v17037_v50 = vadd.f32 %v21616_v55, %v28333_v46 }
 0x66e   : > { %v17050_v29 = vadd.f32 %v17042_v31, %v17034_v28  ;;  %v17035_v23 = vadd.f32 %v21617_v59, %v28333_v46 }
 0x66f   : > { %v17060_v19 = vmax.f32 %v17052_v44, 0.0  ;;  %v17053_v52 = vadd.f32 %v17045_v60, %v17037_v50 }
 0x670   : > { %v17058_v18 = vmax.f32 %v17050_v29, 0.0  ;;  %v17051_v13 = vadd.f32 %v17043_v8, %v17035_v23 }
 0x671   : > { %17068 = vst.msk [vmem:[%s22249_s11 + $0x30] sm:$0xff] %vm13856_vm2, %v17060_v19  ;;  %v17061_v33 = vmax.f32 %v17053_v52, 0.0 }
 0x672   : > { %17066 = vst.msk [vmem:[%s22249_s11 + $0x20] sm:$0xff] %vm13856_vm2, %v17058_v18  ;;  %v17059_v24 = vmax.f32 %v17051_v13, 0.0 }
 0x673   : > { %17069 = vst.msk [vmem:[%s22249_s11 + $0x38] sm:$0xff] %vm13856_vm2, %v17061_v33 }
 0x674   : > { %17067 = vst.msk [vmem:[%s22249_s11 + $0x28] sm:$0xff] %vm13856_vm2, %v17059_v24 }
 0x675 PF: > { %s15_s22 = sadd.s32 1, %s22174_s22   ;;  %s28881_s18 = smov %s22166_s20 }
 0x676   : > { %p12_p8 = scmp.ge.s32.totalorder %s15_s22, 10   ;;  %s28882_s19 = smov %s22170_s21 }
 0x677   : > { %s28883_s20 = smov %s28886_s23  ;;  %s28884_s21 = smov %s28890_s24 }
 0x678   :  { %14 = sbr.rel (!%p12_p8) target bundleno = 3 (0x3), region = 139 }

</bundles_post_ra>
